<compile_context>
chip_gen: v6e
topology: v6e:2x2x1
jax: 0.10.0
libtpu: 0.0.40
codegen_flags: <defaults>
</compile_context>

<pallas_src>
import functools

import jax
import jax.numpy as jnp
from jax import lax
from jax.experimental import pallas as pl
from jax.experimental.pallas import tpu as pltpu


def _round_up(x: int, m: int) -> int:
    return (x + m - 1) // m * m


def _pick_batch_tile(n_pad: int, cap: int = 256) -> int:
    """Largest multiple of 8 that divides n_pad and is <= cap (no wasted padded tiles)."""
    best, t = 8, 8
    while t <= min(n_pad, cap):
        if n_pad % t == 0:
            best = t
        t += 8
    return best


# --------------------------------------------------------------------------- fused kernel
def _fused_lstm_kernel(price_ref, news_ref,
                       wih_p_ref, b_p_ref, whh_p_ref,
                       wih_n_ref, b_n_ref, whh_n_ref,
                       w1p_ref, w1n_ref, b1_ref, w2_ref, b2_ref,
                       out_ref, *, price_len: int, news_len: int):
    Nb = price_ref.shape[0]
    Hp = whh_p_ref.shape[0]
    Hn = whh_n_ref.shape[0]
    bf16 = jnp.bfloat16

    whh_p = whh_p_ref[...]            # (Hp, 4*Hp) bf16
    whh_n = whh_n_ref[...]            # (Hn, 4*Hn) bf16
    wih_n = wih_n_ref[...]            # (D,  4*Hn) bf16

    def gate_consts(H):
        # 1.0 on the tanh ("g") lanes, 0.0 on the sigmoid (i,f,o) lanes. PyTorch order i,f,g,o.
        lane = lax.broadcasted_iota(jnp.int32, (Nb, 4 * H), 1)
        gm = ((lane >= 2 * H) & (lane < 3 * H)).astype(jnp.float32)
        return gm, gm + 1.0            # (shift, scale): tanh(x) = 2*sigmoid(2x) - 1

    gm_p, gs_p = gate_consts(Hp)       # hoisted out of the time loops (no per-iter broadcast)
    gm_n, gs_n = gate_consts(Hn)

    def lstm_cell(pre, c, H, gm, gs):
        # Single EUP sigmoid pass over all 4H lanes; g lanes fixed up with cheap VPU mul/sub.
        act = gs * jax.nn.sigmoid(gs * pre) - gm
        i = act[:, 0 * H:1 * H]
        f = act[:, 1 * H:2 * H]
        g = act[:, 2 * H:3 * H]
        o = act[:, 3 * H:4 * H]
        c_new = f * c + i * g
        h_new = o * jnp.tanh(c_new)
        return h_new, c_new

    # ---- input projections hoisted off the serial recurrence chains --------------------
    b_n = b_n_ref[...]
    news_pre = [
        jnp.dot(news_ref[:, t, :].astype(bf16), wih_n,
                preferred_element_type=jnp.float32) + b_n
        for t in range(news_len)
    ]
    wih_p = wih_p_ref[...]             # input size 1 -> projection is a broadcast multiply
    b_p = b_p_ref[...]
    price_pre = [price_ref[:, t:t + 1] * wih_p + b_p for t in range(price_len)]

    # ---- price LSTM ---------------------------------------------------------------------
    h = jnp.zeros((Nb, Hp), jnp.float32)
    c = jnp.zeros((Nb, Hp), jnp.float32)
    for t in range(price_len):         # fully unrolled; L is small & static
        pre = price_pre[t] + jnp.dot(h.astype(bf16), whh_p,
                                     preferred_element_type=jnp.float32)
        h, c = lstm_cell(pre, c, Hp, gm_p, gs_p)
    h_price = h

    # ---- news LSTM ----------------------------------------------------------------------
    h = jnp.zeros((Nb, Hn), jnp.float32)
    c = jnp.zeros((Nb, Hn), jnp.float32)
    for t in range(news_len):          # per step only the small h @ whh stays on the chain
        pre = news_pre[t] + jnp.dot(h.astype(bf16), whh_n,
                                    preferred_element_type=jnp.float32)
        h, c = lstm_cell(pre, c, Hn, gm_n, gs_n)
    h_news = h

    # ---- mixed MLP head: Linear -> ReLU -> Linear ---------------------------------------
    # concat([h_price, h_news]) @ W1  ==  h_price @ W1[:Hp] + h_news @ W1[Hp:]
    hidden = (jnp.dot(h_price.astype(bf16), w1p_ref[...], preferred_element_type=jnp.float32)
              + jnp.dot(h_news.astype(bf16), w1n_ref[...], preferred_element_type=jnp.float32)
              + b1_ref[...])
    hidden = jnp.maximum(hidden, 0.0)
    out_ref[...] = (jnp.dot(hidden, w2_ref[...], preferred_element_type=jnp.float32)
                    + b2_ref[...])


# --------------------------------------------------------------------------- wrapper
@jax.jit
def price_news_forward(observed_data, observed_news, params):
    B, K, L = observed_data.shape
    Ln = observed_news.shape[2]               # = L + 1
    D = observed_news.shape[-1]
    N = B * K

    Hp = params["whh_p"].shape[0]
    Hn = params["whh_n"].shape[0]
    Gp, Gn = 4 * Hp, 4 * Hn
    Mh = params["w1p"].shape[1]

    # batch padded only to a multiple of 8 (sublanes); no time-axis padding at all
    N_pad = _round_up(N, 8)
    n_tile = _pick_batch_tile(N_pad, cap=256)
    if N_pad // n_tile == 1 and N_pad >= 16 and (N_pad // 2) % 8 == 0:
        n_tile = N_pad // 2                   # >=2 "parallel" grid steps for v7x megacore

    price = observed_data.reshape(N, L).astype(jnp.float32)
    news = observed_news.reshape(N, Ln, D).astype(jnp.float32)   # free reshape, no transpose/cast
    if N_pad != N:
        price = jnp.pad(price, ((0, N_pad - N), (0, 0)))
        news = jnp.pad(news, ((0, N_pad - N), (0, 0), (0, 0)))

    bf16 = jnp.bfloat16
    out = pl.pallas_call(
        functools.partial(_fused_lstm_kernel, price_len=L, news_len=Ln),
        out_shape=jax.ShapeDtypeStruct((N_pad, 1), jnp.float32),
        grid=(N_pad // n_tile,),
        in_specs=[
            pl.BlockSpec((n_tile, L), lambda n: (n, 0)),          # price rows
            pl.BlockSpec((n_tile, Ln, D), lambda n: (n, 0, 0)),   # news rows (full time extent)
            pl.BlockSpec((1, Gp), lambda n: (0, 0)),              # wih_p (f32)
            pl.BlockSpec((1, Gp), lambda n: (0, 0)),              # b_p   (f32)
            pl.BlockSpec((Hp, Gp), lambda n: (0, 0)),             # whh_p (bf16)
            pl.BlockSpec((D, Gn), lambda n: (0, 0)),              # wih_n (bf16)
            pl.BlockSpec((1, Gn), lambda n: (0, 0)),              # b_n   (f32)
            pl.BlockSpec((Hn, Gn), lambda n: (0, 0)),             # whh_n (bf16)
            pl.BlockSpec((Hp, Mh), lambda n: (0, 0)),             # w1p   (bf16)
            pl.BlockSpec((Hn, Mh), lambda n: (0, 0)),             # w1n   (bf16)
            pl.BlockSpec((1, Mh), lambda n: (0, 0)),              # b1    (f32)
            pl.BlockSpec((Mh, 1), lambda n: (0, 0)),              # w2    (f32)
            pl.BlockSpec((1, 1), lambda n: (0, 0)),               # b2    (f32)
        ],
        out_specs=pl.BlockSpec((n_tile, 1), lambda n: (n, 0)),
        compiler_params=pltpu.CompilerParams(
            dimension_semantics=("parallel",),
            vmem_limit_bytes=48 * 1024 * 1024),
    )(price, news,
      params["wih_p"], params["b_p"], params["whh_p"].astype(bf16),
      params["wih_n"].astype(bf16), params["b_n"], params["whh_n"].astype(bf16),
      params["w1p"].astype(bf16), params["w1n"].astype(bf16), params["b1"],
      params["w2"], params["b2"])

    return out[:N, 0].reshape(B, K)


# --------------------------------------------------------------------------- params
def init_params(key, price_hidden=64, news_hidden=64, mixed_hidden=128, news_input_dim=768):
    ks = jax.random.split(key, 16)

    def u(k, shape, bound):
        return jax.random.uniform(k, shape, jnp.float32, -bound, bound)

    bp = 1.0 / jnp.sqrt(price_hidden)
    bn = 1.0 / jnp.sqrt(news_hidden)
    bm1 = 1.0 / jnp.sqrt(price_hidden + news_hidden)
    bm2 = 1.0 / jnp.sqrt(mixed_hidden)

    # LSTM weights stored transposed w.r.t. PyTorch ((in,4H)/(H,4H)); biases = b_ih + b_hh
    return {
        "wih_p": u(ks[0], (1, 4 * price_hidden), bp),
        "whh_p": u(ks[1], (price_hidden, 4 * price_hidden), bp),
        "b_p": u(ks[2], (1, 4 * price_hidden), bp) + u(ks[3], (1, 4 * price_hidden), bp),
        "wih_n": u(ks[4], (news_input_dim, 4 * news_hidden), bn),
        "whh_n": u(ks[5], (news_hidden, 4 * news_hidden), bn),
        "b_n": u(ks[6], (1, 4 * news_hidden), bn) + u(ks[7], (1, 4 * news_hidden), bn),
        # Linear 1 split into the price / news halves of its input dim
        "w1p": u(ks[8], (price_hidden, mixed_hidden), bm1),
        "w1n": u(ks[9], (news_hidden, mixed_hidden), bm1),
        "b1": u(ks[10], (1, mixed_hidden), bm1),
        "w2": u(ks[11], (mixed_hidden, 1), bm2),
        "b2": u(ks[12], (1, 1), bm2),
    }


# --------------------------------------------------------------------------- reference (pure JAX)
def reference_forward(observed_data, observed_news, params, *, matmul_dtype=jnp.float32):
    """matmul_dtype=bf16 replicates exactly the precision layout the kernel uses."""
    B, K, L = observed_data.shape
    Ln = observed_news.shape[2]
    D = observed_news.shape[-1]
    N = B * K
    price = observed_data.reshape(N, L).astype(jnp.float32)
    news = observed_news.reshape(N, Ln, D).astype(jnp.float32)
    md = matmul_dtype

    def mm(a, b):
        return jnp.dot(a.astype(md), b.astype(md), preferred_element_type=jnp.float32)

    def cell(pre, c, H):
        i = jax.nn.sigmoid(pre[:, 0 * H:1 * H])
        f = jax.nn.sigmoid(pre[:, 1 * H:2 * H])
        g = jnp.tanh(pre[:, 2 * H:3 * H])
        o = jax.nn.sigmoid(pre[:, 3 * H:4 * H])
        c = f * c + i * g
        return o * jnp.tanh(c), c

    Hp = params["whh_p"].shape[0]
    Hn = params["whh_n"].shape[0]

    h = jnp.zeros((N, Hp), jnp.float32)
    c = jnp.zeros((N, Hp), jnp.float32)
    for t in range(L):
        pre = price[:, t:t + 1] * params["wih_p"] + params["b_p"] + mm(h, params["whh_p"])
        h, c = cell(pre, c, Hp)
    hp = h

    h = jnp.zeros((N, Hn), jnp.float32)
    c = jnp.zeros((N, Hn), jnp.float32)
    for t in range(Ln):
        pre = mm(news[:, t, :], params["wih_n"]) + params["b_n"] + mm(h, params["whh_n"])
        h, c = cell(pre, c, Hn)
    hn = h

    hidden = jnp.maximum(mm(hp, params["w1p"]) + mm(hn, params["w1n"]) + params["b1"], 0.0)
    out = jnp.dot(hidden, params["w2"], preferred_element_type=jnp.float32) + params["b2"]
    return out.reshape(B, K)


# --------------------------------------------------------------------------- main
if __name__ == "__main__":
    key = jax.random.PRNGKey(0)
    k_param, k_data, k_news = jax.random.split(key, 3)

    B, K, L = 2, 3, 8
    PRICE_H, NEWS_H, MIXED_H, NEWS_D = 64, 64, 128, 768

    params = init_params(k_param, PRICE_H, NEWS_H, MIXED_H, NEWS_D)
    observed_data = jax.random.normal(k_data, (B, K, L), jnp.float32)
    observed_news = jax.random.normal(k_news, (B, K, L + 1, NEWS_D), jnp.float32)

    out = price_news_forward(observed_data, observed_news, params)
    out = jax.block_until_ready(out)
    assert out.shape == (B, K), out.shape
    assert bool(jnp.all(jnp.isfinite(out)))

    # Matched-precision reference (same bf16 matmul operands the kernel uses): tight check.
    ref_matched = reference_forward(observed_data, observed_news, params,
                                    matmul_dtype=jnp.bfloat16)
    assert jnp.allclose(out, ref_matched, atol=5e-3, rtol=5e-3), (out, ref_matched)

    # Fidelity vs the full-f32 module semantics (bf16 matmul operands => looser tolerance).
    ref_f32 = reference_forward(observed_data, observed_news, params)
    assert jnp.allclose(out, ref_f32, atol=5e-2, rtol=5e-2), (out, ref_f32)

    print("KERNEL_OK")
</pallas_src>

<mosaic_0001>
module attributes {stable_mosaic.version = 11 : i64} {
  func.func @_fused_lstm_kernel(%arg0: i32, %arg1: memref<8x8xf32, #tpu.memory_space<vmem>>, %arg2: memref<8x9x768xf32, #tpu.memory_space<vmem>>, %arg3: memref<1x256xf32, #tpu.memory_space<vmem>>, %arg4: memref<1x256xf32, #tpu.memory_space<vmem>>, %arg5: memref<64x256xbf16, #tpu.memory_space<vmem>>, %arg6: memref<768x256xbf16, #tpu.memory_space<vmem>>, %arg7: memref<1x256xf32, #tpu.memory_space<vmem>>, %arg8: memref<64x256xbf16, #tpu.memory_space<vmem>>, %arg9: memref<64x128xbf16, #tpu.memory_space<vmem>>, %arg10: memref<64x128xbf16, #tpu.memory_space<vmem>>, %arg11: memref<1x128xf32, #tpu.memory_space<vmem>>, %arg12: memref<128x1xf32, #tpu.memory_space<vmem>>, %arg13: memref<1x1xf32, #tpu.memory_space<vmem>>, %arg14: memref<8x1xf32, #tpu.memory_space<vmem>>) attributes {dimension_semantics = [#tpu.dimension_semantics<parallel>], iteration_bounds = array<i64: 1>, scalar_prefetch = 0 : i64, scratch_operands = 0 : i64, tpu.core_type = #tpu.core_type<tc>, window_params = [{transform_indices = @transform_0, window_bounds = array<i64: 8, 8>}, {transform_indices = @transform_1, window_bounds = array<i64: 8, 9, 768>}, {pipeline_mode = #tpu.pipeline_mode<synchronous>, transform_indices = @transform_2, window_bounds = array<i64: 1, 256>}, {pipeline_mode = #tpu.pipeline_mode<synchronous>, transform_indices = @transform_3, window_bounds = array<i64: 1, 256>}, {pipeline_mode = #tpu.pipeline_mode<synchronous>, transform_indices = @transform_4, window_bounds = array<i64: 64, 256>}, {pipeline_mode = #tpu.pipeline_mode<synchronous>, transform_indices = @transform_5, window_bounds = array<i64: 768, 256>}, {pipeline_mode = #tpu.pipeline_mode<synchronous>, transform_indices = @transform_6, window_bounds = array<i64: 1, 256>}, {pipeline_mode = #tpu.pipeline_mode<synchronous>, transform_indices = @transform_7, window_bounds = array<i64: 64, 256>}, {pipeline_mode = #tpu.pipeline_mode<synchronous>, transform_indices = @transform_8, window_bounds = array<i64: 64, 128>}, {pipeline_mode = #tpu.pipeline_mode<synchronous>, transform_indices = @transform_9, window_bounds = array<i64: 64, 128>}, {pipeline_mode = #tpu.pipeline_mode<synchronous>, transform_indices = @transform_10, window_bounds = array<i64: 1, 128>}, {pipeline_mode = #tpu.pipeline_mode<synchronous>, transform_indices = @transform_11, window_bounds = array<i64: 128, 1>}, {pipeline_mode = #tpu.pipeline_mode<synchronous>, transform_indices = @transform_12, window_bounds = array<i64: 1, 1>}, {transform_indices = @transform_13, window_bounds = array<i64: 8, 1>}]} {
    %c0 = arith.constant 0 : index
    %c0_0 = arith.constant 0 : index
    %0 = vector.load %arg5[%c0, %c0_0] : memref<64x256xbf16, #tpu.memory_space<vmem>>, vector<64x256xbf16>
    %c0_1 = arith.constant 0 : index
    %c0_2 = arith.constant 0 : index
    %1 = vector.load %arg8[%c0_1, %c0_2] : memref<64x256xbf16, #tpu.memory_space<vmem>>, vector<64x256xbf16>
    %c0_3 = arith.constant 0 : index
    %c0_4 = arith.constant 0 : index
    %2 = vector.load %arg6[%c0_3, %c0_4] : memref<768x256xbf16, #tpu.memory_space<vmem>>, vector<768x256xbf16>
    %3 = tpu.iota {dimensions = array<i32: 1>} : vector<8x256xi32>
    %c128_i32 = arith.constant 128 : i32
    %4 = vector.broadcast %c128_i32 : i32 to vector<8x256xi32>
    %5 = arith.cmpi sge, %3, %4 : vector<8x256xi32>
    %c192_i32 = arith.constant 192 : i32
    %6 = vector.broadcast %c192_i32 : i32 to vector<8x256xi32>
    %7 = arith.cmpi slt, %3, %6 : vector<8x256xi32>
    %8 = arith.andi %5, %7 : vector<8x256xi1>
    %9 = arith.extui %8 : vector<8x256xi1> to vector<8x256xi32>
    %10 = arith.sitofp %9 : vector<8x256xi32> to vector<8x256xf32>
    %cst = arith.constant 1.000000e+00 : f32
    %11 = vector.broadcast %cst : f32 to vector<8x256xf32>
    %12 = arith.addf %10, %11 : vector<8x256xf32>
    %13 = tpu.iota {dimensions = array<i32: 1>} : vector<8x256xi32>
    %c128_i32_5 = arith.constant 128 : i32
    %14 = vector.broadcast %c128_i32_5 : i32 to vector<8x256xi32>
    %15 = arith.cmpi sge, %13, %14 : vector<8x256xi32>
    %c192_i32_6 = arith.constant 192 : i32
    %16 = vector.broadcast %c192_i32_6 : i32 to vector<8x256xi32>
    %17 = arith.cmpi slt, %13, %16 : vector<8x256xi32>
    %18 = arith.andi %15, %17 : vector<8x256xi1>
    %19 = arith.extui %18 : vector<8x256xi1> to vector<8x256xi32>
    %20 = arith.sitofp %19 : vector<8x256xi32> to vector<8x256xf32>
    %cst_7 = arith.constant 1.000000e+00 : f32
    %21 = vector.broadcast %cst_7 : f32 to vector<8x256xf32>
    %22 = arith.addf %20, %21 : vector<8x256xf32>
    %c0_8 = arith.constant 0 : index
    %c0_9 = arith.constant 0 : index
    %23 = vector.load %arg7[%c0_8, %c0_9] : memref<1x256xf32, #tpu.memory_space<vmem>>, vector<1x256xf32>
    %c0_10 = arith.constant 0 : index
    %c0_11 = arith.constant 0 : index
    %c0_12 = arith.constant 0 : index
    %24 = vector.load %arg2[%c0_10, %c0_11, %c0_12] : memref<8x9x768xf32, #tpu.memory_space<vmem>>, vector<8x1x768xf32>
    %25 = vector.shape_cast %24 : vector<8x1x768xf32> to vector<8x768xf32>
    %26 = arith.truncf %25 : vector<8x768xf32> to vector<8x768xbf16>
    %cst_13 = arith.constant dense<0.000000e+00> : vector<8x256xf32>
    %27 = tpu.matmul %26, %2, %cst_13 {dimension_numbers = #tpu.dot_dimension_numbers<[1], [0], [0], [1], [0, 0, 1, 1], [], []>} : vector<8x768xbf16>, vector<768x256xbf16>, vector<8x256xf32> -> vector<8x256xf32>
    %28 = vector.broadcast %23 : vector<1x256xf32> to vector<8x256xf32>
    %29 = arith.addf %27, %28 : vector<8x256xf32>
    %c0_14 = arith.constant 0 : index
    %c1 = arith.constant 1 : index
    %c0_15 = arith.constant 0 : index
    %30 = vector.load %arg2[%c0_14, %c1, %c0_15] : memref<8x9x768xf32, #tpu.memory_space<vmem>>, vector<8x1x768xf32>
    %31 = vector.shape_cast %30 : vector<8x1x768xf32> to vector<8x768xf32>
    %32 = arith.truncf %31 : vector<8x768xf32> to vector<8x768xbf16>
    %cst_16 = arith.constant dense<0.000000e+00> : vector<8x256xf32>
    %33 = tpu.matmul %32, %2, %cst_16 {dimension_numbers = #tpu.dot_dimension_numbers<[1], [0], [0], [1], [0, 0, 1, 1], [], []>} : vector<8x768xbf16>, vector<768x256xbf16>, vector<8x256xf32> -> vector<8x256xf32>
    %34 = vector.broadcast %23 : vector<1x256xf32> to vector<8x256xf32>
    %35 = arith.addf %33, %34 : vector<8x256xf32>
    %c0_17 = arith.constant 0 : index
    %c2 = arith.constant 2 : index
    %c0_18 = arith.constant 0 : index
    %36 = vector.load %arg2[%c0_17, %c2, %c0_18] : memref<8x9x768xf32, #tpu.memory_space<vmem>>, vector<8x1x768xf32>
    %37 = vector.shape_cast %36 : vector<8x1x768xf32> to vector<8x768xf32>
    %38 = arith.truncf %37 : vector<8x768xf32> to vector<8x768xbf16>
    %cst_19 = arith.constant dense<0.000000e+00> : vector<8x256xf32>
    %39 = tpu.matmul %38, %2, %cst_19 {dimension_numbers = #tpu.dot_dimension_numbers<[1], [0], [0], [1], [0, 0, 1, 1], [], []>} : vector<8x768xbf16>, vector<768x256xbf16>, vector<8x256xf32> -> vector<8x256xf32>
    %40 = vector.broadcast %23 : vector<1x256xf32> to vector<8x256xf32>
    %41 = arith.addf %39, %40 : vector<8x256xf32>
    %c0_20 = arith.constant 0 : index
    %c3 = arith.constant 3 : index
    %c0_21 = arith.constant 0 : index
    %42 = vector.load %arg2[%c0_20, %c3, %c0_21] : memref<8x9x768xf32, #tpu.memory_space<vmem>>, vector<8x1x768xf32>
    %43 = vector.shape_cast %42 : vector<8x1x768xf32> to vector<8x768xf32>
    %44 = arith.truncf %43 : vector<8x768xf32> to vector<8x768xbf16>
    %cst_22 = arith.constant dense<0.000000e+00> : vector<8x256xf32>
    %45 = tpu.matmul %44, %2, %cst_22 {dimension_numbers = #tpu.dot_dimension_numbers<[1], [0], [0], [1], [0, 0, 1, 1], [], []>} : vector<8x768xbf16>, vector<768x256xbf16>, vector<8x256xf32> -> vector<8x256xf32>
    %46 = vector.broadcast %23 : vector<1x256xf32> to vector<8x256xf32>
    %47 = arith.addf %45, %46 : vector<8x256xf32>
    %c0_23 = arith.constant 0 : index
    %c4 = arith.constant 4 : index
    %c0_24 = arith.constant 0 : index
    %48 = vector.load %arg2[%c0_23, %c4, %c0_24] : memref<8x9x768xf32, #tpu.memory_space<vmem>>, vector<8x1x768xf32>
    %49 = vector.shape_cast %48 : vector<8x1x768xf32> to vector<8x768xf32>
    %50 = arith.truncf %49 : vector<8x768xf32> to vector<8x768xbf16>
    %cst_25 = arith.constant dense<0.000000e+00> : vector<8x256xf32>
    %51 = tpu.matmul %50, %2, %cst_25 {dimension_numbers = #tpu.dot_dimension_numbers<[1], [0], [0], [1], [0, 0, 1, 1], [], []>} : vector<8x768xbf16>, vector<768x256xbf16>, vector<8x256xf32> -> vector<8x256xf32>
    %52 = vector.broadcast %23 : vector<1x256xf32> to vector<8x256xf32>
    %53 = arith.addf %51, %52 : vector<8x256xf32>
    %c0_26 = arith.constant 0 : index
    %c5 = arith.constant 5 : index
    %c0_27 = arith.constant 0 : index
    %54 = vector.load %arg2[%c0_26, %c5, %c0_27] : memref<8x9x768xf32, #tpu.memory_space<vmem>>, vector<8x1x768xf32>
    %55 = vector.shape_cast %54 : vector<8x1x768xf32> to vector<8x768xf32>
    %56 = arith.truncf %55 : vector<8x768xf32> to vector<8x768xbf16>
    %cst_28 = arith.constant dense<0.000000e+00> : vector<8x256xf32>
    %57 = tpu.matmul %56, %2, %cst_28 {dimension_numbers = #tpu.dot_dimension_numbers<[1], [0], [0], [1], [0, 0, 1, 1], [], []>} : vector<8x768xbf16>, vector<768x256xbf16>, vector<8x256xf32> -> vector<8x256xf32>
    %58 = vector.broadcast %23 : vector<1x256xf32> to vector<8x256xf32>
    %59 = arith.addf %57, %58 : vector<8x256xf32>
    %c0_29 = arith.constant 0 : index
    %c6 = arith.constant 6 : index
    %c0_30 = arith.constant 0 : index
    %60 = vector.load %arg2[%c0_29, %c6, %c0_30] : memref<8x9x768xf32, #tpu.memory_space<vmem>>, vector<8x1x768xf32>
    %61 = vector.shape_cast %60 : vector<8x1x768xf32> to vector<8x768xf32>
    %62 = arith.truncf %61 : vector<8x768xf32> to vector<8x768xbf16>
    %cst_31 = arith.constant dense<0.000000e+00> : vector<8x256xf32>
    %63 = tpu.matmul %62, %2, %cst_31 {dimension_numbers = #tpu.dot_dimension_numbers<[1], [0], [0], [1], [0, 0, 1, 1], [], []>} : vector<8x768xbf16>, vector<768x256xbf16>, vector<8x256xf32> -> vector<8x256xf32>
    %64 = vector.broadcast %23 : vector<1x256xf32> to vector<8x256xf32>
    %65 = arith.addf %63, %64 : vector<8x256xf32>
    %c0_32 = arith.constant 0 : index
    %c7 = arith.constant 7 : index
    %c0_33 = arith.constant 0 : index
    %66 = vector.load %arg2[%c0_32, %c7, %c0_33] : memref<8x9x768xf32, #tpu.memory_space<vmem>>, vector<8x1x768xf32>
    %67 = vector.shape_cast %66 : vector<8x1x768xf32> to vector<8x768xf32>
    %68 = arith.truncf %67 : vector<8x768xf32> to vector<8x768xbf16>
    %cst_34 = arith.constant dense<0.000000e+00> : vector<8x256xf32>
    %69 = tpu.matmul %68, %2, %cst_34 {dimension_numbers = #tpu.dot_dimension_numbers<[1], [0], [0], [1], [0, 0, 1, 1], [], []>} : vector<8x768xbf16>, vector<768x256xbf16>, vector<8x256xf32> -> vector<8x256xf32>
    %70 = vector.broadcast %23 : vector<1x256xf32> to vector<8x256xf32>
    %71 = arith.addf %69, %70 : vector<8x256xf32>
    %c0_35 = arith.constant 0 : index
    %c8 = arith.constant 8 : index
    %c0_36 = arith.constant 0 : index
    %72 = vector.load %arg2[%c0_35, %c8, %c0_36] : memref<8x9x768xf32, #tpu.memory_space<vmem>>, vector<8x1x768xf32>
    %73 = vector.shape_cast %72 : vector<8x1x768xf32> to vector<8x768xf32>
    %74 = arith.truncf %73 : vector<8x768xf32> to vector<8x768xbf16>
    %cst_37 = arith.constant dense<0.000000e+00> : vector<8x256xf32>
    %75 = tpu.matmul %74, %2, %cst_37 {dimension_numbers = #tpu.dot_dimension_numbers<[1], [0], [0], [1], [0, 0, 1, 1], [], []>} : vector<8x768xbf16>, vector<768x256xbf16>, vector<8x256xf32> -> vector<8x256xf32>
    %76 = vector.broadcast %23 : vector<1x256xf32> to vector<8x256xf32>
    %77 = arith.addf %75, %76 : vector<8x256xf32>
    %c0_38 = arith.constant 0 : index
    %c0_39 = arith.constant 0 : index
    %78 = vector.load %arg3[%c0_38, %c0_39] : memref<1x256xf32, #tpu.memory_space<vmem>>, vector<1x256xf32>
    %c0_40 = arith.constant 0 : index
    %c0_41 = arith.constant 0 : index
    %79 = vector.load %arg4[%c0_40, %c0_41] : memref<1x256xf32, #tpu.memory_space<vmem>>, vector<1x256xf32>
    %c0_42 = arith.constant 0 : index
    %c0_43 = arith.constant 0 : index
    %80 = vector.load %arg1[%c0_42, %c0_43] : memref<8x8xf32, #tpu.memory_space<vmem>>, vector<8x1xf32>
    %81 = vector.broadcast %80 : vector<8x1xf32> to vector<8x256xf32>
    %82 = vector.broadcast %78 : vector<1x256xf32> to vector<8x256xf32>
    %83 = arith.mulf %81, %82 : vector<8x256xf32>
    %84 = vector.broadcast %79 : vector<1x256xf32> to vector<8x256xf32>
    %85 = arith.addf %83, %84 : vector<8x256xf32>
    %c0_44 = arith.constant 0 : index
    %c1_45 = arith.constant 1 : index
    %86 = vector.load %arg1[%c0_44, %c1_45] : memref<8x8xf32, #tpu.memory_space<vmem>>, vector<8x1xf32>
    %87 = vector.broadcast %86 : vector<8x1xf32> to vector<8x256xf32>
    %88 = vector.broadcast %78 : vector<1x256xf32> to vector<8x256xf32>
    %89 = arith.mulf %87, %88 : vector<8x256xf32>
    %90 = vector.broadcast %79 : vector<1x256xf32> to vector<8x256xf32>
    %91 = arith.addf %89, %90 : vector<8x256xf32>
    %c0_46 = arith.constant 0 : index
    %c2_47 = arith.constant 2 : index
    %92 = vector.load %arg1[%c0_46, %c2_47] : memref<8x8xf32, #tpu.memory_space<vmem>>, vector<8x1xf32>
    %93 = vector.broadcast %92 : vector<8x1xf32> to vector<8x256xf32>
    %94 = vector.broadcast %78 : vector<1x256xf32> to vector<8x256xf32>
    %95 = arith.mulf %93, %94 : vector<8x256xf32>
    %96 = vector.broadcast %79 : vector<1x256xf32> to vector<8x256xf32>
    %97 = arith.addf %95, %96 : vector<8x256xf32>
    %c0_48 = arith.constant 0 : index
    %c3_49 = arith.constant 3 : index
    %98 = vector.load %arg1[%c0_48, %c3_49] : memref<8x8xf32, #tpu.memory_space<vmem>>, vector<8x1xf32>
    %99 = vector.broadcast %98 : vector<8x1xf32> to vector<8x256xf32>
    %100 = vector.broadcast %78 : vector<1x256xf32> to vector<8x256xf32>
    %101 = arith.mulf %99, %100 : vector<8x256xf32>
    %102 = vector.broadcast %79 : vector<1x256xf32> to vector<8x256xf32>
    %103 = arith.addf %101, %102 : vector<8x256xf32>
    %c0_50 = arith.constant 0 : index
    %c4_51 = arith.constant 4 : index
    %104 = vector.load %arg1[%c0_50, %c4_51] : memref<8x8xf32, #tpu.memory_space<vmem>>, vector<8x1xf32>
    %105 = vector.broadcast %104 : vector<8x1xf32> to vector<8x256xf32>
    %106 = vector.broadcast %78 : vector<1x256xf32> to vector<8x256xf32>
    %107 = arith.mulf %105, %106 : vector<8x256xf32>
    %108 = vector.broadcast %79 : vector<1x256xf32> to vector<8x256xf32>
    %109 = arith.addf %107, %108 : vector<8x256xf32>
    %c0_52 = arith.constant 0 : index
    %c5_53 = arith.constant 5 : index
    %110 = vector.load %arg1[%c0_52, %c5_53] : memref<8x8xf32, #tpu.memory_space<vmem>>, vector<8x1xf32>
    %111 = vector.broadcast %110 : vector<8x1xf32> to vector<8x256xf32>
    %112 = vector.broadcast %78 : vector<1x256xf32> to vector<8x256xf32>
    %113 = arith.mulf %111, %112 : vector<8x256xf32>
    %114 = vector.broadcast %79 : vector<1x256xf32> to vector<8x256xf32>
    %115 = arith.addf %113, %114 : vector<8x256xf32>
    %c0_54 = arith.constant 0 : index
    %c6_55 = arith.constant 6 : index
    %116 = vector.load %arg1[%c0_54, %c6_55] : memref<8x8xf32, #tpu.memory_space<vmem>>, vector<8x1xf32>
    %117 = vector.broadcast %116 : vector<8x1xf32> to vector<8x256xf32>
    %118 = vector.broadcast %78 : vector<1x256xf32> to vector<8x256xf32>
    %119 = arith.mulf %117, %118 : vector<8x256xf32>
    %120 = vector.broadcast %79 : vector<1x256xf32> to vector<8x256xf32>
    %121 = arith.addf %119, %120 : vector<8x256xf32>
    %c0_56 = arith.constant 0 : index
    %c7_57 = arith.constant 7 : index
    %122 = vector.load %arg1[%c0_56, %c7_57] : memref<8x8xf32, #tpu.memory_space<vmem>>, vector<8x1xf32>
    %123 = vector.broadcast %122 : vector<8x1xf32> to vector<8x256xf32>
    %124 = vector.broadcast %78 : vector<1x256xf32> to vector<8x256xf32>
    %125 = arith.mulf %123, %124 : vector<8x256xf32>
    %126 = vector.broadcast %79 : vector<1x256xf32> to vector<8x256xf32>
    %127 = arith.addf %125, %126 : vector<8x256xf32>
    %cst_58 = arith.constant 0.000000e+00 : f32
    %128 = vector.broadcast %cst_58 : f32 to vector<8x64xf32>
    %cst_59 = arith.constant 0.000000e+00 : f32
    %129 = vector.broadcast %cst_59 : f32 to vector<8x64xf32>
    %130 = arith.truncf %128 : vector<8x64xf32> to vector<8x64xbf16>
    %cst_60 = arith.constant dense<0.000000e+00> : vector<8x256xf32>
    %131 = tpu.matmul %130, %0, %cst_60 {dimension_numbers = #tpu.dot_dimension_numbers<[1], [0], [0], [1], [0, 0, 1, 1], [], []>} : vector<8x64xbf16>, vector<64x256xbf16>, vector<8x256xf32> -> vector<8x256xf32>
    %132 = arith.addf %85, %131 : vector<8x256xf32>
    %133 = arith.mulf %12, %132 : vector<8x256xf32>
    %134 = arith.negf %133 : vector<8x256xf32>
    %135 = math.exp %134 : vector<8x256xf32>
    %cst_61 = arith.constant 1.000000e+00 : f32
    %136 = vector.broadcast %cst_61 : f32 to vector<8x256xf32>
    %137 = arith.addf %136, %135 : vector<8x256xf32>
    %138 = arith.divf %136, %137 : vector<8x256xf32>
    %139 = arith.mulf %12, %138 : vector<8x256xf32>
    %140 = arith.subf %139, %10 : vector<8x256xf32>
    %141 = vector.extract_strided_slice %140 {offsets = [0, 0], sizes = [8, 64], strides = [1, 1]} : vector<8x256xf32> to vector<8x64xf32>
    %142 = vector.extract_strided_slice %140 {offsets = [0, 64], sizes = [8, 64], strides = [1, 1]} : vector<8x256xf32> to vector<8x64xf32>
    %143 = vector.extract_strided_slice %140 {offsets = [0, 128], sizes = [8, 64], strides = [1, 1]} : vector<8x256xf32> to vector<8x64xf32>
    %144 = vector.extract_strided_slice %140 {offsets = [0, 192], sizes = [8, 64], strides = [1, 1]} : vector<8x256xf32> to vector<8x64xf32>
    %145 = arith.mulf %142, %129 : vector<8x64xf32>
    %146 = arith.mulf %141, %143 : vector<8x64xf32>
    %147 = arith.addf %145, %146 : vector<8x64xf32>
    %148 = math.tanh %147 : vector<8x64xf32>
    %149 = arith.mulf %144, %148 : vector<8x64xf32>
    %150 = arith.truncf %149 : vector<8x64xf32> to vector<8x64xbf16>
    %cst_62 = arith.constant dense<0.000000e+00> : vector<8x256xf32>
    %151 = tpu.matmul %150, %0, %cst_62 {dimension_numbers = #tpu.dot_dimension_numbers<[1], [0], [0], [1], [0, 0, 1, 1], [], []>} : vector<8x64xbf16>, vector<64x256xbf16>, vector<8x256xf32> -> vector<8x256xf32>
    %152 = arith.addf %91, %151 : vector<8x256xf32>
    %153 = arith.mulf %12, %152 : vector<8x256xf32>
    %154 = arith.negf %153 : vector<8x256xf32>
    %155 = math.exp %154 : vector<8x256xf32>
    %cst_63 = arith.constant 1.000000e+00 : f32
    %156 = vector.broadcast %cst_63 : f32 to vector<8x256xf32>
    %157 = arith.addf %156, %155 : vector<8x256xf32>
    %158 = arith.divf %156, %157 : vector<8x256xf32>
    %159 = arith.mulf %12, %158 : vector<8x256xf32>
    %160 = arith.subf %159, %10 : vector<8x256xf32>
    %161 = vector.extract_strided_slice %160 {offsets = [0, 0], sizes = [8, 64], strides = [1, 1]} : vector<8x256xf32> to vector<8x64xf32>
    %162 = vector.extract_strided_slice %160 {offsets = [0, 64], sizes = [8, 64], strides = [1, 1]} : vector<8x256xf32> to vector<8x64xf32>
    %163 = vector.extract_strided_slice %160 {offsets = [0, 128], sizes = [8, 64], strides = [1, 1]} : vector<8x256xf32> to vector<8x64xf32>
    %164 = vector.extract_strided_slice %160 {offsets = [0, 192], sizes = [8, 64], strides = [1, 1]} : vector<8x256xf32> to vector<8x64xf32>
    %165 = arith.mulf %162, %147 : vector<8x64xf32>
    %166 = arith.mulf %161, %163 : vector<8x64xf32>
    %167 = arith.addf %165, %166 : vector<8x64xf32>
    %168 = math.tanh %167 : vector<8x64xf32>
    %169 = arith.mulf %164, %168 : vector<8x64xf32>
    %170 = arith.truncf %169 : vector<8x64xf32> to vector<8x64xbf16>
    %cst_64 = arith.constant dense<0.000000e+00> : vector<8x256xf32>
    %171 = tpu.matmul %170, %0, %cst_64 {dimension_numbers = #tpu.dot_dimension_numbers<[1], [0], [0], [1], [0, 0, 1, 1], [], []>} : vector<8x64xbf16>, vector<64x256xbf16>, vector<8x256xf32> -> vector<8x256xf32>
    %172 = arith.addf %97, %171 : vector<8x256xf32>
    %173 = arith.mulf %12, %172 : vector<8x256xf32>
    %174 = arith.negf %173 : vector<8x256xf32>
    %175 = math.exp %174 : vector<8x256xf32>
    %cst_65 = arith.constant 1.000000e+00 : f32
    %176 = vector.broadcast %cst_65 : f32 to vector<8x256xf32>
    %177 = arith.addf %176, %175 : vector<8x256xf32>
    %178 = arith.divf %176, %177 : vector<8x256xf32>
    %179 = arith.mulf %12, %178 : vector<8x256xf32>
    %180 = arith.subf %179, %10 : vector<8x256xf32>
    %181 = vector.extract_strided_slice %180 {offsets = [0, 0], sizes = [8, 64], strides = [1, 1]} : vector<8x256xf32> to vector<8x64xf32>
    %182 = vector.extract_strided_slice %180 {offsets = [0, 64], sizes = [8, 64], strides = [1, 1]} : vector<8x256xf32> to vector<8x64xf32>
    %183 = vector.extract_strided_slice %180 {offsets = [0, 128], sizes = [8, 64], strides = [1, 1]} : vector<8x256xf32> to vector<8x64xf32>
    %184 = vector.extract_strided_slice %180 {offsets = [0, 192], sizes = [8, 64], strides = [1, 1]} : vector<8x256xf32> to vector<8x64xf32>
    %185 = arith.mulf %182, %167 : vector<8x64xf32>
    %186 = arith.mulf %181, %183 : vector<8x64xf32>
    %187 = arith.addf %185, %186 : vector<8x64xf32>
    %188 = math.tanh %187 : vector<8x64xf32>
    %189 = arith.mulf %184, %188 : vector<8x64xf32>
    %190 = arith.truncf %189 : vector<8x64xf32> to vector<8x64xbf16>
    %cst_66 = arith.constant dense<0.000000e+00> : vector<8x256xf32>
    %191 = tpu.matmul %190, %0, %cst_66 {dimension_numbers = #tpu.dot_dimension_numbers<[1], [0], [0], [1], [0, 0, 1, 1], [], []>} : vector<8x64xbf16>, vector<64x256xbf16>, vector<8x256xf32> -> vector<8x256xf32>
    %192 = arith.addf %103, %191 : vector<8x256xf32>
    %193 = arith.mulf %12, %192 : vector<8x256xf32>
    %194 = arith.negf %193 : vector<8x256xf32>
    %195 = math.exp %194 : vector<8x256xf32>
    %cst_67 = arith.constant 1.000000e+00 : f32
    %196 = vector.broadcast %cst_67 : f32 to vector<8x256xf32>
    %197 = arith.addf %196, %195 : vector<8x256xf32>
    %198 = arith.divf %196, %197 : vector<8x256xf32>
    %199 = arith.mulf %12, %198 : vector<8x256xf32>
    %200 = arith.subf %199, %10 : vector<8x256xf32>
    %201 = vector.extract_strided_slice %200 {offsets = [0, 0], sizes = [8, 64], strides = [1, 1]} : vector<8x256xf32> to vector<8x64xf32>
    %202 = vector.extract_strided_slice %200 {offsets = [0, 64], sizes = [8, 64], strides = [1, 1]} : vector<8x256xf32> to vector<8x64xf32>
    %203 = vector.extract_strided_slice %200 {offsets = [0, 128], sizes = [8, 64], strides = [1, 1]} : vector<8x256xf32> to vector<8x64xf32>
    %204 = vector.extract_strided_slice %200 {offsets = [0, 192], sizes = [8, 64], strides = [1, 1]} : vector<8x256xf32> to vector<8x64xf32>
    %205 = arith.mulf %202, %187 : vector<8x64xf32>
    %206 = arith.mulf %201, %203 : vector<8x64xf32>
    %207 = arith.addf %205, %206 : vector<8x64xf32>
    %208 = math.tanh %207 : vector<8x64xf32>
    %209 = arith.mulf %204, %208 : vector<8x64xf32>
    %210 = arith.truncf %209 : vector<8x64xf32> to vector<8x64xbf16>
    %cst_68 = arith.constant dense<0.000000e+00> : vector<8x256xf32>
    %211 = tpu.matmul %210, %0, %cst_68 {dimension_numbers = #tpu.dot_dimension_numbers<[1], [0], [0], [1], [0, 0, 1, 1], [], []>} : vector<8x64xbf16>, vector<64x256xbf16>, vector<8x256xf32> -> vector<8x256xf32>
    %212 = arith.addf %109, %211 : vector<8x256xf32>
    %213 = arith.mulf %12, %212 : vector<8x256xf32>
    %214 = arith.negf %213 : vector<8x256xf32>
    %215 = math.exp %214 : vector<8x256xf32>
    %cst_69 = arith.constant 1.000000e+00 : f32
    %216 = vector.broadcast %cst_69 : f32 to vector<8x256xf32>
    %217 = arith.addf %216, %215 : vector<8x256xf32>
    %218 = arith.divf %216, %217 : vector<8x256xf32>
    %219 = arith.mulf %12, %218 : vector<8x256xf32>
    %220 = arith.subf %219, %10 : vector<8x256xf32>
    %221 = vector.extract_strided_slice %220 {offsets = [0, 0], sizes = [8, 64], strides = [1, 1]} : vector<8x256xf32> to vector<8x64xf32>
    %222 = vector.extract_strided_slice %220 {offsets = [0, 64], sizes = [8, 64], strides = [1, 1]} : vector<8x256xf32> to vector<8x64xf32>
    %223 = vector.extract_strided_slice %220 {offsets = [0, 128], sizes = [8, 64], strides = [1, 1]} : vector<8x256xf32> to vector<8x64xf32>
    %224 = vector.extract_strided_slice %220 {offsets = [0, 192], sizes = [8, 64], strides = [1, 1]} : vector<8x256xf32> to vector<8x64xf32>
    %225 = arith.mulf %222, %207 : vector<8x64xf32>
    %226 = arith.mulf %221, %223 : vector<8x64xf32>
    %227 = arith.addf %225, %226 : vector<8x64xf32>
    %228 = math.tanh %227 : vector<8x64xf32>
    %229 = arith.mulf %224, %228 : vector<8x64xf32>
    %230 = arith.truncf %229 : vector<8x64xf32> to vector<8x64xbf16>
    %cst_70 = arith.constant dense<0.000000e+00> : vector<8x256xf32>
    %231 = tpu.matmul %230, %0, %cst_70 {dimension_numbers = #tpu.dot_dimension_numbers<[1], [0], [0], [1], [0, 0, 1, 1], [], []>} : vector<8x64xbf16>, vector<64x256xbf16>, vector<8x256xf32> -> vector<8x256xf32>
    %232 = arith.addf %115, %231 : vector<8x256xf32>
    %233 = arith.mulf %12, %232 : vector<8x256xf32>
    %234 = arith.negf %233 : vector<8x256xf32>
    %235 = math.exp %234 : vector<8x256xf32>
    %cst_71 = arith.constant 1.000000e+00 : f32
    %236 = vector.broadcast %cst_71 : f32 to vector<8x256xf32>
    %237 = arith.addf %236, %235 : vector<8x256xf32>
    %238 = arith.divf %236, %237 : vector<8x256xf32>
    %239 = arith.mulf %12, %238 : vector<8x256xf32>
    %240 = arith.subf %239, %10 : vector<8x256xf32>
    %241 = vector.extract_strided_slice %240 {offsets = [0, 0], sizes = [8, 64], strides = [1, 1]} : vector<8x256xf32> to vector<8x64xf32>
    %242 = vector.extract_strided_slice %240 {offsets = [0, 64], sizes = [8, 64], strides = [1, 1]} : vector<8x256xf32> to vector<8x64xf32>
    %243 = vector.extract_strided_slice %240 {offsets = [0, 128], sizes = [8, 64], strides = [1, 1]} : vector<8x256xf32> to vector<8x64xf32>
    %244 = vector.extract_strided_slice %240 {offsets = [0, 192], sizes = [8, 64], strides = [1, 1]} : vector<8x256xf32> to vector<8x64xf32>
    %245 = arith.mulf %242, %227 : vector<8x64xf32>
    %246 = arith.mulf %241, %243 : vector<8x64xf32>
    %247 = arith.addf %245, %246 : vector<8x64xf32>
    %248 = math.tanh %247 : vector<8x64xf32>
    %249 = arith.mulf %244, %248 : vector<8x64xf32>
    %250 = arith.truncf %249 : vector<8x64xf32> to vector<8x64xbf16>
    %cst_72 = arith.constant dense<0.000000e+00> : vector<8x256xf32>
    %251 = tpu.matmul %250, %0, %cst_72 {dimension_numbers = #tpu.dot_dimension_numbers<[1], [0], [0], [1], [0, 0, 1, 1], [], []>} : vector<8x64xbf16>, vector<64x256xbf16>, vector<8x256xf32> -> vector<8x256xf32>
    %252 = arith.addf %121, %251 : vector<8x256xf32>
    %253 = arith.mulf %12, %252 : vector<8x256xf32>
    %254 = arith.negf %253 : vector<8x256xf32>
    %255 = math.exp %254 : vector<8x256xf32>
    %cst_73 = arith.constant 1.000000e+00 : f32
    %256 = vector.broadcast %cst_73 : f32 to vector<8x256xf32>
    %257 = arith.addf %256, %255 : vector<8x256xf32>
    %258 = arith.divf %256, %257 : vector<8x256xf32>
    %259 = arith.mulf %12, %258 : vector<8x256xf32>
    %260 = arith.subf %259, %10 : vector<8x256xf32>
    %261 = vector.extract_strided_slice %260 {offsets = [0, 0], sizes = [8, 64], strides = [1, 1]} : vector<8x256xf32> to vector<8x64xf32>
    %262 = vector.extract_strided_slice %260 {offsets = [0, 64], sizes = [8, 64], strides = [1, 1]} : vector<8x256xf32> to vector<8x64xf32>
    %263 = vector.extract_strided_slice %260 {offsets = [0, 128], sizes = [8, 64], strides = [1, 1]} : vector<8x256xf32> to vector<8x64xf32>
    %264 = vector.extract_strided_slice %260 {offsets = [0, 192], sizes = [8, 64], strides = [1, 1]} : vector<8x256xf32> to vector<8x64xf32>
    %265 = arith.mulf %262, %247 : vector<8x64xf32>
    %266 = arith.mulf %261, %263 : vector<8x64xf32>
    %267 = arith.addf %265, %266 : vector<8x64xf32>
    %268 = math.tanh %267 : vector<8x64xf32>
    %269 = arith.mulf %264, %268 : vector<8x64xf32>
    %270 = arith.truncf %269 : vector<8x64xf32> to vector<8x64xbf16>
    %cst_74 = arith.constant dense<0.000000e+00> : vector<8x256xf32>
    %271 = tpu.matmul %270, %0, %cst_74 {dimension_numbers = #tpu.dot_dimension_numbers<[1], [0], [0], [1], [0, 0, 1, 1], [], []>} : vector<8x64xbf16>, vector<64x256xbf16>, vector<8x256xf32> -> vector<8x256xf32>
    %272 = arith.addf %127, %271 : vector<8x256xf32>
    %273 = arith.mulf %12, %272 : vector<8x256xf32>
    %274 = arith.negf %273 : vector<8x256xf32>
    %275 = math.exp %274 : vector<8x256xf32>
    %cst_75 = arith.constant 1.000000e+00 : f32
    %276 = vector.broadcast %cst_75 : f32 to vector<8x256xf32>
    %277 = arith.addf %276, %275 : vector<8x256xf32>
    %278 = arith.divf %276, %277 : vector<8x256xf32>
    %279 = arith.mulf %12, %278 : vector<8x256xf32>
    %280 = arith.subf %279, %10 : vector<8x256xf32>
    %281 = vector.extract_strided_slice %280 {offsets = [0, 0], sizes = [8, 64], strides = [1, 1]} : vector<8x256xf32> to vector<8x64xf32>
    %282 = vector.extract_strided_slice %280 {offsets = [0, 64], sizes = [8, 64], strides = [1, 1]} : vector<8x256xf32> to vector<8x64xf32>
    %283 = vector.extract_strided_slice %280 {offsets = [0, 128], sizes = [8, 64], strides = [1, 1]} : vector<8x256xf32> to vector<8x64xf32>
    %284 = vector.extract_strided_slice %280 {offsets = [0, 192], sizes = [8, 64], strides = [1, 1]} : vector<8x256xf32> to vector<8x64xf32>
    %285 = arith.mulf %282, %267 : vector<8x64xf32>
    %286 = arith.mulf %281, %283 : vector<8x64xf32>
    %287 = arith.addf %285, %286 : vector<8x64xf32>
    %288 = math.tanh %287 : vector<8x64xf32>
    %289 = arith.mulf %284, %288 : vector<8x64xf32>
    %cst_76 = arith.constant 0.000000e+00 : f32
    %290 = vector.broadcast %cst_76 : f32 to vector<8x64xf32>
    %cst_77 = arith.constant 0.000000e+00 : f32
    %291 = vector.broadcast %cst_77 : f32 to vector<8x64xf32>
    %292 = arith.truncf %290 : vector<8x64xf32> to vector<8x64xbf16>
    %cst_78 = arith.constant dense<0.000000e+00> : vector<8x256xf32>
    %293 = tpu.matmul %292, %1, %cst_78 {dimension_numbers = #tpu.dot_dimension_numbers<[1], [0], [0], [1], [0, 0, 1, 1], [], []>} : vector<8x64xbf16>, vector<64x256xbf16>, vector<8x256xf32> -> vector<8x256xf32>
    %294 = arith.addf %29, %293 : vector<8x256xf32>
    %295 = arith.mulf %22, %294 : vector<8x256xf32>
    %296 = arith.negf %295 : vector<8x256xf32>
    %297 = math.exp %296 : vector<8x256xf32>
    %cst_79 = arith.constant 1.000000e+00 : f32
    %298 = vector.broadcast %cst_79 : f32 to vector<8x256xf32>
    %299 = arith.addf %298, %297 : vector<8x256xf32>
    %300 = arith.divf %298, %299 : vector<8x256xf32>
    %301 = arith.mulf %22, %300 : vector<8x256xf32>
    %302 = arith.subf %301, %20 : vector<8x256xf32>
    %303 = vector.extract_strided_slice %302 {offsets = [0, 0], sizes = [8, 64], strides = [1, 1]} : vector<8x256xf32> to vector<8x64xf32>
    %304 = vector.extract_strided_slice %302 {offsets = [0, 64], sizes = [8, 64], strides = [1, 1]} : vector<8x256xf32> to vector<8x64xf32>
    %305 = vector.extract_strided_slice %302 {offsets = [0, 128], sizes = [8, 64], strides = [1, 1]} : vector<8x256xf32> to vector<8x64xf32>
    %306 = vector.extract_strided_slice %302 {offsets = [0, 192], sizes = [8, 64], strides = [1, 1]} : vector<8x256xf32> to vector<8x64xf32>
    %307 = arith.mulf %304, %291 : vector<8x64xf32>
    %308 = arith.mulf %303, %305 : vector<8x64xf32>
    %309 = arith.addf %307, %308 : vector<8x64xf32>
    %310 = math.tanh %309 : vector<8x64xf32>
    %311 = arith.mulf %306, %310 : vector<8x64xf32>
    %312 = arith.truncf %311 : vector<8x64xf32> to vector<8x64xbf16>
    %cst_80 = arith.constant dense<0.000000e+00> : vector<8x256xf32>
    %313 = tpu.matmul %312, %1, %cst_80 {dimension_numbers = #tpu.dot_dimension_numbers<[1], [0], [0], [1], [0, 0, 1, 1], [], []>} : vector<8x64xbf16>, vector<64x256xbf16>, vector<8x256xf32> -> vector<8x256xf32>
    %314 = arith.addf %35, %313 : vector<8x256xf32>
    %315 = arith.mulf %22, %314 : vector<8x256xf32>
    %316 = arith.negf %315 : vector<8x256xf32>
    %317 = math.exp %316 : vector<8x256xf32>
    %cst_81 = arith.constant 1.000000e+00 : f32
    %318 = vector.broadcast %cst_81 : f32 to vector<8x256xf32>
    %319 = arith.addf %318, %317 : vector<8x256xf32>
    %320 = arith.divf %318, %319 : vector<8x256xf32>
    %321 = arith.mulf %22, %320 : vector<8x256xf32>
    %322 = arith.subf %321, %20 : vector<8x256xf32>
    %323 = vector.extract_strided_slice %322 {offsets = [0, 0], sizes = [8, 64], strides = [1, 1]} : vector<8x256xf32> to vector<8x64xf32>
    %324 = vector.extract_strided_slice %322 {offsets = [0, 64], sizes = [8, 64], strides = [1, 1]} : vector<8x256xf32> to vector<8x64xf32>
    %325 = vector.extract_strided_slice %322 {offsets = [0, 128], sizes = [8, 64], strides = [1, 1]} : vector<8x256xf32> to vector<8x64xf32>
    %326 = vector.extract_strided_slice %322 {offsets = [0, 192], sizes = [8, 64], strides = [1, 1]} : vector<8x256xf32> to vector<8x64xf32>
    %327 = arith.mulf %324, %309 : vector<8x64xf32>
    %328 = arith.mulf %323, %325 : vector<8x64xf32>
    %329 = arith.addf %327, %328 : vector<8x64xf32>
    %330 = math.tanh %329 : vector<8x64xf32>
    %331 = arith.mulf %326, %330 : vector<8x64xf32>
    %332 = arith.truncf %331 : vector<8x64xf32> to vector<8x64xbf16>
    %cst_82 = arith.constant dense<0.000000e+00> : vector<8x256xf32>
    %333 = tpu.matmul %332, %1, %cst_82 {dimension_numbers = #tpu.dot_dimension_numbers<[1], [0], [0], [1], [0, 0, 1, 1], [], []>} : vector<8x64xbf16>, vector<64x256xbf16>, vector<8x256xf32> -> vector<8x256xf32>
    %334 = arith.addf %41, %333 : vector<8x256xf32>
    %335 = arith.mulf %22, %334 : vector<8x256xf32>
    %336 = arith.negf %335 : vector<8x256xf32>
    %337 = math.exp %336 : vector<8x256xf32>
    %cst_83 = arith.constant 1.000000e+00 : f32
    %338 = vector.broadcast %cst_83 : f32 to vector<8x256xf32>
    %339 = arith.addf %338, %337 : vector<8x256xf32>
    %340 = arith.divf %338, %339 : vector<8x256xf32>
    %341 = arith.mulf %22, %340 : vector<8x256xf32>
    %342 = arith.subf %341, %20 : vector<8x256xf32>
    %343 = vector.extract_strided_slice %342 {offsets = [0, 0], sizes = [8, 64], strides = [1, 1]} : vector<8x256xf32> to vector<8x64xf32>
    %344 = vector.extract_strided_slice %342 {offsets = [0, 64], sizes = [8, 64], strides = [1, 1]} : vector<8x256xf32> to vector<8x64xf32>
    %345 = vector.extract_strided_slice %342 {offsets = [0, 128], sizes = [8, 64], strides = [1, 1]} : vector<8x256xf32> to vector<8x64xf32>
    %346 = vector.extract_strided_slice %342 {offsets = [0, 192], sizes = [8, 64], strides = [1, 1]} : vector<8x256xf32> to vector<8x64xf32>
    %347 = arith.mulf %344, %329 : vector<8x64xf32>
    %348 = arith.mulf %343, %345 : vector<8x64xf32>
    %349 = arith.addf %347, %348 : vector<8x64xf32>
    %350 = math.tanh %349 : vector<8x64xf32>
    %351 = arith.mulf %346, %350 : vector<8x64xf32>
    %352 = arith.truncf %351 : vector<8x64xf32> to vector<8x64xbf16>
    %cst_84 = arith.constant dense<0.000000e+00> : vector<8x256xf32>
    %353 = tpu.matmul %352, %1, %cst_84 {dimension_numbers = #tpu.dot_dimension_numbers<[1], [0], [0], [1], [0, 0, 1, 1], [], []>} : vector<8x64xbf16>, vector<64x256xbf16>, vector<8x256xf32> -> vector<8x256xf32>
    %354 = arith.addf %47, %353 : vector<8x256xf32>
    %355 = arith.mulf %22, %354 : vector<8x256xf32>
    %356 = arith.negf %355 : vector<8x256xf32>
    %357 = math.exp %356 : vector<8x256xf32>
    %cst_85 = arith.constant 1.000000e+00 : f32
    %358 = vector.broadcast %cst_85 : f32 to vector<8x256xf32>
    %359 = arith.addf %358, %357 : vector<8x256xf32>
    %360 = arith.divf %358, %359 : vector<8x256xf32>
    %361 = arith.mulf %22, %360 : vector<8x256xf32>
    %362 = arith.subf %361, %20 : vector<8x256xf32>
    %363 = vector.extract_strided_slice %362 {offsets = [0, 0], sizes = [8, 64], strides = [1, 1]} : vector<8x256xf32> to vector<8x64xf32>
    %364 = vector.extract_strided_slice %362 {offsets = [0, 64], sizes = [8, 64], strides = [1, 1]} : vector<8x256xf32> to vector<8x64xf32>
    %365 = vector.extract_strided_slice %362 {offsets = [0, 128], sizes = [8, 64], strides = [1, 1]} : vector<8x256xf32> to vector<8x64xf32>
    %366 = vector.extract_strided_slice %362 {offsets = [0, 192], sizes = [8, 64], strides = [1, 1]} : vector<8x256xf32> to vector<8x64xf32>
    %367 = arith.mulf %364, %349 : vector<8x64xf32>
    %368 = arith.mulf %363, %365 : vector<8x64xf32>
    %369 = arith.addf %367, %368 : vector<8x64xf32>
    %370 = math.tanh %369 : vector<8x64xf32>
    %371 = arith.mulf %366, %370 : vector<8x64xf32>
    %372 = arith.truncf %371 : vector<8x64xf32> to vector<8x64xbf16>
    %cst_86 = arith.constant dense<0.000000e+00> : vector<8x256xf32>
    %373 = tpu.matmul %372, %1, %cst_86 {dimension_numbers = #tpu.dot_dimension_numbers<[1], [0], [0], [1], [0, 0, 1, 1], [], []>} : vector<8x64xbf16>, vector<64x256xbf16>, vector<8x256xf32> -> vector<8x256xf32>
    %374 = arith.addf %53, %373 : vector<8x256xf32>
    %375 = arith.mulf %22, %374 : vector<8x256xf32>
    %376 = arith.negf %375 : vector<8x256xf32>
    %377 = math.exp %376 : vector<8x256xf32>
    %cst_87 = arith.constant 1.000000e+00 : f32
    %378 = vector.broadcast %cst_87 : f32 to vector<8x256xf32>
    %379 = arith.addf %378, %377 : vector<8x256xf32>
    %380 = arith.divf %378, %379 : vector<8x256xf32>
    %381 = arith.mulf %22, %380 : vector<8x256xf32>
    %382 = arith.subf %381, %20 : vector<8x256xf32>
    %383 = vector.extract_strided_slice %382 {offsets = [0, 0], sizes = [8, 64], strides = [1, 1]} : vector<8x256xf32> to vector<8x64xf32>
    %384 = vector.extract_strided_slice %382 {offsets = [0, 64], sizes = [8, 64], strides = [1, 1]} : vector<8x256xf32> to vector<8x64xf32>
    %385 = vector.extract_strided_slice %382 {offsets = [0, 128], sizes = [8, 64], strides = [1, 1]} : vector<8x256xf32> to vector<8x64xf32>
    %386 = vector.extract_strided_slice %382 {offsets = [0, 192], sizes = [8, 64], strides = [1, 1]} : vector<8x256xf32> to vector<8x64xf32>
    %387 = arith.mulf %384, %369 : vector<8x64xf32>
    %388 = arith.mulf %383, %385 : vector<8x64xf32>
    %389 = arith.addf %387, %388 : vector<8x64xf32>
    %390 = math.tanh %389 : vector<8x64xf32>
    %391 = arith.mulf %386, %390 : vector<8x64xf32>
    %392 = arith.truncf %391 : vector<8x64xf32> to vector<8x64xbf16>
    %cst_88 = arith.constant dense<0.000000e+00> : vector<8x256xf32>
    %393 = tpu.matmul %392, %1, %cst_88 {dimension_numbers = #tpu.dot_dimension_numbers<[1], [0], [0], [1], [0, 0, 1, 1], [], []>} : vector<8x64xbf16>, vector<64x256xbf16>, vector<8x256xf32> -> vector<8x256xf32>
    %394 = arith.addf %59, %393 : vector<8x256xf32>
    %395 = arith.mulf %22, %394 : vector<8x256xf32>
    %396 = arith.negf %395 : vector<8x256xf32>
    %397 = math.exp %396 : vector<8x256xf32>
    %cst_89 = arith.constant 1.000000e+00 : f32
    %398 = vector.broadcast %cst_89 : f32 to vector<8x256xf32>
    %399 = arith.addf %398, %397 : vector<8x256xf32>
    %400 = arith.divf %398, %399 : vector<8x256xf32>
    %401 = arith.mulf %22, %400 : vector<8x256xf32>
    %402 = arith.subf %401, %20 : vector<8x256xf32>
    %403 = vector.extract_strided_slice %402 {offsets = [0, 0], sizes = [8, 64], strides = [1, 1]} : vector<8x256xf32> to vector<8x64xf32>
    %404 = vector.extract_strided_slice %402 {offsets = [0, 64], sizes = [8, 64], strides = [1, 1]} : vector<8x256xf32> to vector<8x64xf32>
    %405 = vector.extract_strided_slice %402 {offsets = [0, 128], sizes = [8, 64], strides = [1, 1]} : vector<8x256xf32> to vector<8x64xf32>
    %406 = vector.extract_strided_slice %402 {offsets = [0, 192], sizes = [8, 64], strides = [1, 1]} : vector<8x256xf32> to vector<8x64xf32>
    %407 = arith.mulf %404, %389 : vector<8x64xf32>
    %408 = arith.mulf %403, %405 : vector<8x64xf32>
    %409 = arith.addf %407, %408 : vector<8x64xf32>
    %410 = math.tanh %409 : vector<8x64xf32>
    %411 = arith.mulf %406, %410 : vector<8x64xf32>
    %412 = arith.truncf %411 : vector<8x64xf32> to vector<8x64xbf16>
    %cst_90 = arith.constant dense<0.000000e+00> : vector<8x256xf32>
    %413 = tpu.matmul %412, %1, %cst_90 {dimension_numbers = #tpu.dot_dimension_numbers<[1], [0], [0], [1], [0, 0, 1, 1], [], []>} : vector<8x64xbf16>, vector<64x256xbf16>, vector<8x256xf32> -> vector<8x256xf32>
    %414 = arith.addf %65, %413 : vector<8x256xf32>
    %415 = arith.mulf %22, %414 : vector<8x256xf32>
    %416 = arith.negf %415 : vector<8x256xf32>
    %417 = math.exp %416 : vector<8x256xf32>
    %cst_91 = arith.constant 1.000000e+00 : f32
    %418 = vector.broadcast %cst_91 : f32 to vector<8x256xf32>
    %419 = arith.addf %418, %417 : vector<8x256xf32>
    %420 = arith.divf %418, %419 : vector<8x256xf32>
    %421 = arith.mulf %22, %420 : vector<8x256xf32>
    %422 = arith.subf %421, %20 : vector<8x256xf32>
    %423 = vector.extract_strided_slice %422 {offsets = [0, 0], sizes = [8, 64], strides = [1, 1]} : vector<8x256xf32> to vector<8x64xf32>
    %424 = vector.extract_strided_slice %422 {offsets = [0, 64], sizes = [8, 64], strides = [1, 1]} : vector<8x256xf32> to vector<8x64xf32>
    %425 = vector.extract_strided_slice %422 {offsets = [0, 128], sizes = [8, 64], strides = [1, 1]} : vector<8x256xf32> to vector<8x64xf32>
    %426 = vector.extract_strided_slice %422 {offsets = [0, 192], sizes = [8, 64], strides = [1, 1]} : vector<8x256xf32> to vector<8x64xf32>
    %427 = arith.mulf %424, %409 : vector<8x64xf32>
    %428 = arith.mulf %423, %425 : vector<8x64xf32>
    %429 = arith.addf %427, %428 : vector<8x64xf32>
    %430 = math.tanh %429 : vector<8x64xf32>
    %431 = arith.mulf %426, %430 : vector<8x64xf32>
    %432 = arith.truncf %431 : vector<8x64xf32> to vector<8x64xbf16>
    %cst_92 = arith.constant dense<0.000000e+00> : vector<8x256xf32>
    %433 = tpu.matmul %432, %1, %cst_92 {dimension_numbers = #tpu.dot_dimension_numbers<[1], [0], [0], [1], [0, 0, 1, 1], [], []>} : vector<8x64xbf16>, vector<64x256xbf16>, vector<8x256xf32> -> vector<8x256xf32>
    %434 = arith.addf %71, %433 : vector<8x256xf32>
    %435 = arith.mulf %22, %434 : vector<8x256xf32>
    %436 = arith.negf %435 : vector<8x256xf32>
    %437 = math.exp %436 : vector<8x256xf32>
    %cst_93 = arith.constant 1.000000e+00 : f32
    %438 = vector.broadcast %cst_93 : f32 to vector<8x256xf32>
    %439 = arith.addf %438, %437 : vector<8x256xf32>
    %440 = arith.divf %438, %439 : vector<8x256xf32>
    %441 = arith.mulf %22, %440 : vector<8x256xf32>
    %442 = arith.subf %441, %20 : vector<8x256xf32>
    %443 = vector.extract_strided_slice %442 {offsets = [0, 0], sizes = [8, 64], strides = [1, 1]} : vector<8x256xf32> to vector<8x64xf32>
    %444 = vector.extract_strided_slice %442 {offsets = [0, 64], sizes = [8, 64], strides = [1, 1]} : vector<8x256xf32> to vector<8x64xf32>
    %445 = vector.extract_strided_slice %442 {offsets = [0, 128], sizes = [8, 64], strides = [1, 1]} : vector<8x256xf32> to vector<8x64xf32>
    %446 = vector.extract_strided_slice %442 {offsets = [0, 192], sizes = [8, 64], strides = [1, 1]} : vector<8x256xf32> to vector<8x64xf32>
    %447 = arith.mulf %444, %429 : vector<8x64xf32>
    %448 = arith.mulf %443, %445 : vector<8x64xf32>
    %449 = arith.addf %447, %448 : vector<8x64xf32>
    %450 = math.tanh %449 : vector<8x64xf32>
    %451 = arith.mulf %446, %450 : vector<8x64xf32>
    %452 = arith.truncf %451 : vector<8x64xf32> to vector<8x64xbf16>
    %cst_94 = arith.constant dense<0.000000e+00> : vector<8x256xf32>
    %453 = tpu.matmul %452, %1, %cst_94 {dimension_numbers = #tpu.dot_dimension_numbers<[1], [0], [0], [1], [0, 0, 1, 1], [], []>} : vector<8x64xbf16>, vector<64x256xbf16>, vector<8x256xf32> -> vector<8x256xf32>
    %454 = arith.addf %77, %453 : vector<8x256xf32>
    %455 = arith.mulf %22, %454 : vector<8x256xf32>
    %456 = arith.negf %455 : vector<8x256xf32>
    %457 = math.exp %456 : vector<8x256xf32>
    %cst_95 = arith.constant 1.000000e+00 : f32
    %458 = vector.broadcast %cst_95 : f32 to vector<8x256xf32>
    %459 = arith.addf %458, %457 : vector<8x256xf32>
    %460 = arith.divf %458, %459 : vector<8x256xf32>
    %461 = arith.mulf %22, %460 : vector<8x256xf32>
    %462 = arith.subf %461, %20 : vector<8x256xf32>
    %463 = vector.extract_strided_slice %462 {offsets = [0, 0], sizes = [8, 64], strides = [1, 1]} : vector<8x256xf32> to vector<8x64xf32>
    %464 = vector.extract_strided_slice %462 {offsets = [0, 64], sizes = [8, 64], strides = [1, 1]} : vector<8x256xf32> to vector<8x64xf32>
    %465 = vector.extract_strided_slice %462 {offsets = [0, 128], sizes = [8, 64], strides = [1, 1]} : vector<8x256xf32> to vector<8x64xf32>
    %466 = vector.extract_strided_slice %462 {offsets = [0, 192], sizes = [8, 64], strides = [1, 1]} : vector<8x256xf32> to vector<8x64xf32>
    %467 = arith.mulf %464, %449 : vector<8x64xf32>
    %468 = arith.mulf %463, %465 : vector<8x64xf32>
    %469 = arith.addf %467, %468 : vector<8x64xf32>
    %470 = math.tanh %469 : vector<8x64xf32>
    %471 = arith.mulf %466, %470 : vector<8x64xf32>
    %472 = arith.truncf %289 : vector<8x64xf32> to vector<8x64xbf16>
    %c0_96 = arith.constant 0 : index
    %c0_97 = arith.constant 0 : index
    %473 = vector.load %arg9[%c0_96, %c0_97] : memref<64x128xbf16, #tpu.memory_space<vmem>>, vector<64x128xbf16>
    %cst_98 = arith.constant dense<0.000000e+00> : vector<8x128xf32>
    %474 = tpu.matmul %472, %473, %cst_98 {dimension_numbers = #tpu.dot_dimension_numbers<[1], [0], [0], [1], [0, 0, 1, 1], [], []>} : vector<8x64xbf16>, vector<64x128xbf16>, vector<8x128xf32> -> vector<8x128xf32>
    %475 = arith.truncf %471 : vector<8x64xf32> to vector<8x64xbf16>
    %c0_99 = arith.constant 0 : index
    %c0_100 = arith.constant 0 : index
    %476 = vector.load %arg10[%c0_99, %c0_100] : memref<64x128xbf16, #tpu.memory_space<vmem>>, vector<64x128xbf16>
    %cst_101 = arith.constant dense<0.000000e+00> : vector<8x128xf32>
    %477 = tpu.matmul %475, %476, %cst_101 {dimension_numbers = #tpu.dot_dimension_numbers<[1], [0], [0], [1], [0, 0, 1, 1], [], []>} : vector<8x64xbf16>, vector<64x128xbf16>, vector<8x128xf32> -> vector<8x128xf32>
    %478 = arith.addf %474, %477 : vector<8x128xf32>
    %c0_102 = arith.constant 0 : index
    %c0_103 = arith.constant 0 : index
    %479 = vector.load %arg11[%c0_102, %c0_103] : memref<1x128xf32, #tpu.memory_space<vmem>>, vector<1x128xf32>
    %480 = vector.broadcast %479 : vector<1x128xf32> to vector<8x128xf32>
    %481 = arith.addf %478, %480 : vector<8x128xf32>
    %cst_104 = arith.constant 0.000000e+00 : f32
    %482 = vector.broadcast %cst_104 : f32 to vector<8x128xf32>
    %483 = arith.maximumf %481, %482 : vector<8x128xf32>
    %c0_105 = arith.constant 0 : index
    %c0_106 = arith.constant 0 : index
    %484 = vector.load %arg12[%c0_105, %c0_106] : memref<128x1xf32, #tpu.memory_space<vmem>>, vector<128x1xf32>
    %cst_107 = arith.constant dense<0.000000e+00> : vector<8x1xf32>
    %485 = tpu.matmul %483, %484, %cst_107 {dimension_numbers = #tpu.dot_dimension_numbers<[1], [0], [0], [1], [0, 0, 1, 1], [], []>} : vector<8x128xf32>, vector<128x1xf32>, vector<8x1xf32> -> vector<8x1xf32>
    %c0_108 = arith.constant 0 : index
    %c0_109 = arith.constant 0 : index
    %486 = vector.load %arg13[%c0_108, %c0_109] : memref<1x1xf32, #tpu.memory_space<vmem>>, vector<1x1xf32>
    %487 = vector.broadcast %486 : vector<1x1xf32> to vector<8x1xf32>
    %488 = arith.addf %485, %487 : vector<8x1xf32>
    %c0_110 = arith.constant 0 : index
    %c0_111 = arith.constant 0 : index
    %489 = vector.load %arg14[%c0_110, %c0_111] : memref<8x1xf32, #tpu.memory_space<vmem>>, vector<8x1xf32>
    tpu.vector_store %arg14[%c0_110, %c0_111], %488 {strides = array<i32>} : memref<8x1xf32, #tpu.memory_space<vmem>>, vector<8x1xf32>,
    return
  }
  func.func @transform_0(%arg0: i32) -> (i32, i32) {
    %c0_i32 = arith.constant 0 : i32
    %c0_i32_0 = arith.constant 0 : i32
    return %arg0, %c0_i32 : i32, i32
  }
  func.func @transform_1(%arg0: i32) -> (i32, i32, i32) {
    %c0_i32 = arith.constant 0 : i32
    %c0_i32_0 = arith.constant 0 : i32
    %c0_i32_1 = arith.constant 0 : i32
    return %arg0, %c0_i32, %c0_i32_0 : i32, i32, i32
  }
  func.func @transform_2(%arg0: i32) -> (i32, i32) {
    %c0_i32 = arith.constant 0 : i32
    %c0_i32_0 = arith.constant 0 : i32
    %c0_i32_1 = arith.constant 0 : i32
    return %c0_i32, %c0_i32_0 : i32, i32
  }
  func.func @transform_3(%arg0: i32) -> (i32, i32) {
    %c0_i32 = arith.constant 0 : i32
    %c0_i32_0 = arith.constant 0 : i32
    %c0_i32_1 = arith.constant 0 : i32
    return %c0_i32, %c0_i32_0 : i32, i32
  }
  func.func @transform_4(%arg0: i32) -> (i32, i32) {
    %c0_i32 = arith.constant 0 : i32
    %c0_i32_0 = arith.constant 0 : i32
    %c0_i32_1 = arith.constant 0 : i32
    return %c0_i32, %c0_i32_0 : i32, i32
  }
  func.func @transform_5(%arg0: i32) -> (i32, i32) {
    %c0_i32 = arith.constant 0 : i32
    %c0_i32_0 = arith.constant 0 : i32
    %c0_i32_1 = arith.constant 0 : i32
    return %c0_i32, %c0_i32_0 : i32, i32
  }
  func.func @transform_6(%arg0: i32) -> (i32, i32) {
    %c0_i32 = arith.constant 0 : i32
    %c0_i32_0 = arith.constant 0 : i32
    %c0_i32_1 = arith.constant 0 : i32
    return %c0_i32, %c0_i32_0 : i32, i32
  }
  func.func @transform_7(%arg0: i32) -> (i32, i32) {
    %c0_i32 = arith.constant 0 : i32
    %c0_i32_0 = arith.constant 0 : i32
    %c0_i32_1 = arith.constant 0 : i32
    return %c0_i32, %c0_i32_0 : i32, i32
  }
  func.func @transform_8(%arg0: i32) -> (i32, i32) {
    %c0_i32 = arith.constant 0 : i32
    %c0_i32_0 = arith.constant 0 : i32
    %c0_i32_1 = arith.constant 0 : i32
    return %c0_i32, %c0_i32_0 : i32, i32
  }
  func.func @transform_9(%arg0: i32) -> (i32, i32) {
    %c0_i32 = arith.constant 0 : i32
    %c0_i32_0 = arith.constant 0 : i32
    %c0_i32_1 = arith.constant 0 : i32
    return %c0_i32, %c0_i32_0 : i32, i32
  }
  func.func @transform_10(%arg0: i32) -> (i32, i32) {
    %c0_i32 = arith.constant 0 : i32
    %c0_i32_0 = arith.constant 0 : i32
    %c0_i32_1 = arith.constant 0 : i32
    return %c0_i32, %c0_i32_0 : i32, i32
  }
  func.func @transform_11(%arg0: i32) -> (i32, i32) {
    %c0_i32 = arith.constant 0 : i32
    %c0_i32_0 = arith.constant 0 : i32
    %c0_i32_1 = arith.constant 0 : i32
    return %c0_i32, %c0_i32_0 : i32, i32
  }
  func.func @transform_12(%arg0: i32) -> (i32, i32) {
    %c0_i32 = arith.constant 0 : i32
    %c0_i32_0 = arith.constant 0 : i32
    %c0_i32_1 = arith.constant 0 : i32
    return %c0_i32, %c0_i32_0 : i32, i32
  }
  func.func @transform_13(%arg0: i32) -> (i32, i32) {
    %c0_i32 = arith.constant 0 : i32
    %c0_i32_0 = arith.constant 0 : i32
    return %arg0, %c0_i32 : i32, i32
  }
}

</mosaic_0001>

<bundles_post_ra>
// kernel: squeeze.1
= control target key start
LH: loop header
LB: loop body
LE: loop exit
PB: predicated region body
PF: predicated region fallthrough
CT: control target
= control target key end

     0   :  { %s77_s0 = inlined_call_operand.vmem [shape: f32[6], index: 0, kind: input, shape index: {}]   ;;  %s78_s1 = inlined_call_operand.hbm [shape: f32[2,3], index: 1, kind: output, shape index: {}]  }
   0x1   :  { %v6_v0 = vld [vmem:[%s77_s0] sm:$0x1] }
   0x2   :  { %2 = vsyncpa [#allocation1], 0  ;;  %7 = vst [vmem:[#allocation3] sm:$0x1] %v6_v0  ;;  %vm9_vm0 = vcmask 23552   ;;  %s59_s0 = smov 125  }
   0x3   :  { %s60_s8 = smov [#allocation0]  }
   0x4   :  { %s29_s9 = sshll.u32 %s60_s8, 4  ;;  %s30_s9 = int_to_ptr.vmem [resolvable:$true] %s29_s9 }
   0x5   :  { %s37_s10 = scalar_lea.vmem %s30_s9, 32  ;;  %p42_p1 = scmp.lt.s32.totalorder %s30_s9, %s30_s9 }
   0x6   :  { %p38_p0 = scmp.ne.s32.totalorder %s30_s9, %s37_s10  ;;  %p43_p2 = scmp.lt.s32.totalorder %s37_s10, %s37_s10 }
   0x8   :  { %p44_p3 = por %p43_p2, %p42_p1 }
   0x9   :  { %v11_v1 = vld [vmem:[#allocation3] sm:$0x1]  }
   0xa   :  { %v8_v2 = vld [vmem:[#allocation3] sm:$0x1]   ;;  %12 = vrot.lane.b32.xlu0 %v11_v1, %s59_s0  ;;  %p45_p4 = pnand %p44_p3, %p38_p0 }
   0xb   :  { %10 = vst.msk [vmem:[#allocation2] sm:$0x1] %vm9_vm0, %v8_v2  }
  0x7c   :  { %v13_v3 = vpop.permute.xlu0 %12  }
  0x7d   :  { %16 = vst.msk [vmem:[#allocation2 + $0x1] sm:$0x1] %vm9_vm0, %v13_v3  }
  0x84   :  { %v21_v4 = vld [vmem:[#allocation2] sm:$0x3] }
  0x85   :  { %24 = vst [vmem:[#allocation0] sm:$0x3] %v21_v4 }
  0x86   :  { %48 = shalt.err (!%p45_p4)
}
  0x87   :  { %32 = dma.vmem_to_hbm [thread:$0]  %s30_s9, 32, %s78_s1, [#allocation1]  }
  0x88   :  { %57 = dma.done.wait [#allocation1], 32  }
  0x89   :  { %58 = vsyncadd [#allocation1], 4294967264 }
  0x8a   :  { %34 = vsyncpa [#allocation1], 1 }

// kernel: price_news_forward.1
= control target key start
LH: loop header
LB: loop body
LE: loop exit
PB: predicated region body
PF: predicated region fallthrough
CT: control target
= control target key end

     0   :  { %v15281_v37 = vlaneseq  ;;  %vm610_vm0 = vcmask 1041409   ;;  %vm613_vm1 = vcmask 1042434   ;;  %vm616_vm2 = vcmask 1043459   ;;  %s15267_s5 = inlined_call_operand.vmem [shape: bf16[768,256], index: 5, kind: input, shape index: {}]   ;;  %s15268_s1 = inlined_call_operand.vmem [shape: f32[8,9,768], index: 1, kind: input, shape index: {}]   ;;  %s15269_s6 = inlined_call_operand.vmem [shape: f32[1,256], index: 6, kind: input, shape index: {}]   ;;  %s15270_s4 = inlined_call_operand.vmem [shape: bf16[64,256], index: 4, kind: input, shape index: {}]   ;;  %s15271_s0 = inlined_call_operand.vmem [shape: f32[8,8], index: 0, kind: input, shape index: {}]   ;;  %s15272_s2 = inlined_call_operand.vmem [shape: f32[1,256], index: 2, kind: input, shape index: {}]   ;;  %s15273_s3 = inlined_call_operand.vmem [shape: f32[1,256], index: 3, kind: input, shape index: {}]   ;;  %s15274_s7 = inlined_call_operand.vmem [shape: bf16[64,256], index: 7, kind: input, shape index: {}]   ;;  %s15275_s8 = inlined_call_operand.vmem [shape: bf16[64,128], index: 8, kind: input, shape index: {}]   ;;  %s15276_s9 = inlined_call_operand.vmem [shape: bf16[64,128], index: 9, kind: input, shape index: {}]   ;;  %s15277_s11 = inlined_call_operand.vmem [shape: f32[128,1], index: 11, kind: input, shape index: {}]   ;;  %s15278_s12 = inlined_call_operand.<no memory space> [shape: f32[1,1], index: 12, kind: input, shape index: {}]   ;;  %s15279_s10 = inlined_call_operand.vmem [shape: f32[1,128], index: 10, kind: input, shape index: {}]   ;;  %s15280_s13 = inlined_call_operand.vmem [shape: f32[8,1], index: 13, kind: output, shape index: {}]  }
   0x1   :  { %v9450_v0 = vld [vmem:[%s15267_s5 + $0x74] ss:$8 sps:$4 sm:$0xff]   ;;  %v9459_v2 = vld [vmem:[%s15267_s5 + $0x70] ss:$8 sps:$4 sm:$0xff]   ;;  %v9467_v4 = vld [vmem:[%s15267_s5 + $0x64] ss:$8 sps:$4 sm:$0xff]  }
   0x2   :  { %v8617_v1 = vld [vmem:[%s15267_s5 + $0x174] ss:$8 sps:$4 sm:$0xff]   ;;  %1192 = vmatprep.subr.bf16.mxu0 %v9450_v0  ;;  %v8620_v3 = vld [vmem:[%s15267_s5 + $0x170] ss:$8 sps:$4 sm:$0xff]   ;;  %v8623_v5 = vld [vmem:[%s15267_s5 + $0x164] ss:$8 sps:$4 sm:$0xff]  }
   0x3   :  { %1233 = vmatprep.subr.bf16.mxu1 %v8617_v1  ;;  %1193 = vmatpush1.bf16.msra.mxu0 %v9459_v2  ;;  %v9476_v6 = vld [vmem:[%s15267_s5 + $0x60] ss:$8 sps:$4 sm:$0xff]   ;;  %v9485_v8 = vld [vmem:[%s15267_s5 + $0x54] ss:$8 sps:$4 sm:$0xff]   ;;  %v9493_v10 = vld [vmem:[%s15267_s5 + $0x50] ss:$8 sps:$4 sm:$0xff]  }
   0x4   :  { %1234 = vmatpush1.bf16.msra.mxu1 %v8620_v3  ;;  %1194 = vmatprep.subr.bf16.mxu0 %v9467_v4  ;;  %v8626_v7 = vld [vmem:[%s15267_s5 + $0x160] ss:$8 sps:$4 sm:$0xff]   ;;  %v8629_v9 = vld [vmem:[%s15267_s5 + $0x154] ss:$8 sps:$4 sm:$0xff]   ;;  %v8632_v11 = vld [vmem:[%s15267_s5 + $0x150] ss:$8 sps:$4 sm:$0xff]  }
   0x5   :  { %1235 = vmatprep.subr.bf16.mxu1 %v8623_v5  ;;  %v9502_v12 = vld [vmem:[%s15267_s5 + $0x44] ss:$8 sps:$4 sm:$0xff]   ;;  %v8637_v14 = vld [vmem:[%s15267_s5 + $0x40] ss:$8 sps:$4 sm:$0xff]   ;;  %v8639_v16 = vld [vmem:[%s15267_s5 + $0x34] ss:$8 sps:$4 sm:$0xff]  }
   0x6   :  { %v8635_v13 = vld [vmem:[%s15267_s5 + $0x144] ss:$8 sps:$4 sm:$0xff]   ;;  %v8638_v15 = vld [vmem:[%s15267_s5 + $0x140] ss:$8 sps:$4 sm:$0xff]   ;;  %v8641_v17 = vld [vmem:[%s15267_s5 + $0x134] ss:$8 sps:$4 sm:$0xff]  }
   0x7   :  { %1195 = vmatpush1.bf16.msra.mxu0 %v9476_v6  ;;  %v8643_v18 = vld [vmem:[%s15267_s5 + $0x30] ss:$8 sps:$4 sm:$0xff]   ;;  %v8645_v20 = vld [vmem:[%s15267_s5 + $0x24] ss:$8 sps:$4 sm:$0xff]   ;;  %v8649_v22 = vld [vmem:[%s15267_s5 + $0x20] ss:$8 sps:$4 sm:$0xff]  }
   0x8   :  { %1236 = vmatpush1.bf16.msra.mxu1 %v8626_v7  ;;  %1196 = vmatprep.subr.bf16.mxu0 %v9485_v8  ;;  %v8644_v19 = vld [vmem:[%s15267_s5 + $0x130] ss:$8 sps:$4 sm:$0xff]   ;;  %v8647_v21 = vld [vmem:[%s15267_s5 + $0x124] ss:$8 sps:$4 sm:$0xff]   ;;  %v8650_v23 = vld [vmem:[%s15267_s5 + $0x120] ss:$8 sps:$4 sm:$0xff]  }
   0x9   :  { %1237 = vmatprep.subr.bf16.mxu1 %v8629_v9  ;;  %v8651_v24 = vld [vmem:[%s15267_s5 + $0x14] ss:$8 sps:$4 sm:$0xff]   ;;  %v8655_v26 = vld [vmem:[%s15267_s5 + $0x10] ss:$8 sps:$4 sm:$0xff]   ;;  %v8657_v28 = vld [vmem:[%s15267_s5 + $0x4] ss:$8 sps:$4 sm:$0xff]  }
   0xa   :  { %v8653_v25 = vld [vmem:[%s15267_s5 + $0x114] ss:$8 sps:$4 sm:$0xff]   ;;  %v8656_v27 = vld [vmem:[%s15267_s5 + $0x110] ss:$8 sps:$4 sm:$0xff]   ;;  %v8659_v29 = vld [vmem:[%s15267_s5 + $0x104] ss:$8 sps:$4 sm:$0xff]  }
   0xb   :  { %1197 = vmatpush1.bf16.msra.mxu0 %v9493_v10  ;;  %v8661_v30 = vld [vmem:[%s15267_s5] ss:$8 sps:$4 sm:$0xff]   ;;  %v8663_v32 = vld [vmem:[%s15267_s5 + $0xf4] ss:$8 sps:$4 sm:$0xff]   ;;  %v8667_v34 = vld [vmem:[%s15267_s5 + $0xf0] ss:$8 sps:$4 sm:$0xff]  }
   0xc   :  { %1238 = vmatpush1.bf16.msra.mxu1 %v8632_v11  ;;  %1198 = vmatprep.subr.bf16.mxu0 %v9502_v12  ;;  %v8662_v31 = vld [vmem:[%s15267_s5 + $0x100] ss:$8 sps:$4 sm:$0xff]   ;;  %v8665_v33 = vld [vmem:[%s15267_s5 + $0x1f4] ss:$8 sps:$4 sm:$0xff]   ;;  %v8668_v35 = vld [vmem:[%s15267_s5 + $0x1f0] ss:$8 sps:$4 sm:$0xff]  }
   0xd   :  { %1239 = vmatprep.subr.bf16.mxu1 %v8635_v13  ;;  %v8669_v36 = vld [vmem:[%s15267_s5 + $0xe4] ss:$8 sps:$4 sm:$0xff]   ;;  %v8673_v39 = vld [vmem:[%s15267_s5 + $0xe0] ss:$8 sps:$4 sm:$0xff]   ;;  %v8675_v41 = vld [vmem:[%s15267_s5 + $0xd4] ss:$8 sps:$4 sm:$0xff]  }
   0xe   :  { %v8671_v38 = vld [vmem:[%s15267_s5 + $0x1e4] ss:$8 sps:$4 sm:$0xff]   ;;  %v8674_v40 = vld [vmem:[%s15267_s5 + $0x1e0] ss:$8 sps:$4 sm:$0xff]   ;;  %v9592_v42 = vshrl.u32 %v15281_v37, 7  ;;  %vm619_vm3 = vcmask 1044484  }
   0xf   :  { %1199 = vmatpush1.bf16.msra.mxu0 %v8637_v14  ;;  %v8677_v43 = vld [vmem:[%s15267_s5 + $0x1d4] ss:$8 sps:$4 sm:$0xff]   ;;  %v8679_v44 = vld [vmem:[%s15267_s5 + $0xd0] ss:$8 sps:$4 sm:$0xff]   ;;  %v8681_v46 = vld [vmem:[%s15267_s5 + $0xc4] ss:$8 sps:$4 sm:$0xff]  }
  0x10   :  { %1240 = vmatpush1.bf16.msra.mxu1 %v8638_v15  ;;  %1200 = vmatprep.subr.bf16.mxu0 %v8639_v16  ;;  %v8680_v45 = vld [vmem:[%s15267_s5 + $0x1d0] ss:$8 sps:$4 sm:$0xff]   ;;  %v9607_v47 = vsub.s32 1, %v9592_v42  ;;  %v9610_v48 = vsub.s32 3, %v9592_v42  ;;  %v8683_v49 = vld [vmem:[%s15267_s5 + $0x1c4] ss:$8 sps:$4 sm:$0xff]  }
  0x11   :  { %1241 = vmatprep.subr.bf16.mxu1 %v8641_v17  ;;  %v9616_v50 = vsub.s32 0, %v9592_v42  ;;  %v9619_v51 = vsub.s32 2, %v9592_v42  ;;  %v8685_v52 = vld [vmem:[%s15267_s5 + $0xc0] ss:$8 sps:$4 sm:$0xff]   ;;  %v9628_v54 = vsub.s32 5, %v9592_v42  ;;  %vm622_vm4 = vcmask 1045509  }
  0x12   :  { %15512 = vst [vmem:[#allocation3_spill] sm:$0xff] %v9607_v47  ;;  %15513 = vst [vmem:[#allocation4_spill] sm:$0xff] %v9610_v48  ;;  %v8686_v53 = vld [vmem:[%s15267_s5 + $0x1c0] ss:$8 sps:$4 sm:$0xff]   ;;  %v8687_v55 = vld [vmem:[%s15267_s5 + $0xb4] ss:$8 sps:$4 sm:$0xff]  }
  0x13   :  { %1201 = vmatpush1.bf16.msra.mxu0 %v8643_v18  ;;  %15514 = vst [vmem:[#allocation5_spill] sm:$0xff] %v9616_v50  ;;  %15515 = vst [vmem:[#allocation6_spill] sm:$0xff] %v9619_v51  ;;  %v8689_v56 = vld [vmem:[%s15267_s5 + $0x1b4] ss:$8 sps:$4 sm:$0xff]   ;;  %v8691_v3 = vld [vmem:[%s15267_s5 + $0xb0] ss:$8 sps:$4 sm:$0xff]  }
  0x14   :  { %1242 = vmatpush1.bf16.msra.mxu1 %v8644_v19  ;;  %1202 = vmatprep.subr.bf16.mxu0 %v8645_v20  ;;  %15516 = vst [vmem:[#allocation7_spill] sm:$0xff] %v9628_v54  ;;  %v175_v57 = vld [vmem:[%s15268_s1] ss:$8 sm:$0xf]  ;;  %v8693_v16 = vld [vmem:[%s15267_s5 + $0xa4] ss:$8 sps:$4 sm:$0xff]  }
  0x15   :  { %1243 = vmatprep.subr.bf16.mxu1 %v8647_v21  ;;  %v176_v58 = vld [vmem:[%s15268_s1] ss:$8 sm:$0x30]  ;;  %v8692_v5 = vld [vmem:[%s15267_s5 + $0x1b0] ss:$8 sps:$4 sm:$0xff]   ;;  %vm625_vm5 = vcmask 1046534  }
  0x16   :  { %v9642_v59 = vor.u32 %v176_v58, %v175_v57  ;;  %v8195_v60 = vld [vmem:[%s15268_s1 + $0x60] ss:$8 sm:$0xf]  ;;  %v8695_v17 = vld [vmem:[%s15267_s5 + $0x1a4] ss:$8 sps:$4 sm:$0xff]   ;;  %vm628_vm6 = vcmask 1047559  }
  0x17   :  { %1203 = vmatpush1.bf16.msra.mxu0 %v8649_v22  ;;  %v8196_v61 = vld [vmem:[%s15268_s1 + $0x60] ss:$8 sm:$0x30]  ;;  %v8701_v58 = vld [vmem:[%s15267_s5 + $0x194] ss:$8 sps:$4 sm:$0xff]   ;;  %vm6589_vm8 = vcmask 523264  }
  0x18   :  { %1244 = vmatpush1.bf16.msra.mxu1 %v8650_v23  ;;  %1204 = vmatprep.subr.bf16.mxu0 %v8651_v24  ;;  %v9650_v62 = vor.u32 %v8196_v61, %v8195_v60  ;;  %v8197_v63 = vld [vmem:[%s15268_s1 + $0xc0] ss:$8 sm:$0xf]  ;;  %v221_v13 = vrot.slane %v9642_v59, %v9607_v47  ;;  %v9676_v14 = vrot.slane %v9642_v59, %v9610_v48  ;;  %vm9376_vm9 = vmmov 0  }
  0x19   :  { %1245 = vmatprep.subr.bf16.mxu1 %v8653_v25  ;;  %v8198_v1 = vld [vmem:[%s15268_s1 + $0xc0] ss:$8 sm:$0x30]  ;;  %v9680_v15 = vrot.slane %v9642_v59, %v9616_v50  ;;  %vm8188_vm10 = vcmask 7168  }
  0x1a   :  { %v9664_v7 = vor.u32 %v8198_v1, %v8197_v63  ;;  %v8199_v9 = vld [vmem:[%s15268_s1 + $0x120] ss:$8 sm:$0xf]  ;;  %v245_v21 = vrot.slane %v9650_v62, %v9607_v47  ;;  %v9700_v22 = vrot.slane %v9650_v62, %v9610_v48  ;;  %v9704_v23 = vrot.slane %v9650_v62, %v9616_v50 }
  0x1b   :  { %1205 = vmatpush1.bf16.msra.mxu0 %v8655_v26  ;;  %v8200_v11 = vld [vmem:[%s15268_s1 + $0x120] ss:$8 sm:$0x30] }
  0x1c   :  { %1246 = vmatpush1.bf16.msra.mxu1 %v8656_v27  ;;  %1206 = vmatprep.subr.bf16.mxu0 %v8657_v28  ;;  %v9688_v18 = vor.u32 %v8200_v11, %v8199_v9  ;;  %v8201_v19 = vld [vmem:[%s15268_s1 + $0x180] ss:$8 sm:$0xf]  ;;  %v269_v27 = vrot.slane %v9664_v7, %v9607_v47  ;;  %v455_v28 = vpack.c.bf16 %v221_v13, %v221_v13 }
  0x1d   :  { %1247 = vmatprep.subr.bf16.mxu1 %v8659_v29  ;;  %v8202_v20 = vld [vmem:[%s15268_s1 + $0x180] ss:$8 sm:$0x30]  ;;  %v277_v57 = vrot.slane %v9664_v7, %v9610_v48  ;;  %v8703_v13 = vld [vmem:[%s15267_s5 + $0x90] ss:$8 sps:$4 sm:$0xff]  }
  0x1e   :  { %v9706_v24 = vor.u32 %v8202_v20, %v8201_v19  ;;  %v8203_v25 = vld [vmem:[%s15268_s1 + $0x1e0] ss:$8 sm:$0xf]  ;;  %v301_v11 = vrot.slane %v9688_v18, %v9610_v48 }
  0x1f   :  { %1207 = vmatpush1.bf16.msra.mxu0 %v8661_v30  ;;  %v8204_v26 = vld [vmem:[%s15268_s1 + $0x1e0] ss:$8 sm:$0x30] }
  0x20   :  { %1248 = vmatpush1.bf16.msra.mxu1 %v8662_v31  ;;  %1208 = vmatprep.subr.bf16.mxu0 %v8663_v32  ;;  %v9716_v29 = vor.u32 %v8204_v26, %v8203_v25  ;;  %v8205_v30 = vld [vmem:[%s15268_s1 + $0x240] ss:$8 sm:$0xf]  ;;  %v293_v32 = vrot.slane %v9688_v18, %v9607_v47  ;;  %v8705_v25 = vld [vmem:[%s15267_s5 + $0x84] ss:$8 sps:$4 sm:$0xff]  }
  0x21   :  { %1249 = vmatprep.subr.bf16.mxu1 %v8665_v33  ;;  %v8206_v31 = vld [vmem:[%s15268_s1 + $0x240] ss:$8 sm:$0x30]  ;;  %v461_v33 = vpack.c.bf16 %v245_v21, %v245_v21 }
  0x23   :  { %1209 = vmatpush2.bf16.msra.mxu0 %v8667_v34  ;;  %v9726_v34 = vor.u32 %v8206_v31, %v8205_v30  ;;  %v325_v30 = vrot.slane %v9706_v24, %v9610_v48  ;;  %v8707_v31 = vld [vmem:[%s15267_s5 + $0x184] ss:$8 sps:$4 sm:$0xff]  }
  0x24   :  { %1250 = vmatpush2.bf16.msra.mxu1 %v8668_v35  ;;  %1210 = vmatprep.subr.bf16.mxu0 %v8669_v36  ;;  %v8207_v35 = vld [vmem:[%s15268_s1 + $0x2a0] ss:$8 sm:$0xf] }
  0x25   :  { %1251 = vmatprep.subr.bf16.mxu1 %v8671_v38  ;;  %v8208_v36 = vld [vmem:[%s15268_s1 + $0x2a0] ss:$8 sm:$0x30]  ;;  %v317_v38 = vrot.slane %v9706_v24, %v9607_v47 }
  0x27   :  { %1211 = vmatpush2.bf16.msra.mxu0 %v8673_v39  ;;  %v467_v39 = vpack.c.bf16 %v269_v27, %v269_v27 }
  0x28   :  { %1252 = vmatpush2.bf16.msra.mxu1 %v8674_v40  ;;  %1212 = vmatprep.subr.bf16.mxu0 %v8675_v41  ;;  %v562_v40 = vunpack.c.l.b16 %v455_v28  ;;  %v8697_v41 = vld [vmem:[%s15267_s5 + $0xa0] ss:$8 sps:$4 sm:$0xff]  }
  0x29   :  { %1253 = vmatprep.subr.bf16.mxu1 %v8677_v43  ;;  %v8698_v43 = vld [vmem:[%s15267_s5 + $0x1a0] ss:$8 sps:$4 sm:$0xff]  }
  0x2b   :  { %1213 = vmatpush2.bf16.msra.mxu0 %v8679_v44  ;;  %v9742_v44 = vor.u32 %v8208_v36, %v8207_v35  ;;  %v349_v36 = vrot.slane %v9716_v29, %v9610_v48 }
  0x2c   :  { %1254 = vmatpush2.bf16.msra.mxu1 %v8680_v45  ;;  %1214 = vmatprep.subr.bf16.mxu0 %v8681_v46  ;;  %v341_v45 = vrot.slane %v9716_v29, %v9607_v47  ;;  %v473_v46 = vpack.c.bf16 %v293_v32, %v293_v32 }
  0x2d   :  { %1255 = vmatprep.subr.bf16.mxu1 %v8683_v49  ;;  %v568_v49 = vunpack.c.l.b16 %v461_v33  ;;  %v389_v60 = vrot.slane %v9742_v44, %v9607_v47 }
  0x2e   :  { %v485_v61 = vpack.c.bf16 %v341_v45, %v341_v45  ;;  %v580_v63 = vunpack.c.l.b16 %v473_v46 }
  0x2f   :  { %1215 = vmatpush2.bf16.msra.mxu0 %v8685_v52  ;;  %v8699_v52 = vld [vmem:[%s15267_s5 + $0x94] ss:$8 sps:$4 sm:$0xff]   ;;  %v630_v1 = vrot.slane %v568_v49, 7  ;;  %v457_v49 = vpack.c.bf16 %v9676_v14, %v9676_v14 }
  0x30   :  { %1256 = vmatpush2.bf16.msra.mxu1 %v8686_v53  ;;  %1216 = vmatprep.subr.bf16.mxu0 %v8687_v55  ;;  %v365_v53 = vrot.slane %v9726_v34, %v9607_v47  ;;  %v479_v55 = vpack.c.bf16 %v317_v38, %v317_v38  ;;  %v592_v19 = vunpack.c.l.b16 %v485_v61  ;;  %v634_v21 = vrot.slane %v580_v63, 5 }
  0x31   :  { %1257 = vmatprep.subr.bf16.mxu1 %v8689_v56  ;;  %v574_v56 = vunpack.c.l.b16 %v467_v39  ;;  %v631_v20 = vsel %vm610_vm0, %v630_v1, %v562_v40  ;;  %v373_v40 = vrot.slane %v9726_v34, %v9610_v48  ;;  %v481_v61 = vpack.c.bf16 %v325_v30, %v325_v30  ;;  %v8711_v1 = vld [vmem:[%s15267_s5 + $0x274] ss:$8 sps:$4 sm:$0xff]  }
  0x32   :  { %v638_v35 = vrot.slane %v592_v19, 3  ;;  %v487_v63 = vpack.c.bf16 %v349_v36, %v349_v36  ;;  %v313_v36 = vrot.slane %v9706_v24, %v9616_v50 }
  0x33   :  { %1217 = vmatpush2.bf16.msra.mxu0 %v8691_v3  ;;  %v491_v3 = vpack.c.bf16 %v365_v53, %v365_v53  ;;  %v632_v9 = vrot.slane %v574_v56, 6  ;;  %v8710_v53 = vld [vmem:[%s15267_s5 + $0x180] ss:$8 sps:$4 sm:$0xff]   ;;  %v469_v56 = vpack.c.bf16 %v277_v57, %v277_v57 }
  0x34   :  { %1258 = vmatpush2.bf16.msra.mxu1 %v8692_v5  ;;  %1218 = vmatprep.subr.bf16.mxu0 %v8693_v16  ;;  %v586_v5 = vunpack.c.l.b16 %v479_v55  ;;  %v8704_v16 = vld [vmem:[%s15267_s5 + $0x190] ss:$8 sps:$4 sm:$0xff]  }
  0x35   :  { %1259 = vmatprep.subr.bf16.mxu1 %v8695_v17  ;;  %v497_v17 = vpack.c.bf16 %v389_v60, %v389_v60  ;;  %v598_v26 = vunpack.c.l.b16 %v491_v3  ;;  %v633_v27 = vsel %vm613_vm1, %v632_v9, %v631_v20  ;;  %v9797_v60 = vsub.s32 4, %v9592_v42 }
  0x36   :  { %v636_v28 = vrot.slane %v586_v5, 4  ;;  %v635_v33 = vsel %vm616_vm2, %v634_v21, %v633_v27  ;;  %v493_v5 = vpack.c.bf16 %v373_v40, %v373_v40  ;;  %v576_v57 = vunpack.c.l.b16 %v469_v56 }
  0x37   :  { %1219 = vmatpush2.bf16.msra.mxu0 %v8697_v41  ;;  %v604_v32 = vunpack.c.l.b16 %v497_v17  ;;  %v640_v39 = vrot.slane %v598_v26, 2  ;;  %v397_v41 = vrot.slane %v9742_v44, %v9610_v48  ;;  %15517 = vst [vmem:[#allocation8_spill] sm:$0xff] %v9797_v60  ;;  %v594_v42 = vunpack.c.l.b16 %v487_v63 }
  0x38   :  { %1260 = vmatpush2.bf16.msra.mxu1 %v8698_v43  ;;  %1220 = vmatprep.subr.bf16.mxu0 %v8699_v52  ;;  %v637_v38 = vsel %vm619_vm3, %v636_v28, %v635_v33  ;;  %v8709_v43 = vld [vmem:[%s15267_s5 + $0x80] ss:$8 sps:$4 sm:$0xff]   ;;  %v463_v52 = vpack.c.bf16 %v9700_v22, %v9700_v22  ;;  %v564_v22 = vunpack.c.l.b16 %v457_v49  ;;  %v600_v17 = vunpack.c.l.b16 %v493_v5 }
  0x39   :  { %1261 = vmatprep.subr.bf16.mxu1 %v8701_v58  ;;  %v639_v45 = vsel %vm622_vm4, %v638_v35, %v637_v38  ;;  %v642_v46 = vrot.slane %v604_v32, 1  ;;  %v475_v58 = vpack.c.bf16 %v301_v11, %v301_v11  ;;  %v499_v9 = vpack.c.bf16 %v397_v41, %v397_v41 }
  0x3a   :  { %v641_v55 = vsel %vm625_vm5, %v640_v39, %v639_v45  ;;  %v265_v21 = vrot.slane %v9664_v7, %v9616_v50  ;;  %v666_v28 = vrot.slane %v594_v42, 3  ;;  %v289_v33 = vrot.slane %v9688_v18, %v9616_v50 }
  0x3b   :  { %1221 = vmatpush2.bf16.msra.mxu0 %v8703_v13  ;;  %v643_v14 = vsel %vm628_vm6, %v642_v46, %v641_v55  ;;  %v570_v13 = vunpack.c.l.b16 %v463_v52  ;;  %v582_v11 = vunpack.c.l.b16 %v475_v58  ;;  %v606_v19 = vunpack.c.l.b16 %v499_v9 }
  0x3c   :  { %1262 = vmatpush2.bf16.msra.mxu1 %v8704_v16  ;;  %1222 = vmatprep.subr.bf16.mxu0 %v8705_v25  ;;  %v701_v3 = vpack.c.b16 %v643_v14, %v643_v14  ;;  %v588_v16 = vunpack.c.l.b16 %v481_v61  ;;  %v660_v25 = vrot.slane %v576_v57, 6  ;;  %v337_v38 = vrot.slane %v9716_v29, %v9616_v50 }
  0x3d   :  { %1263 = vmatprep.subr.bf16.mxu1 %v8707_v31  ;;  %v658_v20 = vrot.slane %v570_v13, 7  ;;  %v662_v26 = vrot.slane %v582_v11, 5  ;;  %v668_v31 = vrot.slane %v600_v17, 2  ;;  %v670_v32 = vrot.slane %v606_v19, 1 }
  0x3e   :  { %1224 = vmatprep.mubr.bf16.mxu0 %v701_v3  ;;  %v664_v27 = vrot.slane %v588_v16, 4  ;;  %v361_v39 = vrot.slane %v9726_v34, %v9616_v50  ;;  %v385_v41 = vrot.slane %v9742_v44, %v9616_v50  ;;  %v466_v46 = vpack.c.bf16 %v265_v21, %v265_v21 }
  0x3f   :  { %1223 = vmatpush2.bf16.msra.mxu0 %v8709_v43  ;;  %v659_v30 = vsel %vm610_vm0, %v658_v20, %v564_v22  ;;  %v454_v43 = vpack.c.bf16 %v9680_v15, %v9680_v15  ;;  %v472_v49 = vpack.c.bf16 %v289_v33, %v289_v33  ;;  %v478_v52 = vpack.c.bf16 %v313_v36, %v313_v36 }
  0x40   :  { %1264 = vmatpush2.bf16.msra.mxu1 %v8710_v53  ;;  %1274 = vmatprep.subr.bf16.mxu0 %v8711_v1  ;;  %v661_v35 = vsel %vm613_vm1, %v660_v25, %v659_v30  ;;  %v484_v55 = vpack.c.bf16 %v337_v38, %v337_v38  ;;  %v490_v56 = vpack.c.bf16 %v361_v39, %v361_v39  ;;  %v573_v22 = vunpack.c.l.b16 %v466_v46 }
  0x41   :  { %1835 = vmatprep.subr.bf16.mxu1 %v9450_v0  ;;  %v663_v40 = vsel %vm616_vm2, %v662_v26, %v661_v35  ;;  %v460_v0 = vpack.c.bf16 %v9704_v23, %v9704_v23  ;;  %v496_v58 = vpack.c.bf16 %v385_v41, %v385_v41  ;;  %v561_v61 = vunpack.c.l.b16 %v454_v43 }
  0x42   :  { %v665_v45 = vsel %vm619_vm3, %v664_v27, %v663_v40  ;;  %v579_v1 = vunpack.c.l.b16 %v472_v49  ;;  %v585_v3 = vunpack.c.l.b16 %v478_v52  ;;  %v591_v23 = vunpack.c.l.b16 %v484_v55 }
  0x43   :  { %v667_v53 = vsel %vm622_vm4, %v666_v28, %v665_v45  ;;  %v567_v63 = vunpack.c.l.b16 %v460_v0  ;;  %v597_v9 = vunpack.c.l.b16 %v490_v56  ;;  %v603_v13 = vunpack.c.l.b16 %v496_v58 }
  0x44   :  { %v669_v14 = vsel %vm625_vm5, %v668_v31, %v667_v53  ;;  %v612_v11 = vrot.slane %v573_v22, 6  ;;  %v615_v16 = vrot.slane %v579_v1, 5  ;;  %v618_v42 = vrot.slane %v585_v3, 4  ;;  %v9858_v3 = vld [vmem:[%s15267_s5 + $0x264] ss:$8 sps:$4 sm:$0xff]  }
  0x45   :  { %v671_v15 = vsel %vm628_vm6, %v670_v32, %v669_v14  ;;  %v609_v57 = vrot.slane %v567_v63, 7  ;;  %v621_v17 = vrot.slane %v591_v23, 3  ;;  %v624_v20 = vrot.slane %v597_v9, 2 }
  0x46   :  { %v703_v5 = vpack.c.b16 %v671_v15, %v671_v15  ;;  %v627_v21 = vrot.slane %v603_v13, 1  ;;  %v225_v25 = vrot.slane %v9642_v59, %v9619_v51  ;;  %v249_v27 = vrot.slane %v9650_v62, %v9619_v51 }
  0x47   :  { %v611_v19 = vsel %vm610_vm0, %v609_v57, %v561_v61  ;;  %v273_v28 = vrot.slane %v9664_v7, %v9619_v51  ;;  %v297_v30 = vrot.slane %v9688_v18, %v9619_v51  ;;  %v321_v32 = vrot.slane %v9706_v24, %v9619_v51  ;;  %v9853_v61 = vld [vmem:[%s15267_s5 + $0x270] ss:$8 sps:$4 sm:$0xff]  }
  0x48   :  { %1265 = vmatprep.mubr.bf16.mxu1 %v703_v5  ;;  %v614_v26 = vsel %vm613_vm1, %v612_v11, %v611_v19  ;;  %v345_v33 = vrot.slane %v9716_v29, %v9619_v51  ;;  %v369_v35 = vrot.slane %v9726_v34, %v9619_v51  ;;  %v393_v38 = vrot.slane %v9742_v44, %v9619_v51 }
  0x49   :  { %v617_v31 = vsel %vm616_vm2, %v615_v16, %v614_v26  ;;  %v456_v39 = vpack.c.bf16 %v225_v25, %v225_v25  ;;  %v462_v40 = vpack.c.bf16 %v249_v27, %v249_v27  ;;  %v468_v43 = vpack.c.bf16 %v273_v28, %v273_v28  ;;  %v9876_v27 = vld [vmem:[%s15267_s5 + $0x254] ss:$8 sps:$4 sm:$0xff]  }
  0x4a   :  { %v620_v36 = vsel %vm619_vm3, %v618_v42, %v617_v31  ;;  %v474_v0 = vpack.c.bf16 %v297_v30, %v297_v30  ;;  %v480_v45 = vpack.c.bf16 %v321_v32, %v321_v32  ;;  %v486_v49 = vpack.c.bf16 %v345_v33, %v345_v33 }
  0x4b   :  { %v623_v41 = vsel %vm622_vm4, %v621_v17, %v620_v36  ;;  %v492_v52 = vpack.c.bf16 %v369_v35, %v369_v35  ;;  %v498_v53 = vpack.c.bf16 %v393_v38, %v393_v38  ;;  %v563_v56 = vunpack.c.l.b16 %v456_v39  ;;  %v9895_v39 = vld [vmem:[%s15267_s5 + $0x250] ss:$8 sps:$4 sm:$0xff]  }
  0x4c   :  { %v626_v46 = vsel %vm625_vm5, %v624_v20, %v623_v41  ;;  %v569_v58 = vunpack.c.l.b16 %v462_v40  ;;  %v575_v14 = vunpack.c.l.b16 %v468_v43  ;;  %v581_v22 = vunpack.c.l.b16 %v474_v0  ;;  %v9900_v40 = vld [vmem:[%s15267_s5 + $0x244] ss:$8 sps:$4 sm:$0xff]  }
  0x4d   :  { %v629_v55 = vsel %vm628_vm6, %v627_v21, %v626_v46  ;;  %v587_v15 = vunpack.c.l.b16 %v480_v45  ;;  %v593_v1 = vunpack.c.l.b16 %v486_v49  ;;  %v599_v23 = vunpack.c.l.b16 %v492_v52  ;;  %v9867_v21 = vld [vmem:[%s15267_s5 + $0x260] ss:$8 sps:$4 sm:$0xff]  }
  0x4e   :  { %v700_v63 = vpack.c.b16 %v629_v55, %v629_v55  ;;  %v605_v5 = vunpack.c.l.b16 %v498_v53  ;;  %v644_v9 = vrot.slane %v569_v58, 7  ;;  %v646_v13 = vrot.slane %v575_v14, 6  ;;  %v8305_v53 = vld [vmem:[%s15268_s1 + $0x1] ss:$8 sm:$0xf] }
  0x4f   :  { %v648_v57 = vrot.slane %v581_v22, 5  ;;  %v650_v11 = vrot.slane %v587_v15, 4  ;;  %v652_v16 = vrot.slane %v593_v1, 3  ;;  %v237_v42 = vrot.slane %v9642_v59, %v9628_v54  ;;  %v8306_v55 = vld [vmem:[%s15268_s1 + $0x1] ss:$8 sm:$0x30] }
  0x50   :  { %1225 = vmatmul.mubr.bf16.vlgmr.msra.gmra.mxu0 %v700_v63  ;;  %v645_v17 = vsel %vm610_vm0, %v644_v9, %v563_v56  ;;  %v654_v19 = vrot.slane %v599_v23, 2  ;;  %v656_v20 = vrot.slane %v605_v5, 1  ;;  %v261_v25 = vrot.slane %v9650_v62, %v9628_v54  ;;  %v8307_v22 = vld [vmem:[%s15268_s1 + $0x61] ss:$8 sm:$0xf] }
  0x51   :  { %1275 = vmatpush1.bf16.msra.mxu0 %v9853_v61  ;;  %v647_v26 = vsel %vm613_vm1, %v646_v13, %v645_v17  ;;  %v285_v28 = vrot.slane %v9664_v7, %v9628_v54  ;;  %v309_v30 = vrot.slane %v9688_v18, %v9628_v54  ;;  %v333_v31 = vrot.slane %v9706_v24, %v9628_v54  ;;  %v8308_v15 = vld [vmem:[%s15268_s1 + $0x61] ss:$8 sm:$0x30] }
  0x52   :  { %1276 = vmatprep.subr.bf16.mxu0 %v9858_v3  ;;  %v649_v32 = vsel %vm616_vm2, %v648_v57, %v647_v26  ;;  %v357_v33 = vrot.slane %v9716_v29, %v9628_v54  ;;  %v381_v35 = vrot.slane %v9726_v34, %v9628_v54  ;;  %v405_v36 = vrot.slane %v9742_v44, %v9628_v54  ;;  %v8309_v1 = vld [vmem:[%s15268_s1 + $0xc1] ss:$8 sm:$0xf] }
  0x53   :  { %v651_v38 = vsel %vm619_vm3, %v650_v11, %v649_v32  ;;  %v459_v41 = vpack.c.bf16 %v237_v42, %v237_v42  ;;  %v465_v43 = vpack.c.bf16 %v261_v25, %v261_v25  ;;  %v471_v0 = vpack.c.bf16 %v285_v28, %v285_v28  ;;  %v8310_v23 = vld [vmem:[%s15268_s1 + $0xc1] ss:$8 sm:$0x30]  ;;  %v9951_v28 = vld [vmem:[%s15267_s5 + $0x234] ss:$8 sps:$4 sm:$0xff]  }
  0x54   :  { %v653_v45 = vsel %vm622_vm4, %v652_v16, %v651_v38  ;;  %v477_v46 = vpack.c.bf16 %v309_v30, %v309_v30  ;;  %v483_v49 = vpack.c.bf16 %v333_v31, %v333_v31  ;;  %v489_v52 = vpack.c.bf16 %v357_v33, %v357_v33  ;;  %v9928_v9 = vld [vmem:[%s15267_s5 + $0x240] ss:$8 sps:$4 sm:$0xff]  }
  0x55   :  { %1277 = vmatpush1.bf16.msra.mxu0 %v9867_v21  ;;  %v655_v56 = vsel %vm625_vm5, %v654_v19, %v653_v45  ;;  %v495_v58 = vpack.c.bf16 %v381_v35, %v381_v35  ;;  %v501_v14 = vpack.c.bf16 %v405_v36, %v405_v36  ;;  %v566_v63 = vunpack.c.l.b16 %v459_v41  ;;  %v8311_v16 = vld [vmem:[%s15268_s1 + $0x121] ss:$8 sm:$0xf] }
  0x56   :  { %1278 = vmatprep.subr.bf16.mxu0 %v9876_v27  ;;  %v657_v5 = vsel %vm628_vm6, %v656_v20, %v655_v56  ;;  %v572_v13 = vunpack.c.l.b16 %v465_v43  ;;  %v578_v57 = vunpack.c.l.b16 %v471_v0  ;;  %v584_v11 = vunpack.c.l.b16 %v477_v46  ;;  %v8312_v42 = vld [vmem:[%s15268_s1 + $0x121] ss:$8 sm:$0x30] }
  0x57   :  { %v8313_v17 = vld [vmem:[%s15268_s1 + $0x181] ss:$8 sm:$0xf]  ;;  %v702_v26 = vpack.c.b16 %v657_v5, %v657_v5  ;;  %v590_v30 = vunpack.c.l.b16 %v483_v49  ;;  %v596_v31 = vunpack.c.l.b16 %v489_v52  ;;  %v602_v32 = vunpack.c.l.b16 %v495_v58 }
  0x58   :  { %v8314_v19 = vld [vmem:[%s15268_s1 + $0x181] ss:$8 sm:$0x30]  ;;  %v608_v36 = vunpack.c.l.b16 %v501_v14  ;;  %v686_v38 = vrot.slane %v572_v13, 7  ;;  %v688_v41 = vrot.slane %v578_v57, 6  ;;  %v690_v43 = vrot.slane %v584_v11, 5 }
  0x59   :  { %v8315_v20 = vld [vmem:[%s15268_s1 + $0x1e1] ss:$8 sm:$0xf]  ;;  %1279 = vmatpush1.bf16.msra.mxu0 %v9895_v39  ;;  %1266 = vmatmul.mubr.bf16.vlgmr.msra.gmra.mxu1 %v702_v26  ;;  %v692_v45 = vrot.slane %v590_v30, 4  ;;  %v694_v46 = vrot.slane %v596_v31, 3  ;;  %v696_v49 = vrot.slane %v602_v32, 2  ;;  %v9964_v52 = vor.u32 %v8306_v55, %v8305_v53 }
  0x5a   :  { %v8316_v25 = vld [vmem:[%s15268_s1 + $0x1e1] ss:$8 sm:$0x30]  ;;  %1280 = vmatprep.subr.bf16.mxu0 %v9900_v40  ;;  %1836 = vmatpush1.bf16.msra.mxu1 %v9459_v2  ;;  %v687_v58 = vsel %vm610_vm0, %v686_v38, %v566_v63  ;;  %v698_v14 = vrot.slane %v608_v36, 1  ;;  %v9971_v5 = vor.u32 %v8308_v15, %v8307_v22  ;;  %v9973_v13 = vor.u32 %v8310_v23, %v8309_v1  ;;  %v9987_v2 = vld [vmem:[%s15267_s5 + $0x230] ss:$8 sps:$4 sm:$0xff]  }
  0x5b   :  { %v8317_v33 = vld [vmem:[%s15268_s1 + $0x241] ss:$8 sm:$0xf]  ;;  %1837 = vmatprep.subr.bf16.mxu1 %v9467_v4  ;;  %v689_v57 = vsel %vm613_vm1, %v688_v41, %v687_v58  ;;  %v9977_v11 = vor.u32 %v8312_v42, %v8311_v16  ;;  %v9979_v53 = vor.u32 %v8314_v19, %v8313_v17  ;;  %v9981_v55 = vor.u32 %v8316_v25, %v8315_v20  ;;  %v10000_v1 = vld [vmem:[%s15267_s5 + $0x224] ss:$8 sps:$4 sm:$0xff]  }
  0x5c   :  { %v8318_v35 = vld [vmem:[%s15268_s1 + $0x241] ss:$8 sm:$0x30]  ;;  %v691_v63 = vsel %vm616_vm2, %v690_v43, %v689_v57  ;;  %v1362_v15 = vrot.slane %v9964_v52, %v9607_v47  ;;  %v1386_v16 = vrot.slane %v9971_v5, %v9607_v47  ;;  %v1410_v42 = vrot.slane %v9973_v13, %v9607_v47 }
  0x5d   :  { %v8319_v0 = vld [vmem:[%s15268_s1 + $0x2a1] ss:$8 sm:$0xf]  ;;  %1281 = vmatpush1.bf16.msra.mxu0 %v9928_v9  ;;  %v9990_v22 = vor.u32 %v8318_v35, %v8317_v33  ;;  %v693_v23 = vsel %vm619_vm3, %v692_v45, %v691_v63  ;;  %v1434_v17 = vrot.slane %v9977_v11, %v9607_v47  ;;  %v1458_v20 = vrot.slane %v9979_v53, %v9607_v47 }
  0x5e   :  { %v8320_v56 = vld [vmem:[%s15268_s1 + $0x2a1] ss:$8 sm:$0x30]  ;;  %1282 = vmatprep.subr.bf16.mxu0 %v9951_v28  ;;  %1838 = vmatpush1.bf16.msra.mxu1 %v9476_v6  ;;  %v695_v19 = vsel %vm622_vm4, %v694_v46, %v693_v23  ;;  %v1482_v25 = vrot.slane %v9981_v55, %v9607_v47  ;;  %v1596_v32 = vpack.c.bf16 %v1362_v15, %v1362_v15 }
  0x5f   :  { %v9992_v4 = vor.u32 %v8320_v56, %v8319_v0  ;;  %v1506_v26 = vrot.slane %v9990_v22, %v9607_v47  ;;  %1839 = vmatprep.subr.bf16.mxu1 %v9485_v8  ;;  %v697_v30 = vsel %vm625_vm5, %v696_v49, %v695_v19  ;;  %v1602_v6 = vpack.c.bf16 %v1386_v16, %v1386_v16  ;;  %v10025_v33 = vld [vmem:[%s15267_s5 + $0x220] ss:$8 sps:$4 sm:$0xff]   ;;  %v10032_v8 = vld [vmem:[%s15267_s5 + $0x214] ss:$8 sps:$4 sm:$0xff]   ;;  %v10040_v16 = vld [vmem:[%s15267_s5 + $0x210] ss:$8 sps:$4 sm:$0xff]  }
  0x60   :  { %v699_v35 = vsel %vm628_vm6, %v698_v14, %v697_v30  ;;  %v1608_v36 = vpack.c.bf16 %v1410_v42, %v1410_v42  ;;  %v1614_v38 = vpack.c.bf16 %v1434_v17, %v1434_v17  ;;  %v1620_v41 = vpack.c.bf16 %v1458_v20, %v1458_v20 }
  0x61   :  { %v1530_v31 = vrot.slane %v9992_v4, %v9607_v47  ;;  %1283 = vmatpush1.bf16.msra.mxu0 %v9987_v2  ;;  %v705_v43 = vpack.c.b16 %v699_v35, %v699_v35  ;;  %v1626_v0 = vpack.c.bf16 %v1482_v25, %v1482_v25  ;;  %v1632_v45 = vpack.c.bf16 %v1506_v26, %v1506_v26 }
  0x62   :  { %1284 = vmatprep.subr.bf16.mxu0 %v10000_v1  ;;  %1840 = vmatpush1.bf16.msra.mxu1 %v9493_v10  ;;  %v1692_v49 = vunpack.c.l.b16 %v1596_v32  ;;  %v1698_v56 = vunpack.c.l.b16 %v1602_v6  ;;  %v1704_v58 = vunpack.c.l.b16 %v1608_v36  ;;  %v1710_v14 = vunpack.c.l.b16 %v1614_v38  ;;  %v8962_v36 = vld [vmem:[%s15267_s5 + $0x34] ss:$8 sps:$4 sm:$0xff]  }
  0x63   :  { %v1638_v46 = vpack.c.bf16 %v1530_v31, %v1530_v31  ;;  %1841 = vmatprep.subr.bf16.mxu1 %v9502_v12  ;;  %1306 = vmatprep.mubr.bf16.mxu0 %v705_v43  ;;  %v1716_v57 = vunpack.c.l.b16 %v1620_v41  ;;  %v1722_v63 = vunpack.c.l.b16 %v1626_v0  ;;  %v1728_v15 = vunpack.c.l.b16 %v1632_v45  ;;  %v10048_v12 = vld [vmem:[%s15267_s5 + $0x204] ss:$8 sps:$4 sm:$0xff]   ;;  %v8961_v31 = vld [vmem:[%s15267_s5 + $0x40] ss:$8 sps:$4 sm:$0xff]  }
  0x64   :  { %v1753_v42 = vrot.slane %v1698_v56, 7  ;;  %v1755_v10 = vrot.slane %v1704_v58, 6  ;;  %v1757_v17 = vrot.slane %v1710_v14, 5  ;;  %v233_v19 = vrot.slane %v9642_v59, %v9797_v60  ;;  %v8963_v58 = vld [vmem:[%s15267_s5 + $0x30] ss:$8 sps:$4 sm:$0xff]  }
  0x65   :  { %v1734_v23 = vunpack.c.l.b16 %v1638_v46  ;;  %1285 = vmatpush1.bf16.msra.mxu0 %v10025_v33  ;;  %v1759_v20 = vrot.slane %v1716_v57, 4  ;;  %v1761_v25 = vrot.slane %v1722_v63, 3  ;;  %v1763_v26 = vrot.slane %v1728_v15, 2  ;;  %v8964_v15 = vld [vmem:[%s15267_s5 + $0x24] ss:$8 sps:$4 sm:$0xff]  }
  0x66   :  { %1286 = vmatprep.subr.bf16.mxu0 %v10032_v8  ;;  %1842 = vmatpush1.bf16.msra.mxu1 %v8961_v31  ;;  %v1754_v32 = vsel %vm610_vm0, %v1753_v42, %v1692_v49  ;;  %v257_v59 = vrot.slane %v9650_v62, %v9797_v60  ;;  %v281_v6 = vrot.slane %v9664_v7, %v9797_v60  ;;  %v10074_v7 = vld [vmem:[%s15267_s5 + $0x200] ss:$8 sps:$4 sm:$0xff]  }
  0x67   :  { %v1765_v30 = vrot.slane %v1734_v23, 1  ;;  %v305_v35 = vrot.slane %v9688_v18, %v9797_v60  ;;  %1843 = vmatprep.subr.bf16.mxu1 %v8962_v36  ;;  %v1756_v38 = vsel %vm613_vm1, %v1755_v10, %v1754_v32  ;;  %v329_v41 = vrot.slane %v9706_v24, %v9797_v60 }
  0x68   :  { %v353_v43 = vrot.slane %v9716_v29, %v9797_v60  ;;  %v377_v62 = vrot.slane %v9726_v34, %v9797_v60  ;;  %v1758_v18 = vsel %vm616_vm2, %v1757_v17, %v1756_v38  ;;  %v401_v0 = vrot.slane %v9742_v44, %v9797_v60  ;;  %v10083_v29 = vld [vmem:[%s15267_s5 + $0x2f4] ss:$8 sps:$4 sm:$0xff]   ;;  %v8965_v38 = vld [vmem:[%s15267_s5 + $0x20] ss:$8 sps:$4 sm:$0xff]  }
  0x69   :  { %1287 = vmatpush1.bf16.msra.mxu0 %v10040_v16  ;;  %v458_v45 = vpack.c.bf16 %v233_v19, %v233_v19  ;;  %v464_v24 = vpack.c.bf16 %v257_v59, %v257_v59  ;;  %v1760_v34 = vsel %vm619_vm3, %v1759_v20, %v1758_v18  ;;  %v470_v46 = vpack.c.bf16 %v281_v6, %v281_v6  ;;  %v10098_v19 = vld [vmem:[%s15267_s5 + $0x2f0] ss:$8 sps:$4 sm:$0xff]   ;;  %v8966_v18 = vld [vmem:[%s15267_s5 + $0x14] ss:$8 sps:$4 sm:$0xff]  }
  0x6a   :  { %1288 = vmatprep.subr.bf16.mxu0 %v10048_v12  ;;  %v476_v49 = vpack.c.bf16 %v305_v35, %v305_v35  ;;  %v482_v56 = vpack.c.bf16 %v329_v41, %v329_v41  ;;  %1844 = vmatpush1.bf16.msra.mxu1 %v8963_v58  ;;  %v1762_v44 = vsel %vm622_vm4, %v1761_v25, %v1760_v34 }
  0x6b   :  { %v488_v14 = vpack.c.bf16 %v353_v43, %v353_v43  ;;  %v494_v57 = vpack.c.bf16 %v377_v62, %v377_v62  ;;  %v500_v63 = vpack.c.bf16 %v401_v0, %v401_v0  ;;  %1845 = vmatprep.subr.bf16.mxu1 %v8964_v15  ;;  %v1764_v23 = vsel %vm625_vm5, %v1763_v26, %v1762_v44  ;;  %v10105_v26 = vld [vmem:[%s15267_s5 + $0x2e4] ss:$8 sps:$4 sm:$0xff]  }
  0x6c   :  { %v565_v42 = vunpack.c.l.b16 %v458_v45  ;;  %v571_v10 = vunpack.c.l.b16 %v464_v24  ;;  %v577_v17 = vunpack.c.l.b16 %v470_v46  ;;  %v1766_v20 = vsel %vm628_vm6, %v1765_v30, %v1764_v23  ;;  %v10120_v46 = vld [vmem:[%s15267_s5 + $0x2e0] ss:$8 sps:$4 sm:$0xff]  }
  0x6d   :  { %1289 = vmatpush1.bf16.msra.mxu0 %v10074_v7  ;;  %v583_v25 = vunpack.c.l.b16 %v476_v49  ;;  %v589_v31 = vunpack.c.l.b16 %v482_v56  ;;  %v595_v32 = vunpack.c.l.b16 %v488_v14  ;;  %v1824_v59 = vpack.c.b16 %v1766_v20, %v1766_v20  ;;  %v10133_v14 = vld [vmem:[%s15267_s5 + $0x2d4] ss:$8 sps:$4 sm:$0xff]  }
  0x6e   :  { %1290 = vmatprep.subr.bf16.mxu0 %v10083_v29  ;;  %v601_v6 = vunpack.c.l.b16 %v494_v57  ;;  %v607_v35 = vunpack.c.l.b16 %v500_v63  ;;  %v672_v36 = vrot.slane %v571_v10, 7  ;;  %1846 = vmatpush1.bf16.msra.mxu1 %v8965_v38  ;;  %v674_v30 = vrot.slane %v577_v17, 6 }
  0x6f   :  { %v676_v41 = vrot.slane %v583_v25, 5  ;;  %v678_v43 = vrot.slane %v589_v31, 4  ;;  %v680_v62 = vrot.slane %v595_v32, 3  ;;  %1847 = vmatprep.subr.bf16.mxu1 %v8966_v18  ;;  %1867 = vmatprep.mubr.bf16.mxu1 %v1824_v59  ;;  %v1358_v34 = vrot.slane %v9964_v52, %v9616_v50  ;;  %v8968_v31 = vld [vmem:[%s15267_s5 + $0x4] ss:$8 sps:$4 sm:$0xff]  }
  0x70   :  { %v673_v0 = vsel %vm610_vm0, %v672_v36, %v565_v42  ;;  %v682_v45 = vrot.slane %v601_v6, 2  ;;  %v684_v24 = vrot.slane %v607_v35, 1  ;;  %v1382_v56 = vrot.slane %v9971_v5, %v9616_v50  ;;  %v8967_v42 = vld [vmem:[%s15267_s5 + $0x10] ss:$8 sps:$4 sm:$0xff]  }
  0x71   :  { %1291 = vmatpush2.bf16.msra.mxu0 %v10098_v19  ;;  %v675_v49 = vsel %vm613_vm1, %v674_v30, %v673_v0  ;;  %v1406_v58 = vrot.slane %v9973_v13, %v9616_v50  ;;  %v1430_v44 = vrot.slane %v9977_v11, %v9616_v50  ;;  %v1454_v63 = vrot.slane %v9979_v53, %v9616_v50  ;;  %v10156_v36 = vld [vmem:[%s15267_s5 + $0x2d0] ss:$8 sps:$4 sm:$0xff]  }
  0x72   :  { %1292 = vmatprep.subr.bf16.mxu0 %v10105_v26  ;;  %v677_v57 = vsel %vm616_vm2, %v676_v41, %v675_v49  ;;  %v1478_v15 = vrot.slane %v9981_v55, %v9616_v50  ;;  %v1502_v23 = vrot.slane %v9990_v22, %v9616_v50  ;;  %1848 = vmatpush1.bf16.msra.mxu1 %v8967_v42 }
  0x73   :  { %v679_v10 = vsel %vm619_vm3, %v678_v43, %v677_v57  ;;  %v1526_v17 = vrot.slane %v9992_v4, %v9616_v50  ;;  %v1595_v20 = vpack.c.bf16 %v1358_v34, %v1358_v34  ;;  %v1601_v25 = vpack.c.bf16 %v1382_v56, %v1382_v56  ;;  %1849 = vmatprep.subr.bf16.mxu1 %v8968_v31  ;;  %v8970_v57 = vld [vmem:[%s15267_s5 + $0xf4] ss:$8 sps:$4 sm:$0xff]  }
  0x74   :  { %v681_v32 = vsel %vm622_vm4, %v680_v62, %v679_v10  ;;  %v1607_v59 = vpack.c.bf16 %v1406_v58, %v1406_v58  ;;  %v1613_v6 = vpack.c.bf16 %v1430_v44, %v1430_v44  ;;  %v1619_v35 = vpack.c.bf16 %v1454_v63, %v1454_v63  ;;  %v10163_v62 = vld [vmem:[%s15267_s5 + $0x2c4] ss:$8 sps:$4 sm:$0xff]  }
  0x75   :  { %1293 = vmatpush2.bf16.msra.mxu0 %v10120_v46  ;;  %v683_v38 = vsel %vm625_vm5, %v682_v45, %v681_v32  ;;  %v1625_v30 = vpack.c.bf16 %v1478_v15, %v1478_v15  ;;  %v1631_v41 = vpack.c.bf16 %v1502_v23, %v1502_v23  ;;  %v1637_v43 = vpack.c.bf16 %v1526_v17, %v1526_v17  ;;  %v8969_v45 = vld [vmem:[%s15267_s5] ss:$8 sps:$4 sm:$0xff]  }
  0x76   :  { %1294 = vmatprep.subr.bf16.mxu0 %v10133_v14  ;;  %v10166_v18 = vsel %vm628_vm6, %v684_v24, %v683_v38  ;;  %v1691_v0 = vunpack.c.l.b16 %v1595_v20  ;;  %v1697_v34 = vunpack.c.l.b16 %v1601_v25  ;;  %v1703_v49 = vunpack.c.l.b16 %v1607_v59  ;;  %1850 = vmatpush1.bf16.msra.mxu1 %v8969_v45  ;;  %v10178_v23 = vld [vmem:[%s15267_s5 + $0x2c0] ss:$8 sps:$4 sm:$0xff]   ;;  %v10188_v25 = vld [vmem:[%s15267_s5 + $0x2b4] ss:$8 sps:$4 sm:$0xff]  }
  0x77   :  { %v1709_v56 = vunpack.c.l.b16 %v1613_v6  ;;  %v1715_v58 = vunpack.c.l.b16 %v1619_v35  ;;  %v1721_v44 = vunpack.c.l.b16 %v1625_v30  ;;  %1851 = vmatprep.subr.bf16.mxu1 %v8970_v57  ;;  %v1727_v63 = vunpack.c.l.b16 %v1631_v41  ;;  %15518 = vst [vmem:[#allocation9_spill] sm:$0xff] %v10188_v25  ;;  %v8971_v35 = vld [vmem:[%s15267_s5 + $0xf0] ss:$8 sps:$4 sm:$0xff]  }
  0x78   :  { %v1739_v15 = vrot.slane %v1697_v34, 7  ;;  %v1741_v24 = vrot.slane %v1703_v49, 6  ;;  %v10180_v42 = vunpack.c.l.b16 %v1637_v43  ;;  %v1370_v20 = vrot.slane %v9964_v52, %v9610_v48 }
  0x79   :  { %1295 = vmatpush2.bf16.msra.mxu0 %v10156_v36  ;;  %v1743_v10 = vrot.slane %v1709_v56, 5  ;;  %v1745_v17 = vrot.slane %v1715_v58, 4  ;;  %v1747_v32 = vrot.slane %v1721_v44, 3  ;;  %v1749_v59 = vrot.slane %v1727_v63, 2  ;;  %v10217_v58 = vld [vmem:[%s15267_s5 + $0x2b0] ss:$8 sps:$4 sm:$0xff]  }
  0x7a   :  { %1296 = vmatprep.subr.bf16.mxu0 %v10163_v62  ;;  %v1740_v31 = vsel %vm610_vm0, %v1739_v15, %v1691_v0  ;;  %v1394_v6 = vrot.slane %v9971_v5, %v9610_v48  ;;  %1852 = vmatpush2.bf16.msra.mxu1 %v8971_v35  ;;  %v1418_v30 = vrot.slane %v9973_v13, %v9610_v48  ;;  %v8972_v0 = vld [vmem:[%s15267_s5 + $0xe4] ss:$8 sps:$4 sm:$0xff]  }
  0x7b   :  { %v1742_v38 = vsel %vm613_vm1, %v1741_v24, %v1740_v31  ;;  %v1442_v41 = vrot.slane %v9977_v11, %v9610_v48  ;;  %v1466_v43 = vrot.slane %v9979_v53, %v9610_v48  ;;  %1853 = vmatprep.subr.bf16.mxu1 %v8972_v0  ;;  %v1490_v49 = vrot.slane %v9981_v55, %v9610_v48  ;;  %v10224_v24 = vld [vmem:[%s15267_s5 + $0x2a4] ss:$8 sps:$4 sm:$0xff]   ;;  %v8973_v0 = vld [vmem:[%s15267_s5 + $0xe0] ss:$8 sps:$4 sm:$0xff]  }
  0x7c   :  { %v1744_v34 = vsel %vm616_vm2, %v1743_v10, %v1742_v38  ;;  %v1514_v45 = vrot.slane %v9990_v22, %v9610_v48  ;;  %v1538_v56 = vrot.slane %v9992_v4, %v9610_v48  ;;  %15519 = vst [vmem:[#allocation10_spill] sm:$0xff] %v10217_v58  ;;  %v1598_v57 = vpack.c.bf16 %v1370_v20, %v1370_v20  ;;  %v8977_v20 = vld [vmem:[%s15267_s5 + $0xc0] ss:$8 sps:$4 sm:$0xff]  }
  0x7d   :  { %1297 = vmatpush2.bf16.msra.mxu0 %v10178_v23  ;;  %v1746_v44 = vsel %vm619_vm3, %v1745_v17, %v1744_v34  ;;  %v1604_v63 = vpack.c.bf16 %v1394_v6, %v1394_v6  ;;  %v1610_v15 = vpack.c.bf16 %v1418_v30, %v1418_v30  ;;  %15520 = vst [vmem:[#allocation11_spill] sm:$0xff] %v10224_v24  ;;  %v8974_v34 = vld [vmem:[%s15267_s5 + $0xd4] ss:$8 sps:$4 sm:$0xff]   ;;  %v8975_v17 = vld [vmem:[%s15267_s5 + $0xd0] ss:$8 sps:$4 sm:$0xff]  }
  0x7e   :  { %1298 = vmatprep.subr.bf16.mxu0 %v10188_v25  ;;  %v1748_v10 = vsel %vm622_vm4, %v1747_v32, %v1746_v44  ;;  %v1616_v31 = vpack.c.bf16 %v1442_v41, %v1442_v41  ;;  %v1622_v35 = vpack.c.bf16 %v1466_v43, %v1466_v43  ;;  %v1628_v38 = vpack.c.bf16 %v1490_v49, %v1490_v49  ;;  %v10240_v44 = vld [vmem:[%s15267_s5 + $0x2a0] ss:$8 sps:$4 sm:$0xff]  }
  0x7f   :  { %1854 = vmatpush2.bf16.msra.mxu1 %v8973_v0  ;;  %v1634_v6 = vpack.c.bf16 %v1514_v45, %v1514_v45  ;;  %v1640_v30 = vpack.c.bf16 %v1538_v56, %v1538_v56  ;;  %v1694_v32 = vunpack.c.l.b16 %v1598_v57  ;;  %v1700_v41 = vunpack.c.l.b16 %v1604_v63  ;;  %15521 = vst [vmem:[#allocation12_spill] sm:$0xff] %v10240_v44  ;;  %v10247_v57 = vld [vmem:[%s15267_s5 + $0x294] ss:$8 sps:$4 sm:$0xff]  }
  0x80   :  { %1855 = vmatprep.subr.bf16.mxu1 %v8974_v34  ;;  %v1706_v43 = vunpack.c.l.b16 %v1610_v15  ;;  %v1712_v49 = vunpack.c.l.b16 %v1616_v31  ;;  %v1750_v0 = vsel %vm625_vm5, %v1749_v59, %v1748_v10  ;;  %v1718_v45 = vunpack.c.l.b16 %v1622_v35  ;;  %15522 = vst [vmem:[#allocation13_spill] sm:$0xff] %v10247_v57 }
  0x81   :  { %1299 = vmatpush2.bf16.msra.mxu0 %v10217_v58  ;;  %v1724_v56 = vunpack.c.l.b16 %v1628_v38  ;;  %v1730_v37 = vunpack.c.l.b16 %v1634_v6  ;;  %v1736_v63 = vunpack.c.l.b16 %v1640_v30  ;;  %v1781_v15 = vrot.slane %v1700_v41, 7  ;;  %v8976_v6 = vld [vmem:[%s15267_s5 + $0xc4] ss:$8 sps:$4 sm:$0xff]  }
  0x82   :  { %1300 = vmatprep.subr.bf16.mxu0 %v10224_v24  ;;  %v1783_v31 = vrot.slane %v1706_v43, 6  ;;  %v1785_v34 = vrot.slane %v1712_v49, 5  ;;  %v1787_v59 = vrot.slane %v1718_v45, 4  ;;  %v1378_v38 = vrot.slane %v9964_v52, %v9628_v54 }
  0x83   :  { %1856 = vmatpush2.bf16.msra.mxu1 %v8975_v17  ;;  %v1789_v10 = vrot.slane %v1724_v56, 3  ;;  %v1791_v35 = vrot.slane %v1730_v37, 2  ;;  %v1782_v30 = vsel %vm610_vm0, %v1781_v15, %v1694_v32  ;;  %v1793_v41 = vrot.slane %v1736_v63, 1  ;;  %v10266_v37 = vld [vmem:[%s15267_s5 + $0x290] ss:$8 sps:$4 sm:$0xff]  }
  0x84   :  { %1857 = vmatprep.subr.bf16.mxu1 %v8976_v6  ;;  %v1402_v43 = vrot.slane %v9971_v5, %v9628_v54  ;;  %v1426_v17 = vrot.slane %v9973_v13, %v9628_v54  ;;  %v1784_v49 = vsel %vm613_vm1, %v1783_v31, %v1782_v30  ;;  %v1450_v45 = vrot.slane %v9977_v11, %v9628_v54  ;;  %v10279_v63 = vld [vmem:[%s15267_s5 + $0x284] ss:$8 sps:$4 sm:$0xff]  }
  0x85   :  { %1301 = vmatpush2.bf16.msra.mxu0 %v10240_v44  ;;  %v1474_v32 = vrot.slane %v9979_v53, %v9628_v54  ;;  %v1498_v56 = vrot.slane %v9981_v55, %v9628_v54  ;;  %v1786_v15 = vsel %vm616_vm2, %v1785_v34, %v1784_v49  ;;  %v1522_v31 = vrot.slane %v9990_v22, %v9628_v54  ;;  %v8978_v34 = vld [vmem:[%s15267_s5 + $0xb4] ss:$8 sps:$4 sm:$0xff]  }
  0x86   :  { %1302 = vmatprep.subr.bf16.mxu0 %v10247_v57  ;;  %v1546_v6 = vrot.slane %v9992_v4, %v9628_v54  ;;  %v1600_v30 = vpack.c.bf16 %v1378_v38, %v1378_v38  ;;  %v1788_v57 = vsel %vm619_vm3, %v1787_v59, %v1786_v15  ;;  %v1606_v44 = vpack.c.bf16 %v1402_v43, %v1402_v43 }
  0x87   :  { %1858 = vmatpush2.bf16.msra.mxu1 %v8977_v20  ;;  %v1612_v24 = vpack.c.bf16 %v1426_v17, %v1426_v17  ;;  %v1618_v58 = vpack.c.bf16 %v1450_v45, %v1450_v45  ;;  %v1790_v49 = vsel %vm622_vm4, %v1789_v10, %v1788_v57  ;;  %v1624_v25 = vpack.c.bf16 %v1474_v32, %v1474_v32  ;;  %v10298_v20 = vld [vmem:[%s15267_s5 + $0x280] ss:$8 sps:$4 sm:$0xff]  }
  0x88   :  { %1859 = vmatprep.subr.bf16.mxu1 %v8978_v34  ;;  %v1630_v54 = vpack.c.bf16 %v1498_v56, %v1498_v56  ;;  %v1636_v38 = vpack.c.bf16 %v1522_v31, %v1522_v31  ;;  %v1792_v59 = vsel %vm625_vm5, %v1791_v35, %v1790_v49  ;;  %v1642_v43 = vpack.c.bf16 %v1546_v6, %v1546_v6  ;;  %v8979_v56 = vld [vmem:[%s15267_s5 + $0xb0] ss:$8 sps:$4 sm:$0xff]  }
  0x89   :  { %1303 = vmatpush2.bf16.msra.mxu0 %v10266_v37  ;;  %v1696_v17 = vunpack.c.l.b16 %v1600_v30  ;;  %v1702_v45 = vunpack.c.l.b16 %v1606_v44  ;;  %v1794_v15 = vsel %vm628_vm6, %v1793_v41, %v1792_v59  ;;  %v1708_v57 = vunpack.c.l.b16 %v1612_v24  ;;  %v8980_v41 = vld [vmem:[%s15267_s5 + $0xa4] ss:$8 sps:$4 sm:$0xff]  }
  0x8a   :  { %1304 = vmatprep.subr.bf16.mxu0 %v10279_v63  ;;  %v1714_v10 = vunpack.c.l.b16 %v1618_v58  ;;  %v1720_v32 = vunpack.c.l.b16 %v1624_v25  ;;  %v15523_v31 = vrot.slane %v10180_v42, 1  ;;  %v1826_v35 = vpack.c.b16 %v1794_v15, %v1794_v15 }
  0x8b   :  { %1860 = vmatpush2.bf16.msra.mxu1 %v8979_v56  ;;  %v1726_v6 = vunpack.c.l.b16 %v1630_v54  ;;  %v1732_v44 = vunpack.c.l.b16 %v1636_v38  ;;  %v1738_v58 = vunpack.c.l.b16 %v1642_v43  ;;  %v1809_v25 = vrot.slane %v1702_v45, 7  ;;  %v10320_v54 = vld [vmem:[%s15267_s5 + $0x174] ss:$8 sps:$4 sm:$0xff]  }
  0x8c   :  { %v10309_v34 = vsel %vm628_vm6, %v15523_v31, %v1750_v0  ;;  %1861 = vmatprep.subr.bf16.mxu1 %v8980_v41  ;;  %v1811_v24 = vrot.slane %v1708_v57, 6  ;;  %v1813_v30 = vrot.slane %v1714_v10, 5  ;;  %v1815_v49 = vrot.slane %v1720_v32, 4  ;;  %v10333_v57 = vld [vmem:[%s15267_s5 + $0xa0] ss:$8 sps:$4 sm:$0xff]  }
  0x8d   :  { %1305 = vmatpush2.bf16.msra.mxu0 %v10298_v20  ;;  %v1817_v59 = vrot.slane %v1726_v6, 3  ;;  %v1819_v42 = vrot.slane %v1732_v44, 2  ;;  %v1366_v0 = vrot.slane %v9964_v52, %v9619_v51  ;;  %v1810_v38 = vsel %vm610_vm0, %v1809_v25, %v1696_v17  ;;  %15524 = vst [vmem:[#allocation14_spill] sm:$0xff] %v10333_v57  ;;  %v10346_v31 = vld [vmem:[%s15267_s5 + $0x94] ss:$8 sps:$4 sm:$0xff]  }
  0x8e   :  { %1876 = vmatprep.subr.bf16.mxu0 %v10320_v54  ;;  %v1390_v43 = vrot.slane %v9971_v5, %v9619_v51  ;;  %v1414_v45 = vrot.slane %v9973_v13, %v9619_v51  ;;  %v1438_v15 = vrot.slane %v9977_v11, %v9619_v51  ;;  %v1812_v10 = vsel %vm613_vm1, %v1811_v24, %v1810_v38  ;;  %v10358_v38 = vld [vmem:[%s15267_s5 + $0x170] ss:$8 sps:$4 sm:$0xff]  }
  0x8f   :  { %1862 = vmatpush2.bf16.msra.mxu1 %v10333_v57  ;;  %v1462_v17 = vrot.slane %v9979_v53, %v9619_v51  ;;  %v1486_v32 = vrot.slane %v9981_v55, %v9619_v51  ;;  %v1510_v56 = vrot.slane %v9990_v22, %v9619_v51  ;;  %15525 = vst [vmem:[#allocation15_spill] sm:$0xff] %v10346_v31  ;;  %v1821_v41 = vrot.slane %v1738_v58, 1  ;;  %v10365_v58 = vld [vmem:[%s15267_s5 + $0x164] ss:$8 sps:$4 sm:$0xff]  }
  0x90   :  { %1863 = vmatprep.subr.bf16.mxu1 %v10346_v31  ;;  %v15526_v6 = vpack.c.b16 %v10166_v18, %v10166_v18  ;;  %v1814_v44 = vsel %vm616_vm2, %v1813_v30, %v1812_v10  ;;  %v1534_v25 = vrot.slane %v9992_v4, %v9619_v51  ;;  %v1597_v24 = vpack.c.bf16 %v1366_v0, %v1366_v0 }
  0x91   :  { %v1816_v31 = vsel %vm619_vm3, %v1815_v49, %v1814_v44  ;;  %v1603_v57 = vpack.c.bf16 %v1390_v43, %v1390_v43  ;;  %v1609_v18 = vpack.c.bf16 %v1414_v45, %v1414_v45  ;;  %15527 = vst [vmem:[#allocation16_spill] sm:$0xff] %v10365_v58  ;;  %v1615_v0 = vpack.c.bf16 %v1438_v15, %v1438_v15 }
  0x92   :  { %1307 = vmatmul.mubr.bf16.vlgmr.msra.gmra.mxu0 %v15526_v6  ;;  %v1818_v30 = vsel %vm622_vm4, %v1817_v59, %v1816_v31  ;;  %v1621_v10 = vpack.c.bf16 %v1462_v17, %v1462_v17  ;;  %v1627_v6 = vpack.c.bf16 %v1486_v32, %v1486_v32  ;;  %v1633_v43 = vpack.c.bf16 %v1510_v56, %v1510_v56 }
  0x93   :  { %1877 = vmatpush1.bf16.msra.mxu0 %v10358_v38  ;;  %1908 = vmatprep.mubr.bf16.mxu0 %v1826_v35  ;;  %v10372_v35 = vld [vmem:[%s15267_s5 + $0x90] ss:$8 sps:$4 sm:$0xff]   ;;  %v1820_v49 = vsel %vm625_vm5, %v1819_v42, %v1818_v30  ;;  %v1639_v45 = vpack.c.bf16 %v1534_v25, %v1534_v25  ;;  %v1693_v44 = vunpack.c.l.b16 %v1597_v24  ;;  %v1699_v15 = vunpack.c.l.b16 %v1603_v57  ;;  %v10388_v42 = vld [vmem:[%s15267_s5 + $0x160] ss:$8 sps:$4 sm:$0xff]  }
  0x94   :  { %1878 = vmatprep.subr.bf16.mxu0 %v10365_v58  ;;  %15528 = vst [vmem:[#allocation17_spill] sm:$0xff] %v10372_v35  ;;  %1864 = vmatpush2.bf16.msra.mxu1 %v10372_v35  ;;  %v10379_v58 = vld [vmem:[%s15267_s5 + $0x84] ss:$8 sps:$4 sm:$0xff]   ;;  %v1822_v59 = vsel %vm628_vm6, %v1821_v41, %v1820_v49  ;;  %v1705_v17 = vunpack.c.l.b16 %v1609_v18  ;;  %v1711_v32 = vunpack.c.l.b16 %v1615_v0  ;;  %v1823_v31 = vpack.c.b16 %v10309_v34, %v10309_v34  ;;  %v10394_v41 = vld [vmem:[%s15267_s5 + $0x154] ss:$8 sps:$4 sm:$0xff]  }
  0x95   :  { %15529 = vst [vmem:[#allocation18_spill] sm:$0xff] %v10379_v58  ;;  %1865 = vmatprep.subr.bf16.mxu1 %v10379_v58  ;;  %v1717_v56 = vunpack.c.l.b16 %v1621_v10  ;;  %v1723_v25 = vunpack.c.l.b16 %v1627_v6  ;;  %v1729_v24 = vunpack.c.l.b16 %v1633_v43  ;;  %v1735_v57 = vunpack.c.l.b16 %v1639_v45  ;;  %v10400_v0 = vld [vmem:[%s15267_s5 + $0x80] ss:$8 sps:$4 sm:$0xff]   ;;  %v10408_v45 = vld [vmem:[%s15267_s5 + $0x274] ss:$8 sps:$4 sm:$0xff]  }
  0x96   :  { %v1767_v18 = vrot.slane %v1699_v15, 7  ;;  %v1769_v34 = vrot.slane %v1705_v17, 6  ;;  %v1771_v30 = vrot.slane %v1711_v32, 5  ;;  %15530 = vst [vmem:[#allocation19_spill] sm:$0xff] %v10400_v0  ;;  %v1828_v10 = vpack.c.b16 %v1822_v59, %v1822_v59  ;;  %15531 = vst [vmem:[#allocation20_spill] sm:$0xff] %v10408_v45 }
  0x97   :  { %1879 = vmatpush1.bf16.msra.mxu0 %v10388_v42  ;;  %v1773_v6 = vrot.slane %v1717_v56, 4  ;;  %v1775_v49 = vrot.slane %v1723_v25, 3  ;;  %v1374_v43 = vrot.slane %v9964_v52, %v9797_v60  ;;  %v1777_v17 = vrot.slane %v1729_v24, 2  ;;  %v10419_v52 = vld [vmem:[%s15267_s5 + $0x150] ss:$8 sps:$4 sm:$0xff]  }
  0x98   :  { %1880 = vmatprep.subr.bf16.mxu0 %v10394_v41  ;;  %1866 = vmatpush2.bf16.msra.mxu1 %v10400_v0  ;;  %v1768_v15 = vsel %vm610_vm0, %v1767_v18, %v1693_v44  ;;  %v1398_v32 = vrot.slane %v9971_v5, %v9797_v60  ;;  %v1422_v59 = vrot.slane %v9973_v13, %v9797_v60  ;;  %v10432_v13 = vld [vmem:[%s15267_s5 + $0x144] ss:$8 sps:$4 sm:$0xff]   ;;  %v1779_v18 = vrot.slane %v1735_v57, 1  ;;  %v8333_v0 = vld [vmem:[%s15268_s1 + $0x242] ss:$8 sm:$0xf] }
  0x99   :  { %1917 = vmatprep.subr.bf16.mxu1 %v10408_v45  ;;  %15532 = vst [vmem:[#allocation21_spill] sm:$0xff] %v10419_v52  ;;  %v1770_v56 = vsel %vm613_vm1, %v1769_v34, %v1768_v15  ;;  %v1446_v25 = vrot.slane %v9977_v11, %v9797_v60  ;;  %v1470_v44 = vrot.slane %v9979_v53, %v9797_v60  ;;  %15533 = vst [vmem:[#allocation22_spill] sm:$0xff] %v10432_v13  ;;  %v8334_v58 = vld [vmem:[%s15268_s1 + $0x242] ss:$8 sm:$0x30] }
  0x9a   :  { %v1494_v5 = vrot.slane %v9981_v55, %v9797_v60  ;;  %v1772_v24 = vsel %vm616_vm2, %v1771_v30, %v1770_v56  ;;  %v1518_v11 = vrot.slane %v9990_v22, %v9797_v60  ;;  %v1542_v53 = vrot.slane %v9992_v4, %v9797_v60  ;;  %v10447_v22 = vld [vmem:[%s15267_s5 + $0x140] ss:$8 sps:$4 sm:$0xff]  }
  0x9b   :  { %1881 = vmatpush1.bf16.msra.mxu0 %v10419_v52  ;;  %1868 = vmatmul.mubr.bf16.vlgmr.msra.gmra.mxu1 %v1823_v31  ;;  %v1774_v55 = vsel %vm619_vm3, %v1773_v6, %v1772_v24  ;;  %v1599_v31 = vpack.c.bf16 %v1374_v43, %v1374_v43  ;;  %v1605_v34 = vpack.c.bf16 %v1398_v32, %v1398_v32  ;;  %v8323_v43 = vld [vmem:[%s15268_s1 + $0x62] ss:$8 sm:$0xf] }
  0x9c   :  { %1882 = vmatprep.subr.bf16.mxu0 %v10432_v13  ;;  %1918 = vmatpush1.bf16.msra.mxu1 %v9853_v61  ;;  %v1776_v15 = vsel %vm622_vm4, %v1775_v49, %v1774_v55  ;;  %v1611_v45 = vpack.c.bf16 %v1422_v59, %v1422_v59  ;;  %v1617_v30 = vpack.c.bf16 %v1446_v25, %v1446_v25  ;;  %v8322_v49 = vld [vmem:[%s15268_s1 + $0x2] ss:$8 sm:$0x30] }
  0x9d   :  { %1949 = vmatprep.mubr.bf16.mxu1 %v1828_v10  ;;  %1919 = vmatprep.subr.bf16.mxu1 %v9858_v3  ;;  %v1623_v57 = vpack.c.bf16 %v1470_v44, %v1470_v44  ;;  %15534 = vst [vmem:[#allocation23_spill] sm:$0xff] %v10447_v22  ;;  %v1778_v61 = vsel %vm625_vm5, %v1777_v17, %v1776_v15  ;;  %v8321_v3 = vld [vmem:[%s15268_s1 + $0x2] ss:$8 sm:$0xf]  ;;  %v10466_v17 = vld [vmem:[%s15267_s5 + $0x134] ss:$8 sps:$4 sm:$0xff]   ;;  %v1695_v56 = vunpack.c.l.b16 %v1599_v31  ;;  %v1701_v25 = vunpack.c.l.b16 %v1605_v34 }
  0x9e   :  { %v1629_v4 = vpack.c.bf16 %v1494_v5, %v1494_v5  ;;  %v1635_v10 = vpack.c.bf16 %v1518_v11, %v1518_v11  ;;  %v1641_v6 = vpack.c.bf16 %v1542_v53, %v1542_v53  ;;  %v8324_v32 = vld [vmem:[%s15268_s1 + $0x62] ss:$8 sm:$0x30]  ;;  %15535 = vst [vmem:[#allocation24_spill] sm:$0xff] %v10466_v17  ;;  %v10470_v59 = vsel %vm628_vm6, %v1779_v18, %v1778_v61 }
  0x9f   :  { %1883 = vmatpush1.bf16.msra.mxu0 %v10447_v22  ;;  %v1707_v44 = vunpack.c.l.b16 %v1611_v45  ;;  %v8325_v5 = vld [vmem:[%s15268_s1 + $0xc2] ss:$8 sm:$0xf]  ;;  %v1713_v55 = vunpack.c.l.b16 %v1617_v30  ;;  %v1719_v31 = vunpack.c.l.b16 %v1623_v57  ;;  %v1795_v57 = vrot.slane %v1701_v25, 7 }
  0xa0   :  { %1884 = vmatprep.subr.bf16.mxu0 %v10466_v17  ;;  %v8326_v24 = vld [vmem:[%s15268_s1 + $0xc2] ss:$8 sm:$0x30]  ;;  %1920 = vmatpush1.bf16.msra.mxu1 %v9867_v21  ;;  %v1725_v34 = vunpack.c.l.b16 %v1629_v4  ;;  %v1731_v21 = vunpack.c.l.b16 %v1635_v10  ;;  %v1737_v30 = vunpack.c.l.b16 %v1641_v6  ;;  %v10510_v17 = vld [vmem:[%s15267_s5 + $0x130] ss:$8 sps:$4 sm:$0xff]   ;;  %v10513_v60 = vor.u32 %v8322_v49, %v8321_v3 }
  0xa1   :  { %v8327_v11 = vld [vmem:[%s15268_s1 + $0x122] ss:$8 sm:$0xf]  ;;  %1921 = vmatprep.subr.bf16.mxu1 %v9876_v27  ;;  %v1797_v4 = vrot.slane %v1707_v44, 6  ;;  %15536 = vst [vmem:[#allocation25_spill] sm:$0xff] %v10510_v17  ;;  %v1799_v22 = vrot.slane %v1713_v55, 5  ;;  %v1796_v6 = vsel %vm610_vm0, %v1795_v57, %v1695_v56  ;;  %v10525_v55 = vor.u32 %v8324_v32, %v8323_v43 }
  0xa2   :  { %v8328_v18 = vld [vmem:[%s15268_s1 + $0x122] ss:$8 sm:$0x30]  ;;  %v1801_v13 = vrot.slane %v1719_v31, 4  ;;  %v1803_v52 = vrot.slane %v1725_v34, 3  ;;  %v1805_v25 = vrot.slane %v1731_v21, 2  ;;  %v10529_v49 = vor.u32 %v8326_v24, %v8325_v5 }
  0xa3   :  { %v8329_v45 = vld [vmem:[%s15268_s1 + $0x182] ss:$8 sm:$0xf]  ;;  %1885 = vmatpush1.bf16.msra.mxu0 %v10510_v17  ;;  %v10521_v10 = vld [vmem:[%s15267_s5 + $0x124] ss:$8 sps:$4 sm:$0xff]   ;;  %v1807_v44 = vrot.slane %v1737_v30, 1  ;;  %v1798_v3 = vsel %vm613_vm1, %v1797_v4, %v1796_v6  ;;  %v10531_v31 = vor.u32 %v8328_v18, %v8327_v11  ;;  %v10539_v56 = vor.u32 %v8334_v58, %v8333_v0 }
  0xa4   :  { %v8330_v53 = vld [vmem:[%s15268_s1 + $0x182] ss:$8 sm:$0x30]  ;;  %15537 = vst [vmem:[#allocation26_spill] sm:$0xff] %v10521_v10  ;;  %1886 = vmatprep.subr.bf16.mxu0 %v10521_v10  ;;  %1922 = vmatpush1.bf16.msra.mxu1 %v9895_v39  ;;  %v1800_v10 = vsel %vm616_vm2, %v1799_v22, %v1798_v3  ;;  %v2029_v22 = vrot.slane %v10525_v55, %v9607_v47 }
  0xa5   :  { %v8331_v15 = vld [vmem:[%s15268_s1 + $0x1e2] ss:$8 sm:$0xf]  ;;  %v10533_v34 = vor.u32 %v8330_v53, %v8329_v45  ;;  %1923 = vmatprep.subr.bf16.mxu1 %v9900_v40  ;;  %v1802_v32 = vsel %vm619_vm3, %v1801_v13, %v1800_v10  ;;  %v2005_v40 = vrot.slane %v10513_v60, %v9607_v47  ;;  %v2053_v58 = vrot.slane %v10529_v49, %v9607_v47 }
  0xa6   :  { %v8332_v61 = vld [vmem:[%s15268_s1 + $0x1e2] ss:$8 sm:$0x30]  ;;  %v1804_v0 = vsel %vm622_vm4, %v1803_v52, %v1802_v32  ;;  %v2077_v13 = vrot.slane %v10531_v31, %v9607_v47  ;;  %v2149_v18 = vrot.slane %v10539_v56, %v9607_v47 }
  0xa7   :  { %v8335_v35 = vld [vmem:[%s15268_s1 + $0x2a2] ss:$8 sm:$0xf]  ;;  %v10537_v17 = vor.u32 %v8332_v61, %v8331_v15  ;;  %v2101_v5 = vrot.slane %v10533_v34, %v9607_v47  ;;  %v1806_v11 = vsel %vm625_vm5, %v1805_v25, %v1804_v0  ;;  %v2239_v52 = vpack.c.bf16 %v2005_v40, %v2005_v40 }
  0xa8   :  { %v8336_v27 = vld [vmem:[%s15268_s1 + $0x2a2] ss:$8 sm:$0x30]  ;;  %1924 = vmatpush1.bf16.msra.mxu1 %v9928_v9  ;;  %v10577_v53 = vsel %vm628_vm6, %v1807_v44, %v1806_v11  ;;  %v2245_v15 = vpack.c.bf16 %v2029_v22, %v2029_v22  ;;  %v2251_v61 = vpack.c.bf16 %v2053_v58, %v2053_v58  ;;  %v2257_v21 = vpack.c.bf16 %v2077_v13, %v2077_v13  ;;  %v10582_v9 = vld [vmem:[%s15267_s5 + $0x110] ss:$8 sps:$4 sm:$0xff]  }
  0xa9   :  { %v10541_v43 = vor.u32 %v8336_v27, %v8335_v35  ;;  %v10546_v39 = vld [vmem:[%s15267_s5 + $0x120] ss:$8 sps:$4 sm:$0xff]   ;;  %v10559_v35 = vld [vmem:[%s15267_s5 + $0x114] ss:$8 sps:$4 sm:$0xff]   ;;  %v2125_v24 = vrot.slane %v10537_v17, %v9607_v47  ;;  %1925 = vmatprep.subr.bf16.mxu1 %v9951_v28  ;;  %v2263_v30 = vpack.c.bf16 %v2101_v5, %v2101_v5  ;;  %v2275_v4 = vpack.c.bf16 %v2149_v18, %v2149_v18  ;;  %v10588_v28 = vld [vmem:[%s15267_s5 + $0x104] ss:$8 sps:$4 sm:$0xff]  }
  0xaa   :  { %1887 = vmatpush1.bf16.msra.mxu0 %v10546_v39  ;;  %v2335_v10 = vunpack.c.l.b16 %v2239_v52  ;;  %v2341_v6 = vunpack.c.l.b16 %v2245_v15  ;;  %v2347_v25 = vunpack.c.l.b16 %v2251_v61  ;;  %v2353_v44 = vunpack.c.l.b16 %v2257_v21  ;;  %v10598_v5 = vld [vmem:[%s15267_s5 + $0x100] ss:$8 sps:$4 sm:$0xff]  }
  0xab   :  { %1888 = vmatprep.subr.bf16.mxu0 %v10559_v35  ;;  %v2173_v45 = vrot.slane %v10541_v43, %v9607_v47  ;;  %v2269_v57 = vpack.c.bf16 %v2125_v24, %v2125_v24  ;;  %v2359_v3 = vunpack.c.l.b16 %v2263_v30  ;;  %v2371_v40 = vunpack.c.l.b16 %v2275_v4 }
  0xac   :  { %1926 = vmatpush1.bf16.msra.mxu1 %v9987_v2  ;;  %v2396_v58 = vrot.slane %v2341_v6, 7  ;;  %v2398_v0 = vrot.slane %v2347_v25, 6  ;;  %v2013_v13 = vrot.slane %v10513_v60, %v9610_v48  ;;  %v2400_v2 = vrot.slane %v2353_v44, 5  ;;  %v10627_v6 = vld [vmem:[%s15267_s5 + $0x1f0] ss:$8 sps:$4 sm:$0xff]  }
  0xad   :  { %v2281_v27 = vpack.c.bf16 %v2173_v45, %v2173_v45  ;;  %v2365_v32 = vunpack.c.l.b16 %v2269_v57  ;;  %1927 = vmatprep.subr.bf16.mxu1 %v10000_v1  ;;  %v2402_v24 = vrot.slane %v2359_v3, 4  ;;  %v10604_v1 = vld [vmem:[%s15267_s5 + $0x1f4] ss:$8 sps:$4 sm:$0xff]   ;;  %v2406_v45 = vrot.slane %v2371_v40, 2 }
  0xae   :  { %1889 = vmatpush1.bf16.msra.mxu0 %v10582_v9  ;;  %v2397_v18 = vsel %vm610_vm0, %v2396_v58, %v2335_v10  ;;  %v2037_v52 = vrot.slane %v10525_v55, %v9610_v48  ;;  %v2061_v15 = vrot.slane %v10529_v49, %v9610_v48  ;;  %v2085_v21 = vrot.slane %v10531_v31, %v9610_v48 }
  0xaf   :  { %1890 = vmatprep.subr.bf16.mxu0 %v10588_v28  ;;  %v2377_v22 = vunpack.c.l.b16 %v2281_v27  ;;  %v2404_v11 = vrot.slane %v2365_v32, 3  ;;  %v2399_v61 = vsel %vm613_vm1, %v2398_v0, %v2397_v18  ;;  %v2109_v30 = vrot.slane %v10533_v34, %v9610_v48 }
  0xb0   :  { %1928 = vmatpush1.bf16.msra.mxu1 %v10025_v33  ;;  %v2133_v57 = vrot.slane %v10537_v17, %v9610_v48  ;;  %v2401_v4 = vsel %vm616_vm2, %v2400_v2, %v2399_v61  ;;  %v2157_v10 = vrot.slane %v10539_v56, %v9610_v48  ;;  %v2241_v33 = vpack.c.bf16 %v2013_v13, %v2013_v13 }
  0xb1   :  { %1929 = vmatprep.subr.bf16.mxu1 %v10032_v8  ;;  %v2408_v27 = vrot.slane %v2377_v22, 1  ;;  %v2403_v25 = vsel %vm619_vm3, %v2402_v24, %v2401_v4  ;;  %v2247_v44 = vpack.c.bf16 %v2037_v52, %v2037_v52  ;;  %v2253_v3 = vpack.c.bf16 %v2061_v15, %v2061_v15  ;;  %v10634_v8 = vld [vmem:[%s15267_s5 + $0x1e4] ss:$8 sps:$4 sm:$0xff]  }
  0xb2   :  { %1891 = vmatpush1.bf16.msra.mxu0 %v10598_v5  ;;  %v2259_v32 = vpack.c.bf16 %v2085_v21, %v2085_v21  ;;  %v2405_v40 = vsel %vm622_vm4, %v2404_v11, %v2403_v25  ;;  %v2181_v22 = vrot.slane %v10541_v43, %v9610_v48  ;;  %v2265_v58 = vpack.c.bf16 %v2109_v30, %v2109_v30  ;;  %v10649_v21 = vld [vmem:[%s15267_s5 + $0x1e0] ss:$8 sps:$4 sm:$0xff]  }
  0xb3   :  { %1892 = vmatprep.subr.bf16.mxu0 %v10604_v1  ;;  %v2271_v0 = vpack.c.bf16 %v2133_v57, %v2133_v57  ;;  %v2407_v13 = vsel %vm625_vm5, %v2406_v45, %v2405_v40  ;;  %v2277_v2 = vpack.c.bf16 %v2157_v10, %v2157_v10  ;;  %v2337_v24 = vunpack.c.l.b16 %v2241_v33  ;;  %v10676_v40 = vld [vmem:[%s15267_s5 + $0x1d0] ss:$8 sps:$4 sm:$0xff]  }
  0xb4   :  { %1930 = vmatpush1.bf16.msra.mxu1 %v10040_v16  ;;  %v2343_v18 = vunpack.c.l.b16 %v2247_v44  ;;  %v10644_v52 = vsel %vm628_vm6, %v2408_v27, %v2407_v13  ;;  %v2349_v15 = vunpack.c.l.b16 %v2253_v3  ;;  %v2355_v61 = vunpack.c.l.b16 %v2259_v32  ;;  %v10689_v13 = vld [vmem:[%s15267_s5 + $0x1c4] ss:$8 sps:$4 sm:$0xff]  }
  0xb5   :  { %1931 = vmatprep.subr.bf16.mxu1 %v10048_v12  ;;  %v2361_v11 = vunpack.c.l.b16 %v2265_v58  ;;  %v10657_v12 = vld [vmem:[%s15267_s5 + $0x1d4] ss:$8 sps:$4 sm:$0xff]   ;;  %v2283_v45 = vpack.c.bf16 %v2181_v22, %v2181_v22  ;;  %v2367_v10 = vunpack.c.l.b16 %v2271_v0  ;;  %v10663_v33 = vunpack.c.l.b16 %v2277_v2 }
  0xb6   :  { %1893 = vmatpush2.bf16.msra.mxu0 %v10627_v6  ;;  %v2424_v30 = vrot.slane %v2343_v18, 7  ;;  %v2426_v57 = vrot.slane %v2349_v15, 6  ;;  %v2428_v4 = vrot.slane %v2355_v61, 5  ;;  %v2001_v3 = vrot.slane %v10513_v60, %v9616_v50 }
  0xb7   :  { %1894 = vmatprep.subr.bf16.mxu0 %v10634_v8  ;;  %v2430_v25 = vrot.slane %v2361_v11, 4  ;;  %v2025_v32 = vrot.slane %v10525_v55, %v9616_v50  ;;  %v2073_v22 = vrot.slane %v10531_v31, %v9616_v50  ;;  %v2097_v58 = vrot.slane %v10533_v34, %v9616_v50 }
  0xb8   :  { %1932 = vmatpush1.bf16.msra.mxu1 %v10074_v7  ;;  %v2425_v44 = vsel %vm610_vm0, %v2424_v30, %v2337_v24  ;;  %v2049_v7 = vrot.slane %v10529_v49, %v9616_v50  ;;  %v2121_v0 = vrot.slane %v10537_v17, %v9616_v50  ;;  %v2145_v24 = vrot.slane %v10539_v56, %v9616_v50 }
  0xb9   :  { %1933 = vmatprep.subr.bf16.mxu1 %v10083_v29  ;;  %v2427_v29 = vsel %vm613_vm1, %v2426_v57, %v2425_v44  ;;  %v2169_v18 = vrot.slane %v10541_v43, %v9616_v50  ;;  %v2238_v15 = vpack.c.bf16 %v2001_v3, %v2001_v3  ;;  %v2432_v61 = vrot.slane %v2367_v10, 3 }
  0xba   :  { %1895 = vmatpush2.bf16.msra.mxu0 %v10649_v21  ;;  %v2429_v2 = vsel %vm616_vm2, %v2428_v4, %v2427_v29  ;;  %v2244_v11 = vpack.c.bf16 %v2025_v32, %v2025_v32  ;;  %v2250_v30 = vpack.c.bf16 %v2049_v7, %v2049_v7  ;;  %v2256_v57 = vpack.c.bf16 %v2073_v22, %v2073_v22  ;;  %v10703_v29 = vld [vmem:[%s15267_s5 + $0x1c0] ss:$8 sps:$4 sm:$0xff]  }
  0xbb   :  { %1896 = vmatprep.subr.bf16.mxu0 %v10657_v12  ;;  %v2431_v44 = vsel %vm619_vm3, %v2430_v25, %v2429_v2  ;;  %v2262_v27 = vpack.c.bf16 %v2097_v58, %v2097_v58  ;;  %v2268_v16 = vpack.c.bf16 %v2121_v0, %v2121_v0  ;;  %v2274_v4 = vpack.c.bf16 %v2145_v24, %v2145_v24 }
  0xbc   :  { %1934 = vmatpush2.bf16.msra.mxu1 %v10098_v19  ;;  %v10706_v3 = vunpack.c.l.b16 %v2283_v45  ;;  %v2280_v10 = vpack.c.bf16 %v2169_v18, %v2169_v18  ;;  %v2340_v32 = vunpack.c.l.b16 %v2244_v11  ;;  %v2334_v25 = vunpack.c.l.b16 %v2238_v15  ;;  %v10721_v15 = vld [vmem:[%s15267_s5 + $0x1b0] ss:$8 sps:$4 sm:$0xff]  }
  0xbd   :  { %1935 = vmatprep.subr.bf16.mxu1 %v10105_v26  ;;  %v10712_v26 = vld [vmem:[%s15267_s5 + $0x1b4] ss:$8 sps:$4 sm:$0xff]   ;;  %v2346_v7 = vunpack.c.l.b16 %v2250_v30  ;;  %v2352_v22 = vunpack.c.l.b16 %v2256_v57  ;;  %v2358_v58 = vunpack.c.l.b16 %v2262_v27  ;;  %v2433_v45 = vsel %vm622_vm4, %v2432_v61, %v2431_v44 }
  0xbe   :  { %1897 = vmatpush2.bf16.msra.mxu0 %v10676_v40  ;;  %v2364_v0 = vunpack.c.l.b16 %v2268_v16  ;;  %v2370_v2 = vunpack.c.l.b16 %v2274_v4  ;;  %v2376_v24 = vunpack.c.l.b16 %v2280_v10  ;;  %v2382_v18 = vrot.slane %v2340_v32, 7 }
  0xbf   :  { %1898 = vmatprep.subr.bf16.mxu0 %v10689_v13  ;;  %v2384_v11 = vrot.slane %v2346_v7, 6  ;;  %v2386_v19 = vrot.slane %v2352_v22, 5  ;;  %v2388_v48 = vrot.slane %v2358_v58, 4  ;;  %v2009_v16 = vrot.slane %v10513_v60, %v9619_v51 }
  0xc0   :  { %1936 = vmatpush2.bf16.msra.mxu1 %v10120_v46  ;;  %v2390_v27 = vrot.slane %v2364_v0, 3  ;;  %v2392_v46 = vrot.slane %v2370_v2, 2  ;;  %v2394_v30 = vrot.slane %v2376_v24, 1  ;;  %v2383_v61 = vsel %vm610_vm0, %v2382_v18, %v2334_v25  ;;  %v10754_v2 = vld [vmem:[%s15267_s5 + $0x1a0] ss:$8 sps:$4 sm:$0xff]  }
  0xc1   :  { %1937 = vmatprep.subr.bf16.mxu1 %v10133_v14  ;;  %v10729_v14 = vld [vmem:[%s15267_s5 + $0x1a4] ss:$8 sps:$4 sm:$0xff]   ;;  %v2033_v57 = vrot.slane %v10525_v55, %v9619_v51  ;;  %v2057_v44 = vrot.slane %v10529_v49, %v9619_v51  ;;  %v2081_v4 = vrot.slane %v10531_v31, %v9619_v51  ;;  %v2385_v10 = vsel %vm613_vm1, %v2384_v11, %v2383_v61 }
  0xc2   :  { %1899 = vmatpush2.bf16.msra.mxu0 %v10703_v29  ;;  %v2105_v32 = vrot.slane %v10533_v34, %v9619_v51  ;;  %v2129_v7 = vrot.slane %v10537_v17, %v9619_v51  ;;  %v2153_v25 = vrot.slane %v10539_v56, %v9619_v51  ;;  %v2387_v22 = vsel %vm616_vm2, %v2386_v19, %v2385_v10 }
  0xc3   :  { %1900 = vmatprep.subr.bf16.mxu0 %v10712_v26  ;;  %v2177_v58 = vrot.slane %v10541_v43, %v9619_v51  ;;  %v2240_v0 = vpack.c.bf16 %v2009_v16, %v2009_v16  ;;  %15538 = vst [vmem:[#allocation27_spill] sm:$0xff] %v10754_v2  ;;  %v2389_v24 = vsel %vm619_vm3, %v2388_v48, %v2387_v22 }
  0xc4   :  { %1938 = vmatpush2.bf16.msra.mxu1 %v10156_v36  ;;  %v2246_v36 = vpack.c.bf16 %v2033_v57, %v2033_v57  ;;  %v2252_v18 = vpack.c.bf16 %v2057_v44, %v2057_v44  ;;  %v2258_v11 = vpack.c.bf16 %v2081_v4, %v2081_v4  ;;  %v2264_v61 = vpack.c.bf16 %v2105_v32, %v2105_v32  ;;  %v15540_v32 = vld [vmem:[#allocation9_spill] sm:$0xff] }
  0xc5   :  { %1939 = vmatprep.subr.bf16.mxu1 %v10163_v62  ;;  %v10761_v62 = vld [vmem:[%s15267_s5 + $0x194] ss:$8 sps:$4 sm:$0xff]   ;;  %v2391_v19 = vsel %vm622_vm4, %v2390_v27, %v2389_v24  ;;  %v2270_v16 = vpack.c.bf16 %v2129_v7, %v2129_v7  ;;  %v2276_v57 = vpack.c.bf16 %v2153_v25, %v2153_v25  ;;  %v2282_v10 = vpack.c.bf16 %v2177_v58, %v2177_v58  ;;  %v10774_v27 = vld [vmem:[%s15267_s5 + $0x190] ss:$8 sps:$4 sm:$0xff]  }
  0xc6   :  { %1901 = vmatpush2.bf16.msra.mxu0 %v10721_v15  ;;  %15539 = vst [vmem:[#allocation28_spill] sm:$0xff] %v10761_v62  ;;  %v2393_v51 = vsel %vm625_vm5, %v2392_v46, %v2391_v19  ;;  %v2336_v48 = vunpack.c.l.b16 %v2240_v0  ;;  %v2342_v44 = vunpack.c.l.b16 %v2246_v36  ;;  %v2348_v4 = vunpack.c.l.b16 %v2252_v18  ;;  %v15543_v18 = vld [vmem:[#allocation10_spill] sm:$0xff] }
  0xc7   :  { %1902 = vmatprep.subr.bf16.mxu0 %v10729_v14  ;;  %v10769_v22 = vsel %vm628_vm6, %v2394_v30, %v2393_v51  ;;  %v2354_v50 = vunpack.c.l.b16 %v2258_v11  ;;  %v2372_v46 = vunpack.c.l.b16 %v2276_v57  ;;  %v2378_v7 = vunpack.c.l.b16 %v2282_v10  ;;  %v10781_v51 = vld [vmem:[%s15267_s5 + $0x184] ss:$8 sps:$4 sm:$0xff]  }
  0xc8   :  { %1940 = vmatpush2.bf16.msra.mxu1 %v10178_v23  ;;  %v2436_v23 = vrot.slane %v10706_v3, 1  ;;  %v2410_v25 = vrot.slane %v2342_v44, 7  ;;  %15541 = vst [vmem:[#allocation9_spill] sm:$0xff] %v10781_v51  ;;  %v15542_v30 = vrot.slane %v10663_v33, 2  ;;  %v2412_v0 = vrot.slane %v2348_v4, 6  ;;  %v15545_v10 = vld [vmem:[#allocation7_spill] sm:$0xff] }
  0xc9   :  { %1941 = vmatprep.subr.bf16.mxu1 %v15540_v32  ;;  %v2414_v36 = vrot.slane %v2354_v50, 5  ;;  %v2422_v19 = vrot.slane %v2378_v7, 1  ;;  %v2021_v44 = vrot.slane %v10513_v60, %v15545_v10  ;;  %v2045_v33 = vrot.slane %v10525_v55, %v15545_v10  ;;  %v10813_v32 = vld [vmem:[%s15267_s5 + $0x74] ss:$8 sps:$4 sm:$0xff]  }
  0xca   :  { %1903 = vmatpush2.bf16.msra.mxu0 %v10754_v2  ;;  %v2360_v2 = vunpack.c.l.b16 %v2264_v61  ;;  %v2435_v58 = vsel %vm625_vm5, %v15542_v30, %v2433_v45  ;;  %v2411_v3 = vsel %vm610_vm0, %v2410_v25, %v2336_v48  ;;  %v2420_v61 = vrot.slane %v2372_v46, 2  ;;  %v10800_v45 = vld [vmem:[%s15267_s5 + $0x180] ss:$8 sps:$4 sm:$0xff]  }
  0xcb   :  { %1904 = vmatprep.subr.bf16.mxu0 %v10761_v62  ;;  %v2366_v62 = vunpack.c.l.b16 %v2270_v16  ;;  %v15544_v16 = vld [vmem:[#allocation11_spill] sm:$0xff]  ;;  %v2413_v57 = vsel %vm613_vm1, %v2412_v0, %v2411_v3  ;;  %v2069_v50 = vrot.slane %v10529_v49, %v15545_v10  ;;  %15546 = vst [vmem:[#allocation10_spill] sm:$0xff] %v10800_v45  ;;  %v2117_v48 = vrot.slane %v10533_v34, %v15545_v10  ;;  %v15548_v0 = vld [vmem:[#allocation12_spill] sm:$0xff] }
  0xcc   :  { %v2416_v24 = vrot.slane %v2360_v2, 4  ;;  %1942 = vmatpush2.bf16.msra.mxu1 %v15543_v18  ;;  %v2415_v2 = vsel %vm616_vm2, %v2414_v36, %v2413_v57  ;;  %v2141_v4 = vrot.slane %v10537_v17, %v15545_v10  ;;  %15547 = vst [vmem:[#allocation11_spill] sm:$0xff] %v10813_v32  ;;  %v2165_v7 = vrot.slane %v10539_v56, %v15545_v10  ;;  %v15549_v57 = vld [vmem:[#allocation13_spill] sm:$0xff] }
  0xcd   :  { %v2418_v11 = vrot.slane %v2366_v62, 3  ;;  %1943 = vmatprep.subr.bf16.mxu1 %v15544_v16  ;;  %v2093_v62 = vrot.slane %v10531_v31, %v15545_v10  ;;  %v2189_v25 = vrot.slane %v10541_v43, %v15545_v10  ;;  %v2243_v30 = vpack.c.bf16 %v2021_v44, %v2021_v44  ;;  %v10831_v44 = vld [vmem:[%s15267_s5 + $0x70] ss:$8 sps:$4 sm:$0xff]  }
  0xce   :  { %1905 = vmatpush2.bf16.msra.mxu0 %v10774_v27  ;;  %v2417_v46 = vsel %vm619_vm3, %v2416_v24, %v2415_v2  ;;  %v2249_v18 = vpack.c.bf16 %v2045_v33, %v2045_v33  ;;  %v2255_v3 = vpack.c.bf16 %v2069_v50, %v2069_v50  ;;  %v2267_v2 = vpack.c.bf16 %v2117_v48, %v2117_v48 }
  0xcf   :  { %1906 = vmatprep.subr.bf16.mxu0 %v10781_v51  ;;  %v2419_v36 = vsel %vm622_vm4, %v2418_v11, %v2417_v46  ;;  %v2261_v16 = vpack.c.bf16 %v2093_v62, %v2093_v62  ;;  %v2339_v51 = vunpack.c.l.b16 %v2243_v30  ;;  %v15551_v11 = vpack.c.b16 %v10644_v52, %v10644_v52  ;;  %v10843_v62 = vld [vmem:[%s15267_s5 + $0x64] ss:$8 sps:$4 sm:$0xff]  }
  0xd0   :  { %1944 = vmatpush2.bf16.msra.mxu1 %v15548_v0  ;;  %v2421_v24 = vsel %vm625_vm5, %v2420_v61, %v2419_v36  ;;  %v2285_v50 = vpack.c.bf16 %v2189_v25, %v2189_v25  ;;  %v2345_v61 = vunpack.c.l.b16 %v2249_v18  ;;  %v2351_v48 = vunpack.c.l.b16 %v2255_v3  ;;  %v10852_v18 = vld [vmem:[%s15267_s5 + $0x60] ss:$8 sps:$4 sm:$0xff]  }
  0xd1   :  { %1945 = vmatprep.subr.bf16.mxu1 %v15549_v57  ;;  %v10838_v33 = vsel %vm628_vm6, %v2422_v19, %v2421_v24  ;;  %v1827_v3 = vpack.c.b16 %v10577_v53, %v10577_v53  ;;  %v10872_v24 = vld [vmem:[%s15267_s5 + $0x50] ss:$8 sps:$4 sm:$0xff]  }
  0xd2   :  { %1907 = vmatpush2.bf16.msra.mxu0 %v10800_v45  ;;  %v2273_v45 = vpack.c.bf16 %v2141_v4, %v2141_v4  ;;  %v2357_v4 = vunpack.c.l.b16 %v2261_v16  ;;  %v2381_v30 = vunpack.c.l.b16 %v2285_v50  ;;  %v2452_v19 = vrot.slane %v2345_v61, 7  ;;  %v10891_v50 = vld [vmem:[%s15267_s5 + $0x40] ss:$8 sps:$4 sm:$0xff]   ;;  %v10897_v61 = vld [vmem:[%s15267_s5 + $0x34] ss:$8 sps:$4 sm:$0xff]  }
  0xd3   :  { %2478 = vmatprep.subr.bf16.mxu0 %v10813_v32  ;;  %v15550_v32 = vpack.c.b16 %v10470_v59, %v10470_v59  ;;  %v2279_v59 = vpack.c.bf16 %v2165_v7, %v2165_v7  ;;  %v2437_v7 = vsel %vm628_vm6, %v2436_v23, %v2435_v58  ;;  %v2454_v25 = vrot.slane %v2351_v48, 6 }
  0xd4   :  { %1946 = vmatpush2.bf16.msra.mxu1 %v10266_v37  ;;  %v2369_v52 = vunpack.c.l.b16 %v2273_v45  ;;  %v2456_v0 = vrot.slane %v2357_v4, 5  ;;  %v2453_v37 = vsel %vm610_vm0, %v2452_v19, %v2339_v51  ;;  %v2469_v16 = vpack.c.b16 %v2437_v7, %v2437_v7  ;;  %v10907_v4 = vld [vmem:[%s15267_s5 + $0x30] ss:$8 sps:$4 sm:$0xff]  }
  0xd5   :  { %1909 = vmatmul.mubr.bf16.vlgmr.msra.gmra.mxu0 %v15550_v32  ;;  %v2363_v32 = vunpack.c.l.b16 %v2267_v2  ;;  %v2375_v46 = vunpack.c.l.b16 %v2279_v59  ;;  %1947 = vmatprep.subr.bf16.mxu1 %v10279_v63  ;;  %v10861_v63 = vld [vmem:[%s15267_s5 + $0x54] ss:$8 sps:$4 sm:$0xff]   ;;  %v2455_v23 = vsel %vm613_vm1, %v2454_v25, %v2453_v37  ;;  %v2464_v51 = vrot.slane %v2381_v30, 1  ;;  %v15552_v59 = vld [vmem:[#allocation16_spill] sm:$0xff] }
  0xd6   :  { %2479 = vmatpush1.bf16.msra.mxu0 %v10831_v44  ;;  %2510 = vmatprep.mubr.bf16.mxu0 %v15551_v11  ;;  %v2460_v45 = vrot.slane %v2369_v52, 3  ;;  %v2457_v57 = vsel %vm616_vm2, %v2456_v0, %v2455_v23  ;;  %v15554_v52 = vld [vmem:[#allocation21_spill] sm:$0xff]  ;;  %v15555_v7 = vld [vmem:[#allocation22_spill] sm:$0xff] }
  0xd7   :  { %2480 = vmatprep.subr.bf16.mxu0 %v10843_v62  ;;  %v2458_v36 = vrot.slane %v2363_v32, 4  ;;  %v2462_v58 = vrot.slane %v2375_v46, 2  ;;  %v10913_v32 = vld [vmem:[%s15267_s5 + $0x24] ss:$8 sps:$4 sm:$0xff]  }
  0xd8   :  { %1948 = vmatpush2.bf16.msra.mxu1 %v10298_v20  ;;  %v10879_v20 = vld [vmem:[%s15267_s5 + $0x44] ss:$8 sps:$4 sm:$0xff]  }
  0xd9   :  { %2519 = vmatprep.subr.bf16.mxu1 %v10320_v54  ;;  %v2459_v53 = vsel %vm619_vm3, %v2458_v36, %v2457_v57 }
  0xda   :  { %2481 = vmatpush1.bf16.msra.mxu0 %v10852_v18  ;;  %v2461_v2 = vsel %vm622_vm4, %v2460_v45, %v2459_v53  ;;  %v15556_v45 = vld [vmem:[#allocation23_spill] sm:$0xff] }
  0xdb   :  { %2482 = vmatprep.subr.bf16.mxu0 %v10861_v63  ;;  %1950 = vmatmul.mubr.bf16.vlgmr.msra.gmra.mxu1 %v1827_v3  ;;  %v2463_v54 = vsel %vm625_vm5, %v2462_v58, %v2461_v2  ;;  %v10949_v2 = vld [vmem:[%s15267_s5 + $0x10] ss:$8 sps:$4 sm:$0xff]  }
  0xdc   :  { %2520 = vmatpush1.bf16.msra.mxu1 %v10358_v38  ;;  %2551 = vmatprep.mubr.bf16.mxu1 %v2469_v16  ;;  %v10885_v11 = vsel %vm628_vm6, %v2464_v51, %v2463_v54  ;;  %v15553_v38 = vld [vmem:[#allocation8_spill] sm:$0xff] }
  0xdd   :  { %2521 = vmatprep.subr.bf16.mxu1 %v15552_v59  ;;  %v2017_v48 = vrot.slane %v10513_v60, %v15553_v38  ;;  %v2065_v60 = vrot.slane %v10529_v49, %v15553_v38  ;;  %v2113_v46 = vrot.slane %v10533_v34, %v15553_v38  ;;  %v2137_v30 = vrot.slane %v10537_v17, %v15553_v38  ;;  %v15557_v16 = vld [vmem:[#allocation24_spill] sm:$0xff] }
  0xde   :  { %2483 = vmatpush1.bf16.msra.mxu0 %v10872_v24  ;;  %v2161_v19 = vrot.slane %v10539_v56, %v15553_v38  ;;  %v10941_v56 = vld [vmem:[%s15267_s5 + $0x14] ss:$8 sps:$4 sm:$0xff]  }
  0xdf   :  { %2484 = vmatprep.subr.bf16.mxu0 %v10879_v20  ;;  %v2242_v49 = vpack.c.bf16 %v2017_v48, %v2017_v48  ;;  %v2254_v34 = vpack.c.bf16 %v2065_v60, %v2065_v60  ;;  %v2266_v17 = vpack.c.bf16 %v2113_v46, %v2113_v46  ;;  %v8339_v60 = vld [vmem:[%s15268_s1 + $0x63] ss:$8 sm:$0xf] }
  0xe0   :  { %2522 = vmatpush1.bf16.msra.mxu1 %v10388_v42  ;;  %v2041_v42 = vrot.slane %v10525_v55, %v15553_v38  ;;  %v2185_v55 = vrot.slane %v10541_v43, %v15553_v38  ;;  %v2272_v43 = vpack.c.bf16 %v2137_v30, %v2137_v30  ;;  %v2278_v36 = vpack.c.bf16 %v2161_v19, %v2161_v19  ;;  %v15558_v30 = vld [vmem:[#allocation25_spill] sm:$0xff]  ;;  %v8340_v19 = vld [vmem:[%s15268_s1 + $0x63] ss:$8 sm:$0x30] }
  0xe1   :  { %2523 = vmatprep.subr.bf16.mxu1 %v10394_v41  ;;  %v2089_v41 = vrot.slane %v10531_v31, %v15553_v38  ;;  %v10935_v31 = vld [vmem:[%s15267_s5 + $0x20] ss:$8 sps:$4 sm:$0xff]   ;;  %v2338_v3 = vunpack.c.l.b16 %v2242_v49  ;;  %v2350_v58 = vunpack.c.l.b16 %v2254_v34  ;;  %v2362_v51 = vunpack.c.l.b16 %v2266_v17 }
  0xe2   :  { %2485 = vmatpush1.bf16.msra.mxu0 %v10891_v50  ;;  %v2248_v25 = vpack.c.bf16 %v2041_v42, %v2041_v42  ;;  %v2284_v37 = vpack.c.bf16 %v2185_v55, %v2185_v55  ;;  %v2368_v53 = vunpack.c.l.b16 %v2272_v43  ;;  %v2374_v54 = vunpack.c.l.b16 %v2278_v36  ;;  %v10955_v42 = vld [vmem:[%s15267_s5 + $0x4] ss:$8 sps:$4 sm:$0xff]   ;;  %v15559_v49 = vld [vmem:[#allocation26_spill] sm:$0xff] }
  0xe3   :  { %2486 = vmatprep.subr.bf16.mxu0 %v10897_v61  ;;  %v2260_v0 = vpack.c.bf16 %v2089_v41, %v2089_v41  ;;  %v2440_v41 = vrot.slane %v2350_v58, 6  ;;  %v2444_v46 = vrot.slane %v2362_v51, 4  ;;  %v10978_v36 = vld [vmem:[%s15267_s5 + $0xf4] ss:$8 sps:$4 sm:$0xff]  }
  0xe4   :  { %2524 = vmatpush1.bf16.msra.mxu1 %v15554_v52  ;;  %v2344_v23 = vunpack.c.l.b16 %v2248_v25  ;;  %v2380_v59 = vunpack.c.l.b16 %v2284_v37  ;;  %v2446_v55 = vrot.slane %v2368_v53, 3  ;;  %v2448_v34 = vrot.slane %v2374_v54, 2  ;;  %v8337_v58 = vld [vmem:[%s15268_s1 + $0x3] ss:$8 sm:$0xf] }
  0xe5   :  { %2525 = vmatprep.subr.bf16.mxu1 %v15555_v7  ;;  %v2356_v57 = vunpack.c.l.b16 %v2260_v0  ;;  %v10971_v0 = vld [vmem:[%s15267_s5] ss:$8 sps:$4 sm:$0xff]   ;;  %v10981_v37 = vor.u32 %v8340_v19, %v8339_v60  ;;  %v11003_v53 = vld [vmem:[%s15267_s5 + $0xf0] ss:$8 sps:$4 sm:$0xff]  }
  0xe6   :  { %2487 = vmatpush1.bf16.msra.mxu0 %v10907_v4  ;;  %v2438_v48 = vrot.slane %v2344_v23, 7  ;;  %v2450_v43 = vrot.slane %v2380_v59, 1  ;;  %v8343_v54 = vld [vmem:[%s15268_s1 + $0x123] ss:$8 sm:$0xf] }
  0xe7   :  { %2488 = vmatprep.subr.bf16.mxu0 %v10913_v32  ;;  %v2442_v52 = vrot.slane %v2356_v57, 5  ;;  %v8344_v59 = vld [vmem:[%s15268_s1 + $0x123] ss:$8 sm:$0x30] }
  0xe8   :  { %2526 = vmatpush1.bf16.msra.mxu1 %v15556_v45  ;;  %v2439_v7 = vsel %vm610_vm0, %v2438_v48, %v2338_v3  ;;  %v8341_v45 = vld [vmem:[%s15268_s1 + $0xc3] ss:$8 sm:$0xf]  ;;  %v11020_v48 = vld [vmem:[%s15267_s5 + $0xe4] ss:$8 sps:$4 sm:$0xff]  }
  0xe9   :  { %2527 = vmatprep.subr.bf16.mxu1 %v15557_v16  ;;  %v2441_v25 = vsel %vm613_vm1, %v2440_v41, %v2439_v7  ;;  %v8342_v3 = vld [vmem:[%s15268_s1 + $0xc3] ss:$8 sm:$0x30]  ;;  %v2672_v41 = vrot.slane %v10981_v37, %v9607_v47 }
  0xea   :  { %2489 = vmatpush1.bf16.msra.mxu0 %v10935_v31  ;;  %v2443_v17 = vsel %vm616_vm2, %v2442_v52, %v2441_v25  ;;  %v8338_v16 = vld [vmem:[%s15268_s1 + $0x3] ss:$8 sm:$0x30]  ;;  %v11029_v52 = vor.u32 %v8344_v59, %v8343_v54 }
  0xeb   :  { %2490 = vmatprep.subr.bf16.mxu0 %v10941_v56  ;;  %v2445_v23 = vsel %vm619_vm3, %v2444_v46, %v2443_v17  ;;  %v11023_v60 = vor.u32 %v8338_v16, %v8337_v58  ;;  %v8345_v46 = vld [vmem:[%s15268_s1 + $0x183] ss:$8 sm:$0xf] }
  0xec   :  { %2528 = vmatpush1.bf16.msra.mxu1 %v15558_v30  ;;  %v2447_v57 = vsel %vm622_vm4, %v2446_v55, %v2445_v23  ;;  %v8346_v30 = vld [vmem:[%s15268_s1 + $0x183] ss:$8 sm:$0x30]  ;;  %v2888_v55 = vpack.c.bf16 %v2672_v41, %v2672_v41  ;;  %v2720_v17 = vrot.slane %v11029_v52, %v9607_v47 }
  0xed   :  { %2529 = vmatprep.subr.bf16.mxu1 %v15559_v49  ;;  %v2449_v51 = vsel %vm625_vm5, %v2448_v34, %v2447_v57  ;;  %v11040_v19 = vld [vmem:[%s15267_s5 + $0xe0] ss:$8 sps:$4 sm:$0xff]   ;;  %v2648_v7 = vrot.slane %v11023_v60, %v9607_v47  ;;  %v11054_v49 = vor.u32 %v8346_v30, %v8345_v46 }
  0xee   :  { %2491 = vmatpush1.bf16.msra.mxu0 %v10949_v2  ;;  %v8347_v25 = vld [vmem:[%s15268_s1 + $0x1e3] ss:$8 sm:$0xf]  ;;  %v2984_v16 = vunpack.c.l.b16 %v2888_v55 }
  0xef   :  { %2492 = vmatprep.subr.bf16.mxu0 %v10955_v42  ;;  %v8348_v34 = vld [vmem:[%s15268_s1 + $0x1e3] ss:$8 sm:$0x30]  ;;  %v2882_v58 = vpack.c.bf16 %v2648_v7, %v2648_v7  ;;  %v2744_v57 = vrot.slane %v11054_v49, %v9607_v47 }
  0xf0   :  { %2530 = vmatpush1.bf16.msra.mxu1 %v10546_v39  ;;  %v11006_v39 = vor.u32 %v8342_v3, %v8341_v45  ;;  %v11074_v45 = vld [vmem:[%s15267_s5 + $0xc4] ss:$8 sps:$4 sm:$0xff]   ;;  %v11077_v3 = vor.u32 %v8348_v34, %v8347_v25  ;;  %v8350_v23 = vld [vmem:[%s15268_s1 + $0x243] ss:$8 sm:$0x30]  ;;  %v3039_v7 = vrot.slane %v2984_v16, 7 }
  0xf1   :  { %2531 = vmatprep.subr.bf16.mxu1 %v10559_v35  ;;  %v11015_v35 = vsel %vm628_vm6, %v2450_v43, %v2449_v51  ;;  %v11068_v43 = vld [vmem:[%s15267_s5 + $0xd0] ss:$8 sps:$4 sm:$0xff]   ;;  %v2900_v51 = vpack.c.bf16 %v2720_v17, %v2720_v17  ;;  %v11092_v54 = vld [vmem:[%s15267_s5 + $0xc0] ss:$8 sps:$4 sm:$0xff]   ;;  %v2906_v55 = vpack.c.bf16 %v2744_v57, %v2744_v57 }
  0xf2   :  { %2493 = vmatpush1.bf16.msra.mxu0 %v10971_v0  ;;  %v8351_v41 = vld [vmem:[%s15268_s1 + $0x2a3] ss:$8 sm:$0xf]  ;;  %v2768_v30 = vrot.slane %v11077_v3, %v9607_v47 }
  0xf3   :  { %2494 = vmatprep.subr.bf16.mxu0 %v10978_v36  ;;  %v2996_v34 = vunpack.c.l.b16 %v2900_v51  ;;  %v11118_v17 = vld [vmem:[%s15267_s5 + $0xb0] ss:$8 sps:$4 sm:$0xff]  }
  0xf4   :  { %2532 = vmatpush1.bf16.msra.mxu1 %v10582_v9  ;;  %v2696_v9 = vrot.slane %v11006_v39, %v9607_v47  ;;  %v15560_v51 = vld [vmem:[#allocation14_spill] sm:$0xff] }
  0xf5   :  { %2533 = vmatprep.subr.bf16.mxu1 %v10588_v28  ;;  %v11048_v28 = vld [vmem:[%s15267_s5 + $0xd4] ss:$8 sps:$4 sm:$0xff]   ;;  %v3043_v57 = vrot.slane %v2996_v34, 5 }
  0xf6   :  { %2495 = vmatpush2.bf16.msra.mxu0 %v11003_v53 }
  0xf7   :  { %2496 = vmatprep.subr.bf16.mxu0 %v11020_v48 }
  0xf8   :  { %2534 = vmatpush1.bf16.msra.mxu1 %v10598_v5  ;;  %v2894_v5 = vpack.c.bf16 %v2696_v9, %v2696_v9  ;;  %v2978_v9 = vunpack.c.l.b16 %v2882_v58  ;;  %v3002_v58 = vunpack.c.l.b16 %v2906_v55  ;;  %v15563_v55 = vld [vmem:[#allocation18_spill] sm:$0xff] }
  0xf9   :  { %2535 = vmatprep.subr.bf16.mxu1 %v10604_v1  ;;  %v8349_v1 = vld [vmem:[%s15268_s1 + $0x243] ss:$8 sm:$0xf] }
  0xfa   :  { %2497 = vmatpush2.bf16.msra.mxu0 %v11040_v19  ;;  %v11095_v59 = vor.u32 %v8350_v23, %v8349_v1  ;;  %v2990_v46 = vunpack.c.l.b16 %v2894_v5  ;;  %v3040_v23 = vsel %vm610_vm0, %v3039_v7, %v2978_v9  ;;  %v15562_v9 = vld [vmem:[#allocation17_spill] sm:$0xff] }
  0xfb   :  { %2498 = vmatprep.subr.bf16.mxu0 %v11048_v28 }
  0xfc   :  { %2536 = vmatpush2.bf16.msra.mxu1 %v10627_v6  ;;  %v8352_v6 = vld [vmem:[%s15268_s1 + $0x2a3] ss:$8 sm:$0x30]  ;;  %v2792_v5 = vrot.slane %v11095_v59, %v9607_v47  ;;  %v3041_v1 = vrot.slane %v2990_v46, 6 }
  0xfd   :  { %2537 = vmatprep.subr.bf16.mxu1 %v10634_v8  ;;  %v11106_v8 = vld [vmem:[%s15267_s5 + $0xb4] ss:$8 sps:$4 sm:$0xff]   ;;  %v11113_v25 = vor.u32 %v8352_v6, %v8351_v41  ;;  %v15561_v46 = vld [vmem:[#allocation15_spill] sm:$0xff] }
  0xfe   :  { %2499 = vmatpush2.bf16.msra.mxu0 %v11068_v43  ;;  %v2918_v41 = vpack.c.bf16 %v2792_v5, %v2792_v5  ;;  %v3042_v6 = vsel %vm613_vm1, %v3041_v1, %v3040_v23 }
  0xff   :  { %2500 = vmatprep.subr.bf16.mxu0 %v11074_v45  ;;  %v2816_v16 = vrot.slane %v11113_v25, %v9607_v47 }
 0x100   :  { %2538 = vmatpush2.bf16.msra.mxu1 %v10649_v21  ;;  %v11126_v21 = vld [vmem:[%s15267_s5 + $0xa4] ss:$8 sps:$4 sm:$0xff]   ;;  %v3014_v7 = vunpack.c.l.b16 %v2918_v41 }
 0x101   :  { %2539 = vmatprep.subr.bf16.mxu1 %v10657_v12  ;;  %v2912_v12 = vpack.c.bf16 %v2768_v30, %v2768_v30  ;;  %v3045_v30 = vrot.slane %v3002_v58, 4  ;;  %v15565_v58 = vld [vmem:[#allocation20_spill] sm:$0xff] }
 0x102   :  { %2501 = vmatpush2.bf16.msra.mxu0 %v11092_v54  ;;  %v3049_v23 = vrot.slane %v3014_v7, 2 }
 0x103   :  { %2502 = vmatprep.subr.bf16.mxu0 %v11106_v8  ;;  %v3008_v38 = vunpack.c.l.b16 %v2912_v12  ;;  %v2471_v12 = vpack.c.b16 %v10885_v11, %v10885_v11  ;;  %v11160_v11 = vld [vmem:[%s15267_s5 + $0x270] ss:$8 sps:$4 sm:$0xff]  }
 0x104   :  { %2540 = vmatpush2.bf16.msra.mxu1 %v10676_v40  ;;  %v2924_v40 = vpack.c.bf16 %v2816_v16, %v2816_v16  ;;  %v15566_v16 = vld [vmem:[#allocation27_spill] sm:$0xff] }
 0x105   :  { %2541 = vmatprep.subr.bf16.mxu1 %v10689_v13  ;;  %v3044_v13 = vsel %vm616_vm2, %v3043_v57, %v3042_v6  ;;  %v3047_v34 = vrot.slane %v3008_v38, 3  ;;  %v11167_v6 = vld [vmem:[%s15267_s5 + $0x264] ss:$8 sps:$4 sm:$0xff]  }
 0x106   :  { %2503 = vmatpush2.bf16.msra.mxu0 %v11118_v17  ;;  %v3046_v5 = vsel %vm619_vm3, %v3045_v30, %v3044_v13  ;;  %v3020_v1 = vunpack.c.l.b16 %v2924_v40  ;;  %v15570_v40 = vld [vmem:[#allocation9_spill] sm:$0xff] }
 0x107   :  { %2504 = vmatprep.subr.bf16.mxu0 %v11126_v21  ;;  %v3048_v38 = vsel %vm622_vm4, %v3047_v34, %v3046_v5  ;;  %v11190_v34 = vld [vmem:[%s15267_s5 + $0x254] ss:$8 sps:$4 sm:$0xff]  }
 0x108   :  { %2542 = vmatpush2.bf16.msra.mxu1 %v10703_v29  ;;  %v2466_v29 = vpack.c.b16 %v10769_v22, %v10769_v22  ;;  %v3051_v57 = vrot.slane %v3020_v1, 1 }
 0x109   :  { %2543 = vmatprep.subr.bf16.mxu1 %v10712_v26  ;;  %v15564_v26 = vld [vmem:[#allocation19_spill] sm:$0xff] }
 0x10a   :  { %2505 = vmatpush2.bf16.msra.mxu0 %v15560_v51  ;;  %v3050_v51 = vsel %vm625_vm5, %v3049_v23, %v3048_v38  ;;  %v11206_v38 = vld [vmem:[%s15267_s5 + $0x244] ss:$8 sps:$4 sm:$0xff]  }
 0x10b   :  { %2506 = vmatprep.subr.bf16.mxu0 %v15561_v46  ;;  %v15568_v46 = vld [vmem:[#allocation5_spill] sm:$0xff] }
 0x10c   :  { %2544 = vmatpush2.bf16.msra.mxu1 %v10721_v15  ;;  %v15567_v15 = vld [vmem:[#allocation28_spill] sm:$0xff] }
 0x10d   :  { %2545 = vmatprep.subr.bf16.mxu1 %v10729_v14  ;;  %v174_v14 = vld [vmem:[%s15269_s6] sm:$0x3] }
 0x10e   :  { %2507 = vmatpush2.bf16.msra.mxu0 %v15562_v9  ;;  %v11172_v30 = vrot.slane %v174_v14, %v15568_v46  ;;  %v3052_v9 = vsel %vm628_vm6, %v3051_v57, %v3050_v51  ;;  %v11177_v7 = vrot.slane %v174_v14, %v9607_v47  ;;  %v11224_v51 = vld [vmem:[%s15267_s5 + $0x234] ss:$8 sps:$4 sm:$0xff]  }
 0x10f   :  { %2508 = vmatprep.subr.bf16.mxu0 %v15563_v55  ;;  %v11182_v55 = vld [vmem:[%s15267_s5 + $0x260] ss:$8 sps:$4 sm:$0xff]  }
 0x110   :  { %2546 = vmatpush2.bf16.msra.mxu1 %v15566_v16  ;;  %v1226_v22 = vpop.f32.mrf.mxu0  ;;  %15569 = vst [vmem:[#allocation12_spill] sm:$0xff] %v11172_v30  ;;  %15571 = vst [vmem:[#allocation13_spill] sm:$0xff] %v11177_v7 }
 0x111   :  { %2547 = vmatprep.subr.bf16.mxu1 %v15567_v15  ;;  %v1227_v1 = vadd.f32 %v1226_v22, %v11172_v30  ;;  %v11218_v22 = vld [vmem:[%s15267_s5 + $0x240] ss:$8 sps:$4 sm:$0xff]  }
 0x112   :  { %2509 = vmatpush2.bf16.msra.mxu0 %v15564_v26  ;;  %v1228_v41 = vpop.f32.mrf.mxu0  ;;  %v3110_v26 = vpack.c.b16 %v3052_v9, %v3052_v9 }
 0x113   :  { %2560 = vmatprep.subr.bf16.mxu0 %v15565_v58  ;;  %v1229_v23 = vadd.f32 %v1228_v41, %v11177_v7  ;;  %v11238_v41 = vld [vmem:[%s15267_s5 + $0x224] ss:$8 sps:$4 sm:$0xff]   ;;  %v2712_v7 = vrot.slane %v11006_v39, %v15545_v10 }
 0x114   :  { %2548 = vmatpush2.bf16.msra.mxu1 %v10774_v27  ;;  %v1230_v13 = vpop.f32.mrf.mxu0  ;;  %v2468_v27 = vpack.c.b16 %v10838_v33, %v10838_v33  ;;  %v11200_v33 = vld [vmem:[%s15267_s5 + $0x250] ss:$8 sps:$4 sm:$0xff]  }
 0x115   :  { %2511 = vmatmul.mubr.bf16.vlgmr.msra.gmra.mxu0 %v2466_v29  ;;  %2549 = vmatprep.subr.bf16.mxu1 %v15570_v40  ;;  %v15572_v29 = vld [vmem:[#allocation10_spill] sm:$0xff]  ;;  %v11268_v13 = vld [vmem:[%s15267_s5 + $0x204] ss:$8 sps:$4 sm:$0xff]  }
 0x116   :  { %2561 = vmatpush1.bf16.msra.mxu0 %v11160_v11  ;;  %2592 = vmatprep.mubr.bf16.mxu0 %v2471_v12  ;;  %v1231_v5 = vpop.f32.mrf.mxu0  ;;  %v15573_v12 = vld [vmem:[#allocation11_spill] sm:$0xff]  ;;  %v11262_v40 = vld [vmem:[%s15267_s5 + $0x210] ss:$8 sps:$4 sm:$0xff]   ;;  %15577 = vst [vmem:[#allocation22_spill] sm:$0xff] %v11268_v13 }
 0x117   :  { %2562 = vmatprep.subr.bf16.mxu0 %v11167_v6  ;;  %15576 = vst [vmem:[#allocation21_spill] sm:$0xff] %v11262_v40 }
 0x118   :  { %2550 = vmatpush2.bf16.msra.mxu1 %v15572_v29 }
 0x119   :  { %3121 = vmatprep.subr.bf16.mxu1 %v15573_v12  ;;  %v1267_v58 = vpop.f32.mrf.mxu1  ;;  %v2668_v12 = vrot.slane %v10981_v37, %v15568_v46 }
 0x11a   :  { %2563 = vmatpush1.bf16.msra.mxu0 %v11182_v55  ;;  %v11209_v16 = vadd.f32 %v1267_v58, %v1227_v1  ;;  %v2688_v58 = vrot.slane %v10981_v37, %v15545_v10 }
 0x11b   :  { %2564 = vmatprep.subr.bf16.mxu0 %v11190_v34  ;;  %2552 = vmatmul.mubr.bf16.vlgmr.msra.gmra.mxu1 %v2468_v27  ;;  %v1269_v15 = vpop.f32.mrf.mxu1  ;;  %v11280_v27 = vld [vmem:[%s15267_s5 + $0x200] ss:$8 sps:$4 sm:$0xff]  }
 0x11c   :  { %3122 = vmatpush1.bf16.msra.mxu1 %v10831_v44  ;;  %3153 = vmatprep.mubr.bf16.mxu1 %v3110_v26  ;;  %v11213_v14 = vadd.f32 %v1269_v15, %v1229_v23  ;;  %15578 = vst [vmem:[#allocation23_spill] sm:$0xff] %v11280_v27  ;;  %v11296_v26 = vld [vmem:[%s15267_s5 + $0x2f0] ss:$8 sps:$4 sm:$0xff]   ;;  %v2644_v15 = vrot.slane %v11023_v60, %v15568_v46 }
 0x11d   :  { %3123 = vmatprep.subr.bf16.mxu1 %v10843_v62  ;;  %v1271_v57 = vpop.f32.mrf.mxu1  ;;  %v11232_v62 = vld [vmem:[%s15267_s5 + $0x230] ss:$8 sps:$4 sm:$0xff]   ;;  %15580 = vst [vmem:[#allocation25_spill] sm:$0xff] %v11296_v26 }
 0x11e   :  { %2565 = vmatpush1.bf16.msra.mxu0 %v11200_v33  ;;  %v2692_v57 = vrot.slane %v11006_v39, %v15568_v46 }
 0x11f   :  { %2566 = vmatprep.subr.bf16.mxu0 %v11206_v38  ;;  %v1272_v44 = vpop.f32.mrf.mxu1 }
 0x120   :  { %3124 = vmatpush1.bf16.msra.mxu1 %v10852_v18  ;;  %v11246_v18 = vld [vmem:[%s15267_s5 + $0x220] ss:$8 sps:$4 sm:$0xff]  }
 0x121   :  { %3125 = vmatprep.subr.bf16.mxu1 %v10861_v63  ;;  %v11252_v63 = vld [vmem:[%s15267_s5 + $0x214] ss:$8 sps:$4 sm:$0xff]  }
 0x122   :  { %2567 = vmatpush1.bf16.msra.mxu0 %v11218_v22  ;;  %15574 = vst [vmem:[#allocation16_spill] sm:$0xff] %v11252_v63 }
 0x123   :  { %2568 = vmatprep.subr.bf16.mxu0 %v11224_v51 }
 0x124   :  { %3126 = vmatpush1.bf16.msra.mxu1 %v10872_v24  ;;  %v15575_v24 = vld [vmem:[#allocation4_spill] sm:$0xff] }
 0x125   :  { %3127 = vmatprep.subr.bf16.mxu1 %v10879_v20  ;;  %v2680_v20 = vrot.slane %v10981_v37, %v15575_v24  ;;  %v2752_v23 = vrot.slane %v11054_v49, %v15575_v24 }
 0x126   :  { %2569 = vmatpush1.bf16.msra.mxu0 %v11232_v62 }
 0x127   :  { %2570 = vmatprep.subr.bf16.mxu0 %v11238_v41  ;;  %v2890_v9 = vpack.c.bf16 %v2680_v20, %v2680_v20  ;;  %v2716_v20 = vrot.slane %v11029_v52, %v15568_v46 }
 0x128   :  { %3128 = vmatpush1.bf16.msra.mxu1 %v10891_v50  ;;  %v2704_v50 = vrot.slane %v11006_v39, %v15575_v24 }
 0x129   :  { %3129 = vmatprep.subr.bf16.mxu1 %v10897_v61  ;;  %v2656_v61 = vrot.slane %v11023_v60, %v15575_v24  ;;  %v2986_v1 = vunpack.c.l.b16 %v2890_v9 }
 0x12a   :  { %2571 = vmatpush1.bf16.msra.mxu0 %v11246_v18  ;;  %v2896_v5 = vpack.c.bf16 %v2704_v50, %v2704_v50  ;;  %v2776_v50 = vrot.slane %v11077_v3, %v15575_v24 }
 0x12b   :  { %2572 = vmatprep.subr.bf16.mxu0 %v11252_v63  ;;  %v2884_v29 = vpack.c.bf16 %v2656_v61, %v2656_v61  ;;  %v3067_v9 = vrot.slane %v2986_v1, 7  ;;  %v11341_v1 = vrot.slane %v11077_v3, %v15568_v46 }
 0x12c   :  { %3130 = vmatpush1.bf16.msra.mxu1 %v10907_v4  ;;  %v11286_v4 = vld [vmem:[%s15267_s5 + $0x2f4] ss:$8 sps:$4 sm:$0xff]   ;;  %v2992_v44 = vunpack.c.l.b16 %v2896_v5  ;;  %v2908_v5 = vpack.c.bf16 %v2752_v23, %v2752_v23  ;;  %v11348_v23 = vrot.slane %v11095_v59, %v15568_v46 }
 0x12d   :  { %3131 = vmatprep.subr.bf16.mxu1 %v10913_v32  ;;  %15579 = vst [vmem:[#allocation24_spill] sm:$0xff] %v11286_v4  ;;  %v2728_v32 = vrot.slane %v11029_v52, %v15575_v24  ;;  %v2980_v61 = vunpack.c.l.b16 %v2884_v29  ;;  %v11336_v29 = vld [vmem:[%s15267_s5 + $0x2d4] ss:$8 sps:$4 sm:$0xff]  }
 0x12e   :  { %2573 = vmatpush1.bf16.msra.mxu0 %v11262_v40  ;;  %15583 = vst [vmem:[#allocation15_spill] sm:$0xff] %v11336_v29  ;;  %v3004_v40 = vunpack.c.l.b16 %v2908_v5  ;;  %v2760_v5 = vrot.slane %v11054_v49, %v15545_v10 }
 0x12f   :  { %2574 = vmatprep.subr.bf16.mxu0 %v11268_v13 }
 0x130   :  { %3132 = vmatpush1.bf16.msra.mxu1 %v10935_v31  ;;  %v11306_v31 = vld [vmem:[%s15267_s5 + $0x2e4] ss:$8 sps:$4 sm:$0xff]  }
 0x131   :  { %3133 = vmatprep.subr.bf16.mxu1 %v10941_v56  ;;  %15581 = vst [vmem:[#allocation26_spill] sm:$0xff] %v11306_v31  ;;  %v2902_v56 = vpack.c.bf16 %v2728_v32, %v2728_v32  ;;  %v11329_v32 = vrot.slane %v11054_v49, %v15568_v46 }
 0x132   :  { %2575 = vmatpush1.bf16.msra.mxu0 %v11280_v27  ;;  %v2914_v27 = vpack.c.bf16 %v2776_v50, %v2776_v50 }
 0x133   :  { %2576 = vmatprep.subr.bf16.mxu0 %v11286_v4  ;;  %v2998_v30 = vunpack.c.l.b16 %v2902_v56  ;;  %v2893_v4 = vpack.c.bf16 %v2692_v57, %v2692_v57  ;;  %v3068_v56 = vsel %vm610_vm0, %v3067_v9, %v2980_v61  ;;  %v2824_v57 = vrot.slane %v11113_v25, %v15575_v24 }
 0x134   :  { %3134 = vmatpush1.bf16.msra.mxu1 %v10949_v2  ;;  %v11324_v2 = vld [vmem:[%s15267_s5 + $0x2e0] ss:$8 sps:$4 sm:$0xff]   ;;  %v3010_v63 = vunpack.c.l.b16 %v2914_v27 }
 0x135   :  { %3135 = vmatprep.subr.bf16.mxu1 %v10955_v42  ;;  %15582 = vst [vmem:[#allocation14_spill] sm:$0xff] %v11324_v2  ;;  %v2887_v42 = vpack.c.bf16 %v2668_v12, %v2668_v12  ;;  %v2892_v12 = vpack.c.bf16 %v2688_v58, %v2688_v58  ;;  %v2736_v58 = vrot.slane %v11029_v52, %v15545_v10  ;;  %v3071_v50 = vrot.slane %v2998_v30, 5  ;;  %v11380_v30 = vld [vmem:[%s15267_s5 + $0x2c0] ss:$8 sps:$4 sm:$0xff]  }
 0x136   :  { %2577 = vmatpush2.bf16.msra.mxu0 %v11296_v26  ;;  %v2800_v26 = vrot.slane %v11095_v59, %v15575_v24  ;;  %v2926_v27 = vpack.c.bf16 %v2824_v57, %v2824_v57 }
 0x137   :  { %2578 = vmatprep.subr.bf16.mxu0 %v11306_v31  ;;  %v2881_v31 = vpack.c.bf16 %v2644_v15, %v2644_v15  ;;  %v2899_v15 = vpack.c.bf16 %v2716_v20, %v2716_v20  ;;  %v2983_v13 = vunpack.c.l.b16 %v2887_v42  ;;  %v2988_v9 = vunpack.c.l.b16 %v2892_v12 }
 0x138   :  { %3136 = vmatpush1.bf16.msra.mxu1 %v10971_v0  ;;  %v11359_v0 = vld [vmem:[%s15267_s5 + $0x2d0] ss:$8 sps:$4 sm:$0xff]   ;;  %v2905_v20 = vpack.c.bf16 %v11329_v32, %v11329_v32  ;;  %v2920_v42 = vpack.c.bf16 %v2800_v26, %v2800_v26  ;;  %v2904_v24 = vpack.c.bf16 %v2736_v58, %v2736_v58  ;;  %v3073_v26 = vrot.slane %v3004_v40, 4 }
 0x139   :  { %3137 = vmatprep.subr.bf16.mxu1 %v10978_v36  ;;  %15584 = vst [vmem:[#allocation17_spill] sm:$0xff] %v11359_v0  ;;  %v11365_v36 = vld [vmem:[%s15267_s5 + $0x2c4] ss:$8 sps:$4 sm:$0xff]   ;;  %v2812_v40 = vrot.slane %v11113_v25, %v15568_v46  ;;  %v2911_v58 = vpack.c.bf16 %v11341_v1, %v11341_v1  ;;  %v3022_v1 = vunpack.c.l.b16 %v2926_v27 }
 0x13a   :  { %2579 = vmatpush2.bf16.msra.mxu0 %v11324_v2  ;;  %v2664_v2 = vrot.slane %v11023_v60, %v15545_v10  ;;  %15585 = vst [vmem:[#allocation18_spill] sm:$0xff] %v11365_v36  ;;  %v3016_v12 = vunpack.c.l.b16 %v2920_v42  ;;  %v3000_v57 = vunpack.c.l.b16 %v2904_v24  ;;  %v3001_v24 = vunpack.c.l.b16 %v2905_v20 }
 0x13b   :  { %2580 = vmatprep.subr.bf16.mxu0 %v11336_v29  ;;  %v3069_v29 = vrot.slane %v2992_v44, 6  ;;  %v2898_v44 = vpack.c.bf16 %v2712_v7, %v2712_v7  ;;  %v2832_v20 = vrot.slane %v11113_v25, %v15545_v10 }
 0x13c   :  { %v2886_v61 = vpack.c.bf16 %v2664_v2, %v2664_v2  ;;  %3138 = vmatpush2.bf16.msra.mxu1 %v11003_v53  ;;  %v3025_v53 = vrot.slane %v2983_v13, 7  ;;  %v2784_v2 = vrot.slane %v11077_v3, %v15545_v10  ;;  %v2995_v13 = vunpack.c.l.b16 %v2899_v15 }
 0x13d   :  { %v3070_v7 = vsel %vm613_vm1, %v3069_v29, %v3068_v56  ;;  %3139 = vmatprep.subr.bf16.mxu1 %v11020_v48  ;;  %v2994_v32 = vunpack.c.l.b16 %v2898_v44  ;;  %v11388_v48 = vld [vmem:[%s15267_s5 + $0x2b4] ss:$8 sps:$4 sm:$0xff]   ;;  %v3095_v29 = vrot.slane %v2988_v9, 7  ;;  %v2910_v56 = vpack.c.bf16 %v2760_v5, %v2760_v5 }
 0x13e   :  { %2581 = vmatpush2.bf16.msra.mxu0 %v11359_v0  ;;  %v2989_v0 = vunpack.c.l.b16 %v2893_v4  ;;  %15586 = vst [vmem:[#allocation19_spill] sm:$0xff] %v11388_v48  ;;  %v3072_v4 = vsel %vm616_vm2, %v3071_v50, %v3070_v7  ;;  %v11401_v50 = vld [vmem:[%s15267_s5 + $0x2b0] ss:$8 sps:$4 sm:$0xff]   ;;  %v3029_v42 = vrot.slane %v2995_v13, 5  ;;  %v3077_v7 = vrot.slane %v3016_v12, 2 }
 0x13f   :  { %2582 = vmatprep.subr.bf16.mxu0 %v11365_v36  ;;  %v2977_v36 = vunpack.c.l.b16 %v2881_v31  ;;  %v2982_v31 = vunpack.c.l.b16 %v2886_v61  ;;  %v3074_v15 = vsel %vm619_vm3, %v3073_v26, %v3072_v4  ;;  %v3097_v61 = vrot.slane %v2994_v32, 6 }
 0x140   :  { %3140 = vmatpush2.bf16.msra.mxu1 %v11040_v19  ;;  %v3027_v44 = vrot.slane %v2989_v0, 6  ;;  %v2916_v0 = vpack.c.bf16 %v2784_v2, %v2784_v2  ;;  %v3006_v5 = vunpack.c.l.b16 %v2910_v56  ;;  %v3099_v2 = vrot.slane %v3000_v57, 5 }
 0x141   :  { %3141 = vmatprep.subr.bf16.mxu1 %v11048_v28  ;;  %v3026_v19 = vsel %vm610_vm0, %v3025_v53, %v2977_v36  ;;  %v2808_v28 = vrot.slane %v11095_v59, %v15545_v10  ;;  %v3096_v9 = vsel %vm610_vm0, %v3095_v29, %v2982_v31  ;;  %v2917_v36 = vpack.c.bf16 %v11348_v23, %v11348_v23 }
 0x142   :  { %2583 = vmatpush2.bf16.msra.mxu0 %v11380_v30  ;;  %v3028_v53 = vsel %vm613_vm1, %v3027_v44, %v3026_v19  ;;  %v3007_v23 = vunpack.c.l.b16 %v2911_v58  ;;  %v3098_v27 = vsel %vm613_vm1, %v3097_v61, %v3096_v9  ;;  %v3079_v4 = vrot.slane %v3022_v1, 1  ;;  %v11444_v19 = vld [vmem:[%s15267_s5 + $0x290] ss:$8 sps:$4 sm:$0xff]  }
 0x143   :  { %2584 = vmatprep.subr.bf16.mxu0 %v11388_v48  ;;  %v3075_v48 = vrot.slane %v3010_v63, 3  ;;  %v11411_v63 = vld [vmem:[%s15267_s5 + $0x2a4] ss:$8 sps:$4 sm:$0xff]   ;;  %v2922_v32 = vpack.c.bf16 %v2808_v28, %v2808_v28  ;;  %v3012_v31 = vunpack.c.l.b16 %v2916_v0  ;;  %v2923_v29 = vpack.c.bf16 %v2812_v40, %v2812_v40 }
 0x144   :  { %3142 = vmatpush2.bf16.msra.mxu1 %v11068_v43  ;;  %v11426_v43 = vld [vmem:[%s15267_s5 + $0x2a0] ss:$8 sps:$4 sm:$0xff]   ;;  %v3030_v13 = vsel %vm616_vm2, %v3029_v42, %v3028_v53  ;;  %v3101_v56 = vrot.slane %v3006_v5, 4  ;;  %v3013_v58 = vunpack.c.l.b16 %v2917_v36  ;;  %v2928_v44 = vpack.c.bf16 %v2832_v20, %v2832_v20  ;;  %v11483_v20 = vld [vmem:[%s15267_s5 + $0x94] ss:$8 sps:$4 sm:$0xff]  }
 0x145   :  { %3143 = vmatprep.subr.bf16.mxu1 %v11074_v45  ;;  %v3076_v26 = vsel %vm622_vm4, %v3075_v48, %v3074_v15  ;;  %v11433_v45 = vld [vmem:[%s15267_s5 + $0x294] ss:$8 sps:$4 sm:$0xff]   ;;  %v3031_v48 = vrot.slane %v3001_v24, 4  ;;  %v3100_v57 = vsel %vm616_vm2, %v3099_v2, %v3098_v27  ;;  %v3018_v40 = vunpack.c.l.b16 %v2922_v32  ;;  %v11450_v15 = vld [vmem:[%s15267_s5 + $0x284] ss:$8 sps:$4 sm:$0xff]   ;;  %15588 = vst [vmem:[#allocation27_spill] sm:$0xff] %v11483_v20 }
 0x146   :  { %2585 = vmatpush2.bf16.msra.mxu0 %v11401_v50  ;;  %v3078_v12 = vsel %vm625_vm5, %v3077_v7, %v3076_v26  ;;  %v3103_v61 = vrot.slane %v3012_v31, 3  ;;  %v3019_v24 = vunpack.c.l.b16 %v2923_v29  ;;  %v3102_v1 = vsel %vm619_vm3, %v3101_v56, %v3100_v57  ;;  %v11463_v42 = vld [vmem:[%s15267_s5 + $0x280] ss:$8 sps:$4 sm:$0xff]   ;;  %v11500_v29 = vld [vmem:[%s15267_s5 + $0x164] ss:$8 sps:$4 sm:$0xff]  }
 0x147   :  { %2586 = vmatprep.subr.bf16.mxu0 %v11411_v63  ;;  %v3080_v28 = vsel %vm628_vm6, %v3079_v4, %v3078_v12  ;;  %v2470_v0 = vpack.c.b16 %v11015_v35, %v11015_v35  ;;  %v3035_v9 = vrot.slane %v3013_v58, 2  ;;  %v3024_v36 = vunpack.c.l.b16 %v2928_v44  ;;  %v11477_v53 = vld [vmem:[%s15267_s5 + $0xa0] ss:$8 sps:$4 sm:$0xff]   ;;  %v11516_v56 = vld [vmem:[%s15267_s5 + $0x84] ss:$8 sps:$4 sm:$0xff]  }
 0x148   :  { %3144 = vmatpush2.bf16.msra.mxu1 %v11092_v54  ;;  %v3033_v54 = vrot.slane %v3007_v23, 3  ;;  %v3105_v5 = vrot.slane %v3018_v40, 2  ;;  %v3104_v35 = vsel %vm622_vm4, %v3103_v61, %v3102_v1  ;;  %15587 = vst [vmem:[#allocation20_spill] sm:$0xff] %v11477_v53  ;;  %v3037_v26 = vrot.slane %v3019_v24, 1  ;;  %15592 = vst [vmem:[#allocation11_spill] sm:$0xff] %v11516_v56 }
 0x149   :  { %3145 = vmatprep.subr.bf16.mxu1 %v11106_v8  ;;  %v3032_v8 = vsel %vm619_vm3, %v3031_v48, %v3030_v13  ;;  %v3107_v32 = vrot.slane %v3024_v36, 1  ;;  %v11493_v48 = vld [vmem:[%s15267_s5 + $0x170] ss:$8 sps:$4 sm:$0xff]   ;;  %v11523_v57 = vld [vmem:[%s15267_s5 + $0x160] ss:$8 sps:$4 sm:$0xff]  }
 0x14a   :  { %2587 = vmatpush2.bf16.msra.mxu0 %v11426_v43  ;;  %v3034_v7 = vsel %vm622_vm4, %v3033_v54, %v3032_v8  ;;  %v3106_v4 = vsel %vm625_vm5, %v3105_v5, %v3104_v35  ;;  %v11535_v8 = vld [vmem:[%s15267_s5 + $0x80] ss:$8 sps:$4 sm:$0xff]   ;;  %v11541_v61 = vld [vmem:[%s15267_s5 + $0x274] ss:$8 sps:$4 sm:$0xff]   ;;  %v11547_v24 = vld [vmem:[%s15267_s5 + $0x150] ss:$8 sps:$4 sm:$0xff]  }
 0x14b   :  { %2588 = vmatprep.subr.bf16.mxu0 %v11433_v45  ;;  %v3036_v23 = vsel %vm625_vm5, %v3035_v9, %v3034_v7  ;;  %v3108_v44 = vsel %vm628_vm6, %v3107_v32, %v3106_v4  ;;  %15593 = vst [vmem:[#allocation29_spill] sm:$0xff] %v11535_v8  ;;  %15594 = vst [vmem:[#allocation30_spill] sm:$0xff] %v11541_v61  ;;  %v11565_v36 = vld [vmem:[%s15267_s5 + $0x140] ss:$8 sps:$4 sm:$0xff]  }
 0x14c   :  { %3146 = vmatpush2.bf16.msra.mxu1 %v11118_v17  ;;  %v3112_v17 = vpack.c.b16 %v3080_v28, %v3080_v28  ;;  %v3038_v13 = vsel %vm628_vm6, %v3037_v26, %v3036_v23  ;;  %v3114_v28 = vpack.c.b16 %v3108_v44, %v3108_v44  ;;  %v15595_v7 = vld [vmem:[#allocation6_spill] sm:$0xff] }
 0x14d   :  { %3147 = vmatprep.subr.bf16.mxu1 %v11126_v21  ;;  %v11470_v21 = vld [vmem:[%s15267_s5 + $0x174] ss:$8 sps:$4 sm:$0xff]   ;;  %v3109_v54 = vpack.c.b16 %v3038_v13, %v3038_v13  ;;  %v2700_v35 = vrot.slane %v11006_v39, %v15595_v7  ;;  %v11583_v26 = vld [vmem:[%s15267_s5 + $0x130] ss:$8 sps:$4 sm:$0xff]   ;;  %v2652_v32 = vrot.slane %v11023_v60, %v15595_v7  ;;  %v2724_v4 = vrot.slane %v11029_v52, %v15595_v7 }
 0x14e   :  { %2589 = vmatpush2.bf16.msra.mxu0 %v11444_v19  ;;  %15597 = vst [vmem:[#allocation32_spill] sm:$0xff] %v11583_v26  ;;  %v8355_v23 = vld [vmem:[%s15268_s1 + $0x64] ss:$8 sm:$0xf]  ;;  %v2772_v13 = vrot.slane %v11077_v3, %v15595_v7 }
 0x14f   :  { %2590 = vmatprep.subr.bf16.mxu0 %v11450_v15  ;;  %v2895_v44 = vpack.c.bf16 %v2700_v35, %v2700_v35  ;;  %v2883_v35 = vpack.c.bf16 %v2652_v32, %v2652_v32  ;;  %v2820_v32 = vrot.slane %v11113_v25, %v15595_v7 }
 0x150   :  { %3148 = vmatpush2.bf16.msra.mxu1 %v11477_v53 }
 0x151   :  { %3149 = vmatprep.subr.bf16.mxu1 %v11483_v20 }
 0x152   :  { %2591 = vmatpush2.bf16.msra.mxu0 %v11463_v42  ;;  %v1308_v2 = vpop.f32.mrf.mxu0 }
 0x153   :  { %3162 = vmatprep.subr.bf16.mxu0 %v11470_v21  ;;  %v11488_v27 = vadd.f32 %v1308_v2, %v11209_v16  ;;  %v11506_v16 = vld [vmem:[%s15267_s5 + $0x90] ss:$8 sps:$4 sm:$0xff]  }
 0x154   :  { %v1310_v31 = vpop.f32.mrf.mxu0  ;;  %15590 = vst [vmem:[#allocation9_spill] sm:$0xff] %v11506_v16  ;;  %3150 = vmatpush2.bf16.msra.mxu1 %v11506_v16 }
 0x155   :  { %2593 = vmatmul.mubr.bf16.vlgmr.msra.gmra.mxu0 %v2470_v0  ;;  %15589 = vst [vmem:[#allocation28_spill] sm:$0xff] %v11488_v27  ;;  %v11511_v12 = vadd.f32 %v1310_v31, %v11213_v14  ;;  %3151 = vmatprep.subr.bf16.mxu1 %v11516_v56  ;;  %v11529_v14 = vld [vmem:[%s15267_s5 + $0x154] ss:$8 sps:$4 sm:$0xff]   ;;  %v11555_v0 = vld [vmem:[%s15267_s5 + $0x144] ss:$8 sps:$4 sm:$0xff]   ;;  %v2748_v31 = vrot.slane %v11054_v49, %v15595_v7 }
 0x156   :  { %3163 = vmatpush1.bf16.msra.mxu0 %v11493_v48  ;;  %3194 = vmatprep.mubr.bf16.mxu0 %v3112_v17  ;;  %v1312_v58 = vpop.f32.mrf.mxu0  ;;  %v2676_v17 = vrot.slane %v10981_v37, %v15595_v7 }
 0x157   :  { %3164 = vmatprep.subr.bf16.mxu0 %v11500_v29  ;;  %15591 = vst [vmem:[#allocation10_spill] sm:$0xff] %v11511_v12  ;;  %v2796_v58 = vrot.slane %v11095_v59, %v15595_v7  ;;  %v15611_v7 = vld [vmem:[#allocation22_spill] sm:$0xff] }
 0x158   :  { %v1313_v40 = vpop.f32.mrf.mxu0  ;;  %3152 = vmatpush2.bf16.msra.mxu1 %v11535_v8  ;;  %v2889_v2 = vpack.c.bf16 %v2676_v17, %v2676_v17  ;;  %v8360_v8 = vld [vmem:[%s15268_s1 + $0x124] ss:$8 sm:$0x30] }
 0x159   :  { %3203 = vmatprep.subr.bf16.mxu1 %v11541_v61  ;;  %v8357_v40 = vld [vmem:[%s15268_s1 + $0xc4] ss:$8 sm:$0xf]  ;;  %v2919_v12 = vpack.c.bf16 %v2796_v58, %v2796_v58 }
 0x15a   :  { %3165 = vmatpush1.bf16.msra.mxu0 %v11523_v57  ;;  %v2985_v17 = vunpack.c.l.b16 %v2889_v2  ;;  %v2907_v2 = vpack.c.bf16 %v2748_v31, %v2748_v31  ;;  %v8359_v61 = vld [vmem:[%s15268_s1 + $0x124] ss:$8 sm:$0xf] }
 0x15b   :  { %3166 = vmatprep.subr.bf16.mxu0 %v11529_v14  ;;  %v11550_v1 = vpop.f32.mrf.mxu1  ;;  %3154 = vmatmul.mubr.bf16.vlgmr.msra.gmra.mxu1 %v3109_v54  ;;  %v11677_v16 = vunpack.c.l.b16 %v2919_v12 }
 0x15c   :  { %3204 = vmatpush1.bf16.msra.mxu1 %v11160_v11  ;;  %3235 = vmatprep.mubr.bf16.mxu1 %v3114_v28  ;;  %v11573_v11 = vld [vmem:[%s15267_s5 + $0x134] ss:$8 sps:$4 sm:$0xff]   ;;  %v11621_v28 = vld [vmem:[%s15267_s5 + $0x120] ss:$8 sps:$4 sm:$0xff]   ;;  %v3053_v58 = vrot.slane %v2985_v17, 7  ;;  %v11673_v17 = vunpack.c.l.b16 %v2907_v2 }
 0x15d   :  { %v11559_v9 = vpop.f32.mrf.mxu1  ;;  %3205 = vmatprep.subr.bf16.mxu1 %v11167_v6  ;;  %15596 = vst [vmem:[#allocation31_spill] sm:$0xff] %v11573_v11  ;;  %15599 = vst [vmem:[#allocation34_spill] sm:$0xff] %v11621_v28  ;;  %v8363_v2 = vld [vmem:[%s15268_s1 + $0x1e4] ss:$8 sm:$0xf] }
 0x15e   :  { %3167 = vmatpush1.bf16.msra.mxu0 %v11547_v24  ;;  %v3059_v53 = vrot.slane %v11673_v17, 4  ;;  %v11727_v17 = vld [vmem:[%s15267_s5 + $0x1f0] ss:$8 sps:$4 sm:$0xff]  }
 0x15f   :  { %3168 = vmatprep.subr.bf16.mxu0 %v11555_v0  ;;  %v1873_v5 = vpop.f32.mrf.mxu1 }
 0x160   :  { %3206 = vmatpush1.bf16.msra.mxu1 %v11182_v55  ;;  %v8356_v55 = vld [vmem:[%s15268_s1 + $0x64] ss:$8 sm:$0x30] }
 0x161   :  { %v1874_v6 = vpop.f32.mrf.mxu1  ;;  %3207 = vmatprep.subr.bf16.mxu1 %v11190_v34  ;;  %v11595_v34 = vld [vmem:[%s15267_s5 + $0x124] ss:$8 sps:$4 sm:$0xff]   ;;  %v11610_v54 = vor.u32 %v8356_v55, %v8355_v23  ;;  %v2901_v23 = vpack.c.bf16 %v2724_v4, %v2724_v4  ;;  %v2913_v55 = vpack.c.bf16 %v2772_v13, %v2772_v13  ;;  %v2991_v4 = vunpack.c.l.b16 %v2895_v44  ;;  %v11655_v13 = vld [vmem:[%s15267_s5 + $0x110] ss:$8 sps:$4 sm:$0xff]  }
 0x162   :  { %3169 = vmatpush1.bf16.msra.mxu0 %v11565_v36  ;;  %15598 = vst [vmem:[#allocation33_spill] sm:$0xff] %v11595_v34  ;;  %v8354_v5 = vld [vmem:[%s15268_s1 + $0x4] ss:$8 sm:$0x30]  ;;  %v11633_v6 = vld [vmem:[%s15267_s5 + $0x114] ss:$8 sps:$4 sm:$0xff]   ;;  %v2979_v44 = vunpack.c.l.b16 %v2883_v35 }
 0x163   :  { %3170 = vmatprep.subr.bf16.mxu0 %v11573_v11  ;;  %15600 = vst [vmem:[#allocation35_spill] sm:$0xff] %v11633_v6  ;;  %v3315_v31 = vrot.slane %v11610_v54, %v9607_v47  ;;  %15601 = vst [vmem:[#allocation36_spill] sm:$0xff] %v11655_v13  ;;  %v11675_v56 = vunpack.c.l.b16 %v2913_v55  ;;  %v3055_v35 = vrot.slane %v2991_v4, 6  ;;  %v11701_v55 = vld [vmem:[%s15267_s5 + $0x1f4] ss:$8 sps:$4 sm:$0xff]  }
 0x164   :  { %3208 = vmatpush1.bf16.msra.mxu1 %v11200_v33  ;;  %v8358_v33 = vld [vmem:[%s15268_s1 + $0xc4] ss:$8 sm:$0x30]  ;;  %15604 = vst [vmem:[#allocation39_spill] sm:$0xff] %v11701_v55 }
 0x165   :  { %3209 = vmatprep.subr.bf16.mxu1 %v11206_v38  ;;  %v8353_v38 = vld [vmem:[%s15268_s1 + $0x4] ss:$8 sm:$0xf]  ;;  %v11637_v27 = vor.u32 %v8358_v33, %v8357_v40  ;;  %v2997_v40 = vunpack.c.l.b16 %v2901_v23  ;;  %v11664_v33 = vor.u32 %v8360_v8, %v8359_v61  ;;  %v2925_v61 = vpack.c.bf16 %v2820_v32, %v2820_v32 }
 0x166   :  { %3171 = vmatpush1.bf16.msra.mxu0 %v11583_v26  ;;  %v3531_v20 = vpack.c.bf16 %v3315_v31, %v3315_v31  ;;  %v3054_v32 = vsel %vm610_vm0, %v3053_v58, %v2979_v44  ;;  %v15605_v31 = vld [vmem:[#allocation8_spill] sm:$0xff] }
 0x167   :  { %3172 = vmatprep.subr.bf16.mxu0 %v11595_v34  ;;  %v3339_v8 = vrot.slane %v11637_v27, %v9607_v47  ;;  %v3057_v4 = vrot.slane %v2997_v40, 5  ;;  %v15616_v26 = vld [vmem:[#allocation24_spill] sm:$0xff] }
 0x168   :  { %3210 = vmatpush1.bf16.msra.mxu1 %v11218_v22  ;;  %v11648_v22 = vor.u32 %v8354_v5, %v8353_v38  ;;  %v8361_v38 = vld [vmem:[%s15268_s1 + $0x184] ss:$8 sm:$0xf]  ;;  %v3627_v40 = vunpack.c.l.b16 %v3531_v20 }
 0x169   :  { %3211 = vmatprep.subr.bf16.mxu1 %v11224_v51  ;;  %v11661_v51 = vld [vmem:[%s15267_s5 + $0x104] ss:$8 sps:$4 sm:$0xff]  }
 0x16a   :  { %3173 = vmatpush1.bf16.msra.mxu0 %v11621_v28  ;;  %15602 = vst [vmem:[#allocation37_spill] sm:$0xff] %v11661_v51  ;;  %v8362_v5 = vld [vmem:[%s15268_s1 + $0x184] ss:$8 sm:$0x30]  ;;  %v3291_v23 = vrot.slane %v11648_v22, %v9607_v47 }
 0x16b   :  { %3174 = vmatprep.subr.bf16.mxu0 %v11633_v6  ;;  %v11690_v12 = vor.u32 %v8362_v5, %v8361_v38  ;;  %v2684_v38 = vrot.slane %v10981_v37, %v15605_v31  ;;  %v3363_v5 = vrot.slane %v11664_v33, %v9607_v47  ;;  %v15606_v6 = vld [vmem:[#allocation16_spill] sm:$0xff] }
 0x16c   :  { %3212 = vmatpush1.bf16.msra.mxu1 %v11232_v62  ;;  %v11687_v62 = vld [vmem:[%s15267_s5 + $0x100] ss:$8 sps:$4 sm:$0xff]   ;;  %v8365_v37 = vld [vmem:[%s15268_s1 + $0x244] ss:$8 sm:$0xf]  ;;  %v3525_v44 = vpack.c.bf16 %v3291_v23, %v3291_v23  ;;  %15607 = vst [vmem:[#allocation16_spill] sm:$0xff] %v11727_v17  ;;  %v11745_v23 = vrot.slane %v11029_v52, %v15605_v31  ;;  %v11762_v52 = vrot.slane %v11077_v3, %v15605_v31 }
 0x16d   :  { %3213 = vmatprep.subr.bf16.mxu1 %v11238_v41  ;;  %15603 = vst [vmem:[#allocation38_spill] sm:$0xff] %v11687_v62  ;;  %v8364_v41 = vld [vmem:[%s15268_s1 + $0x1e4] ss:$8 sm:$0x30]  ;;  %v11777_v3 = vld [vmem:[%s15267_s5 + $0x1e0] ss:$8 sps:$4 sm:$0xff]  }
 0x16e   :  { %3175 = vmatpush1.bf16.msra.mxu0 %v11655_v13  ;;  %v3537_v13 = vpack.c.bf16 %v3339_v8, %v3339_v8  ;;  %v11716_v58 = vor.u32 %v8364_v41, %v8363_v2  ;;  %v2660_v8 = vrot.slane %v11023_v60, %v15605_v31  ;;  %v3387_v2 = vrot.slane %v11690_v12, %v9607_v47  ;;  %v11740_v20 = vld [vmem:[%s15267_s5 + $0x1e4] ss:$8 sps:$4 sm:$0xff]  }
 0x16f   :  { %3176 = vmatprep.subr.bf16.mxu0 %v11661_v51  ;;  %15608 = vst [vmem:[#allocation40_spill] sm:$0xff] %v11740_v20  ;;  %v11749_v60 = vrot.slane %v11054_v49, %v15605_v31  ;;  %v3543_v41 = vpack.c.bf16 %v3363_v5, %v3363_v5  ;;  %v11766_v49 = vrot.slane %v11095_v59, %v15605_v31  ;;  %v3621_v34 = vunpack.c.l.b16 %v3525_v44 }
 0x170   :  { %3214 = vmatpush1.bf16.msra.mxu1 %v11246_v18  ;;  %v8366_v18 = vld [vmem:[%s15268_s1 + $0x244] ss:$8 sm:$0x30]  ;;  %v3411_v28 = vrot.slane %v11716_v58, %v9607_v47  ;;  %v2891_v59 = vpack.c.bf16 %v2684_v38, %v2684_v38 }
 0x171   :  { %3215 = vmatprep.subr.bf16.mxu1 %v15606_v6  ;;  %v3056_v6 = vsel %vm613_vm1, %v3055_v35, %v3054_v32  ;;  %v8368_v35 = vld [vmem:[%s15268_s1 + $0x2a4] ss:$8 sm:$0x30]  ;;  %v3639_v44 = vunpack.c.l.b16 %v3543_v41 }
 0x172   :  { %3177 = vmatpush1.bf16.msra.mxu0 %v11687_v62  ;;  %v15609_v32 = vld [vmem:[#allocation4_spill] sm:$0xff]  ;;  %v15610_v62 = vld [vmem:[#allocation21_spill] sm:$0xff]  ;;  %v3058_v5 = vsel %vm616_vm2, %v3057_v4, %v3056_v6  ;;  %v15615_v6 = vld [vmem:[#allocation23_spill] sm:$0xff]  ;;  %v3555_v10 = vpack.c.bf16 %v3411_v28, %v3411_v28  ;;  %v2903_v28 = vpack.c.bf16 %v11745_v23, %v11745_v23 }
 0x173   :  { %3178 = vmatprep.subr.bf16.mxu0 %v11701_v55  ;;  %v11714_v55 = vunpack.c.l.b16 %v2925_v61  ;;  %v2708_v61 = vrot.slane %v11006_v39, %v15605_v31  ;;  %v8367_v39 = vld [vmem:[%s15268_s1 + $0x2a4] ss:$8 sm:$0xf]  ;;  %v3323_v51 = vrot.slane %v11610_v54, %v15609_v32  ;;  %15612 = vst [vmem:[#allocation21_spill] sm:$0xff] %v11777_v3  ;;  %v3299_v38 = vrot.slane %v11648_v22, %v15609_v32 }
 0x174   :  { %3216 = vmatpush1.bf16.msra.mxu1 %v15610_v62  ;;  %v3682_v62 = vrot.slane %v3627_v40, 7  ;;  %v11787_v4 = vld [vmem:[%s15267_s5 + $0x1d4] ss:$8 sps:$4 sm:$0xff]   ;;  %v3371_v41 = vrot.slane %v11664_v33, %v15609_v32  ;;  %v3651_v11 = vunpack.c.l.b16 %v3555_v10 }
 0x175   :  { %3217 = vmatprep.subr.bf16.mxu1 %v15611_v7  ;;  %v3347_v7 = vrot.slane %v11637_v27, %v15609_v32  ;;  %15614 = vst [vmem:[#allocation41_spill] sm:$0xff] %v11787_v4  ;;  %v3533_v40 = vpack.c.bf16 %v3323_v51, %v3323_v51  ;;  %v11807_v51 = vld [vmem:[%s15267_s5 + $0x1d0] ss:$8 sps:$4 sm:$0xff]  }
 0x176   :  { %3179 = vmatpush2.bf16.msra.mxu0 %v11727_v17  ;;  %v3633_v17 = vunpack.c.l.b16 %v3537_v13  ;;  %v3549_v13 = vpack.c.bf16 %v3387_v2, %v3387_v2  ;;  %v3060_v2 = vsel %vm619_vm3, %v3059_v53, %v3058_v5  ;;  %15617 = vst [vmem:[#allocation23_spill] sm:$0xff] %v11807_v51  ;;  %v2987_v53 = vunpack.c.l.b16 %v2891_v59 }
 0x177   :  { %3180 = vmatprep.subr.bf16.mxu0 %v11740_v20  ;;  %v11768_v20 = vor.u32 %v8366_v18, %v8365_v37  ;;  %v11780_v37 = vor.u32 %v8368_v35, %v8367_v39  ;;  %v11792_v18 = vrot.slane %v11113_v25, %v15605_v31  ;;  %v2885_v39 = vpack.c.bf16 %v2660_v8, %v2660_v8 }
 0x178   :  { %3218 = vmatpush1.bf16.msra.mxu1 %v15615_v6  ;;  %v3683_v25 = vsel %vm610_vm0, %v3682_v62, %v3621_v34  ;;  %v3645_v8 = vunpack.c.l.b16 %v3549_v13  ;;  %v11815_v34 = vld [vmem:[%s15267_s5 + $0x1c4] ss:$8 sps:$4 sm:$0xff]   ;;  %v3527_v5 = vpack.c.bf16 %v3299_v38, %v3299_v38  ;;  %v3629_v62 = vunpack.c.l.b16 %v3533_v40  ;;  %v15619_v6 = vld [vmem:[#allocation25_spill] sm:$0xff] }
 0x179   :  { %15613 = vst [vmem:[#allocation22_spill] sm:$0xff] %v11780_v37  ;;  %v3435_v35 = vrot.slane %v11768_v20, %v9607_v47  ;;  %3219 = vmatprep.subr.bf16.mxu1 %v15616_v26  ;;  %v3539_v26 = vpack.c.bf16 %v3347_v7, %v3347_v7  ;;  %15618 = vst [vmem:[#allocation24_spill] sm:$0xff] %v11815_v34  ;;  %v2909_v59 = vpack.c.bf16 %v11749_v60, %v11749_v60 }
 0x17a   :  { %3181 = vmatpush2.bf16.msra.mxu0 %v11777_v3  ;;  %v3684_v3 = vrot.slane %v3633_v17, 6  ;;  %v3459_v17 = vrot.slane %v11780_v37, %v9607_v47  ;;  %v3395_v31 = vrot.slane %v11690_v12, %v15609_v32  ;;  %v3545_v23 = vpack.c.bf16 %v3371_v41, %v3371_v41  ;;  %v15623_v41 = vld [vmem:[#allocation14_spill] sm:$0xff] }
 0x17b   :  { %3182 = vmatprep.subr.bf16.mxu0 %v11787_v4  ;;  %v2897_v4 = vpack.c.bf16 %v2708_v61, %v2708_v61  ;;  %v3686_v61 = vrot.slane %v3639_v44, 5  ;;  %v3561_v13 = vpack.c.bf16 %v3435_v35, %v3435_v35  ;;  %v11830_v44 = vld [vmem:[%s15267_s5 + $0x1c0] ss:$8 sps:$4 sm:$0xff]   ;;  %v3081_v60 = vrot.slane %v2987_v53, 7  ;;  %v11836_v35 = vld [vmem:[%s15267_s5 + $0x1b4] ss:$8 sps:$4 sm:$0xff]  }
 0x17c   :  { %3220 = vmatpush2.bf16.msra.mxu1 %v15619_v6  ;;  %v3685_v7 = vsel %vm613_vm1, %v3684_v3, %v3683_v25  ;;  %15621 = vst [vmem:[#allocation25_spill] sm:$0xff] %v11830_v44  ;;  %v3567_v38 = vpack.c.bf16 %v3459_v17, %v3459_v17  ;;  %v3688_v40 = vrot.slane %v3645_v8, 4  ;;  %v3635_v3 = vunpack.c.l.b16 %v3539_v26  ;;  %v15625_v6 = vld [vmem:[#allocation15_spill] sm:$0xff] }
 0x17d   :  { %v2993_v47 = vunpack.c.l.b16 %v2897_v4  ;;  %v3687_v10 = vsel %vm616_vm2, %v3686_v61, %v3685_v7  ;;  %v3419_v4 = vrot.slane %v11716_v58, %v15609_v32  ;;  %v3710_v25 = vrot.slane %v3629_v62, 7 }
 0x17e   :  { %3183 = vmatpush2.bf16.msra.mxu0 %v11807_v51  ;;  %v15620_v51 = vld [vmem:[#allocation26_spill] sm:$0xff]  ;;  %v2999_v17 = vunpack.c.l.b16 %v2903_v28  ;;  %v3657_v8 = vunpack.c.l.b16 %v3561_v13  ;;  %v3551_v26 = vpack.c.bf16 %v3395_v31, %v3395_v31  ;;  %v3690_v7 = vrot.slane %v3651_v11, 3 }
 0x17f   :  { %3184 = vmatprep.subr.bf16.mxu0 %v11815_v34  ;;  %3221 = vmatprep.subr.bf16.mxu1 %v15620_v51  ;;  %v2981_v34 = vunpack.c.l.b16 %v2885_v39  ;;  %15622 = vst [vmem:[#allocation26_spill] sm:$0xff] %v11836_v35  ;;  %v3623_v39 = vunpack.c.l.b16 %v3527_v5  ;;  %v15624_v51 = vrot.slane %v11675_v56, 3  ;;  %v3083_v61 = vrot.slane %v2993_v47, 6  ;;  %v11852_v5 = vld [vmem:[%s15267_s5 + $0x1b0] ss:$8 sps:$4 sm:$0xff]  }
 0x180   :  { %3222 = vmatpush2.bf16.msra.mxu1 %v15623_v41  ;;  %v3443_v31 = vrot.slane %v11768_v20, %v15609_v32  ;;  %v3712_v28 = vrot.slane %v3635_v3, 6  ;;  %v11862_v47 = vld [vmem:[%s15267_s5 + $0x1a4] ss:$8 sps:$4 sm:$0xff]   ;;  %v3005_v11 = vunpack.c.l.b16 %v2909_v59  ;;  %v3557_v62 = vpack.c.bf16 %v3419_v4, %v3419_v4  ;;  %v11877_v4 = vld [vmem:[%s15267_s5 + $0x1a0] ss:$8 sps:$4 sm:$0xff]  }
 0x181   :  { %v3062_v53 = vsel %vm622_vm4, %v15624_v51, %v3060_v2  ;;  %3223 = vmatprep.subr.bf16.mxu1 %v15625_v6  ;;  %v3082_v56 = vsel %vm610_vm0, %v3081_v60, %v2981_v34  ;;  %v3689_v2 = vsel %vm619_vm3, %v3688_v40, %v3687_v10  ;;  %v3711_v13 = vsel %vm610_vm0, %v3710_v25, %v3623_v39  ;;  %v15627_v10 = vld [vmem:[#allocation18_spill] sm:$0xff] }
 0x182   :  { %3185 = vmatpush2.bf16.msra.mxu0 %v11830_v44  ;;  %v3641_v44 = vunpack.c.l.b16 %v3545_v23  ;;  %v15626_v23 = vld [vmem:[#allocation17_spill] sm:$0xff]  ;;  %v2921_v34 = vpack.c.bf16 %v11766_v49, %v11766_v49  ;;  %v3085_v60 = vrot.slane %v2999_v17, 5  ;;  %v3692_v40 = vrot.slane %v3657_v8, 2 }
 0x183   :  { %3186 = vmatprep.subr.bf16.mxu0 %v11836_v35  ;;  %v2915_v35 = vpack.c.bf16 %v11762_v52, %v11762_v52  ;;  %v3663_v52 = vunpack.c.l.b16 %v3567_v38  ;;  %v3647_v3 = vunpack.c.l.b16 %v3551_v26  ;;  %v3084_v41 = vsel %vm613_vm1, %v3083_v61, %v3082_v56  ;;  %v11885_v8 = vld [vmem:[%s15267_s5 + $0x194] ss:$8 sps:$4 sm:$0xff]  }
 0x184   :  { %3224 = vmatpush2.bf16.msra.mxu1 %v15626_v23  ;;  %v3691_v51 = vsel %vm622_vm4, %v3690_v7, %v3689_v2  ;;  %v3467_v59 = vrot.slane %v11780_v37, %v15609_v32  ;;  %v3714_v38 = vrot.slane %v3641_v44, 5  ;;  %v3065_v49 = vrot.slane %v11714_v55, 1 }
 0x185   :  { %3225 = vmatprep.subr.bf16.mxu1 %v15627_v10  ;;  %v3011_v39 = vunpack.c.l.b16 %v2915_v35  ;;  %v3563_v25 = vpack.c.bf16 %v3443_v31, %v3443_v31  ;;  %v3713_v17 = vsel %vm613_vm1, %v3712_v28, %v3711_v13  ;;  %v15628_v44 = vrot.slane %v11677_v16, 2  ;;  %v15629_v31 = vld [vmem:[#allocation19_spill] sm:$0xff] }
 0x186   :  { %3187 = vmatpush2.bf16.msra.mxu0 %v11852_v5  ;;  %v3087_v6 = vrot.slane %v3005_v11, 4  ;;  %v3694_v61 = vrot.slane %v3663_v52, 1  ;;  %v3653_v7 = vunpack.c.l.b16 %v3557_v62  ;;  %v2927_v55 = vpack.c.bf16 %v11792_v18, %v11792_v18  ;;  %v11908_v52 = vld [vmem:[%s15267_s5 + $0x184] ss:$8 sps:$4 sm:$0xff]  }
 0x187   :  { %3188 = vmatprep.subr.bf16.mxu0 %v11862_v47  ;;  %v3064_v26 = vsel %vm625_vm5, %v15628_v44, %v3062_v53  ;;  %v3086_v35 = vsel %vm616_vm2, %v3085_v60, %v3084_v41  ;;  %v3693_v56 = vsel %vm625_vm5, %v3692_v40, %v3691_v51  ;;  %v3716_v2 = vrot.slane %v3647_v3, 4  ;;  %v11901_v53 = vld [vmem:[%s15267_s5 + $0x190] ss:$8 sps:$4 sm:$0xff]   ;;  %v11919_v51 = vld [vmem:[%s15267_s5 + $0x180] ss:$8 sps:$4 sm:$0xff]  }
 0x188   :  { %3226 = vmatpush2.bf16.msra.mxu1 %v11380_v30  ;;  %v3017_v28 = vunpack.c.l.b16 %v2921_v34  ;;  %v3569_v13 = vpack.c.bf16 %v3467_v59, %v3467_v59  ;;  %v3715_v16 = vsel %vm616_vm2, %v3714_v38, %v3713_v17  ;;  %v3066_v30 = vsel %vm628_vm6, %v3065_v49, %v3064_v26 }
 0x189   :  { %3227 = vmatprep.subr.bf16.mxu1 %v15629_v31  ;;  %v3089_v18 = vrot.slane %v3011_v39, 3  ;;  %v3659_v11 = vunpack.c.l.b16 %v3563_v25  ;;  %v3088_v62 = vsel %vm619_vm3, %v3087_v6, %v3086_v35  ;;  %v3695_v23 = vsel %vm628_vm6, %v3694_v61, %v3693_v56  ;;  %v15630_v39 = vld [vmem:[#allocation12_spill] sm:$0xff]  ;;  %v15631_v61 = vld [vmem:[#allocation13_spill] sm:$0xff] }
 0x18a   :  { %3189 = vmatpush2.bf16.msra.mxu0 %v11877_v4  ;;  %v3718_v34 = vrot.slane %v3653_v7, 3  ;;  %v3023_v60 = vunpack.c.l.b16 %v2927_v55  ;;  %v3717_v40 = vsel %vm619_vm3, %v3716_v2, %v3715_v16  ;;  %v3111_v3 = vpack.c.b16 %v3066_v30, %v3066_v30  ;;  %v11940_v35 = vld [vmem:[%s15267_s5 + $0x70] ss:$8 sps:$4 sm:$0xff]  }
 0x18b   :  { %3190 = vmatprep.subr.bf16.mxu0 %v11885_v8  ;;  %v3091_v10 = vrot.slane %v3017_v28, 2  ;;  %v3665_v41 = vunpack.c.l.b16 %v3569_v13  ;;  %v3090_v59 = vsel %vm622_vm4, %v3089_v18, %v3088_v62  ;;  %v3753_v38 = vpack.c.b16 %v3695_v23, %v3695_v23  ;;  %v11957_v28 = vld [vmem:[%s15267_s5 + $0x60] ss:$8 sps:$4 sm:$0xff]   ;;  %v11971_v30 = vld [vmem:[%s15267_s5 + $0x50] ss:$8 sps:$4 sm:$0xff]  }
 0x18c   :  { %3228 = vmatpush2.bf16.msra.mxu1 %v11401_v50  ;;  %v3720_v49 = vrot.slane %v3659_v11, 2  ;;  %v11926_v50 = vld [vmem:[%s15267_s5 + $0x74] ss:$8 sps:$4 sm:$0xff]   ;;  %v1870_v25 = vadd.f32 %v11550_v1, %v15630_v39  ;;  %v3093_v17 = vrot.slane %v3023_v60, 1  ;;  %v1872_v7 = vadd.f32 %v11559_v9, %v15631_v61  ;;  %v11947_v1 = vld [vmem:[%s15267_s5 + $0x64] ss:$8 sps:$4 sm:$0xff]  }
 0x18d   :  { %3229 = vmatprep.subr.bf16.mxu1 %v11411_v63  ;;  %v3719_v63 = vsel %vm622_vm4, %v3718_v34, %v3717_v40  ;;  %v3092_v26 = vsel %vm625_vm5, %v3091_v10, %v3090_v59  ;;  %v3722_v6 = vrot.slane %v3665_v41, 1  ;;  %v11977_v11 = vld [vmem:[%s15267_s5 + $0x44] ss:$8 sps:$4 sm:$0xff]   ;;  %v11991_v34 = vld [vmem:[%s15267_s5 + $0x40] ss:$8 sps:$4 sm:$0xff]   ;;  %v3335_v60 = vrot.slane %v11637_v27, %v15568_v46 }
 0x18e   :  { %3191 = vmatpush2.bf16.msra.mxu0 %v11901_v53  ;;  %v3094_v9 = vsel %vm628_vm6, %v3093_v17, %v3092_v26  ;;  %v3359_v41 = vrot.slane %v11664_v33, %v15568_v46  ;;  %v12011_v59 = vld [vmem:[%s15267_s5 + $0x30] ss:$8 sps:$4 sm:$0xff]   ;;  %v12031_v26 = vld [vmem:[%s15267_s5 + $0x20] ss:$8 sps:$4 sm:$0xff]  }
 0x18f   :  { %3192 = vmatprep.subr.bf16.mxu0 %v11908_v52  ;;  %v3113_v13 = vpack.c.b16 %v3094_v9, %v3094_v9  ;;  %15635 = vst [vmem:[#allocation18_spill] sm:$0xff] %v12011_v59  ;;  %15637 = vst [vmem:[#allocation42_spill] sm:$0xff] %v12031_v26 }
 0x190   :  { %3230 = vmatpush2.bf16.msra.mxu1 %v11426_v43  ;;  %v3721_v43 = vsel %vm625_vm5, %v3720_v49, %v3719_v63  ;;  %v3407_v49 = vrot.slane %v11716_v58, %v15568_v46  ;;  %v12023_v63 = vld [vmem:[%s15267_s5 + $0x24] ss:$8 sps:$4 sm:$0xff]  }
 0x191   :  { %3231 = vmatprep.subr.bf16.mxu1 %v11433_v45  ;;  %v3723_v31 = vsel %vm628_vm6, %v3722_v6, %v3721_v43  ;;  %15636 = vst [vmem:[#allocation19_spill] sm:$0xff] %v12023_v63 }
 0x192   :  { %3193 = vmatpush2.bf16.msra.mxu0 %v11919_v51 }
 0x193   :  { %3764 = vmatprep.subr.bf16.mxu0 %v11926_v50 }
 0x194   :  { %3232 = vmatpush2.bf16.msra.mxu1 %v11444_v19  ;;  %v11963_v19 = vld [vmem:[%s15267_s5 + $0x54] ss:$8 sps:$4 sm:$0xff]  }
 0x195   :  { %v1910_v44 = vpop.f32.mrf.mxu0  ;;  %3195 = vmatmul.mubr.bf16.vlgmr.msra.gmra.mxu0 %v3111_v3  ;;  %3233 = vmatprep.subr.bf16.mxu1 %v11450_v15  ;;  %v3755_v15 = vpack.c.b16 %v3723_v31, %v3723_v31  ;;  %v15640_v31 = vld [vmem:[#allocation7_spill] sm:$0xff] }
 0x196   :  { %v1911_v55 = vadd.f32 %v1910_v44, %v1870_v25  ;;  %3765 = vmatpush1.bf16.msra.mxu0 %v11940_v35  ;;  %3796 = vmatprep.mubr.bf16.mxu0 %v3753_v38  ;;  %v3383_v38 = vrot.slane %v11690_v12, %v15568_v46  ;;  %v3542_v44 = vpack.c.bf16 %v3359_v41, %v3359_v41  ;;  %v8372_v41 = vld [vmem:[%s15268_s1 + $0x65] ss:$8 sm:$0x30] }
 0x197   :  { %v1912_v45 = vpop.f32.mrf.mxu0  ;;  %3766 = vmatprep.subr.bf16.mxu0 %v11947_v1 }
 0x198   :  { %v1913_v56 = vadd.f32 %v1912_v45, %v1872_v7  ;;  %3234 = vmatpush2.bf16.msra.mxu1 %v11463_v42  ;;  %v3311_v42 = vrot.slane %v11610_v54, %v15568_v46  ;;  %v3548_v6 = vpack.c.bf16 %v3383_v38, %v3383_v38  ;;  %v3554_v7 = vpack.c.bf16 %v3407_v49, %v3407_v49  ;;  %v12037_v45 = vld [vmem:[%s15267_s5 + $0x14] ss:$8 sps:$4 sm:$0xff]  }
 0x199   :  { %v1914_v2 = vpop.f32.mrf.mxu0  ;;  %3805 = vmatprep.subr.bf16.mxu1 %v11470_v21  ;;  %15638 = vst [vmem:[#allocation43_spill] sm:$0xff] %v12037_v45  ;;  %v15644_v38 = vld [vmem:[#allocation33_spill] sm:$0xff] }
 0x19a   :  { %3767 = vmatpush1.bf16.msra.mxu0 %v11957_v28  ;;  %v3530_v3 = vpack.c.bf16 %v3311_v42, %v3311_v42  ;;  %v3638_v2 = vunpack.c.l.b16 %v3542_v44 }
 0x19b   :  { %3768 = vmatprep.subr.bf16.mxu0 %v11963_v19  ;;  %v1915_v16 = vpop.f32.mrf.mxu0  ;;  %v1951_v18 = vpop.f32.mrf.mxu1  ;;  %3236 = vmatmul.mubr.bf16.vlgmr.msra.gmra.mxu1 %v3113_v13  ;;  %v3331_v13 = vrot.slane %v11610_v54, %v15640_v31 }
 0x19c   :  { %v11982_v21 = vadd.f32 %v1951_v18, %v1911_v55  ;;  %3806 = vmatpush1.bf16.msra.mxu1 %v11493_v48  ;;  %3837 = vmatprep.mubr.bf16.mxu1 %v3755_v15  ;;  %v11999_v48 = vld [vmem:[%s15267_s5 + $0x34] ss:$8 sps:$4 sm:$0xff]   ;;  %v3626_v17 = vunpack.c.l.b16 %v3530_v3  ;;  %v12049_v16 = vld [vmem:[%s15267_s5 + $0x10] ss:$8 sps:$4 sm:$0xff]   ;;  %v3644_v15 = vunpack.c.l.b16 %v3548_v6  ;;  %v12052_v18 = vunpack.c.l.b16 %v3554_v7 }
 0x19d   :  { %v1953_v62 = vpop.f32.mrf.mxu1  ;;  %3807 = vmatprep.subr.bf16.mxu1 %v11500_v29  ;;  %15634 = vst [vmem:[#allocation17_spill] sm:$0xff] %v11999_v48  ;;  %v3287_v29 = vrot.slane %v11648_v22, %v15568_v46  ;;  %v3355_v3 = vrot.slane %v11637_v27, %v15640_v31  ;;  %v3672_v49 = vrot.slane %v3638_v2, 5  ;;  %v15648_v2 = vld [vmem:[#allocation34_spill] sm:$0xff] }
 0x19e   :  { %3769 = vmatpush1.bf16.msra.mxu0 %v11971_v30  ;;  %15632 = vst [vmem:[#allocation14_spill] sm:$0xff] %v11982_v21  ;;  %v11986_v23 = vadd.f32 %v1953_v62, %v1913_v56  ;;  %v3668_v9 = vrot.slane %v3626_v17, 7  ;;  %v15639_v56 = vld [vmem:[#allocation31_spill] sm:$0xff]  ;;  %v3674_v44 = vrot.slane %v3644_v15, 4  ;;  %v3676_v6 = vrot.slane %v12052_v18, 3 }
 0x19f   :  { %3770 = vmatprep.subr.bf16.mxu0 %v11977_v11  ;;  %v1955_v40 = vpop.f32.mrf.mxu1  ;;  %v3524_v25 = vpack.c.bf16 %v3287_v29, %v3287_v29  ;;  %15641 = vst [vmem:[#allocation31_spill] sm:$0xff] %v12049_v16  ;;  %v15643_v29 = vld [vmem:[#allocation32_spill] sm:$0xff] }
 0x1a0   :  { %15633 = vst [vmem:[#allocation15_spill] sm:$0xff] %v11986_v23  ;;  %3808 = vmatpush1.bf16.msra.mxu1 %v11523_v57  ;;  %v3431_v57 = vrot.slane %v11768_v20, %v15568_v46  ;;  %v12152_v21 = vld [vmem:[%s15267_s5 + $0xe4] ss:$8 sps:$4 sm:$0xff]  }
 0x1a1   :  { %v1956_v10 = vpop.f32.mrf.mxu1  ;;  %3809 = vmatprep.subr.bf16.mxu1 %v11529_v14  ;;  %v3536_v14 = vpack.c.bf16 %v3335_v60, %v3335_v60  ;;  %15653 = vst [vmem:[#allocation46_spill] sm:$0xff] %v12152_v21 }
 0x1a2   :  { %3771 = vmatpush1.bf16.msra.mxu0 %v11991_v34  ;;  %v3560_v55 = vpack.c.bf16 %v3431_v57, %v3431_v57  ;;  %v8371_v10 = vld [vmem:[%s15268_s1 + $0x65] ss:$8 sm:$0xf]  ;;  %v3307_v57 = vrot.slane %v11648_v22, %v15640_v31 }
 0x1a3   :  { %3772 = vmatprep.subr.bf16.mxu0 %v11999_v48  ;;  %v3632_v43 = vunpack.c.l.b16 %v3536_v14  ;;  %v3535_v14 = vpack.c.bf16 %v3331_v13, %v3331_v13  ;;  %v15649_v13 = vld [vmem:[#allocation6_spill] sm:$0xff]  ;;  %v15667_v48 = vld [vmem:[#allocation40_spill] sm:$0xff] }
 0x1a4   :  { %3810 = vmatpush1.bf16.msra.mxu1 %v11547_v24  ;;  %v3455_v24 = vrot.slane %v11780_v37, %v15568_v46  ;;  %v12054_v42 = vunpack.c.l.b16 %v3560_v55  ;;  %v12087_v55 = vld [vmem:[%s15267_s5 + $0xf4] ss:$8 sps:$4 sm:$0xff]   ;;  %v12105_v15 = vrot.slane %v11648_v22, %v15649_v13  ;;  %v3319_v18 = vrot.slane %v11610_v54, %v15649_v13 }
 0x1a5   :  { %3811 = vmatprep.subr.bf16.mxu1 %v11555_v0  ;;  %v3620_v0 = vunpack.c.l.b16 %v3524_v25  ;;  %v3670_v62 = vrot.slane %v3632_v43, 6  ;;  %v12078_v25 = vld [vmem:[%s15267_s5] ss:$8 sps:$4 sm:$0xff]   ;;  %15646 = vst [vmem:[#allocation33_spill] sm:$0xff] %v12087_v55  ;;  %v3631_v7 = vunpack.c.l.b16 %v3535_v14  ;;  %v12133_v23 = vrot.slane %v11690_v12, %v15649_v13 }
 0x1a6   :  { %3773 = vmatpush1.bf16.msra.mxu0 %v12011_v59  ;;  %v3566_v60 = vpack.c.bf16 %v3455_v24, %v3455_v24  ;;  %15645 = vst [vmem:[#allocation32_spill] sm:$0xff] %v12078_v25  ;;  %v3379_v24 = vrot.slane %v11664_v33, %v15640_v31  ;;  %v8375_v14 = vld [vmem:[%s15268_s1 + $0x125] ss:$8 sm:$0xf]  ;;  %v12167_v46 = vrot.slane %v11780_v37, %v15649_v13 }
 0x1a7   :  { %3774 = vmatprep.subr.bf16.mxu0 %v12023_v63  ;;  %v3669_v40 = vsel %vm610_vm0, %v3668_v9, %v3620_v0  ;;  %v12094_v0 = vor.u32 %v8372_v41, %v8371_v10  ;;  %v8373_v9 = vld [vmem:[%s15268_s1 + $0xc5] ss:$8 sm:$0xf]  ;;  %v3738_v63 = vrot.slane %v3631_v7, 7 }
 0x1a8   :  { %3812 = vmatpush1.bf16.msra.mxu1 %v11565_v36  ;;  %v12059_v36 = vld [vmem:[%s15267_s5 + $0x4] ss:$8 sps:$4 sm:$0xff]   ;;  %v3671_v17 = vsel %vm613_vm1, %v3670_v62, %v3669_v40  ;;  %v12090_v43 = vunpack.c.l.b16 %v3566_v60  ;;  %v12111_v62 = vrot.slane %v11637_v27, %v15649_v13  ;;  %v3541_v60 = vpack.c.bf16 %v3355_v3, %v3355_v3  ;;  %v12128_v3 = vld [vmem:[%s15267_s5 + $0xf0] ss:$8 sps:$4 sm:$0xff]  }
 0x1a9   :  { %3813 = vmatprep.subr.bf16.mxu1 %v15639_v56  ;;  %15642 = vst [vmem:[#allocation44_spill] sm:$0xff] %v12059_v36  ;;  %15647 = vst [vmem:[#allocation45_spill] sm:$0xff] %v12094_v0  ;;  %v8374_v56 = vld [vmem:[%s15268_s1 + $0xc5] ss:$8 sm:$0x30]  ;;  %v3673_v41 = vsel %vm616_vm2, %v3672_v49, %v3671_v17  ;;  %v12137_v49 = vrot.slane %v11716_v58, %v15649_v13  ;;  %v3403_v17 = vrot.slane %v11690_v12, %v15640_v31 }
 0x1aa   :  { %3775 = vmatpush1.bf16.msra.mxu0 %v12031_v26  ;;  %v8369_v40 = vld [vmem:[%s15268_s1 + $0x5] ss:$8 sm:$0xf]  ;;  %15651 = vst [vmem:[#allocation34_spill] sm:$0xff] %v12128_v3 }
 0x1ab   :  { %3776 = vmatprep.subr.bf16.mxu0 %v12037_v45  ;;  %v15650_v10 = vld [vmem:[#allocation35_spill] sm:$0xff]  ;;  %v3532_v45 = vpack.c.bf16 %v3319_v18, %v3319_v18  ;;  %v3553_v7 = vpack.c.bf16 %v3403_v17, %v3403_v17 }
 0x1ac   :  { %3814 = vmatpush1.bf16.msra.mxu1 %v15643_v29  ;;  %v8370_v29 = vld [vmem:[%s15268_s1 + $0x5] ss:$8 sm:$0x30]  ;;  %v12183_v18 = vld [vmem:[%s15267_s5 + $0xe0] ss:$8 sps:$4 sm:$0xff]  }
 0x1ad   :  { %3815 = vmatprep.subr.bf16.mxu1 %v15644_v38  ;;  %v12123_v38 = vrot.slane %v11664_v33, %v15649_v13  ;;  %v8377_v26 = vld [vmem:[%s15268_s1 + $0x185] ss:$8 sm:$0xf] }
 0x1ae   :  { %3777 = vmatpush1.bf16.msra.mxu0 %v12049_v16  ;;  %v3675_v16 = vsel %vm619_vm3, %v3674_v44, %v3673_v41  ;;  %v8378_v44 = vld [vmem:[%s15268_s1 + $0x185] ss:$8 sm:$0x30]  ;;  %v3538_v41 = vpack.c.bf16 %v12111_v62, %v12111_v62 }
 0x1af   :  { %3778 = vmatprep.subr.bf16.mxu0 %v12059_v36  ;;  %v15656_v36 = vld [vmem:[#allocation36_spill] sm:$0xff]  ;;  %v12211_v59 = vor.u32 %v8378_v44, %v8377_v26  ;;  %v3475_v26 = vrot.slane %v11780_v37, %v15640_v31 }
 0x1b0   :  { %3816 = vmatpush1.bf16.msra.mxu1 %v15648_v2  ;;  %v3529_v2 = vpack.c.bf16 %v3307_v57, %v3307_v57  ;;  %v12141_v57 = vor.u32 %v8374_v56, %v8373_v9  ;;  %v3547_v9 = vpack.c.bf16 %v3379_v24, %v3379_v24  ;;  %v12159_v56 = vor.u32 %v8370_v29, %v8369_v40  ;;  %v15657_v24 = vld [vmem:[#allocation37_spill] sm:$0xff] }
 0x1b1   :  { %3817 = vmatprep.subr.bf16.mxu1 %v15650_v10  ;;  %v8376_v10 = vld [vmem:[%s15268_s1 + $0x125] ss:$8 sm:$0x30]  ;;  %v3427_v40 = vrot.slane %v11716_v58, %v15640_v31  ;;  %15659 = vst [vmem:[#allocation37_spill] sm:$0xff] %v12183_v18 }
 0x1b2   :  { %3779 = vmatpush1.bf16.msra.mxu0 %v12078_v25  ;;  %15652 = vst [vmem:[#allocation35_spill] sm:$0xff] %v12141_v57  ;;  %15654 = vst [vmem:[#allocation47_spill] sm:$0xff] %v12159_v56  ;;  %v3625_v29 = vunpack.c.l.b16 %v3529_v2 }
 0x1b3   :  { %3780 = vmatprep.subr.bf16.mxu0 %v12087_v55  ;;  %v15655_v55 = vld [vmem:[#allocation3_spill] sm:$0xff] }
 0x1b4   :  { %v3958_v25 = vrot.slane %v12094_v0, %v15655_v55  ;;  %3818 = vmatpush1.bf16.msra.mxu1 %v15656_v36  ;;  %v12175_v36 = vor.u32 %v8376_v10, %v8375_v14  ;;  %v3982_v2 = vrot.slane %v12141_v57, %v15655_v55  ;;  %v12195_v14 = vld [vmem:[%s15267_s5 + $0xd4] ss:$8 sps:$4 sm:$0xff]   ;;  %v3544_v10 = vpack.c.bf16 %v12123_v38, %v12123_v38  ;;  %v8380_v38 = vld [vmem:[%s15268_s1 + $0x1e5] ss:$8 sm:$0x30] }
 0x1b5   :  { %3819 = vmatprep.subr.bf16.mxu1 %v15657_v24  ;;  %15660 = vst [vmem:[#allocation48_spill] sm:$0xff] %v12195_v14  ;;  %v3643_v24 = vunpack.c.l.b16 %v3547_v9  ;;  %v3934_v62 = vrot.slane %v12159_v56, %v15655_v55  ;;  %v15663_v9 = vld [vmem:[#allocation39_spill] sm:$0xff]  ;;  %v3628_v0 = vunpack.c.l.b16 %v3532_v45  ;;  %v3559_v56 = vpack.c.bf16 %v3427_v40, %v3427_v40 }
 0x1b6   :  { %3781 = vmatpush2.bf16.msra.mxu0 %v12128_v3  ;;  %v12157_v3 = vrot.slane %v11768_v20, %v15649_v13  ;;  %15658 = vst [vmem:[#allocation36_spill] sm:$0xff] %v12175_v36  ;;  %v4174_v17 = vpack.c.bf16 %v3958_v25, %v3958_v25  ;;  %v15661_v13 = vld [vmem:[#allocation38_spill] sm:$0xff]  ;;  %v3739_v25 = vsel %vm610_vm0, %v3738_v63, %v3625_v29  ;;  %v3649_v45 = vunpack.c.l.b16 %v3553_v7  ;;  %v12236_v40 = vld [vmem:[%s15267_s5 + $0xc4] ss:$8 sps:$4 sm:$0xff]  }
 0x1b7   :  { %3782 = vmatprep.subr.bf16.mxu0 %v12152_v21  ;;  %v3637_v21 = vunpack.c.l.b16 %v3541_v60  ;;  %v3526_v60 = vpack.c.bf16 %v12105_v15, %v12105_v15  ;;  %v8379_v15 = vld [vmem:[%s15268_s1 + $0x1e5] ss:$8 sm:$0xf]  ;;  %15662 = vst [vmem:[#allocation38_spill] sm:$0xff] %v12211_v59  ;;  %15665 = vst [vmem:[#allocation49_spill] sm:$0xff] %v12236_v40  ;;  %v3742_v29 = vrot.slane %v3643_v24, 5  ;;  %v4168_v7 = vpack.c.bf16 %v3934_v62, %v3934_v62 }
 0x1b8   :  { %3820 = vmatpush1.bf16.msra.mxu1 %v15661_v13  ;;  %v8381_v63 = vld [vmem:[%s15268_s1 + $0x245] ss:$8 sm:$0xf]  ;;  %v4180_v13 = vpack.c.bf16 %v3982_v2, %v3982_v2  ;;  %v12239_v44 = vor.u32 %v8380_v38, %v8379_v15  ;;  %v4030_v32 = vrot.slane %v12211_v59, %v15655_v55  ;;  %v3634_v24 = vunpack.c.l.b16 %v3538_v41 }
 0x1b9   :  { %v3740_v57 = vrot.slane %v3637_v21, 6  ;;  %3821 = vmatprep.subr.bf16.mxu1 %v15663_v9  ;;  %v3550_v21 = vpack.c.bf16 %v12133_v23, %v12133_v23  ;;  %v8382_v23 = vld [vmem:[%s15268_s1 + $0x245] ss:$8 sm:$0x30]  ;;  %v4270_v9 = vunpack.c.l.b16 %v4174_v17  ;;  %v3696_v15 = vrot.slane %v3628_v0, 7 }
 0x1ba   :  { %3783 = vmatpush2.bf16.msra.mxu0 %v12183_v18  ;;  %v12207_v18 = vsel %vm622_vm4, %v3676_v6, %v3675_v16  ;;  %v4006_v16 = vrot.slane %v12175_v36, %v15655_v55  ;;  %v12223_v6 = vld [vmem:[%s15267_s5 + $0xd0] ss:$8 sps:$4 sm:$0xff]   ;;  %v3655_v38 = vunpack.c.l.b16 %v3559_v56  ;;  %v12258_v17 = vor.u32 %v8382_v23, %v8381_v63  ;;  %v12266_v56 = vld [vmem:[%s15267_s5 + $0xb4] ss:$8 sps:$4 sm:$0xff]  }
 0x1bb   :  { %3784 = vmatprep.subr.bf16.mxu0 %v12195_v14  ;;  %v3451_v14 = vrot.slane %v11768_v20, %v15640_v31  ;;  %15664 = vst [vmem:[#allocation39_spill] sm:$0xff] %v12223_v6  ;;  %v3622_v31 = vunpack.c.l.b16 %v3526_v60  ;;  %v3741_v36 = vsel %vm613_vm1, %v3740_v57, %v3739_v25  ;;  %v12255_v60 = vld [vmem:[%s15267_s5 + $0xc0] ss:$8 sps:$4 sm:$0xff]   ;;  %v3571_v57 = vpack.c.bf16 %v3475_v26, %v3475_v26  ;;  %v15670_v26 = vld [vmem:[#allocation21_spill] sm:$0xff] }
 0x1bc   :  { %v4186_v62 = vpack.c.bf16 %v4006_v16, %v4006_v16  ;;  %v4276_v0 = vunpack.c.l.b16 %v4180_v13  ;;  %15669 = vst [vmem:[#allocation40_spill] sm:$0xff] %v12266_v56  ;;  %v3743_v41 = vsel %vm616_vm2, %v3742_v29, %v3741_v36  ;;  %v4054_v25 = vrot.slane %v12239_v44, %v15655_v55  ;;  %v12281_v29 = vld [vmem:[%s15267_s5 + $0xb0] ss:$8 sps:$4 sm:$0xff]  }
 0x1bd   :  { %v3565_v2 = vpack.c.bf16 %v3451_v14, %v3451_v14  ;;  %v3744_v14 = vrot.slane %v3649_v45, 4  ;;  %v4264_v16 = vunpack.c.l.b16 %v4168_v7  ;;  %v3556_v45 = vpack.c.bf16 %v12137_v49, %v12137_v49 }
 0x1be   :  { %3785 = vmatpush2.bf16.msra.mxu0 %v12223_v6  ;;  %v15666_v6 = vld [vmem:[#allocation16_spill] sm:$0xff]  ;;  %v3640_v63 = vunpack.c.l.b16 %v3544_v10  ;;  %v4192_v23 = vpack.c.bf16 %v4030_v32, %v4030_v32  ;;  %v3698_v59 = vrot.slane %v3634_v24, 6  ;;  %v3746_v37 = vrot.slane %v3655_v38, 3 }
 0x1bf   :  { %3786 = vmatprep.subr.bf16.mxu0 %v12236_v40  ;;  %3822 = vmatpush2.bf16.msra.mxu1 %v15666_v6  ;;  %v8383_v40 = vld [vmem:[%s15268_s1 + $0x2a5] ss:$8 sm:$0xf]  ;;  %15668 = vst [vmem:[#allocation16_spill] sm:$0xff] %v12255_v60  ;;  %v4325_v6 = vrot.slane %v4270_v9, 7  ;;  %v3661_v13 = vunpack.c.l.b16 %v3565_v2  ;;  %v4282_v36 = vunpack.c.l.b16 %v4186_v62  ;;  %v3697_v7 = vsel %vm610_vm0, %v3696_v15, %v3622_v31 }
 0x1c0   :  { %3823 = vmatprep.subr.bf16.mxu1 %v15667_v48  ;;  %v8384_v48 = vld [vmem:[%s15268_s1 + $0x2a5] ss:$8 sm:$0x30]  ;;  %v3745_v49 = vsel %vm619_vm3, %v3744_v14, %v3743_v41  ;;  %v4078_v32 = vrot.slane %v12258_v17, %v15655_v55  ;;  %v4327_v10 = vrot.slane %v4276_v0, 6  ;;  %v3646_v9 = vunpack.c.l.b16 %v3550_v21 }
 0x1c1   :  { %v3667_v2 = vunpack.c.l.b16 %v3571_v57  ;;  %v4198_v24 = vpack.c.bf16 %v4054_v25, %v4054_v25  ;;  %v4326_v38 = vsel %vm610_vm0, %v4325_v6, %v4264_v16  ;;  %v15672_v62 = vld [vmem:[#allocation23_spill] sm:$0xff]  ;;  %v3562_v31 = vpack.c.bf16 %v12157_v3, %v12157_v3  ;;  %v15674_v25 = vld [vmem:[#allocation20_spill] sm:$0xff] }
 0x1c2   :  { %3787 = vmatpush2.bf16.msra.mxu0 %v12255_v60  ;;  %v15671_v60 = vld [vmem:[#allocation41_spill] sm:$0xff]  ;;  %v3700_v15 = vrot.slane %v3640_v63, 5  ;;  %v4288_v14 = vunpack.c.l.b16 %v4192_v23  ;;  %v3699_v0 = vsel %vm613_vm1, %v3698_v59, %v3697_v7  ;;  %v3747_v41 = vsel %vm622_vm4, %v3746_v37, %v3745_v49  ;;  %v15675_v63 = vld [vmem:[#allocation27_spill] sm:$0xff] }
 0x1c3   :  { %3788 = vmatprep.subr.bf16.mxu0 %v12266_v56  ;;  %3824 = vmatpush2.bf16.msra.mxu1 %v15670_v26  ;;  %v12276_v56 = vor.u32 %v8384_v48, %v8383_v40  ;;  %v12291_v40 = vld [vmem:[%s15267_s5 + $0xa4] ss:$8 sps:$4 sm:$0xff]   ;;  %v4329_v57 = vrot.slane %v4282_v36, 5  ;;  %v3680_v16 = vrot.slane %v12090_v43, 1  ;;  %v3652_v6 = vunpack.c.l.b16 %v3556_v45  ;;  %v15677_v49 = vld [vmem:[#allocation25_spill] sm:$0xff] }
 0x1c4   :  { %3825 = vmatprep.subr.bf16.mxu1 %v15671_v60  ;;  %v3748_v60 = vrot.slane %v3661_v13, 2  ;;  %v15673_v48 = vld [vmem:[#allocation24_spill] sm:$0xff]  ;;  %v4204_v26 = vpack.c.bf16 %v4078_v32, %v4078_v32  ;;  %v4328_v3 = vsel %vm613_vm1, %v4327_v10, %v4326_v38  ;;  %v15676_v13 = vrot.slane %v12054_v42, 2  ;;  %v15678_v10 = vld [vmem:[#allocation26_spill] sm:$0xff] }
 0x1c5   :  { %v4102_v21 = vrot.slane %v12276_v56, %v15655_v55  ;;  %v3702_v37 = vrot.slane %v3646_v9, 4  ;;  %v3750_v23 = vrot.slane %v3667_v2, 1  ;;  %v4294_v7 = vunpack.c.l.b16 %v4198_v24 }
 0x1c6   :  { %3789 = vmatpush2.bf16.msra.mxu0 %v12281_v29  ;;  %v3679_v59 = vsel %vm625_vm5, %v15676_v13, %v12207_v18  ;;  %v3568_v36 = vpack.c.bf16 %v12167_v46, %v12167_v46  ;;  %v3701_v43 = vsel %vm616_vm2, %v3700_v15, %v3699_v0  ;;  %v3749_v45 = vsel %vm625_vm5, %v3748_v60, %v3747_v41  ;;  %v15679_v18 = vld [vmem:[#allocation9_spill] sm:$0xff] }
 0x1c7   :  { %3790 = vmatprep.subr.bf16.mxu0 %v12291_v40  ;;  %3826 = vmatpush2.bf16.msra.mxu1 %v15672_v62  ;;  %v4331_v32 = vrot.slane %v4288_v14, 4  ;;  %v3658_v38 = vunpack.c.l.b16 %v3562_v31  ;;  %v4210_v62 = vpack.c.bf16 %v4102_v21, %v4102_v21  ;;  %v4330_v42 = vsel %vm616_vm2, %v4329_v57, %v4328_v3  ;;  %v15681_v57 = vld [vmem:[#allocation29_spill] sm:$0xff] }
 0x1c8   :  { %3827 = vmatprep.subr.bf16.mxu1 %v15673_v48  ;;  %v3681_v9 = vsel %vm628_vm6, %v3680_v16, %v3679_v59  ;;  %v3704_v2 = vrot.slane %v3652_v6, 3  ;;  %v4300_v24 = vunpack.c.l.b16 %v4204_v26  ;;  %v15680_v48 = vld [vmem:[#allocation11_spill] sm:$0xff]  ;;  %v3703_v46 = vsel %vm619_vm3, %v3702_v37, %v3701_v43  ;;  %v15682_v26 = vld [vmem:[#allocation30_spill] sm:$0xff] }
 0x1c9   :  { %v3751_v15 = vsel %vm628_vm6, %v3750_v23, %v3749_v45  ;;  %v4333_v60 = vrot.slane %v4294_v7, 3  ;;  %v3664_v14 = vunpack.c.l.b16 %v3568_v36  ;;  %v4332_v31 = vsel %vm619_vm3, %v4331_v32, %v4330_v42  ;;  %v12336_v59 = vld [vmem:[%s15267_s5 + $0x270] ss:$8 sps:$4 sm:$0xff]   ;;  %v12353_v36 = vld [vmem:[%s15267_s5 + $0x260] ss:$8 sps:$4 sm:$0xff]  }
 0x1ca   :  { %3791 = vmatpush2.bf16.msra.mxu0 %v15674_v25  ;;  %v3752_v0 = vpack.c.b16 %v3681_v9, %v3681_v9  ;;  %v3706_v41 = vrot.slane %v3658_v38, 2  ;;  %v4306_v21 = vunpack.c.l.b16 %v4210_v62  ;;  %v3705_v25 = vsel %vm622_vm4, %v3704_v2, %v3703_v46  ;;  %v12359_v45 = vld [vmem:[%s15267_s5 + $0x254] ss:$8 sps:$4 sm:$0xff]   ;;  %v12369_v38 = vld [vmem:[%s15267_s5 + $0x250] ss:$8 sps:$4 sm:$0xff]  }
 0x1cb   :  { %3792 = vmatprep.subr.bf16.mxu0 %v15675_v63  ;;  %3828 = vmatpush2.bf16.msra.mxu1 %v15677_v49  ;;  %v3757_v16 = vpack.c.b16 %v3751_v15, %v3751_v15  ;;  %v4335_v6 = vrot.slane %v4300_v24, 2  ;;  %v4334_v3 = vsel %vm622_vm4, %v4333_v60, %v4332_v31  ;;  %v12387_v9 = vld [vmem:[%s15267_s5 + $0x240] ss:$8 sps:$4 sm:$0xff]   ;;  %v12393_v24 = vld [vmem:[%s15267_s5 + $0x234] ss:$8 sps:$4 sm:$0xff]  }
 0x1cc   :  { %3829 = vmatprep.subr.bf16.mxu1 %v15678_v10  ;;  %v4337_v13 = vrot.slane %v4306_v21, 1  ;;  %v12403_v46 = vld [vmem:[%s15267_s5 + $0x230] ss:$8 sps:$4 sm:$0xff]   ;;  %v12411_v60 = vld [vmem:[%s15267_s5 + $0x224] ss:$8 sps:$4 sm:$0xff]  }
 0x1cd   :  { %v4336_v37 = vsel %vm625_vm5, %v4335_v6, %v4334_v3  ;;  %v12427_v31 = vld [vmem:[%s15267_s5 + $0x220] ss:$8 sps:$4 sm:$0xff]   ;;  %v15686_v21 = vld [vmem:[#allocation17_spill] sm:$0xff] }
 0x1ce   :  { %3793 = vmatpush2.bf16.msra.mxu0 %v15679_v18  ;;  %v4338_v49 = vsel %vm628_vm6, %v4337_v13, %v4336_v37  ;;  %v15691_v13 = vld [vmem:[#allocation18_spill] sm:$0xff] }
 0x1cf   :  { %3794 = vmatprep.subr.bf16.mxu0 %v15680_v48  ;;  %3830 = vmatpush2.bf16.msra.mxu1 %v11852_v5  ;;  %v3708_v5 = vrot.slane %v3664_v14, 1  ;;  %v4396_v32 = vpack.c.b16 %v4338_v49, %v4338_v49  ;;  %v15693_v49 = vld [vmem:[#allocation19_spill] sm:$0xff] }
 0x1d0   :  { %3831 = vmatprep.subr.bf16.mxu1 %v11862_v47  ;;  %v3707_v47 = vsel %vm625_vm5, %v3706_v41, %v3705_v25  ;;  %v15687_v25 = vld [vmem:[#allocation4_spill] sm:$0xff] }
 0x1d2   :  { %3795 = vmatpush2.bf16.msra.mxu0 %v15681_v57 }
 0x1d3   :  { %3846 = vmatprep.subr.bf16.mxu0 %v15682_v26  ;;  %3832 = vmatpush2.bf16.msra.mxu1 %v11877_v4  ;;  %v12343_v4 = vld [vmem:[%s15267_s5 + $0x264] ss:$8 sps:$4 sm:$0xff]   ;;  %v12447_v26 = vld [vmem:[%s15267_s5 + $0x210] ss:$8 sps:$4 sm:$0xff]  }
 0x1d4   :  { %3833 = vmatprep.subr.bf16.mxu1 %v11885_v8  ;;  %v3709_v8 = vsel %vm628_vm6, %v3708_v5, %v3707_v47  ;;  %15689 = vst [vmem:[#allocation41_spill] sm:$0xff] %v12447_v26  ;;  %v12453_v5 = vld [vmem:[%s15267_s5 + $0x204] ss:$8 sps:$4 sm:$0xff]  }
 0x1d5   :  { %v2512_v63 = vpop.f32.mrf.mxu0  ;;  %3797 = vmatmul.mubr.bf16.vlgmr.msra.gmra.mxu0 %v3752_v0  ;;  %v3754_v43 = vpack.c.b16 %v3709_v8, %v3709_v8  ;;  %15690 = vst [vmem:[#allocation23_spill] sm:$0xff] %v12453_v5  ;;  %v15692_v8 = vld [vmem:[#allocation35_spill] sm:$0xff] }
 0x1d6   :  { %3847 = vmatpush1.bf16.msra.mxu0 %v12336_v59  ;;  %3878 = vmatprep.mubr.bf16.mxu0 %v3757_v16  ;;  %v15688_v16 = vld [vmem:[#allocation45_spill] sm:$0xff] }
 0x1d7   :  { %v2514_v23 = vpop.f32.mrf.mxu0  ;;  %3848 = vmatprep.subr.bf16.mxu0 %v12343_v4  ;;  %3834 = vmatpush2.bf16.msra.mxu1 %v11901_v53  ;;  %v3966_v6 = vrot.slane %v15688_v16, %v15687_v25 }
 0x1d8   :  { %3835 = vmatprep.subr.bf16.mxu1 %v11908_v52  ;;  %v2513_v52 = vadd.f32 %v2512_v63, %v15630_v39  ;;  %v2515_v10 = vadd.f32 %v2514_v23, %v15631_v61 }
 0x1d9   :  { %v2516_v7 = vpop.f32.mrf.mxu0 }
 0x1da   :  { %3849 = vmatpush1.bf16.msra.mxu0 %v12353_v36  ;;  %v3990_v7 = vrot.slane %v15692_v8, %v15687_v25 }
 0x1db   :  { %3850 = vmatprep.subr.bf16.mxu0 %v12359_v45  ;;  %v2517_v53 = vpop.f32.mrf.mxu0  ;;  %3836 = vmatpush2.bf16.msra.mxu1 %v11919_v51  ;;  %v2553_v62 = vpop.f32.mrf.mxu1  ;;  %v12375_v51 = vld [vmem:[%s15267_s5 + $0x244] ss:$8 sps:$4 sm:$0xff]  }
 0x1dc   :  { %4407 = vmatprep.subr.bf16.mxu1 %v11926_v50  ;;  %v12378_v42 = vadd.f32 %v2553_v62, %v2513_v52  ;;  %v15694_v52 = vld [vmem:[#allocation47_spill] sm:$0xff] }
 0x1dd   :  { %v2555_v50 = vpop.f32.mrf.mxu1  ;;  %v12467_v62 = vld [vmem:[%s15267_s5 + $0x200] ss:$8 sps:$4 sm:$0xff]  }
 0x1de   :  { %3851 = vmatpush1.bf16.msra.mxu0 %v12369_v38  ;;  %3838 = vmatmul.mubr.bf16.vlgmr.msra.gmra.mxu1 %v3754_v43  ;;  %v12382_v18 = vadd.f32 %v2555_v50, %v2515_v10  ;;  %v4176_v10 = vpack.c.bf16 %v3966_v6, %v3966_v6  ;;  %15695 = vst [vmem:[#allocation24_spill] sm:$0xff] %v12467_v62  ;;  %v15702_v6 = vld [vmem:[#allocation38_spill] sm:$0xff] }
 0x1df   :  { %3852 = vmatprep.subr.bf16.mxu0 %v12375_v51  ;;  %4408 = vmatpush1.bf16.msra.mxu1 %v11940_v35  ;;  %v2557_v2 = vpop.f32.mrf.mxu1  ;;  %v15683_v35 = vld [vmem:[#allocation8_spill] sm:$0xff] }
 0x1e0   :  { %4439 = vmatprep.mubr.bf16.mxu1 %v4396_v32  ;;  %4409 = vmatprep.subr.bf16.mxu1 %v11947_v1  ;;  %v3327_v1 = vrot.slane %v11610_v54, %v15683_v35  ;;  %v3351_v15 = vrot.slane %v11637_v27, %v15683_v35  ;;  %v3303_v54 = vrot.slane %v11648_v22, %v15683_v35 }
 0x1e1   :  { %v2558_v48 = vpop.f32.mrf.mxu1  ;;  %v3399_v27 = vrot.slane %v11690_v12, %v15683_v35  ;;  %v3423_v14 = vrot.slane %v11716_v58, %v15683_v35  ;;  %v3447_v22 = vrot.slane %v11768_v20, %v15683_v35  ;;  %v3942_v32 = vrot.slane %v15694_v52, %v15687_v25 }
 0x1e2   :  { %3853 = vmatpush1.bf16.msra.mxu0 %v12387_v9  ;;  %v3528_v12 = vpack.c.bf16 %v3303_v54, %v3303_v54 }
 0x1e3   :  { %3854 = vmatprep.subr.bf16.mxu0 %v12393_v24  ;;  %4410 = vmatpush1.bf16.msra.mxu1 %v11957_v28  ;;  %v3534_v28 = vpack.c.bf16 %v3327_v1, %v3327_v1  ;;  %v3552_v57 = vpack.c.bf16 %v3399_v27, %v3399_v27  ;;  %v3558_v20 = vpack.c.bf16 %v3423_v14, %v3423_v14  ;;  %v12475_v1 = vld [vmem:[%s15267_s5 + $0x2f4] ss:$8 sps:$4 sm:$0xff]  }
 0x1e4   :  { %4411 = vmatprep.subr.bf16.mxu1 %v11963_v19  ;;  %v3375_v19 = vrot.slane %v11664_v33, %v15683_v35  ;;  %v12435_v33 = vld [vmem:[%s15267_s5 + $0x214] ss:$8 sps:$4 sm:$0xff]   ;;  %v3564_v3 = vpack.c.bf16 %v3447_v22, %v3447_v22  ;;  %v3624_v63 = vunpack.c.l.b16 %v3528_v12  ;;  %15696 = vst [vmem:[#allocation20_spill] sm:$0xff] %v12475_v1  ;;  %v4182_v14 = vpack.c.bf16 %v3990_v7, %v3990_v7  ;;  %v15699_v22 = vld [vmem:[#allocation43_spill] sm:$0xff] }
 0x1e5   :  { %15684 = vst [vmem:[#allocation21_spill] sm:$0xff] %v12435_v33  ;;  %v3630_v58 = vunpack.c.l.b16 %v3534_v28  ;;  %v3648_v43 = vunpack.c.l.b16 %v3552_v57  ;;  %v12460_v53 = vunpack.c.l.b16 %v3558_v20  ;;  %v15698_v28 = vld [vmem:[#allocation42_spill] sm:$0xff]  ;;  %v15701_v57 = vld [vmem:[#allocation5_spill] sm:$0xff]  ;;  %v15705_v7 = vld [vmem:[#allocation31_spill] sm:$0xff] }
 0x1e6   :  { %3855 = vmatpush1.bf16.msra.mxu0 %v12403_v46  ;;  %v3546_v41 = vpack.c.bf16 %v3375_v19, %v3375_v19  ;;  %v12470_v50 = vunpack.c.l.b16 %v3564_v3  ;;  %v3954_v20 = vrot.slane %v15688_v16, %v15701_v57  ;;  %v4038_v3 = vrot.slane %v15702_v6, %v15687_v25 }
 0x1e7   :  { %3856 = vmatprep.subr.bf16.mxu0 %v12411_v60  ;;  %4412 = vmatpush1.bf16.msra.mxu1 %v11971_v30  ;;  %v3540_v30 = vpack.c.bf16 %v3351_v15, %v3351_v15  ;;  %v3724_v47 = vrot.slane %v3630_v58, 7  ;;  %v15697_v15 = vld [vmem:[#allocation36_spill] sm:$0xff]  ;;  %v4170_v58 = vpack.c.bf16 %v3942_v32, %v3942_v32  ;;  %v12521_v32 = vrot.slane %v12239_v44, %v15701_v57 }
 0x1e8   :  { %4413 = vmatprep.subr.bf16.mxu1 %v11977_v11  ;;  %v15685_v11 = vld [vmem:[#allocation22_spill] sm:$0xff]  ;;  %v3642_v23 = vunpack.c.l.b16 %v3546_v41  ;;  %v4014_v54 = vrot.slane %v15697_v15, %v15687_v25 }
 0x1e9   :  { %v3471_v0 = vrot.slane %v15685_v11, %v15683_v35  ;;  %v3725_v48 = vsel %vm610_vm0, %v3724_v47, %v3624_v63  ;;  %v4272_v11 = vunpack.c.l.b16 %v4176_v10  ;;  %v3930_v63 = vrot.slane %v15694_v52, %v15701_v57 }
 0x1ea   :  { %3857 = vmatpush1.bf16.msra.mxu0 %v12427_v31  ;;  %v3728_v27 = vrot.slane %v3642_v23, 5  ;;  %v3978_v47 = vrot.slane %v15692_v8, %v15701_v57  ;;  %v4278_v10 = vunpack.c.l.b16 %v4182_v14  ;;  %v4173_v14 = vpack.c.bf16 %v3954_v20, %v3954_v20 }
 0x1eb   :  { %3858 = vmatprep.subr.bf16.mxu0 %v12435_v33  ;;  %4414 = vmatpush1.bf16.msra.mxu1 %v11991_v34  ;;  %v3636_v34 = vunpack.c.l.b16 %v3540_v30  ;;  %v3570_v37 = vpack.c.bf16 %v3471_v0, %v3471_v0  ;;  %v3730_v30 = vrot.slane %v3648_v43, 4  ;;  %v12489_v0 = vld [vmem:[%s15267_s5 + $0x2f0] ss:$8 sps:$4 sm:$0xff]   ;;  %v12517_v43 = vrot.slane %v15702_v6, %v15701_v57 }
 0x1ec   :  { %4415 = vmatprep.subr.bf16.mxu1 %v15686_v21  ;;  %15700 = vst [vmem:[#allocation27_spill] sm:$0xff] %v12489_v0  ;;  %v12535_v21 = vrot.slane %v12258_v17, %v15701_v57  ;;  %v4167_v39 = vpack.c.bf16 %v3930_v63, %v3930_v63  ;;  %v4269_v63 = vunpack.c.l.b16 %v4173_v14 }
 0x1ed   :  { %v3726_v2 = vrot.slane %v3636_v34, 6  ;;  %v12482_v19 = vunpack.c.l.b16 %v3570_v37  ;;  %v12501_v34 = vld [vmem:[%s15267_s5 + $0x2e4] ss:$8 sps:$4 sm:$0xff]  }
 0x1ee   :  { %3859 = vmatpush1.bf16.msra.mxu0 %v12447_v26  ;;  %15703 = vst [vmem:[#allocation25_spill] sm:$0xff] %v12501_v34  ;;  %v15704_v37 = vld [vmem:[#allocation7_spill] sm:$0xff] }
 0x1ef   :  { %3860 = vmatprep.subr.bf16.mxu0 %v12453_v5  ;;  %4416 = vmatpush1.bf16.msra.mxu1 %v15691_v13  ;;  %v3727_v41 = vsel %vm613_vm1, %v3726_v2, %v3725_v48  ;;  %v4188_v13 = vpack.c.bf16 %v4014_v54, %v4014_v54  ;;  %v3974_v23 = vrot.slane %v15688_v16, %v15704_v37  ;;  %v15706_v2 = vld [vmem:[#allocation44_spill] sm:$0xff] }
 0x1f0   :  { %4417 = vmatprep.subr.bf16.mxu1 %v15693_v49  ;;  %v12513_v49 = vrot.slane %v15697_v15, %v15701_v57  ;;  %v3729_v48 = vsel %vm616_vm2, %v3728_v27, %v3727_v41  ;;  %v4062_v54 = vrot.slane %v12239_v44, %v15687_v25  ;;  %v3998_v27 = vrot.slane %v15692_v8, %v15704_v37 }
 0x1f1   :  { %v4284_v41 = vunpack.c.l.b16 %v4188_v13  ;;  %v3950_v12 = vrot.slane %v15694_v52, %v15704_v37  ;;  %v4178_v20 = vpack.c.bf16 %v3974_v23, %v3974_v23  ;;  %v3731_v61 = vsel %vm619_vm3, %v3730_v30, %v3729_v48  ;;  %v12562_v23 = vld [vmem:[%s15267_s5 + $0x2d0] ss:$8 sps:$4 sm:$0xff]  }
 0x1f2   :  { %3861 = vmatpush1.bf16.msra.mxu0 %v12467_v62  ;;  %v4022_v13 = vrot.slane %v15697_v15, %v15704_v37  ;;  %15711 = vst [vmem:[#allocation11_spill] sm:$0xff] %v12562_v23  ;;  %v4185_v30 = vpack.c.bf16 %v12513_v49, %v12513_v49  ;;  %v4110_v48 = vrot.slane %v12276_v56, %v15687_v25 }
 0x1f3   :  { %3862 = vmatprep.subr.bf16.mxu0 %v12475_v1  ;;  %4418 = vmatpush1.bf16.msra.mxu1 %v15698_v28  ;;  %v4266_v28 = vunpack.c.l.b16 %v4170_v58  ;;  %v12542_v58 = vld [vmem:[%s15267_s5 + $0x2d4] ss:$8 sps:$4 sm:$0xff]   ;;  %v4200_v1 = vpack.c.bf16 %v4062_v54, %v4062_v54  ;;  %v4357_v54 = vrot.slane %v4284_v41, 5  ;;  %v4191_v49 = vpack.c.bf16 %v12517_v43, %v12517_v43 }
 0x1f4   :  { %4419 = vmatprep.subr.bf16.mxu1 %v15699_v22  ;;  %v4353_v22 = vrot.slane %v4272_v11, 7  ;;  %15708 = vst [vmem:[#allocation9_spill] sm:$0xff] %v12542_v58  ;;  %v12547_v11 = vrot.slane %v12276_v56, %v15701_v57  ;;  %v4190_v26 = vpack.c.bf16 %v4022_v13, %v4022_v13  ;;  %v4311_v43 = vrot.slane %v4269_v63, 7  ;;  %v15717_v13 = vld [vmem:[#allocation37_spill] sm:$0xff] }
 0x1f5   :  { %v4296_v5 = vunpack.c.l.b16 %v4200_v1  ;;  %v4212_v1 = vpack.c.bf16 %v4110_v48, %v4110_v48 }
 0x1f6   :  { %3863 = vmatpush2.bf16.msra.mxu0 %v12489_v0  ;;  %v15710_v0 = vld [vmem:[#allocation33_spill] sm:$0xff]  ;;  %v4354_v57 = vsel %vm610_vm0, %v4353_v22, %v4266_v28  ;;  %v4172_v28 = vpack.c.bf16 %v3950_v12, %v3950_v12  ;;  %v4274_v22 = vunpack.c.l.b16 %v4178_v20  ;;  %v12585_v12 = vld [vmem:[%s15267_s5 + $0x2c0] ss:$8 sps:$4 sm:$0xff]   ;;  %v4286_v33 = vunpack.c.l.b16 %v4190_v26 }
 0x1f7   :  { %3864 = vmatprep.subr.bf16.mxu0 %v12501_v34  ;;  %4420 = vmatpush1.bf16.msra.mxu1 %v15705_v7  ;;  %v12530_v7 = vld [vmem:[%s15267_s5 + $0x2e0] ss:$8 sps:$4 sm:$0xff]   ;;  %v4355_v34 = vrot.slane %v4278_v10, 6  ;;  %15715 = vst [vmem:[#allocation30_spill] sm:$0xff] %v12585_v12  ;;  %v4361_v48 = vrot.slane %v4296_v5, 3  ;;  %v4287_v26 = vunpack.c.l.b16 %v4191_v49  ;;  %v4118_v49 = vrot.slane %v12276_v56, %v15704_v37 }
 0x1f8   :  { %4421 = vmatprep.subr.bf16.mxu1 %v15706_v2  ;;  %15707 = vst [vmem:[#allocation26_spill] sm:$0xff] %v12530_v7  ;;  %v4194_v2 = vpack.c.bf16 %v4038_v3, %v4038_v3  ;;  %v15709_v3 = vld [vmem:[#allocation32_spill] sm:$0xff]  ;;  %v4268_v41 = vunpack.c.l.b16 %v4172_v28  ;;  %v4381_v20 = vrot.slane %v4274_v22, 7 }
 0x1f9   :  { %v12617_v5 = vld [vmem:[%s15267_s5 + $0x2a4] ss:$8 sps:$4 sm:$0xff]  }
 0x1fa   :  { %3865 = vmatpush2.bf16.msra.mxu0 %v12530_v7  ;;  %v4086_v7 = vrot.slane %v12258_v17, %v15687_v25  ;;  %v4290_v10 = vunpack.c.l.b16 %v4194_v2  ;;  %v4356_v2 = vsel %vm613_vm1, %v4355_v34, %v4354_v57  ;;  %v4070_v57 = vrot.slane %v12239_v44, %v15704_v37 }
 0x1fb   :  { %3866 = vmatprep.subr.bf16.mxu0 %v12542_v58  ;;  %4422 = vmatpush1.bf16.msra.mxu1 %v15709_v3  ;;  %v4179_v58 = vpack.c.bf16 %v3978_v47, %v3978_v47  ;;  %v12570_v47 = vld [vmem:[%s15267_s5 + $0x2c4] ss:$8 sps:$4 sm:$0xff]   ;;  %v15713_v3 = vld [vmem:[#allocation34_spill] sm:$0xff]  ;;  %v4197_v25 = vpack.c.bf16 %v12521_v32, %v12521_v32  ;;  %v4382_v22 = vsel %vm610_vm0, %v4381_v20, %v4268_v41 }
 0x1fc   :  { %4423 = vmatprep.subr.bf16.mxu1 %v15710_v0  ;;  %v4184_v0 = vpack.c.bf16 %v3998_v27, %v3998_v27  ;;  %15712 = vst [vmem:[#allocation29_spill] sm:$0xff] %v12570_v47  ;;  %v4206_v14 = vpack.c.bf16 %v4086_v7, %v4086_v7  ;;  %v4046_v27 = vrot.slane %v15702_v6, %v15704_v37  ;;  %v4359_v7 = vrot.slane %v4290_v10, 4 }
 0x1fd   :  { %v4275_v62 = vunpack.c.l.b16 %v4179_v58  ;;  %v4358_v58 = vsel %vm616_vm2, %v4357_v54, %v4356_v2  ;;  %v4281_v10 = vunpack.c.l.b16 %v4185_v30  ;;  %v12607_v54 = vld [vmem:[%s15267_s5 + $0x2b0] ss:$8 sps:$4 sm:$0xff]   ;;  %v4094_v30 = vrot.slane %v12258_v17, %v15704_v37 }
 0x1fe   :  { %3867 = vmatpush2.bf16.msra.mxu0 %v12562_v23  ;;  %v15714_v23 = vld [vmem:[#allocation46_spill] sm:$0xff]  ;;  %v4280_v34 = vunpack.c.l.b16 %v4184_v0  ;;  %v4302_v0 = vunpack.c.l.b16 %v4206_v14  ;;  %v4202_v32 = vpack.c.bf16 %v4070_v57, %v4070_v57  ;;  %v15720_v14 = vld [vmem:[#allocation39_spill] sm:$0xff]  ;;  %v4385_v57 = vrot.slane %v4286_v33, 5 }
 0x1ff   :  { %3868 = vmatprep.subr.bf16.mxu0 %v12570_v47  ;;  %4424 = vmatpush2.bf16.msra.mxu1 %v15713_v3  ;;  %v4263_v47 = vunpack.c.l.b16 %v4167_v39  ;;  %v12593_v39 = vld [vmem:[%s15267_s5 + $0x2b4] ss:$8 sps:$4 sm:$0xff]   ;;  %v4196_v3 = vpack.c.bf16 %v4046_v27, %v4046_v27  ;;  %v4315_v2 = vrot.slane %v4281_v10, 5  ;;  %v4208_v41 = vpack.c.bf16 %v4094_v30, %v4094_v30 }
 0x200   :  { %4425 = vmatprep.subr.bf16.mxu1 %v15714_v23  ;;  %15716 = vst [vmem:[#allocation22_spill] sm:$0xff] %v12593_v39  ;;  %v15718_v23 = vrot.slane %v12460_v53, 3  ;;  %v4360_v53 = vsel %vm619_vm3, %v4359_v7, %v4358_v58  ;;  %v4383_v28 = vrot.slane %v4280_v34, 6  ;;  %v4363_v27 = vrot.slane %v4302_v0, 2 }
 0x201   :  { %v4362_v34 = vsel %vm622_vm4, %v4361_v48, %v4360_v53  ;;  %v4293_v58 = vunpack.c.l.b16 %v4197_v25  ;;  %v15722_v33 = vrot.slane %v12470_v50, 2  ;;  %v4298_v0 = vunpack.c.l.b16 %v4202_v32  ;;  %v15724_v53 = vld [vmem:[#allocation40_spill] sm:$0xff] }
 0x202   :  { %3869 = vmatpush2.bf16.msra.mxu0 %v12585_v12  ;;  %v3733_v63 = vsel %vm622_vm4, %v15718_v23, %v3731_v61  ;;  %v15719_v12 = vld [vmem:[#allocation48_spill] sm:$0xff]  ;;  %v4312_v61 = vsel %vm610_vm0, %v4311_v43, %v4263_v47  ;;  %v4203_v47 = vpack.c.bf16 %v12535_v21, %v12535_v21  ;;  %v15721_v43 = vld [vmem:[#allocation49_spill] sm:$0xff]  ;;  %v3736_v21 = vrot.slane %v12482_v19, 1 }
 0x203   :  { %3870 = vmatprep.subr.bf16.mxu0 %v12593_v39  ;;  %4426 = vmatpush2.bf16.msra.mxu1 %v15717_v13  ;;  %v4313_v39 = vrot.slane %v4275_v62, 6  ;;  %v4308_v62 = vunpack.c.l.b16 %v4212_v1  ;;  %v12632_v1 = vld [vmem:[%s15267_s5 + $0x2a0] ss:$8 sps:$4 sm:$0xff]   ;;  %v4384_v20 = vsel %vm613_vm1, %v4383_v28, %v4382_v22  ;;  %v3735_v13 = vsel %vm625_vm5, %v15722_v33, %v3733_v63  ;;  %v12656_v63 = vld [vmem:[%s15267_s5 + $0x290] ss:$8 sps:$4 sm:$0xff]  }
 0x204   :  { %4427 = vmatprep.subr.bf16.mxu1 %v15719_v12  ;;  %v4292_v12 = vunpack.c.l.b16 %v4196_v3  ;;  %v4317_v23 = vrot.slane %v4287_v26, 4  ;;  %v15723_v3 = vld [vmem:[#allocation16_spill] sm:$0xff]  ;;  %v4209_v25 = vpack.c.bf16 %v12547_v11, %v12547_v11  ;;  %v4364_v48 = vsel %vm625_vm5, %v4363_v27, %v4362_v34 }
 0x205   :  { %v4314_v7 = vsel %vm613_vm1, %v4313_v39, %v4312_v61  ;;  %v12640_v39 = vld [vmem:[%s15267_s5 + $0x294] ss:$8 sps:$4 sm:$0xff]   ;;  %v4365_v10 = vrot.slane %v4308_v62, 1  ;;  %v4299_v30 = vunpack.c.l.b16 %v4203_v47  ;;  %v4214_v28 = vpack.c.bf16 %v4118_v49, %v4118_v49  ;;  %v12663_v32 = vld [vmem:[%s15267_s5 + $0x284] ss:$8 sps:$4 sm:$0xff]  }
 0x206   :  { %3871 = vmatpush2.bf16.msra.mxu0 %v12607_v54  ;;  %v4316_v19 = vsel %vm616_vm2, %v4315_v2, %v4314_v7  ;;  %v4387_v61 = vrot.slane %v4292_v12, 4  ;;  %v4386_v50 = vsel %vm616_vm2, %v4385_v57, %v4384_v20  ;;  %v3737_v11 = vsel %vm628_vm6, %v3736_v21, %v3735_v13  ;;  %v12674_v34 = vld [vmem:[%s15267_s5 + $0x280] ss:$8 sps:$4 sm:$0xff]   ;;  %v12694_v20 = vld [vmem:[%s15267_s5 + $0x94] ss:$8 sps:$4 sm:$0xff]  }
 0x207   :  { %3872 = vmatprep.subr.bf16.mxu0 %v12617_v5  ;;  %4428 = vmatpush2.bf16.msra.mxu1 %v15720_v14  ;;  %v4319_v26 = vrot.slane %v4293_v58, 3  ;;  %v4304_v62 = vunpack.c.l.b16 %v4208_v41  ;;  %v4318_v22 = vsel %vm619_vm3, %v4317_v23, %v4316_v19  ;;  %v4366_v14 = vsel %vm628_vm6, %v4365_v10, %v4364_v48  ;;  %v12688_v58 = vld [vmem:[%s15267_s5 + $0xa0] ss:$8 sps:$4 sm:$0xff]   ;;  %15726 = vst [vmem:[#allocation45_spill] sm:$0xff] %v12694_v20  ;;  %v12711_v19 = vld [vmem:[%s15267_s5 + $0x164] ss:$8 sps:$4 sm:$0xff]  }
 0x208   :  { %4429 = vmatprep.subr.bf16.mxu1 %v15721_v43  ;;  %v4389_v47 = vrot.slane %v4298_v0, 3  ;;  %v4305_v2 = vunpack.c.l.b16 %v4209_v25  ;;  %v4388_v27 = vsel %vm619_vm3, %v4387_v61, %v4386_v50  ;;  %v3756_v12 = vpack.c.b16 %v3737_v11, %v3737_v11  ;;  %15725 = vst [vmem:[#allocation17_spill] sm:$0xff] %v12688_v58  ;;  %v12704_v0 = vld [vmem:[%s15267_s5 + $0x170] ss:$8 sps:$4 sm:$0xff]   ;;  %v12734_v50 = vld [vmem:[%s15267_s5 + $0x160] ss:$8 sps:$4 sm:$0xff]  }
 0x209   :  { %v4321_v43 = vrot.slane %v4299_v30, 2  ;;  %v4310_v7 = vunpack.c.l.b16 %v4214_v28  ;;  %v4320_v49 = vsel %vm622_vm4, %v4319_v26, %v4318_v22  ;;  %v4398_v57 = vpack.c.b16 %v4366_v14, %v4366_v14  ;;  %v12752_v14 = vld [vmem:[%s15267_s5 + $0x274] ss:$8 sps:$4 sm:$0xff]  }
 0x20a   :  { %3873 = vmatpush2.bf16.msra.mxu0 %v12632_v1  ;;  %v4391_v21 = vrot.slane %v4304_v62, 2  ;;  %v4323_v41 = vrot.slane %v4305_v2, 1  ;;  %v12746_v62 = vld [vmem:[%s15267_s5 + $0x80] ss:$8 sps:$4 sm:$0xff]   ;;  %15732 = vst [vmem:[#allocation42_spill] sm:$0xff] %v12752_v14 }
 0x20b   :  { %3874 = vmatprep.subr.bf16.mxu0 %v12640_v39  ;;  %4430 = vmatpush2.bf16.msra.mxu1 %v15723_v3  ;;  %v4322_v13 = vsel %vm625_vm5, %v4321_v43, %v4320_v49  ;;  %v4393_v23 = vrot.slane %v4310_v7, 1  ;;  %15731 = vst [vmem:[#allocation36_spill] sm:$0xff] %v12746_v62  ;;  %v12776_v43 = vld [vmem:[%s15267_s5 + $0x140] ss:$8 sps:$4 sm:$0xff]  }
 0x20c   :  { %4431 = vmatprep.subr.bf16.mxu1 %v15724_v53  ;;  %v4324_v48 = vsel %vm628_vm6, %v4323_v41, %v4322_v13  ;;  %v12727_v53 = vld [vmem:[%s15267_s5 + $0x84] ss:$8 sps:$4 sm:$0xff]   ;;  %v15733_v7 = vld [vmem:[#allocation6_spill] sm:$0xff] }
 0x20d   :  { %15730 = vst [vmem:[#allocation47_spill] sm:$0xff] %v12727_v53  ;;  %v4395_v11 = vpack.c.b16 %v4324_v48, %v4324_v48  ;;  %v3962_v49 = vrot.slane %v15688_v16, %v15733_v7  ;;  %v3938_v13 = vrot.slane %v15694_v52, %v15733_v7  ;;  %v4082_v48 = vrot.slane %v12258_v17, %v15733_v7 }
 0x20e   :  { %3875 = vmatpush2.bf16.msra.mxu0 %v12656_v63 }
 0x20f   :  { %3876 = vmatprep.subr.bf16.mxu0 %v12663_v32  ;;  %4432 = vmatpush2.bf16.msra.mxu1 %v12281_v29  ;;  %v12681_v29 = vld [vmem:[%s15267_s5 + $0x174] ss:$8 sps:$4 sm:$0xff]   ;;  %v4175_v41 = vpack.c.bf16 %v3962_v49, %v3962_v49  ;;  %v8386_v49 = vld [vmem:[%s15268_s1 + $0x6] ss:$8 sm:$0x30] }
 0x210   :  { %4433 = vmatprep.subr.bf16.mxu1 %v12291_v40  ;;  %v4390_v40 = vsel %vm622_vm4, %v4389_v47, %v4388_v27  ;;  %v12758_v47 = vld [vmem:[%s15267_s5 + $0x150] ss:$8 sps:$4 sm:$0xff]   ;;  %v12766_v27 = vld [vmem:[%s15267_s5 + $0x144] ss:$8 sps:$4 sm:$0xff]  }
 0x211   :  { %v4392_v3 = vsel %vm625_vm5, %v4391_v21, %v4390_v40  ;;  %v3986_v21 = vrot.slane %v15692_v8, %v15733_v7  ;;  %v12794_v40 = vld [vmem:[%s15267_s5 + $0x130] ss:$8 sps:$4 sm:$0xff]  }
 0x212   :  { %3877 = vmatpush2.bf16.msra.mxu0 %v12674_v34  ;;  %v4394_v28 = vsel %vm628_vm6, %v4393_v23, %v4392_v3  ;;  %15734 = vst [vmem:[#allocation43_spill] sm:$0xff] %v12794_v40  ;;  %v4010_v23 = vrot.slane %v15697_v15, %v15733_v7  ;;  %v4034_v3 = vrot.slane %v15702_v6, %v15733_v7 }
 0x213   :  { %4448 = vmatprep.subr.bf16.mxu0 %v12681_v29  ;;  %4434 = vmatpush2.bf16.msra.mxu1 %v12688_v58  ;;  %v4400_v22 = vpack.c.b16 %v4394_v28, %v4394_v28 }
 0x214   :  { %4435 = vmatprep.subr.bf16.mxu1 %v12694_v20  ;;  %v15746_v20 = vld [vmem:[#allocation41_spill] sm:$0xff] }
 0x215   :  { %v2594_v33 = vpop.f32.mrf.mxu0  ;;  %3879 = vmatmul.mubr.bf16.vlgmr.msra.gmra.mxu0 %v3756_v12 }
 0x216   :  { %v12699_v10 = vadd.f32 %v2594_v33, %v12378_v42  ;;  %4449 = vmatpush1.bf16.msra.mxu0 %v12704_v0  ;;  %4480 = vmatprep.mubr.bf16.mxu0 %v4398_v57  ;;  %v12717_v42 = vld [vmem:[%s15267_s5 + $0x90] ss:$8 sps:$4 sm:$0xff]   ;;  %v8387_v33 = vld [vmem:[%s15268_s1 + $0x66] ss:$8 sm:$0xf] }
 0x217   :  { %v2596_v25 = vpop.f32.mrf.mxu0  ;;  %4450 = vmatprep.subr.bf16.mxu0 %v12711_v19  ;;  %15728 = vst [vmem:[#allocation35_spill] sm:$0xff] %v12717_v42  ;;  %4436 = vmatpush2.bf16.msra.mxu1 %v12717_v42 }
 0x218   :  { %15727 = vst [vmem:[#allocation18_spill] sm:$0xff] %v12699_v10  ;;  %v12722_v61 = vadd.f32 %v2596_v25, %v12382_v18  ;;  %4437 = vmatprep.subr.bf16.mxu1 %v12727_v53  ;;  %v12740_v18 = vld [vmem:[%s15267_s5 + $0x154] ss:$8 sps:$4 sm:$0xff]   ;;  %v4058_v25 = vrot.slane %v12239_v44, %v15733_v7 }
 0x219   :  { %v2598_v30 = vpop.f32.mrf.mxu0  ;;  %v8391_v10 = vld [vmem:[%s15268_s1 + $0x126] ss:$8 sm:$0xf] }
 0x21a   :  { %15729 = vst [vmem:[#allocation19_spill] sm:$0xff] %v12722_v61  ;;  %4451 = vmatpush1.bf16.msra.mxu0 %v12734_v50  ;;  %v4181_v30 = vpack.c.bf16 %v3986_v21, %v3986_v21  ;;  %v4187_v21 = vpack.c.bf16 %v4010_v23, %v4010_v23 }
 0x21b   :  { %4452 = vmatprep.subr.bf16.mxu0 %v12740_v18  ;;  %v2599_v26 = vpop.f32.mrf.mxu0  ;;  %4438 = vmatpush2.bf16.msra.mxu1 %v12746_v62  ;;  %v12761_v2 = vpop.f32.mrf.mxu1 }
 0x21c   :  { %4489 = vmatprep.subr.bf16.mxu1 %v12752_v14  ;;  %v12832_v26 = vld [vmem:[%s15267_s5 + $0x120] ss:$8 sps:$4 sm:$0xff]   ;;  %v8392_v14 = vld [vmem:[%s15268_s1 + $0x126] ss:$8 sm:$0x30]  ;;  %v4277_v23 = vunpack.c.l.b16 %v4181_v30 }
 0x21d   :  { %v12770_v12 = vpop.f32.mrf.mxu1  ;;  %15736 = vst [vmem:[#allocation31_spill] sm:$0xff] %v12832_v26 }
 0x21e   :  { %4453 = vmatpush1.bf16.msra.mxu0 %v12758_v47  ;;  %4440 = vmatmul.mubr.bf16.vlgmr.msra.gmra.mxu1 %v4395_v11  ;;  %v8389_v11 = vld [vmem:[%s15268_s1 + $0xc6] ss:$8 sm:$0xf] }
 0x21f   :  { %4454 = vmatprep.subr.bf16.mxu0 %v12766_v27  ;;  %4490 = vmatpush1.bf16.msra.mxu1 %v12336_v59  ;;  %v3159_v57 = vpop.f32.mrf.mxu1  ;;  %v12784_v59 = vld [vmem:[%s15267_s5 + $0x134] ss:$8 sps:$4 sm:$0xff]  }
 0x220   :  { %4521 = vmatprep.mubr.bf16.mxu1 %v4400_v22  ;;  %4491 = vmatprep.subr.bf16.mxu1 %v12343_v4  ;;  %v4271_v22 = vunpack.c.l.b16 %v4175_v41  ;;  %v12844_v57 = vld [vmem:[%s15267_s5 + $0x114] ss:$8 sps:$4 sm:$0xff]   ;;  %v4193_v41 = vpack.c.bf16 %v4034_v3, %v4034_v3 }
 0x221   :  { %v3160_v4 = vpop.f32.mrf.mxu1  ;;  %15737 = vst [vmem:[#allocation44_spill] sm:$0xff] %v12844_v57 }
 0x222   :  { %4455 = vmatpush1.bf16.msra.mxu0 %v12776_v43  ;;  %v4169_v4 = vpack.c.bf16 %v3938_v13, %v3938_v13  ;;  %v4106_v13 = vrot.slane %v12276_v56, %v15733_v7 }
 0x223   :  { %4456 = vmatprep.subr.bf16.mxu0 %v12784_v59  ;;  %4492 = vmatpush1.bf16.msra.mxu1 %v12353_v36  ;;  %v8388_v36 = vld [vmem:[%s15268_s1 + $0x66] ss:$8 sm:$0x30] }
 0x224   :  { %4493 = vmatprep.subr.bf16.mxu1 %v12359_v45  ;;  %v12806_v45 = vld [vmem:[%s15267_s5 + $0x124] ss:$8 sps:$4 sm:$0xff]   ;;  %v12821_v28 = vor.u32 %v8388_v36, %v8387_v33  ;;  %v4199_v33 = vpack.c.bf16 %v4058_v25, %v4058_v25  ;;  %v4205_v36 = vpack.c.bf16 %v4082_v48, %v4082_v48  ;;  %v12866_v25 = vld [vmem:[%s15267_s5 + $0x110] ss:$8 sps:$4 sm:$0xff]   ;;  %v4339_v48 = vrot.slane %v4271_v22, 7 }
 0x225   :  { %15735 = vst [vmem:[#allocation38_spill] sm:$0xff] %v12806_v45  ;;  %15738 = vst [vmem:[#allocation32_spill] sm:$0xff] %v12866_v25  ;;  %v4265_v30 = vunpack.c.l.b16 %v4169_v4  ;;  %v12884_v22 = vunpack.c.l.b16 %v4193_v41  ;;  %v4341_v4 = vrot.slane %v4277_v23, 6 }
 0x226   :  { %4457 = vmatpush1.bf16.msra.mxu0 %v12794_v40  ;;  %v4601_v3 = vrot.slane %v12821_v28, %v15655_v55  ;;  %v12886_v62 = vunpack.c.l.b16 %v4199_v33  ;;  %v12888_v53 = vunpack.c.l.b16 %v4205_v36  ;;  %v8395_v33 = vld [vmem:[%s15268_s1 + $0x1e6] ss:$8 sm:$0xf] }
 0x227   :  { %4458 = vmatprep.subr.bf16.mxu0 %v12806_v45  ;;  %4494 = vmatpush1.bf16.msra.mxu1 %v12369_v38  ;;  %v8390_v38 = vld [vmem:[%s15268_s1 + $0xc6] ss:$8 sm:$0x30]  ;;  %v12912_v36 = vld [vmem:[%s15267_s5 + $0x1f4] ss:$8 sps:$4 sm:$0xff]  }
 0x228   :  { %4495 = vmatprep.subr.bf16.mxu1 %v12375_v51  ;;  %v8385_v51 = vld [vmem:[%s15268_s1 + $0x6] ss:$8 sm:$0xf]  ;;  %v12848_v61 = vor.u32 %v8390_v38, %v8389_v11  ;;  %v4283_v11 = vunpack.c.l.b16 %v4187_v21  ;;  %v12875_v38 = vor.u32 %v8392_v14, %v8391_v10  ;;  %v4211_v14 = vpack.c.bf16 %v4106_v13, %v4106_v13  ;;  %15741 = vst [vmem:[#allocation46_spill] sm:$0xff] %v12912_v36 }
 0x229   :  { %v4817_v42 = vpack.c.bf16 %v4601_v3, %v4601_v3  ;;  %v4340_v13 = vsel %vm610_vm0, %v4339_v48, %v4265_v30  ;;  %v3970_v3 = vrot.slane %v15688_v16, %v15683_v35  ;;  %v8397_v16 = vld [vmem:[%s15268_s1 + $0x246] ss:$8 sm:$0xf] }
 0x22a   :  { %4459 = vmatpush1.bf16.msra.mxu0 %v12832_v26  ;;  %v4625_v10 = vrot.slane %v12848_v61, %v15655_v55  ;;  %v4343_v23 = vrot.slane %v4283_v11, 5  ;;  %v15752_v26 = vld [vmem:[#allocation20_spill] sm:$0xff] }
 0x22b   :  { %4460 = vmatprep.subr.bf16.mxu0 %v12844_v57  ;;  %4496 = vmatpush1.bf16.msra.mxu1 %v12387_v9  ;;  %v12859_v9 = vor.u32 %v8386_v49, %v8385_v51  ;;  %v8393_v51 = vld [vmem:[%s15268_s1 + $0x186] ss:$8 sm:$0xf]  ;;  %v4913_v11 = vunpack.c.l.b16 %v4817_v42 }
 0x22c   :  { %4497 = vmatprep.subr.bf16.mxu1 %v12393_v24  ;;  %v12872_v24 = vld [vmem:[%s15267_s5 + $0x104] ss:$8 sps:$4 sm:$0xff]  }
 0x22d   :  { %15739 = vst [vmem:[#allocation33_spill] sm:$0xff] %v12872_v24  ;;  %v8394_v49 = vld [vmem:[%s15268_s1 + $0x186] ss:$8 sm:$0x30]  ;;  %v4577_v21 = vrot.slane %v12859_v9, %v15655_v55 }
 0x22e   :  { %4461 = vmatpush1.bf16.msra.mxu0 %v12866_v25  ;;  %v12901_v41 = vor.u32 %v8394_v49, %v8393_v51  ;;  %v4649_v51 = vrot.slane %v12875_v38, %v15655_v55  ;;  %v4345_v49 = vrot.slane %v12884_v22, 4  ;;  %v12938_v22 = vld [vmem:[%s15267_s5 + $0x1f0] ss:$8 sps:$4 sm:$0xff]   ;;  %v12951_v42 = vld [vmem:[%s15267_s5 + $0x1e4] ss:$8 sps:$4 sm:$0xff]  }
 0x22f   :  { %4462 = vmatprep.subr.bf16.mxu0 %v12872_v24  ;;  %4498 = vmatpush1.bf16.msra.mxu1 %v12403_v46  ;;  %v12898_v46 = vld [vmem:[%s15267_s5 + $0x100] ss:$8 sps:$4 sm:$0xff]   ;;  %v15742_v24 = vld [vmem:[#allocation21_spill] sm:$0xff]  ;;  %v4811_v30 = vpack.c.bf16 %v4577_v21, %v4577_v21  ;;  %15743 = vst [vmem:[#allocation37_spill] sm:$0xff] %v12938_v22  ;;  %15744 = vst [vmem:[#allocation48_spill] sm:$0xff] %v12951_v42  ;;  %v12956_v21 = vrot.slane %v15697_v15, %v15683_v35 }
 0x230   :  { %4499 = vmatprep.subr.bf16.mxu1 %v12411_v60  ;;  %15740 = vst [vmem:[#allocation34_spill] sm:$0xff] %v12898_v46  ;;  %v8396_v60 = vld [vmem:[%s15268_s1 + $0x1e6] ss:$8 sm:$0x30]  ;;  %v12973_v15 = vrot.slane %v12239_v44, %v15683_v35  ;;  %v12988_v44 = vld [vmem:[%s15267_s5 + $0x1e0] ss:$8 sps:$4 sm:$0xff]  }
 0x231   :  { %v12927_v48 = vor.u32 %v8396_v60, %v8395_v33  ;;  %v4673_v33 = vrot.slane %v12901_v41, %v15655_v55  ;;  %v4829_v60 = vpack.c.bf16 %v4649_v51, %v4649_v51  ;;  %v15747_v25 = vld [vmem:[#allocation23_spill] sm:$0xff]  ;;  %v4907_v7 = vunpack.c.l.b16 %v4811_v30  ;;  %15748 = vst [vmem:[#allocation39_spill] sm:$0xff] %v12988_v44 }
 0x232   :  { %4463 = vmatpush1.bf16.msra.mxu0 %v12898_v46  ;;  %v4823_v46 = vpack.c.bf16 %v4625_v10, %v4625_v10  ;;  %v3946_v10 = vrot.slane %v15694_v52, %v15683_v35  ;;  %v12960_v52 = vrot.slane %v15702_v6, %v15683_v35  ;;  %v12977_v6 = vrot.slane %v12258_v17, %v15683_v35 }
 0x233   :  { %4464 = vmatprep.subr.bf16.mxu0 %v12912_v36  ;;  %4500 = vmatpush1.bf16.msra.mxu1 %v12427_v31  ;;  %v12925_v36 = vunpack.c.l.b16 %v4211_v14  ;;  %v8398_v31 = vld [vmem:[%s15268_s1 + $0x246] ss:$8 sm:$0x30]  ;;  %v3994_v14 = vrot.slane %v15692_v8, %v15683_v35  ;;  %v4697_v57 = vrot.slane %v12927_v48, %v15655_v55  ;;  %v4177_v17 = vpack.c.bf16 %v3970_v3, %v3970_v3 }
 0x234   :  { %4501 = vmatprep.subr.bf16.mxu1 %v15742_v24  ;;  %v4342_v24 = vsel %vm613_vm1, %v4341_v4, %v4340_v13  ;;  %v8399_v8 = vld [vmem:[%s15268_s1 + $0x2a6] ss:$8 sm:$0xf]  ;;  %v4925_v30 = vunpack.c.l.b16 %v4829_v60 }
 0x235   :  { %v8400_v4 = vld [vmem:[%s15268_s1 + $0x2a6] ss:$8 sm:$0x30]  ;;  %v4344_v51 = vsel %vm616_vm2, %v4343_v23, %v4342_v24  ;;  %v12998_v23 = vld [vmem:[%s15267_s5 + $0x1d4] ss:$8 sps:$4 sm:$0xff]   ;;  %v4841_v45 = vpack.c.bf16 %v4697_v57, %v4697_v57  ;;  %v4189_v57 = vpack.c.bf16 %v12956_v21, %v12956_v21 }
 0x236   :  { %4465 = vmatpush2.bf16.msra.mxu0 %v12938_v22  ;;  %v15745_v13 = vld [vmem:[#allocation4_spill] sm:$0xff]  ;;  %v4919_v22 = vunpack.c.l.b16 %v4823_v46  ;;  %v4835_v46 = vpack.c.bf16 %v4673_v33, %v4673_v33  ;;  %15750 = vst [vmem:[#allocation16_spill] sm:$0xff] %v12998_v23  ;;  %v4346_v33 = vsel %vm619_vm3, %v4345_v49, %v4344_v51  ;;  %v4273_v49 = vunpack.c.l.b16 %v4177_v17 }
 0x237   :  { %4466 = vmatprep.subr.bf16.mxu0 %v12951_v42  ;;  %v4609_v58 = vrot.slane %v12821_v28, %v15745_v13  ;;  %4502 = vmatpush1.bf16.msra.mxu1 %v15746_v20  ;;  %v12979_v42 = vor.u32 %v8398_v31, %v8397_v16  ;;  %v4968_v20 = vrot.slane %v4913_v11, 7  ;;  %v12991_v16 = vor.u32 %v8400_v4, %v8399_v8  ;;  %v15751_v24 = vld [vmem:[#allocation24_spill] sm:$0xff] }
 0x238   :  { %4503 = vmatprep.subr.bf16.mxu1 %v15747_v25  ;;  %v4633_v25 = vrot.slane %v12848_v61, %v15745_v13  ;;  %v13003_v31 = vrot.slane %v12276_v56, %v15683_v35  ;;  %v4585_v3 = vrot.slane %v12859_v9, %v15745_v13  ;;  %v4171_v8 = vpack.c.bf16 %v3946_v10, %v3946_v10 }
 0x239   :  { %15749 = vst [vmem:[#allocation49_spill] sm:$0xff] %v12991_v16  ;;  %v4819_v11 = vpack.c.bf16 %v4609_v58, %v4609_v58  ;;  %v4721_v4 = vrot.slane %v12979_v42, %v15655_v55  ;;  %v4969_v56 = vsel %vm610_vm0, %v4968_v20, %v4907_v7  ;;  %v4657_v60 = vrot.slane %v12875_v38, %v15745_v13  ;;  %v13018_v58 = vld [vmem:[%s15267_s5 + $0x1d0] ss:$8 sps:$4 sm:$0xff]   ;;  %v13026_v7 = vld [vmem:[%s15267_s5 + $0x1c4] ss:$8 sps:$4 sm:$0xff]  }
 0x23a   :  { %4467 = vmatpush2.bf16.msra.mxu0 %v12988_v44  ;;  %v4970_v44 = vrot.slane %v4919_v22, 6  ;;  %15753 = vst [vmem:[#allocation40_spill] sm:$0xff] %v13018_v58  ;;  %v4745_v22 = vrot.slane %v12991_v16, %v15655_v55  ;;  %v4931_v10 = vunpack.c.l.b16 %v4835_v46  ;;  %15754 = vst [vmem:[#allocation21_spill] sm:$0xff] %v13026_v7  ;;  %v4813_v51 = vpack.c.bf16 %v4585_v3, %v4585_v3 }
 0x23b   :  { %4468 = vmatprep.subr.bf16.mxu0 %v12998_v23  ;;  %4504 = vmatpush1.bf16.msra.mxu1 %v15751_v24  ;;  %v4183_v23 = vpack.c.bf16 %v3994_v14, %v3994_v14  ;;  %v4972_v14 = vrot.slane %v4925_v30, 5  ;;  %v4915_v20 = vunpack.c.l.b16 %v4819_v11  ;;  %v15755_v24 = vld [vmem:[#allocation27_spill] sm:$0xff]  ;;  %v4195_v17 = vpack.c.bf16 %v12960_v52, %v12960_v52 }
 0x23c   :  { %4505 = vmatprep.subr.bf16.mxu1 %v15752_v26  ;;  %v4825_v26 = vpack.c.bf16 %v4633_v25, %v4633_v25  ;;  %v4847_v46 = vpack.c.bf16 %v4721_v4, %v4721_v4  ;;  %v4971_v25 = vsel %vm613_vm1, %v4970_v44, %v4969_v56  ;;  %v4681_v35 = vrot.slane %v12901_v41, %v15745_v13  ;;  %v13041_v30 = vld [vmem:[%s15267_s5 + $0x1c0] ss:$8 sps:$4 sm:$0xff]   ;;  %v13047_v4 = vld [vmem:[%s15267_s5 + $0x1b4] ss:$8 sps:$4 sm:$0xff]  }
 0x23d   :  { %v4279_v55 = vunpack.c.l.b16 %v4183_v23  ;;  %v4937_v40 = vunpack.c.l.b16 %v4841_v45  ;;  %v4831_v21 = vpack.c.bf16 %v4657_v60, %v4657_v60  ;;  %15757 = vst [vmem:[#allocation41_spill] sm:$0xff] %v13041_v30  ;;  %v4367_v52 = vrot.slane %v4273_v49, 7  ;;  %15758 = vst [vmem:[#allocation23_spill] sm:$0xff] %v13047_v4  ;;  %v15759_v60 = vld [vmem:[#allocation26_spill] sm:$0xff] }
 0x23e   :  { %4469 = vmatpush2.bf16.msra.mxu0 %v13018_v58  ;;  %v15756_v58 = vld [vmem:[#allocation25_spill] sm:$0xff]  ;;  %v4853_v3 = vpack.c.bf16 %v4745_v22, %v4745_v22  ;;  %v4974_v11 = vrot.slane %v4931_v10, 4  ;;  %v4921_v44 = vunpack.c.l.b16 %v4825_v26  ;;  %v4973_v45 = vsel %vm616_vm2, %v4972_v14, %v4971_v25 }
 0x23f   :  { %4470 = vmatprep.subr.bf16.mxu0 %v13026_v7  ;;  %4506 = vmatpush2.bf16.msra.mxu1 %v15755_v24  ;;  %v4267_v7 = vunpack.c.l.b16 %v4171_v8  ;;  %v4705_v23 = vrot.slane %v12927_v48, %v15745_v13  ;;  %v4909_v8 = vunpack.c.l.b16 %v4813_v51  ;;  %v4996_v56 = vrot.slane %v4915_v20, 7  ;;  %v15761_v24 = vld [vmem:[#allocation9_spill] sm:$0xff] }
 0x240   :  { %4507 = vmatprep.subr.bf16.mxu1 %v15756_v58  ;;  %v15760_v58 = vrot.slane %v12886_v62, 3  ;;  %v4285_v22 = vunpack.c.l.b16 %v4189_v57  ;;  %v4943_v10 = vunpack.c.l.b16 %v4847_v46  ;;  %v4837_v26 = vpack.c.bf16 %v4681_v35, %v4681_v35  ;;  %v13063_v51 = vld [vmem:[%s15267_s5 + $0x1b0] ss:$8 sps:$4 sm:$0xff]  }
 0x241   :  { %v4369_v14 = vrot.slane %v4279_v55, 6  ;;  %v4976_v25 = vrot.slane %v4937_v40, 3  ;;  %v4368_v62 = vsel %vm610_vm0, %v4367_v52, %v4267_v7  ;;  %v4729_v35 = vrot.slane %v12979_v42, %v15745_v13  ;;  %v13073_v55 = vld [vmem:[%s15267_s5 + $0x1a4] ss:$8 sps:$4 sm:$0xff]  }
 0x242   :  { %4471 = vmatpush2.bf16.msra.mxu0 %v13041_v30  ;;  %v4348_v49 = vsel %vm622_vm4, %v15760_v58, %v4346_v33  ;;  %v4927_v30 = vunpack.c.l.b16 %v4831_v21  ;;  %v4975_v33 = vsel %vm619_vm3, %v4974_v11, %v4973_v45  ;;  %v4998_v57 = vrot.slane %v4921_v44, 6  ;;  %v15762_v21 = vld [vmem:[#allocation11_spill] sm:$0xff]  ;;  %v15763_v45 = vld [vmem:[#allocation29_spill] sm:$0xff] }
 0x243   :  { %4472 = vmatprep.subr.bf16.mxu0 %v13047_v4  ;;  %4508 = vmatpush2.bf16.msra.mxu1 %v15759_v60  ;;  %v4201_v4 = vpack.c.bf16 %v12973_v15, %v12973_v15  ;;  %v4291_v40 = vunpack.c.l.b16 %v4195_v17  ;;  %v4949_v15 = vunpack.c.l.b16 %v4853_v3  ;;  %v4843_v20 = vpack.c.bf16 %v4705_v23, %v4705_v23  ;;  %v13088_v23 = vld [vmem:[%s15267_s5 + $0x1a0] ss:$8 sps:$4 sm:$0xff]  }
 0x244   :  { %4509 = vmatprep.subr.bf16.mxu1 %v15761_v24  ;;  %v4997_v46 = vsel %vm610_vm0, %v4996_v56, %v4909_v8  ;;  %v4207_v7 = vpack.c.bf16 %v12977_v6, %v12977_v6  ;;  %v4371_v52 = vrot.slane %v4285_v22, 5  ;;  %v4978_v11 = vrot.slane %v4943_v10, 2  ;;  %v13096_v10 = vld [vmem:[%s15267_s5 + $0x194] ss:$8 sps:$4 sm:$0xff]  }
 0x245   :  { %v4933_v44 = vunpack.c.l.b16 %v4837_v26  ;;  %v4370_v60 = vsel %vm613_vm1, %v4369_v14, %v4368_v62  ;;  %v4977_v58 = vsel %vm622_vm4, %v4976_v25, %v4975_v33  ;;  %v4753_v17 = vrot.slane %v12991_v16, %v15745_v13  ;;  %v15765_v62 = vld [vmem:[#allocation30_spill] sm:$0xff] }
 0x246   :  { %4473 = vmatpush2.bf16.msra.mxu0 %v13063_v51  ;;  %v5000_v3 = vrot.slane %v4927_v30, 5  ;;  %v4351_v6 = vrot.slane %v12925_v36, 1  ;;  %v4297_v8 = vunpack.c.l.b16 %v4201_v4  ;;  %v4849_v56 = vpack.c.bf16 %v4729_v35, %v4729_v35 }
 0x247   :  { %4474 = vmatprep.subr.bf16.mxu0 %v13073_v55  ;;  %4510 = vmatpush2.bf16.msra.mxu1 %v15762_v21  ;;  %v4999_v22 = vsel %vm613_vm1, %v4998_v57, %v4997_v46  ;;  %v15764_v30 = vrot.slane %v12888_v53, 2  ;;  %v4373_v24 = vrot.slane %v4291_v40, 4  ;;  %v4980_v14 = vrot.slane %v4949_v15, 1  ;;  %v15766_v57 = vld [vmem:[#allocation22_spill] sm:$0xff] }
 0x248   :  { %4511 = vmatprep.subr.bf16.mxu1 %v15763_v45  ;;  %v4939_v25 = vunpack.c.l.b16 %v4843_v20  ;;  %v4213_v36 = vpack.c.bf16 %v13003_v31, %v13003_v31  ;;  %v4372_v4 = vsel %vm616_vm2, %v4371_v52, %v4370_v60  ;;  %v4979_v33 = vsel %vm625_vm5, %v4978_v11, %v4977_v58  ;;  %v13119_v20 = vld [vmem:[%s15267_s5 + $0x184] ss:$8 sps:$4 sm:$0xff]  }
 0x249   :  { %v4350_v26 = vsel %vm625_vm5, %v15764_v30, %v4348_v49  ;;  %v5002_v35 = vrot.slane %v4933_v44, 4  ;;  %v4303_v46 = vunpack.c.l.b16 %v4207_v7  ;;  %v4855_v21 = vpack.c.bf16 %v4753_v17, %v4753_v17  ;;  %v13112_v49 = vld [vmem:[%s15267_s5 + $0x190] ss:$8 sps:$4 sm:$0xff]  }
 0x24a   :  { %4475 = vmatpush2.bf16.msra.mxu0 %v13088_v23  ;;  %v5001_v53 = vsel %vm616_vm2, %v5000_v3, %v4999_v22  ;;  %v4352_v31 = vsel %vm628_vm6, %v4351_v6, %v4350_v26  ;;  %v4375_v40 = vrot.slane %v4297_v8, 3  ;;  %v4945_v15 = vunpack.c.l.b16 %v4849_v56  ;;  %v13130_v3 = vld [vmem:[%s15267_s5 + $0x180] ss:$8 sps:$4 sm:$0xff]  }
 0x24b   :  { %4476 = vmatprep.subr.bf16.mxu0 %v13096_v10  ;;  %4512 = vmatpush2.bf16.msra.mxu1 %v15765_v62  ;;  %v4374_v7 = vsel %vm619_vm3, %v4373_v24, %v4372_v4  ;;  %v4981_v52 = vsel %vm628_vm6, %v4980_v14, %v4979_v33  ;;  %v5004_v11 = vrot.slane %v4939_v25, 3  ;;  %v4309_v44 = vunpack.c.l.b16 %v4213_v36  ;;  %v15767_v22 = vld [vmem:[#allocation12_spill] sm:$0xff]  ;;  %v15768_v62 = vld [vmem:[#allocation13_spill] sm:$0xff] }
 0x24c   :  { %4513 = vmatprep.subr.bf16.mxu1 %v15766_v57  ;;  %v5003_v45 = vsel %vm619_vm3, %v5002_v35, %v5001_v53  ;;  %v4397_v60 = vpack.c.b16 %v4352_v31, %v4352_v31  ;;  %v4377_v58 = vrot.slane %v4303_v46, 2  ;;  %v4951_v17 = vunpack.c.l.b16 %v4855_v21  ;;  %v13151_v33 = vld [vmem:[%s15267_s5 + $0x70] ss:$8 sps:$4 sm:$0xff]   ;;  %v13168_v21 = vld [vmem:[%s15267_s5 + $0x60] ss:$8 sps:$4 sm:$0xff]  }
 0x24d   :  { %v4376_v6 = vsel %vm622_vm4, %v4375_v40, %v4374_v7  ;;  %v5039_v8 = vpack.c.b16 %v4981_v52, %v4981_v52  ;;  %v5006_v56 = vrot.slane %v4945_v15, 2  ;;  %v3156_v30 = vadd.f32 %v12761_v2, %v15767_v22  ;;  %v13158_v2 = vld [vmem:[%s15267_s5 + $0x64] ss:$8 sps:$4 sm:$0xff]   ;;  %v13182_v40 = vld [vmem:[%s15267_s5 + $0x50] ss:$8 sps:$4 sm:$0xff]  }
 0x24e   :  { %4477 = vmatpush2.bf16.msra.mxu0 %v13112_v49  ;;  %v4379_v26 = vrot.slane %v4309_v44, 1  ;;  %v4378_v14 = vsel %vm625_vm5, %v4377_v58, %v4376_v6  ;;  %v5008_v25 = vrot.slane %v4951_v17, 1  ;;  %v3158_v36 = vadd.f32 %v12770_v12, %v15768_v62  ;;  %v13188_v7 = vld [vmem:[%s15267_s5 + $0x44] ss:$8 sps:$4 sm:$0xff]  }
 0x24f   :  { %4478 = vmatprep.subr.bf16.mxu0 %v13119_v20  ;;  %4514 = vmatpush2.bf16.msra.mxu1 %v12607_v54  ;;  %v13137_v54 = vld [vmem:[%s15267_s5 + $0x74] ss:$8 sps:$4 sm:$0xff]  }
 0x250   :  { %4515 = vmatprep.subr.bf16.mxu1 %v12617_v5  ;;  %v5005_v5 = vsel %vm622_vm4, %v5004_v11, %v5003_v45  ;;  %v4380_v12 = vsel %vm628_vm6, %v4379_v26, %v4378_v14  ;;  %v13202_v45 = vld [vmem:[%s15267_s5 + $0x40] ss:$8 sps:$4 sm:$0xff]   ;;  %v13234_v26 = vld [vmem:[%s15267_s5 + $0x24] ss:$8 sps:$4 sm:$0xff]  }
 0x251   :  { %v4399_v53 = vpack.c.b16 %v4380_v12, %v4380_v12  ;;  %15774 = vst [vmem:[#allocation26_spill] sm:$0xff] %v13234_v26 }
 0x252   :  { %4479 = vmatpush2.bf16.msra.mxu0 %v13130_v3 }
 0x253   :  { %5050 = vmatprep.subr.bf16.mxu0 %v13137_v54  ;;  %4516 = vmatpush2.bf16.msra.mxu1 %v12632_v1  ;;  %v5007_v1 = vsel %vm625_vm5, %v5006_v56, %v5005_v5  ;;  %v13222_v56 = vld [vmem:[%s15267_s5 + $0x30] ss:$8 sps:$4 sm:$0xff]  }
 0x254   :  { %4517 = vmatprep.subr.bf16.mxu1 %v12640_v39  ;;  %v5009_v46 = vsel %vm628_vm6, %v5008_v25, %v5007_v1  ;;  %15773 = vst [vmem:[#allocation25_spill] sm:$0xff] %v13222_v56 }
 0x255   :  { %v3196_v24 = vpop.f32.mrf.mxu0  ;;  %4481 = vmatmul.mubr.bf16.vlgmr.msra.gmra.mxu0 %v4397_v60 }
 0x256   :  { %v3197_v4 = vadd.f32 %v3196_v24, %v3156_v30  ;;  %5051 = vmatpush1.bf16.msra.mxu0 %v13151_v33  ;;  %5082 = vmatprep.mubr.bf16.mxu0 %v5039_v8 }
 0x257   :  { %v3198_v39 = vpop.f32.mrf.mxu0  ;;  %5052 = vmatprep.subr.bf16.mxu0 %v13158_v2  ;;  %4518 = vmatpush2.bf16.msra.mxu1 %v12656_v63  ;;  %v13174_v63 = vld [vmem:[%s15267_s5 + $0x54] ss:$8 sps:$4 sm:$0xff]  }
 0x258   :  { %v3199_v35 = vadd.f32 %v3198_v39, %v3158_v36  ;;  %4519 = vmatprep.subr.bf16.mxu1 %v12663_v32  ;;  %v5041_v32 = vpack.c.b16 %v5009_v46, %v5009_v46  ;;  %v13242_v36 = vld [vmem:[%s15267_s5 + $0x20] ss:$8 sps:$4 sm:$0xff]  }
 0x259   :  { %v3200_v57 = vpop.f32.mrf.mxu0  ;;  %15775 = vst [vmem:[#allocation9_spill] sm:$0xff] %v13242_v36 }
 0x25a   :  { %5053 = vmatpush1.bf16.msra.mxu0 %v13168_v21 }
 0x25b   :  { %5054 = vmatprep.subr.bf16.mxu0 %v13174_v63  ;;  %v3201_v31 = vpop.f32.mrf.mxu0  ;;  %4520 = vmatpush2.bf16.msra.mxu1 %v12674_v34  ;;  %v3237_v15 = vpop.f32.mrf.mxu1  ;;  %v15769_v34 = vld [vmem:[#allocation5_spill] sm:$0xff] }
 0x25c   :  { %5091 = vmatprep.subr.bf16.mxu1 %v12681_v29  ;;  %v4597_v52 = vrot.slane %v12821_v28, %v15769_v34  ;;  %v13193_v29 = vadd.f32 %v3237_v15, %v3197_v4  ;;  %v4621_v60 = vrot.slane %v12848_v61, %v15769_v34  ;;  %v4645_v8 = vrot.slane %v12875_v38, %v15769_v34  ;;  %v13260_v31 = vld [vmem:[%s15267_s5 + $0x10] ss:$8 sps:$4 sm:$0xff]  }
 0x25d   :  { %v3239_v11 = vpop.f32.mrf.mxu1  ;;  %v4669_v5 = vrot.slane %v12901_v41, %v15769_v34  ;;  %v4693_v30 = vrot.slane %v12927_v48, %v15769_v34  ;;  %15777 = vst [vmem:[#allocation29_spill] sm:$0xff] %v13260_v31 }
 0x25e   :  { %5055 = vmatpush1.bf16.msra.mxu0 %v13182_v40  ;;  %4522 = vmatmul.mubr.bf16.vlgmr.msra.gmra.mxu1 %v4399_v53  ;;  %15770 = vst [vmem:[#allocation24_spill] sm:$0xff] %v13193_v29  ;;  %v13197_v44 = vadd.f32 %v3239_v11, %v3199_v35  ;;  %v4816_v17 = vpack.c.bf16 %v4597_v52, %v4597_v52  ;;  %v13248_v35 = vld [vmem:[%s15267_s5 + $0x14] ss:$8 sps:$4 sm:$0xff]   ;;  %v13363_v29 = vld [vmem:[%s15267_s5 + $0xe4] ss:$8 sps:$4 sm:$0xff]  }
 0x25f   :  { %5056 = vmatprep.subr.bf16.mxu0 %v13188_v7  ;;  %5092 = vmatpush1.bf16.msra.mxu1 %v12704_v0  ;;  %v3241_v58 = vpop.f32.mrf.mxu1  ;;  %v13210_v0 = vld [vmem:[%s15267_s5 + $0x34] ss:$8 sps:$4 sm:$0xff]   ;;  %v4828_v25 = vpack.c.bf16 %v4645_v8, %v4645_v8  ;;  %v4834_v4 = vpack.c.bf16 %v4669_v5, %v4669_v5  ;;  %v4840_v1 = vpack.c.bf16 %v4693_v30, %v4693_v30 }
 0x260   :  { %5123 = vmatprep.mubr.bf16.mxu1 %v5041_v32  ;;  %5093 = vmatprep.subr.bf16.mxu1 %v12711_v19  ;;  %15771 = vst [vmem:[#allocation20_spill] sm:$0xff] %v13197_v44  ;;  %15772 = vst [vmem:[#allocation27_spill] sm:$0xff] %v13210_v0  ;;  %v4573_v19 = vrot.slane %v12859_v9, %v15769_v34  ;;  %v4912_v14 = vunpack.c.l.b16 %v4816_v17  ;;  %v4617_v53 = vrot.slane %v12821_v28, %v15704_v37  ;;  %v15779_v58 = vld [vmem:[#allocation43_spill] sm:$0xff]  ;;  %v15780_v8 = vld [vmem:[#allocation38_spill] sm:$0xff] }
 0x261   :  { %v3242_v6 = vpop.f32.mrf.mxu1  ;;  %15776 = vst [vmem:[#allocation11_spill] sm:$0xff] %v13248_v35  ;;  %v4924_v46 = vunpack.c.l.b16 %v4828_v25  ;;  %v4930_v32 = vunpack.c.l.b16 %v4834_v4  ;;  %v13263_v15 = vunpack.c.l.b16 %v4840_v1  ;;  %v8403_v17 = vld [vmem:[%s15268_s1 + $0x67] ss:$8 sm:$0xf]  ;;  %v4593_v30 = vrot.slane %v12859_v9, %v15704_v37  ;;  %15789 = vst [vmem:[#allocation50_spill] sm:$0xff] %v13363_v29 }
 0x262   :  { %5057 = vmatpush1.bf16.msra.mxu0 %v13202_v45  ;;  %v4810_v24 = vpack.c.bf16 %v4573_v19, %v4573_v19  ;;  %v4954_v57 = vrot.slane %v4912_v14, 7  ;;  %v4641_v19 = vrot.slane %v12848_v61, %v15704_v37  ;;  %v8404_v6 = vld [vmem:[%s15268_s1 + $0x67] ss:$8 sm:$0x30]  ;;  %v13298_v1 = vld [vmem:[%s15267_s5 + $0xf4] ss:$8 sps:$4 sm:$0xff]  }
 0x263   :  { %5058 = vmatprep.subr.bf16.mxu0 %v13210_v0  ;;  %5094 = vmatpush1.bf16.msra.mxu1 %v12734_v50  ;;  %v4717_v50 = vrot.slane %v12979_v42, %v15769_v34  ;;  %v4958_v5 = vrot.slane %v4924_v46, 5  ;;  %v4960_v14 = vrot.slane %v4930_v32, 4  ;;  %v4962_v25 = vrot.slane %v13263_v15, 3  ;;  %15782 = vst [vmem:[#allocation43_spill] sm:$0xff] %v13298_v1  ;;  %v15784_v46 = vld [vmem:[#allocation31_spill] sm:$0xff]  ;;  %v15803_v0 = vld [vmem:[#allocation48_spill] sm:$0xff] }
 0x264   :  { %5095 = vmatprep.subr.bf16.mxu1 %v12740_v18  ;;  %v4822_v18 = vpack.c.bf16 %v4621_v60, %v4621_v60 }
 0x265   :  { %v4846_v39 = vpack.c.bf16 %v4717_v50, %v4717_v50  ;;  %v4821_v50 = vpack.c.bf16 %v4617_v53, %v4617_v53  ;;  %v15785_v53 = vld [vmem:[#allocation6_spill] sm:$0xff] }
 0x266   :  { %5059 = vmatpush1.bf16.msra.mxu0 %v13222_v56  ;;  %v4918_v12 = vunpack.c.l.b16 %v4822_v18  ;;  %v13289_v18 = vld [vmem:[%s15267_s5] ss:$8 sps:$4 sm:$0xff]   ;;  %v13316_v32 = vrot.slane %v12859_v9, %v15785_v53  ;;  %v4605_v15 = vrot.slane %v12821_v28, %v15785_v53  ;;  %v13344_v44 = vrot.slane %v12901_v41, %v15785_v53 }
 0x267   :  { %5060 = vmatprep.subr.bf16.mxu0 %v13234_v26  ;;  %5096 = vmatpush1.bf16.msra.mxu1 %v12758_v47  ;;  %v4741_v47 = vrot.slane %v12991_v16, %v15769_v34  ;;  %v13265_v52 = vunpack.c.l.b16 %v4846_v39  ;;  %15781 = vst [vmem:[#allocation22_spill] sm:$0xff] %v13289_v18  ;;  %v4917_v4 = vunpack.c.l.b16 %v4821_v50  ;;  %v8407_v50 = vld [vmem:[%s15268_s1 + $0x127] ss:$8 sm:$0xf]  ;;  %v13378_v34 = vrot.slane %v12991_v16, %v15785_v53 }
 0x268   :  { %5097 = vmatprep.subr.bf16.mxu1 %v12766_v27  ;;  %v4906_v27 = vunpack.c.l.b16 %v4810_v24  ;;  %v4956_v11 = vrot.slane %v4918_v12, 6  ;;  %v4665_v12 = vrot.slane %v12875_v38, %v15704_v37 }
 0x269   :  { %v5024_v26 = vrot.slane %v4917_v4, 7 }
 0x26a   :  { %5061 = vmatpush1.bf16.msra.mxu0 %v13242_v36  ;;  %v4955_v60 = vsel %vm610_vm0, %v4954_v57, %v4906_v27  ;;  %v8405_v27 = vld [vmem:[%s15268_s1 + $0xc7] ss:$8 sm:$0xf] }
 0x26b   :  { %5062 = vmatprep.subr.bf16.mxu0 %v13248_v35  ;;  %5098 = vmatpush1.bf16.msra.mxu1 %v12776_v43  ;;  %v13270_v43 = vld [vmem:[%s15267_s5 + $0x4] ss:$8 sps:$4 sm:$0xff]   ;;  %v4957_v24 = vsel %vm613_vm1, %v4956_v11, %v4955_v60  ;;  %v13322_v11 = vrot.slane %v12848_v61, %v15785_v53  ;;  %v4818_v35 = vpack.c.bf16 %v4605_v15, %v4605_v15  ;;  %v13394_v15 = vld [vmem:[%s15267_s5 + $0xe0] ss:$8 sps:$4 sm:$0xff]  }
 0x26c   :  { %5099 = vmatprep.subr.bf16.mxu1 %v12784_v59  ;;  %15778 = vst [vmem:[#allocation30_spill] sm:$0xff] %v13270_v43  ;;  %v4852_v59 = vpack.c.bf16 %v4741_v47, %v4741_v47  ;;  %v13305_v47 = vor.u32 %v8404_v6, %v8403_v17  ;;  %v8406_v57 = vld [vmem:[%s15268_s1 + $0xc7] ss:$8 sm:$0x30]  ;;  %v4959_v6 = vsel %vm616_vm2, %v4958_v5, %v4957_v24 }
 0x26d   :  { %v8401_v60 = vld [vmem:[%s15268_s1 + $0x7] ss:$8 sm:$0xf]  ;;  %v13348_v5 = vrot.slane %v12927_v48, %v15785_v53  ;;  %v4689_v24 = vrot.slane %v12901_v41, %v15704_v37 }
 0x26e   :  { %5063 = vmatpush1.bf16.msra.mxu0 %v13260_v31  ;;  %v13301_v39 = vunpack.c.l.b16 %v4852_v59  ;;  %15783 = vst [vmem:[#allocation38_spill] sm:$0xff] %v13305_v47  ;;  %v4827_v59 = vpack.c.bf16 %v4641_v19, %v4641_v19  ;;  %v15786_v17 = vld [vmem:[#allocation44_spill] sm:$0xff]  ;;  %v4961_v31 = vsel %vm619_vm3, %v4960_v14, %v4959_v6  ;;  %v4824_v6 = vpack.c.bf16 %v13322_v11, %v13322_v11 }
 0x26f   :  { %5064 = vmatprep.subr.bf16.mxu0 %v13270_v43  ;;  %5100 = vmatpush1.bf16.msra.mxu1 %v15779_v58  ;;  %v8402_v58 = vld [vmem:[%s15268_s1 + $0x7] ss:$8 sm:$0x30]  ;;  %v13339_v19 = vld [vmem:[%s15267_s5 + $0xf0] ss:$8 sps:$4 sm:$0xff]   ;;  %v4839_v4 = vpack.c.bf16 %v4689_v24, %v4689_v24 }
 0x270   :  { %5101 = vmatprep.subr.bf16.mxu1 %v15780_v8  ;;  %v13334_v8 = vrot.slane %v12875_v38, %v15785_v53  ;;  %15787 = vst [vmem:[#allocation31_spill] sm:$0xff] %v13339_v19  ;;  %v15792_v43 = vld [vmem:[#allocation32_spill] sm:$0xff] }
 0x271   :  { %v8409_v36 = vld [vmem:[%s15268_s1 + $0x187] ss:$8 sm:$0xf] }
 0x272   :  { %5065 = vmatpush1.bf16.msra.mxu0 %v13289_v18  ;;  %v8410_v14 = vld [vmem:[%s15268_s1 + $0x187] ss:$8 sm:$0x30] }
 0x273   :  { %5066 = vmatprep.subr.bf16.mxu0 %v13298_v1  ;;  %5102 = vmatpush1.bf16.msra.mxu1 %v15784_v46  ;;  %v4815_v46 = vpack.c.bf16 %v4593_v30, %v4593_v30  ;;  %v13352_v30 = vor.u32 %v8406_v57, %v8405_v27  ;;  %v4833_v27 = vpack.c.bf16 %v4665_v12, %v4665_v12  ;;  %v15791_v1 = vld [vmem:[#allocation3_spill] sm:$0xff]  ;;  %v15793_v12 = vld [vmem:[#allocation33_spill] sm:$0xff] }
 0x274   :  { %5103 = vmatprep.subr.bf16.mxu1 %v15786_v17  ;;  %v8408_v17 = vld [vmem:[%s15268_s1 + $0x127] ss:$8 sm:$0x30]  ;;  %v13370_v57 = vor.u32 %v8402_v58, %v8401_v60  ;;  %v5244_v18 = vrot.slane %v13305_v47, %v15791_v1  ;;  %v4713_v60 = vrot.slane %v12927_v48, %v15704_v37  ;;  %15795 = vst [vmem:[#allocation33_spill] sm:$0xff] %v13394_v15  ;;  %v4914_v47 = vunpack.c.l.b16 %v4818_v35 }
 0x275   :  { %15788 = vst [vmem:[#allocation44_spill] sm:$0xff] %v13352_v30  ;;  %v4911_v58 = vunpack.c.l.b16 %v4815_v46  ;;  %v5268_v46 = vrot.slane %v13352_v30, %v15791_v1  ;;  %v13422_v56 = vor.u32 %v8410_v14, %v8409_v36  ;;  %v4761_v36 = vrot.slane %v12991_v16, %v15704_v37 }
 0x276   :  { %5067 = vmatpush2.bf16.msra.mxu0 %v13339_v19  ;;  %v13368_v19 = vrot.slane %v12979_v42, %v15785_v53  ;;  %15790 = vst [vmem:[#allocation51_spill] sm:$0xff] %v13370_v57  ;;  %v5220_v11 = vrot.slane %v13370_v57, %v15791_v1  ;;  %v5460_v24 = vpack.c.bf16 %v5244_v18, %v5244_v18  ;;  %v15797_v53 = vld [vmem:[#allocation34_spill] sm:$0xff]  ;;  %v4935_v35 = vunpack.c.l.b16 %v4839_v4 }
 0x277   :  { %5068 = vmatprep.subr.bf16.mxu0 %v13363_v29  ;;  %5104 = vmatpush1.bf16.msra.mxu1 %v15792_v43  ;;  %v4923_v29 = vunpack.c.l.b16 %v4827_v59  ;;  %v13386_v43 = vor.u32 %v8408_v17, %v8407_v50  ;;  %v4812_v59 = vpack.c.bf16 %v13316_v32, %v13316_v32  ;;  %v13406_v50 = vld [vmem:[%s15267_s5 + $0xd4] ss:$8 sps:$4 sm:$0xff]   ;;  %v4830_v17 = vpack.c.bf16 %v13334_v8, %v13334_v8  ;;  %v8412_v8 = vld [vmem:[%s15268_s1 + $0x1e7] ss:$8 sm:$0x30] }
 0x278   :  { %5105 = vmatprep.subr.bf16.mxu1 %v15793_v12  ;;  %15796 = vst [vmem:[#allocation52_spill] sm:$0xff] %v13406_v50  ;;  %v4929_v12 = vunpack.c.l.b16 %v4833_v27  ;;  %v8411_v32 = vld [vmem:[%s15268_s1 + $0x1e7] ss:$8 sm:$0xf]  ;;  %15798 = vst [vmem:[#allocation34_spill] sm:$0xff] %v13422_v56  ;;  %v4845_v57 = vpack.c.bf16 %v4713_v60, %v4713_v60  ;;  %v5025_v18 = vsel %vm610_vm0, %v5024_v26, %v4911_v58 }
 0x279   :  { %15794 = vst [vmem:[#allocation32_spill] sm:$0xff] %v13386_v43  ;;  %v5026_v30 = vrot.slane %v4923_v29, 6  ;;  %v15799_v27 = vld [vmem:[#allocation46_spill] sm:$0xff]  ;;  %v4836_v29 = vpack.c.bf16 %v13344_v44, %v13344_v44  ;;  %v13447_v60 = vld [vmem:[%s15267_s5 + $0xc4] ss:$8 sps:$4 sm:$0xff]   ;;  %v13450_v14 = vor.u32 %v8412_v8, %v8411_v32  ;;  %v5454_v4 = vpack.c.bf16 %v5220_v11, %v5220_v11 }
 0x27a   :  { %5069 = vmatpush2.bf16.msra.mxu0 %v13394_v15  ;;  %v13418_v15 = vsel %vm622_vm4, %v4962_v25, %v4961_v31  ;;  %v5292_v31 = vrot.slane %v13386_v43, %v15791_v1  ;;  %v13434_v25 = vld [vmem:[%s15267_s5 + $0xd0] ss:$8 sps:$4 sm:$0xff]   ;;  %v8413_v26 = vld [vmem:[%s15268_s1 + $0x247] ss:$8 sm:$0xf]  ;;  %15801 = vst [vmem:[#allocation53_spill] sm:$0xff] %v13447_v60  ;;  %v5316_v13 = vrot.slane %v13422_v56, %v15791_v1  ;;  %v4941_v8 = vunpack.c.l.b16 %v4845_v57 }
 0x27b   :  { %5070 = vmatprep.subr.bf16.mxu0 %v13406_v50  ;;  %5106 = vmatpush1.bf16.msra.mxu1 %v15797_v53  ;;  %v4737_v50 = vrot.slane %v12979_v42, %v15704_v37  ;;  %15800 = vst [vmem:[#allocation46_spill] sm:$0xff] %v13434_v25  ;;  %v5466_v53 = vpack.c.bf16 %v5268_v46, %v5268_v46  ;;  %v5028_v58 = vrot.slane %v4929_v12, 5  ;;  %v8414_v44 = vld [vmem:[%s15268_s1 + $0x247] ss:$8 sm:$0x30]  ;;  %v4908_v37 = vunpack.c.l.b16 %v4812_v59 }
 0x27c   :  { %5107 = vmatprep.subr.bf16.mxu1 %v15799_v27  ;;  %v5556_v27 = vunpack.c.l.b16 %v5460_v24  ;;  %v5027_v43 = vsel %vm613_vm1, %v5026_v30, %v5025_v18  ;;  %v4920_v12 = vunpack.c.l.b16 %v4824_v6  ;;  %v4982_v32 = vrot.slane %v4914_v47, 7  ;;  %v13466_v59 = vld [vmem:[%s15267_s5 + $0xc0] ss:$8 sps:$4 sm:$0xff]   ;;  %v13477_v57 = vld [vmem:[%s15267_s5 + $0xb4] ss:$8 sps:$4 sm:$0xff]  }
 0x27d   :  { %v4851_v46 = vpack.c.bf16 %v4737_v50, %v4737_v50  ;;  %v5472_v11 = vpack.c.bf16 %v5292_v31, %v5292_v31  ;;  %v4857_v30 = vpack.c.bf16 %v4761_v36, %v4761_v36  ;;  %v5030_v50 = vrot.slane %v4935_v35, 4  ;;  %15805 = vst [vmem:[#allocation48_spill] sm:$0xff] %v13477_v57  ;;  %v15806_v36 = vld [vmem:[#allocation39_spill] sm:$0xff] }
 0x27e   :  { %5071 = vmatpush2.bf16.msra.mxu0 %v13434_v25  ;;  %v15802_v25 = vld [vmem:[#allocation37_spill] sm:$0xff]  ;;  %v13469_v24 = vor.u32 %v8414_v44, %v8413_v26  ;;  %v5562_v47 = vunpack.c.l.b16 %v5466_v53  ;;  %v5029_v6 = vsel %vm616_vm2, %v5028_v58, %v5027_v43  ;;  %v5340_v18 = vrot.slane %v13450_v14, %v15791_v1 }
 0x27f   :  { %5072 = vmatprep.subr.bf16.mxu0 %v13447_v60  ;;  %5108 = vmatpush2.bf16.msra.mxu1 %v15802_v25  ;;  %v8415_v60 = vld [vmem:[%s15268_s1 + $0x2a7] ss:$8 sm:$0xf]  ;;  %15804 = vst [vmem:[#allocation37_spill] sm:$0xff] %v13466_v59  ;;  %v5550_v31 = vunpack.c.l.b16 %v5454_v4  ;;  %v5611_v25 = vrot.slane %v5556_v27, 7  ;;  %v4842_v35 = vpack.c.bf16 %v13348_v5, %v13348_v5  ;;  %v4926_v26 = vunpack.c.l.b16 %v4830_v17 }
 0x280   :  { %5109 = vmatprep.subr.bf16.mxu1 %v15803_v0  ;;  %v8416_v0 = vld [vmem:[%s15268_s1 + $0x2a7] ss:$8 sm:$0x30]  ;;  %v4947_v53 = vunpack.c.l.b16 %v4851_v46  ;;  %v5478_v44 = vpack.c.bf16 %v5316_v13, %v5316_v13  ;;  %v4984_v56 = vrot.slane %v4920_v12, 6  ;;  %v5032_v16 = vrot.slane %v4941_v8, 3 }
 0x281   :  { %v5568_v43 = vunpack.c.l.b16 %v5472_v11  ;;  %v13492_v58 = vld [vmem:[%s15267_s5 + $0xb0] ss:$8 sps:$4 sm:$0xff]   ;;  %v4983_v4 = vsel %vm610_vm0, %v4982_v32, %v4908_v37  ;;  %v5031_v5 = vsel %vm619_vm3, %v5030_v50, %v5029_v6  ;;  %v5364_v13 = vrot.slane %v13469_v24, %v15791_v1 }
 0x282   :  { %5073 = vmatpush2.bf16.msra.mxu0 %v13466_v59  ;;  %v15807_v59 = vld [vmem:[#allocation16_spill] sm:$0xff]  ;;  %v5613_v17 = vrot.slane %v5562_v47, 6  ;;  %v4932_v27 = vunpack.c.l.b16 %v4836_v29  ;;  %v4953_v46 = vunpack.c.l.b16 %v4857_v30  ;;  %v5484_v12 = vpack.c.bf16 %v5340_v18, %v5340_v18  ;;  %v15810_v18 = vld [vmem:[#allocation17_spill] sm:$0xff] }
 0x283   :  { %5074 = vmatprep.subr.bf16.mxu0 %v13477_v57  ;;  %5110 = vmatpush2.bf16.msra.mxu1 %v15806_v36  ;;  %v13487_v57 = vor.u32 %v8416_v0, %v8415_v60  ;;  %v13502_v60 = vld [vmem:[%s15267_s5 + $0xa4] ss:$8 sps:$4 sm:$0xff]   ;;  %v5612_v8 = vsel %vm610_vm0, %v5611_v25, %v5550_v31  ;;  %v4848_v37 = vpack.c.bf16 %v13368_v19, %v13368_v19  ;;  %v4986_v32 = vrot.slane %v4926_v26, 5  ;;  %v15809_v0 = vld [vmem:[#allocation21_spill] sm:$0xff] }
 0x284   :  { %5111 = vmatprep.subr.bf16.mxu1 %v15807_v59  ;;  %v15808_v11 = vld [vmem:[#allocation40_spill] sm:$0xff]  ;;  %v5034_v59 = vrot.slane %v4947_v53, 2  ;;  %v5574_v50 = vunpack.c.l.b16 %v5478_v44  ;;  %v4985_v47 = vsel %vm613_vm1, %v4984_v56, %v4983_v4  ;;  %v5033_v6 = vsel %vm622_vm4, %v5032_v16, %v5031_v5  ;;  %v15811_v26 = vld [vmem:[#allocation45_spill] sm:$0xff] }
 0x285   :  { %v5388_v29 = vrot.slane %v13487_v57, %v15791_v1  ;;  %v5615_v30 = vrot.slane %v5568_v43, 5  ;;  %v4966_v31 = vrot.slane %v13301_v39, 1  ;;  %v4938_v25 = vunpack.c.l.b16 %v4842_v35  ;;  %v15813_v5 = vld [vmem:[#allocation41_spill] sm:$0xff] }
 0x286   :  { %5075 = vmatpush2.bf16.msra.mxu0 %v13492_v58  ;;  %v5490_v36 = vpack.c.bf16 %v5364_v13, %v5364_v13  ;;  %v5614_v19 = vsel %vm613_vm1, %v5613_v17, %v5612_v8  ;;  %v15812_v53 = vrot.slane %v13265_v52, 2  ;;  %v4988_v16 = vrot.slane %v4932_v27, 4  ;;  %v15814_v17 = vld [vmem:[#allocation23_spill] sm:$0xff] }
 0x287   :  { %5076 = vmatprep.subr.bf16.mxu0 %v13502_v60  ;;  %5112 = vmatpush2.bf16.msra.mxu1 %v15808_v11  ;;  %v5036_v44 = vrot.slane %v4953_v46, 1  ;;  %v5580_v4 = vunpack.c.l.b16 %v5484_v12  ;;  %v4854_v43 = vpack.c.bf16 %v13378_v34, %v13378_v34  ;;  %v4987_v39 = vsel %vm616_vm2, %v4986_v32, %v4985_v47 }
 0x288   :  { %5113 = vmatprep.subr.bf16.mxu1 %v15809_v0  ;;  %v4965_v56 = vsel %vm625_vm5, %v15812_v53, %v13418_v15  ;;  %v5035_v35 = vsel %vm625_vm5, %v5034_v59, %v5033_v6  ;;  %v5617_v13 = vrot.slane %v5574_v50, 4  ;;  %v4944_v8 = vunpack.c.l.b16 %v4848_v37  ;;  %v15815_v15 = vld [vmem:[#allocation35_spill] sm:$0xff] }
 0x289   :  { %v5496_v11 = vpack.c.bf16 %v5388_v29, %v5388_v29  ;;  %v5616_v52 = vsel %vm616_vm2, %v5615_v30, %v5614_v19  ;;  %v4967_v27 = vsel %vm628_vm6, %v4966_v31, %v4965_v56  ;;  %v4990_v46 = vrot.slane %v4938_v25, 3  ;;  %v15816_v0 = vld [vmem:[#allocation47_spill] sm:$0xff]  ;;  %v15817_v30 = vld [vmem:[#allocation36_spill] sm:$0xff] }
 0x28a   :  { %5077 = vmatpush2.bf16.msra.mxu0 %v15810_v18  ;;  %v5586_v12 = vunpack.c.l.b16 %v5490_v36  ;;  %v4989_v34 = vsel %vm619_vm3, %v4988_v16, %v4987_v39  ;;  %v5037_v32 = vsel %vm628_vm6, %v5036_v44, %v5035_v35  ;;  %v5619_v59 = vrot.slane %v5580_v4, 3  ;;  %v15818_v36 = vld [vmem:[#allocation42_spill] sm:$0xff] }
 0x28b   :  { %5078 = vmatprep.subr.bf16.mxu0 %v15811_v26  ;;  %5114 = vmatpush2.bf16.msra.mxu1 %v15813_v5  ;;  %v4950_v50 = vunpack.c.l.b16 %v4854_v43  ;;  %v5618_v37 = vsel %vm619_vm3, %v5617_v13, %v5616_v52  ;;  %v5038_v47 = vpack.c.b16 %v4967_v27, %v4967_v27  ;;  %v4992_v6 = vrot.slane %v4944_v8, 2  ;;  %v13547_v56 = vld [vmem:[%s15267_s5 + $0x270] ss:$8 sps:$4 sm:$0xff]   ;;  %v13564_v43 = vld [vmem:[%s15267_s5 + $0x260] ss:$8 sps:$4 sm:$0xff]  }
 0x28c   :  { %5115 = vmatprep.subr.bf16.mxu1 %v15814_v17  ;;  %v5592_v29 = vunpack.c.l.b16 %v5496_v11  ;;  %v4991_v18 = vsel %vm622_vm4, %v4990_v46, %v4989_v34  ;;  %v5043_v31 = vpack.c.b16 %v5037_v32, %v5037_v32  ;;  %v5621_v25 = vrot.slane %v5586_v12, 2  ;;  %v13570_v35 = vld [vmem:[%s15267_s5 + $0x254] ss:$8 sps:$4 sm:$0xff]   ;;  %v13580_v8 = vld [vmem:[%s15267_s5 + $0x250] ss:$8 sps:$4 sm:$0xff]  }
 0x28d   :  { %v5620_v19 = vsel %vm622_vm4, %v5619_v59, %v5618_v37  ;;  %v13598_v27 = vld [vmem:[%s15267_s5 + $0x240] ss:$8 sps:$4 sm:$0xff]   ;;  %v13604_v12 = vld [vmem:[%s15267_s5 + $0x234] ss:$8 sps:$4 sm:$0xff]   ;;  %v13614_v34 = vld [vmem:[%s15267_s5 + $0x230] ss:$8 sps:$4 sm:$0xff]  }
 0x28e   :  { %5079 = vmatpush2.bf16.msra.mxu0 %v15815_v15  ;;  %v5623_v53 = vrot.slane %v5592_v29, 1  ;;  %v5622_v16 = vsel %vm625_vm5, %v5621_v25, %v5620_v19  ;;  %v13622_v59 = vld [vmem:[%s15267_s5 + $0x224] ss:$8 sps:$4 sm:$0xff]   ;;  %v13638_v37 = vld [vmem:[%s15267_s5 + $0x220] ss:$8 sps:$4 sm:$0xff]  }
 0x28f   :  { %5080 = vmatprep.subr.bf16.mxu0 %v15816_v0  ;;  %5116 = vmatpush2.bf16.msra.mxu1 %v13063_v51  ;;  %v4994_v51 = vrot.slane %v4950_v50, 1  ;;  %v15822_v29 = vld [vmem:[#allocation27_spill] sm:$0xff] }
 0x290   :  { %5117 = vmatprep.subr.bf16.mxu1 %v13073_v55  ;;  %v4993_v55 = vsel %vm625_vm5, %v4992_v6, %v4991_v18  ;;  %v5624_v5 = vsel %vm628_vm6, %v5623_v53, %v5622_v16  ;;  %v15823_v18 = vld [vmem:[#allocation4_spill] sm:$0xff]  ;;  %v15827_v53 = vld [vmem:[#allocation25_spill] sm:$0xff] }
 0x291   :  { %v5682_v13 = vpack.c.b16 %v5624_v5, %v5624_v5  ;;  %v15829_v5 = vld [vmem:[#allocation26_spill] sm:$0xff] }
 0x292   :  { %5081 = vmatpush2.bf16.msra.mxu0 %v15817_v30 }
 0x293   :  { %5132 = vmatprep.subr.bf16.mxu0 %v15818_v36  ;;  %5118 = vmatpush2.bf16.msra.mxu1 %v13088_v23  ;;  %v13554_v23 = vld [vmem:[%s15267_s5 + $0x264] ss:$8 sps:$4 sm:$0xff]   ;;  %v13658_v36 = vld [vmem:[%s15267_s5 + $0x210] ss:$8 sps:$4 sm:$0xff]  }
 0x294   :  { %5119 = vmatprep.subr.bf16.mxu1 %v13096_v10  ;;  %v4995_v10 = vsel %vm628_vm6, %v4994_v51, %v4993_v55  ;;  %15825 = vst [vmem:[#allocation16_spill] sm:$0xff] %v13658_v36  ;;  %v13664_v51 = vld [vmem:[%s15267_s5 + $0x204] ss:$8 sps:$4 sm:$0xff]  }
 0x295   :  { %v3798_v26 = vpop.f32.mrf.mxu0  ;;  %5083 = vmatmul.mubr.bf16.vlgmr.msra.gmra.mxu0 %v5038_v47  ;;  %v5040_v39 = vpack.c.b16 %v4995_v10, %v4995_v10  ;;  %15826 = vst [vmem:[#allocation40_spill] sm:$0xff] %v13664_v51  ;;  %v15828_v10 = vld [vmem:[#allocation44_spill] sm:$0xff] }
 0x296   :  { %5133 = vmatpush1.bf16.msra.mxu0 %v13547_v56  ;;  %5164 = vmatprep.mubr.bf16.mxu0 %v5043_v31  ;;  %v15824_v31 = vld [vmem:[#allocation38_spill] sm:$0xff] }
 0x297   :  { %v3800_v44 = vpop.f32.mrf.mxu0  ;;  %5134 = vmatprep.subr.bf16.mxu0 %v13554_v23  ;;  %5120 = vmatpush2.bf16.msra.mxu1 %v13112_v49  ;;  %v5252_v25 = vrot.slane %v15824_v31, %v15823_v18 }
 0x298   :  { %5121 = vmatprep.subr.bf16.mxu1 %v13119_v20  ;;  %v3799_v20 = vadd.f32 %v3798_v26, %v15767_v22  ;;  %v3801_v17 = vadd.f32 %v3800_v44, %v15768_v62 }
 0x299   :  { %v3802_v4 = vpop.f32.mrf.mxu0 }
 0x29a   :  { %5135 = vmatpush1.bf16.msra.mxu0 %v13564_v43  ;;  %v5276_v4 = vrot.slane %v15828_v10, %v15823_v18 }
 0x29b   :  { %5136 = vmatprep.subr.bf16.mxu0 %v13570_v35  ;;  %v3803_v49 = vpop.f32.mrf.mxu0  ;;  %5122 = vmatpush2.bf16.msra.mxu1 %v13130_v3  ;;  %v13586_v3 = vld [vmem:[%s15267_s5 + $0x244] ss:$8 sps:$4 sm:$0xff]  }
 0x29c   :  { %5693 = vmatprep.subr.bf16.mxu1 %v13137_v54 }
 0x29e   :  { %5137 = vmatpush1.bf16.msra.mxu0 %v13580_v8  ;;  %v3839_v11 = vpop.f32.mrf.mxu1  ;;  %5124 = vmatmul.mubr.bf16.vlgmr.msra.gmra.mxu1 %v5040_v39 }
 0x29f   :  { %5138 = vmatprep.subr.bf16.mxu0 %v13586_v3  ;;  %v13589_v52 = vadd.f32 %v3839_v11, %v3799_v20  ;;  %5694 = vmatpush1.bf16.msra.mxu1 %v13151_v33  ;;  %v15819_v33 = vld [vmem:[#allocation8_spill] sm:$0xff]  ;;  %v15830_v20 = vld [vmem:[#allocation51_spill] sm:$0xff] }
 0x2a0   :  { %5725 = vmatprep.mubr.bf16.mxu1 %v5682_v13  ;;  %v3841_v54 = vpop.f32.mrf.mxu1  ;;  %5695 = vmatprep.subr.bf16.mxu1 %v13158_v2  ;;  %v4613_v2 = vrot.slane %v12821_v28, %v15819_v33  ;;  %v4637_v32 = vrot.slane %v12848_v61, %v15819_v33  ;;  %v4589_v28 = vrot.slane %v12859_v9, %v15819_v33  ;;  %v13678_v11 = vld [vmem:[%s15267_s5 + $0x200] ss:$8 sps:$4 sm:$0xff]  }
 0x2a1   :  { %v13593_v15 = vadd.f32 %v3841_v54, %v3801_v17  ;;  %v4685_v61 = vrot.slane %v12901_v41, %v15819_v33  ;;  %v4709_v50 = vrot.slane %v12927_v48, %v15819_v33  ;;  %v4733_v9 = vrot.slane %v12979_v42, %v15819_v33  ;;  %15831 = vst [vmem:[#allocation21_spill] sm:$0xff] %v13678_v11 }
 0x2a2   :  { %5139 = vmatpush1.bf16.msra.mxu0 %v13598_v27  ;;  %v3843_v46 = vpop.f32.mrf.mxu1  ;;  %v4814_v41 = vpack.c.bf16 %v4589_v28, %v4589_v28  ;;  %v5228_v13 = vrot.slane %v15830_v20, %v15823_v18  ;;  %v5462_v17 = vpack.c.bf16 %v5252_v25, %v5252_v25  ;;  %v15838_v25 = vld [vmem:[#allocation34_spill] sm:$0xff] }
 0x2a3   :  { %5140 = vmatprep.subr.bf16.mxu0 %v13604_v12  ;;  %5696 = vmatpush1.bf16.msra.mxu1 %v13168_v21  ;;  %v4820_v21 = vpack.c.bf16 %v4613_v2, %v4613_v2  ;;  %v4838_v30 = vpack.c.bf16 %v4685_v61, %v4685_v61  ;;  %v4844_v42 = vpack.c.bf16 %v4709_v50, %v4709_v50  ;;  %v13686_v2 = vld [vmem:[%s15267_s5 + $0x2f4] ss:$8 sps:$4 sm:$0xff]  }
 0x2a4   :  { %v3844_v0 = vpop.f32.mrf.mxu1  ;;  %5697 = vmatprep.subr.bf16.mxu1 %v13174_v63  ;;  %v4661_v63 = vrot.slane %v12875_v38, %v15819_v33  ;;  %v13646_v38 = vld [vmem:[%s15267_s5 + $0x214] ss:$8 sps:$4 sm:$0xff]   ;;  %v4850_v19 = vpack.c.bf16 %v4733_v9, %v4733_v9  ;;  %v4910_v26 = vunpack.c.l.b16 %v4814_v41  ;;  %15832 = vst [vmem:[#allocation17_spill] sm:$0xff] %v13686_v2  ;;  %v5468_v50 = vpack.c.bf16 %v5276_v4, %v5276_v4  ;;  %v15835_v9 = vld [vmem:[#allocation11_spill] sm:$0xff] }
 0x2a5   :  { %15820 = vst [vmem:[#allocation39_spill] sm:$0xff] %v13646_v38  ;;  %v4916_v48 = vunpack.c.l.b16 %v4820_v21  ;;  %v4934_v39 = vunpack.c.l.b16 %v4838_v30  ;;  %v13671_v49 = vunpack.c.l.b16 %v4844_v42  ;;  %v15834_v21 = vld [vmem:[#allocation9_spill] sm:$0xff] }
 0x2a6   :  { %5141 = vmatpush1.bf16.msra.mxu0 %v13614_v34  ;;  %v4832_v6 = vpack.c.bf16 %v4661_v63, %v4661_v63  ;;  %v13681_v54 = vunpack.c.l.b16 %v4850_v19  ;;  %v15837_v30 = vld [vmem:[#allocation5_spill] sm:$0xff]  ;;  %v5324_v19 = vrot.slane %v15838_v25, %v15823_v18 }
 0x2a7   :  { %5142 = vmatprep.subr.bf16.mxu0 %v13622_v59  ;;  %5698 = vmatpush1.bf16.msra.mxu1 %v13182_v40  ;;  %v4826_v40 = vpack.c.bf16 %v4637_v32, %v4637_v32  ;;  %v5010_v55 = vrot.slane %v4916_v48, 7  ;;  %v15833_v32 = vld [vmem:[#allocation32_spill] sm:$0xff]  ;;  %v5456_v48 = vpack.c.bf16 %v5228_v13, %v5228_v13  ;;  %v5240_v42 = vrot.slane %v15824_v31, %v15837_v30  ;;  %v15841_v4 = vld [vmem:[#allocation29_spill] sm:$0xff] }
 0x2a8   :  { %5699 = vmatprep.subr.bf16.mxu1 %v13188_v7  ;;  %v15821_v7 = vld [vmem:[#allocation49_spill] sm:$0xff]  ;;  %v4928_v44 = vunpack.c.l.b16 %v4832_v6  ;;  %v5300_v28 = vrot.slane %v15833_v32, %v15823_v18  ;;  %v13732_v13 = vrot.slane %v13450_v14, %v15837_v30 }
 0x2a9   :  { %v4757_v47 = vrot.slane %v15821_v7, %v15819_v33  ;;  %v5011_v0 = vsel %vm610_vm0, %v5010_v55, %v4910_v26  ;;  %v5558_v7 = vunpack.c.l.b16 %v5462_v17  ;;  %v5216_v26 = vrot.slane %v15830_v20, %v15837_v30 }
 0x2aa   :  { %5143 = vmatpush1.bf16.msra.mxu0 %v13638_v37  ;;  %v5014_v61 = vrot.slane %v4928_v44, 5  ;;  %v5264_v55 = vrot.slane %v15828_v10, %v15837_v30  ;;  %v5564_v17 = vunpack.c.l.b16 %v5468_v50  ;;  %v5459_v50 = vpack.c.bf16 %v5240_v42, %v5240_v42 }
 0x2ab   :  { %5144 = vmatprep.subr.bf16.mxu0 %v13646_v38  ;;  %5700 = vmatpush1.bf16.msra.mxu1 %v13202_v45  ;;  %v4922_v45 = vunpack.c.l.b16 %v4826_v40  ;;  %v4856_v16 = vpack.c.bf16 %v4757_v47, %v4757_v47  ;;  %v5016_v40 = vrot.slane %v4934_v39, 4  ;;  %v13700_v47 = vld [vmem:[%s15267_s5 + $0x2f0] ss:$8 sps:$4 sm:$0xff]   ;;  %v13728_v39 = vrot.slane %v15838_v25, %v15837_v30 }
 0x2ac   :  { %5701 = vmatprep.subr.bf16.mxu1 %v15822_v29  ;;  %15836 = vst [vmem:[#allocation45_spill] sm:$0xff] %v13700_v47  ;;  %v13746_v29 = vrot.slane %v13469_v24, %v15837_v30  ;;  %v5453_v22 = vpack.c.bf16 %v5216_v26, %v5216_v26  ;;  %v5555_v26 = vunpack.c.l.b16 %v5459_v50 }
 0x2ad   :  { %v5012_v46 = vrot.slane %v4922_v45, 6  ;;  %v13693_v63 = vunpack.c.l.b16 %v4856_v16  ;;  %v13712_v45 = vld [vmem:[%s15267_s5 + $0x2e4] ss:$8 sps:$4 sm:$0xff]  }
 0x2ae   :  { %5145 = vmatpush1.bf16.msra.mxu0 %v13658_v36  ;;  %15839 = vst [vmem:[#allocation41_spill] sm:$0xff] %v13712_v45  ;;  %v15840_v16 = vld [vmem:[#allocation7_spill] sm:$0xff] }
 0x2af   :  { %5146 = vmatprep.subr.bf16.mxu0 %v13664_v51  ;;  %5702 = vmatpush1.bf16.msra.mxu1 %v15827_v53  ;;  %v5013_v6 = vsel %vm613_vm1, %v5012_v46, %v5011_v0  ;;  %v5474_v53 = vpack.c.bf16 %v5300_v28, %v5300_v28  ;;  %v5260_v44 = vrot.slane %v15824_v31, %v15840_v16  ;;  %v15842_v46 = vld [vmem:[#allocation30_spill] sm:$0xff] }
 0x2b0   :  { %5703 = vmatprep.subr.bf16.mxu1 %v15829_v5  ;;  %v13724_v5 = vrot.slane %v15833_v32, %v15837_v30  ;;  %v5015_v0 = vsel %vm616_vm2, %v5014_v61, %v5013_v6  ;;  %v5348_v28 = vrot.slane %v13450_v14, %v15823_v18  ;;  %v5284_v61 = vrot.slane %v15828_v10, %v15840_v16 }
 0x2b1   :  { %v5570_v6 = vunpack.c.l.b16 %v5474_v53  ;;  %v5236_v41 = vrot.slane %v15830_v20, %v15840_v16  ;;  %v5464_v42 = vpack.c.bf16 %v5260_v44, %v5260_v44  ;;  %v5017_v62 = vsel %vm619_vm3, %v5016_v40, %v5015_v0  ;;  %v13773_v44 = vld [vmem:[%s15267_s5 + $0x2d0] ss:$8 sps:$4 sm:$0xff]  }
 0x2b2   :  { %5147 = vmatpush1.bf16.msra.mxu0 %v13678_v11  ;;  %v5308_v53 = vrot.slane %v15833_v32, %v15840_v16  ;;  %15847 = vst [vmem:[#allocation47_spill] sm:$0xff] %v13773_v44  ;;  %v5471_v40 = vpack.c.bf16 %v13724_v5, %v13724_v5  ;;  %v5396_v0 = vrot.slane %v13487_v57, %v15823_v18 }
 0x2b3   :  { %5148 = vmatprep.subr.bf16.mxu0 %v13686_v2  ;;  %5704 = vmatpush1.bf16.msra.mxu1 %v15834_v21  ;;  %v5552_v21 = vunpack.c.l.b16 %v5456_v48  ;;  %v13753_v48 = vld [vmem:[%s15267_s5 + $0x2d4] ss:$8 sps:$4 sm:$0xff]   ;;  %v5486_v2 = vpack.c.bf16 %v5348_v28, %v5348_v28  ;;  %v5643_v28 = vrot.slane %v5570_v6, 5  ;;  %v5477_v5 = vpack.c.bf16 %v13728_v39, %v13728_v39 }
 0x2b4   :  { %5705 = vmatprep.subr.bf16.mxu1 %v15835_v9  ;;  %v5639_v9 = vrot.slane %v5558_v7, 7  ;;  %15844 = vst [vmem:[#allocation35_spill] sm:$0xff] %v13753_v48  ;;  %v13758_v7 = vrot.slane %v13487_v57, %v15837_v30  ;;  %v5476_v36 = vpack.c.bf16 %v5308_v53, %v5308_v53  ;;  %v5597_v39 = vrot.slane %v5555_v26, 7  ;;  %v15853_v53 = vld [vmem:[#allocation33_spill] sm:$0xff] }
 0x2b5   :  { %v5582_v51 = vunpack.c.l.b16 %v5486_v2  ;;  %v5498_v2 = vpack.c.bf16 %v5396_v0, %v5396_v0 }
 0x2b6   :  { %5149 = vmatpush2.bf16.msra.mxu0 %v13700_v47  ;;  %v15846_v47 = vld [vmem:[#allocation43_spill] sm:$0xff]  ;;  %v5640_v30 = vsel %vm610_vm0, %v5639_v9, %v5552_v21  ;;  %v5458_v21 = vpack.c.bf16 %v5236_v41, %v5236_v41  ;;  %v5560_v9 = vunpack.c.l.b16 %v5464_v42  ;;  %v5572_v38 = vunpack.c.l.b16 %v5476_v36 }
 0x2b7   :  { %5150 = vmatprep.subr.bf16.mxu0 %v13712_v45  ;;  %5706 = vmatpush1.bf16.msra.mxu1 %v15841_v4  ;;  %v13741_v4 = vld [vmem:[%s15267_s5 + $0x2e0] ss:$8 sps:$4 sm:$0xff]   ;;  %v5641_v45 = vrot.slane %v5564_v17, 6  ;;  %v5647_v0 = vrot.slane %v5582_v51, 3  ;;  %v13828_v51 = vld [vmem:[%s15267_s5 + $0x2a4] ss:$8 sps:$4 sm:$0xff]   ;;  %v5573_v36 = vunpack.c.l.b16 %v5477_v5  ;;  %v5404_v5 = vrot.slane %v13487_v57, %v15840_v16 }
 0x2b8   :  { %5707 = vmatprep.subr.bf16.mxu1 %v15842_v46  ;;  %15843 = vst [vmem:[#allocation23_spill] sm:$0xff] %v13741_v4  ;;  %v5480_v46 = vpack.c.bf16 %v5324_v19, %v5324_v19  ;;  %v15845_v19 = vld [vmem:[#allocation22_spill] sm:$0xff]  ;;  %v5554_v6 = vunpack.c.l.b16 %v5458_v21  ;;  %v5667_v42 = vrot.slane %v5560_v9, 7 }
 0x2b9   :  { %v13796_v41 = vld [vmem:[%s15267_s5 + $0x2c0] ss:$8 sps:$4 sm:$0xff]  }
 0x2ba   :  { %5151 = vmatpush2.bf16.msra.mxu0 %v13741_v4  ;;  %v5372_v4 = vrot.slane %v13469_v24, %v15823_v18  ;;  %v5576_v17 = vunpack.c.l.b16 %v5480_v46  ;;  %v5642_v46 = vsel %vm613_vm1, %v5641_v45, %v5640_v30  ;;  %15851 = vst [vmem:[#allocation42_spill] sm:$0xff] %v13796_v41  ;;  %v5356_v30 = vrot.slane %v13450_v14, %v15840_v16 }
 0x2bb   :  { %5152 = vmatprep.subr.bf16.mxu0 %v13753_v48  ;;  %5708 = vmatpush1.bf16.msra.mxu1 %v15845_v19  ;;  %v5465_v48 = vpack.c.bf16 %v5264_v55, %v5264_v55  ;;  %v13781_v55 = vld [vmem:[%s15267_s5 + $0x2c4] ss:$8 sps:$4 sm:$0xff]   ;;  %v5483_v18 = vpack.c.bf16 %v13732_v13, %v13732_v13  ;;  %v5668_v9 = vsel %vm610_vm0, %v5667_v42, %v5554_v6 }
 0x2bc   :  { %5709 = vmatprep.subr.bf16.mxu1 %v15846_v47  ;;  %v5470_v47 = vpack.c.bf16 %v5284_v61, %v5284_v61  ;;  %15848 = vst [vmem:[#allocation36_spill] sm:$0xff] %v13781_v55  ;;  %v15849_v19 = vld [vmem:[#allocation31_spill] sm:$0xff]  ;;  %v5492_v50 = vpack.c.bf16 %v5372_v4, %v5372_v4  ;;  %v5332_v61 = vrot.slane %v15838_v25, %v15840_v16  ;;  %v5645_v4 = vrot.slane %v5576_v17, 4 }
 0x2bd   :  { %v5561_v11 = vunpack.c.l.b16 %v5465_v48  ;;  %v5644_v48 = vsel %vm616_vm2, %v5643_v28, %v5642_v46  ;;  %v5567_v17 = vunpack.c.l.b16 %v5471_v40  ;;  %v13818_v28 = vld [vmem:[%s15267_s5 + $0x2b0] ss:$8 sps:$4 sm:$0xff]   ;;  %v5380_v40 = vrot.slane %v13469_v24, %v15840_v16 }
 0x2be   :  { %5153 = vmatpush2.bf16.msra.mxu0 %v13773_v44  ;;  %v15850_v44 = vld [vmem:[#allocation50_spill] sm:$0xff]  ;;  %v5566_v45 = vunpack.c.l.b16 %v5470_v47  ;;  %v5588_v47 = vunpack.c.l.b16 %v5492_v50  ;;  %v5488_v13 = vpack.c.bf16 %v5356_v30, %v5356_v30  ;;  %v5671_v30 = vrot.slane %v5572_v38, 5 }
 0x2bf   :  { %5154 = vmatprep.subr.bf16.mxu0 %v13781_v55  ;;  %5710 = vmatpush2.bf16.msra.mxu1 %v15849_v19  ;;  %v5549_v55 = vunpack.c.l.b16 %v5453_v22  ;;  %v13804_v22 = vld [vmem:[%s15267_s5 + $0x2b4] ss:$8 sps:$4 sm:$0xff]   ;;  %v5482_v19 = vpack.c.bf16 %v5332_v61, %v5332_v61  ;;  %v5601_v46 = vrot.slane %v5567_v17, 5  ;;  %v5494_v6 = vpack.c.bf16 %v5380_v40, %v5380_v40 }
 0x2c0   :  { %5711 = vmatprep.subr.bf16.mxu1 %v15850_v44  ;;  %15852 = vst [vmem:[#allocation49_spill] sm:$0xff] %v13804_v22  ;;  %v15854_v44 = vrot.slane %v13671_v49, 3  ;;  %v5646_v49 = vsel %vm619_vm3, %v5645_v4, %v5644_v48  ;;  %v5669_v21 = vrot.slane %v5566_v45, 6  ;;  %v15856_v50 = vld [vmem:[#allocation46_spill] sm:$0xff]  ;;  %v5649_v61 = vrot.slane %v5588_v47, 2 }
 0x2c1   :  { %v5648_v45 = vsel %vm622_vm4, %v5647_v0, %v5646_v49  ;;  %v5579_v48 = vunpack.c.l.b16 %v5483_v18  ;;  %v15858_v38 = vrot.slane %v13681_v54, 2  ;;  %v5584_v47 = vunpack.c.l.b16 %v5488_v13  ;;  %v15860_v49 = vld [vmem:[#allocation48_spill] sm:$0xff] }
 0x2c2   :  { %5155 = vmatpush2.bf16.msra.mxu0 %v13796_v41  ;;  %v5019_v26 = vsel %vm622_vm4, %v15854_v44, %v5017_v62  ;;  %v15855_v41 = vld [vmem:[#allocation52_spill] sm:$0xff]  ;;  %v5598_v62 = vsel %vm610_vm0, %v5597_v39, %v5549_v55  ;;  %v5489_v55 = vpack.c.bf16 %v13746_v29, %v13746_v29  ;;  %v15857_v39 = vld [vmem:[#allocation53_spill] sm:$0xff]  ;;  %v5022_v29 = vrot.slane %v13693_v63, 1 }
 0x2c3   :  { %5156 = vmatprep.subr.bf16.mxu0 %v13804_v22  ;;  %5712 = vmatpush2.bf16.msra.mxu1 %v15853_v53  ;;  %v5599_v22 = vrot.slane %v5561_v11, 6  ;;  %v5594_v11 = vunpack.c.l.b16 %v5498_v2  ;;  %v13843_v2 = vld [vmem:[%s15267_s5 + $0x2a0] ss:$8 sps:$4 sm:$0xff]   ;;  %v5670_v42 = vsel %vm613_vm1, %v5669_v21, %v5668_v9  ;;  %v5021_v53 = vsel %vm625_vm5, %v15858_v38, %v5019_v26  ;;  %v13867_v26 = vld [vmem:[%s15267_s5 + $0x290] ss:$8 sps:$4 sm:$0xff]  }
 0x2c4   :  { %5713 = vmatprep.subr.bf16.mxu1 %v15855_v41  ;;  %v5578_v41 = vunpack.c.l.b16 %v5482_v19  ;;  %v5603_v44 = vrot.slane %v5573_v36, 4  ;;  %v15859_v19 = vld [vmem:[#allocation37_spill] sm:$0xff]  ;;  %v5495_v18 = vpack.c.bf16 %v13758_v7, %v13758_v7  ;;  %v5650_v0 = vsel %vm625_vm5, %v5649_v61, %v5648_v45  ;;  %v13874_v13 = vld [vmem:[%s15267_s5 + $0x284] ss:$8 sps:$4 sm:$0xff]   ;;  %v13885_v45 = vld [vmem:[%s15267_s5 + $0x280] ss:$8 sps:$4 sm:$0xff]  }
 0x2c5   :  { %v5600_v4 = vsel %vm613_vm1, %v5599_v22, %v5598_v62  ;;  %v13851_v22 = vld [vmem:[%s15267_s5 + $0x294] ss:$8 sps:$4 sm:$0xff]   ;;  %v5651_v17 = vrot.slane %v5594_v11, 1  ;;  %v5585_v40 = vunpack.c.l.b16 %v5489_v55  ;;  %v5500_v21 = vpack.c.bf16 %v5404_v5, %v5404_v5 }
 0x2c6   :  { %5157 = vmatpush2.bf16.msra.mxu0 %v13818_v28  ;;  %v5602_v63 = vsel %vm616_vm2, %v5601_v46, %v5600_v4  ;;  %v5673_v62 = vrot.slane %v5578_v41, 4  ;;  %v5672_v54 = vsel %vm616_vm2, %v5671_v30, %v5670_v42  ;;  %v5023_v7 = vsel %vm628_vm6, %v5022_v29, %v5021_v53  ;;  %v13905_v42 = vld [vmem:[%s15267_s5 + $0x94] ss:$8 sps:$4 sm:$0xff]  }
 0x2c7   :  { %5158 = vmatprep.subr.bf16.mxu0 %v13828_v51  ;;  %5714 = vmatpush2.bf16.msra.mxu1 %v15856_v50  ;;  %v5605_v36 = vrot.slane %v5579_v48, 3  ;;  %v5590_v11 = vunpack.c.l.b16 %v5494_v6  ;;  %v5604_v9 = vsel %vm619_vm3, %v5603_v44, %v5602_v63  ;;  %v5652_v50 = vsel %vm628_vm6, %v5651_v17, %v5650_v0  ;;  %v13899_v48 = vld [vmem:[%s15267_s5 + $0xa0] ss:$8 sps:$4 sm:$0xff]   ;;  %15862 = vst [vmem:[#allocation38_spill] sm:$0xff] %v13905_v42  ;;  %v13922_v63 = vld [vmem:[%s15267_s5 + $0x164] ss:$8 sps:$4 sm:$0xff]  }
 0x2c8   :  { %5715 = vmatprep.subr.bf16.mxu1 %v15857_v39  ;;  %v5675_v55 = vrot.slane %v5584_v47, 3  ;;  %v5591_v46 = vunpack.c.l.b16 %v5495_v18  ;;  %v5674_v61 = vsel %vm619_vm3, %v5673_v62, %v5672_v54  ;;  %v5042_v41 = vpack.c.b16 %v5023_v7, %v5023_v7  ;;  %15861 = vst [vmem:[#allocation27_spill] sm:$0xff] %v13899_v48  ;;  %v13915_v47 = vld [vmem:[%s15267_s5 + $0x170] ss:$8 sps:$4 sm:$0xff]   ;;  %v13945_v54 = vld [vmem:[%s15267_s5 + $0x160] ss:$8 sps:$4 sm:$0xff]  }
 0x2c9   :  { %v5607_v39 = vrot.slane %v5585_v40, 2  ;;  %v5596_v4 = vunpack.c.l.b16 %v5500_v21  ;;  %v5606_v5 = vsel %vm622_vm4, %v5605_v36, %v5604_v9  ;;  %v5684_v30 = vpack.c.b16 %v5652_v50, %v5652_v50  ;;  %v13963_v50 = vld [vmem:[%s15267_s5 + $0x274] ss:$8 sps:$4 sm:$0xff]  }
 0x2ca   :  { %5159 = vmatpush2.bf16.msra.mxu0 %v13843_v2  ;;  %v5677_v29 = vrot.slane %v5590_v11, 2  ;;  %v5609_v6 = vrot.slane %v5591_v46, 1  ;;  %v13957_v11 = vld [vmem:[%s15267_s5 + $0x80] ss:$8 sps:$4 sm:$0xff]   ;;  %15868 = vst [vmem:[#allocation9_spill] sm:$0xff] %v13963_v50 }
 0x2cb   :  { %5160 = vmatprep.subr.bf16.mxu0 %v13851_v22  ;;  %5716 = vmatpush2.bf16.msra.mxu1 %v15859_v19  ;;  %v5608_v53 = vsel %vm625_vm5, %v5607_v39, %v5606_v5  ;;  %v5679_v44 = vrot.slane %v5596_v4, 1  ;;  %15867 = vst [vmem:[#allocation32_spill] sm:$0xff] %v13957_v11  ;;  %v13987_v39 = vld [vmem:[%s15267_s5 + $0x140] ss:$8 sps:$4 sm:$0xff]  }
 0x2cc   :  { %5717 = vmatprep.subr.bf16.mxu1 %v15860_v49  ;;  %v5610_v0 = vsel %vm628_vm6, %v5609_v6, %v5608_v53  ;;  %v13938_v49 = vld [vmem:[%s15267_s5 + $0x84] ss:$8 sps:$4 sm:$0xff]   ;;  %v15869_v4 = vld [vmem:[#allocation6_spill] sm:$0xff] }
 0x2cd   :  { %15866 = vst [vmem:[#allocation51_spill] sm:$0xff] %v13938_v49  ;;  %v5681_v7 = vpack.c.b16 %v5610_v0, %v5610_v0  ;;  %v5248_v5 = vrot.slane %v15824_v31, %v15869_v4  ;;  %v5224_v53 = vrot.slane %v15830_v20, %v15869_v4  ;;  %v5368_v0 = vrot.slane %v13469_v24, %v15869_v4 }
 0x2ce   :  { %5161 = vmatpush2.bf16.msra.mxu0 %v13867_v26 }
 0x2cf   :  { %5162 = vmatprep.subr.bf16.mxu0 %v13874_v13  ;;  %5718 = vmatpush2.bf16.msra.mxu1 %v13492_v58  ;;  %v13892_v58 = vld [vmem:[%s15267_s5 + $0x174] ss:$8 sps:$4 sm:$0xff]   ;;  %v5461_v6 = vpack.c.bf16 %v5248_v5, %v5248_v5  ;;  %v8418_v5 = vld [vmem:[%s15268_s1 + $0x30] ss:$8 sm:$0x30] }
 0x2d0   :  { %5719 = vmatprep.subr.bf16.mxu1 %v13502_v60  ;;  %v5676_v60 = vsel %vm622_vm4, %v5675_v55, %v5674_v61  ;;  %v13969_v55 = vld [vmem:[%s15267_s5 + $0x150] ss:$8 sps:$4 sm:$0xff]   ;;  %v13977_v61 = vld [vmem:[%s15267_s5 + $0x144] ss:$8 sps:$4 sm:$0xff]  }
 0x2d1   :  { %v5678_v19 = vsel %vm625_vm5, %v5677_v29, %v5676_v60  ;;  %v5272_v29 = vrot.slane %v15828_v10, %v15869_v4  ;;  %v14005_v60 = vld [vmem:[%s15267_s5 + $0x130] ss:$8 sps:$4 sm:$0xff]  }
 0x2d2   :  { %5163 = vmatpush2.bf16.msra.mxu0 %v13885_v45  ;;  %v5680_v21 = vsel %vm628_vm6, %v5679_v44, %v5678_v19  ;;  %v5296_v44 = vrot.slane %v15833_v32, %v15869_v4  ;;  %v5320_v19 = vrot.slane %v15838_v25, %v15869_v4 }
 0x2d3   :  { %5734 = vmatprep.subr.bf16.mxu0 %v13892_v58  ;;  %5720 = vmatpush2.bf16.msra.mxu1 %v13899_v48  ;;  %v5686_v9 = vpack.c.b16 %v5680_v21, %v5680_v21 }
 0x2d4   :  { %5721 = vmatprep.subr.bf16.mxu1 %v13905_v42 }
 0x2d5   :  { %v3880_v38 = vpop.f32.mrf.mxu0  ;;  %5165 = vmatmul.mubr.bf16.vlgmr.msra.gmra.mxu0 %v5042_v41 }
 0x2d6   :  { %v13910_v17 = vadd.f32 %v3880_v38, %v13589_v52  ;;  %5735 = vmatpush1.bf16.msra.mxu0 %v13915_v47  ;;  %5766 = vmatprep.mubr.bf16.mxu0 %v5684_v30  ;;  %v13928_v52 = vld [vmem:[%s15267_s5 + $0x90] ss:$8 sps:$4 sm:$0xff]  }
 0x2d7   :  { %v3882_v18 = vpop.f32.mrf.mxu0  ;;  %5736 = vmatprep.subr.bf16.mxu0 %v13922_v63  ;;  %15864 = vst [vmem:[#allocation44_spill] sm:$0xff] %v13928_v52  ;;  %5722 = vmatpush2.bf16.msra.mxu1 %v13928_v52  ;;  %v8419_v38 = vld [vmem:[%s15268_s1 + $0x90] ss:$8 sm:$0xf] }
 0x2d8   :  { %15863 = vst [vmem:[#allocation25_spill] sm:$0xff] %v13910_v17  ;;  %v13933_v62 = vadd.f32 %v3882_v18, %v13593_v15  ;;  %5723 = vmatprep.subr.bf16.mxu1 %v13938_v49  ;;  %v13951_v15 = vld [vmem:[%s15267_s5 + $0x154] ss:$8 sps:$4 sm:$0xff]   ;;  %v5344_v18 = vrot.slane %v13450_v14, %v15869_v4  ;;  %v8423_v17 = vld [vmem:[%s15268_s1 + $0x150] ss:$8 sm:$0xf] }
 0x2d9   :  { %v3884_v40 = vpop.f32.mrf.mxu0  ;;  %v14109_v52 = vld [vmem:[%s15267_s5 + $0x100] ss:$8 sps:$4 sm:$0xff]  }
 0x2da   :  { %15865 = vst [vmem:[#allocation26_spill] sm:$0xff] %v13933_v62  ;;  %5737 = vmatpush1.bf16.msra.mxu0 %v13945_v54  ;;  %v5467_v40 = vpack.c.bf16 %v5272_v29, %v5272_v29  ;;  %v5473_v29 = vpack.c.bf16 %v5296_v44, %v5296_v44  ;;  %15876 = vst [vmem:[#allocation43_spill] sm:$0xff] %v14109_v52 }
 0x2db   :  { %5738 = vmatprep.subr.bf16.mxu0 %v13951_v15  ;;  %v3885_v36 = vpop.f32.mrf.mxu0  ;;  %5724 = vmatpush2.bf16.msra.mxu1 %v13957_v11 }
 0x2dc   :  { %5775 = vmatprep.subr.bf16.mxu1 %v13963_v50  ;;  %v8422_v36 = vld [vmem:[%s15268_s1 + $0xf0] ss:$8 sm:$0x30]  ;;  %v5563_v44 = vunpack.c.l.b16 %v5467_v40 }
 0x2dd   :  { %v8424_v50 = vld [vmem:[%s15268_s1 + $0x150] ss:$8 sm:$0x30] }
 0x2de   :  { %5739 = vmatpush1.bf16.msra.mxu0 %v13969_v55  ;;  %v13972_v46 = vpop.f32.mrf.mxu1  ;;  %5726 = vmatmul.mubr.bf16.vlgmr.msra.gmra.mxu1 %v5681_v7  ;;  %v8421_v7 = vld [vmem:[%s15268_s1 + $0xf0] ss:$8 sm:$0xf] }
 0x2df   :  { %5740 = vmatprep.subr.bf16.mxu0 %v13977_v61  ;;  %5776 = vmatpush1.bf16.msra.mxu1 %v13547_v56  ;;  %v13995_v56 = vld [vmem:[%s15267_s5 + $0x134] ss:$8 sps:$4 sm:$0xff]   ;;  %v14059_v62 = vor.u32 %v8422_v36, %v8421_v7  ;;  %v5569_v7 = vunpack.c.l.b16 %v5473_v29 }
 0x2e0   :  { %5807 = vmatprep.mubr.bf16.mxu1 %v5686_v9  ;;  %v13981_v41 = vpop.f32.mrf.mxu1  ;;  %5777 = vmatprep.subr.bf16.mxu1 %v13554_v23  ;;  %v5557_v9 = vunpack.c.l.b16 %v5461_v6  ;;  %v5485_v6 = vpack.c.bf16 %v5344_v18, %v5344_v18  ;;  %v14077_v18 = vld [vmem:[%s15267_s5 + $0x110] ss:$8 sps:$4 sm:$0xff]  }
 0x2e1   :  { %15873 = vst [vmem:[#allocation29_spill] sm:$0xff] %v14077_v18 }
 0x2e2   :  { %5741 = vmatpush1.bf16.msra.mxu0 %v13987_v39  ;;  %v4445_v30 = vpop.f32.mrf.mxu1  ;;  %v14097_v11 = vunpack.c.l.b16 %v5485_v6 }
 0x2e3   :  { %5742 = vmatprep.subr.bf16.mxu0 %v13995_v56  ;;  %5778 = vmatpush1.bf16.msra.mxu1 %v13564_v43  ;;  %v8420_v43 = vld [vmem:[%s15268_s1 + $0x90] ss:$8 sm:$0x30]  ;;  %v14055_v30 = vld [vmem:[%s15267_s5 + $0x114] ss:$8 sps:$4 sm:$0xff]  }
 0x2e4   :  { %v4446_v23 = vpop.f32.mrf.mxu1  ;;  %5779 = vmatprep.subr.bf16.mxu1 %v13570_v35  ;;  %v14017_v35 = vld [vmem:[%s15267_s5 + $0x124] ss:$8 sps:$4 sm:$0xff]   ;;  %v14032_v21 = vor.u32 %v8420_v43, %v8419_v38  ;;  %15872 = vst [vmem:[#allocation7_spill] sm:$0xff] %v14055_v30  ;;  %v5479_v38 = vpack.c.bf16 %v5320_v19, %v5320_v19  ;;  %v5491_v43 = vpack.c.bf16 %v5368_v0, %v5368_v0  ;;  %v5625_v0 = vrot.slane %v5557_v9, 7 }
 0x2e5   :  { %15870 = vst [vmem:[#allocation11_spill] sm:$0xff] %v14017_v35  ;;  %v5455_v23 = vpack.c.bf16 %v5224_v53, %v5224_v53  ;;  %v5392_v53 = vrot.slane %v13487_v57, %v15869_v4  ;;  %v8426_v9 = vld [vmem:[%s15268_s1 + $0x1b0] ss:$8 sm:$0x30] }
 0x2e6   :  { %5743 = vmatpush1.bf16.msra.mxu0 %v14005_v60  ;;  %v14086_v36 = vunpack.c.l.b16 %v5479_v38  ;;  %v14099_v49 = vunpack.c.l.b16 %v5491_v43  ;;  %v8428_v43 = vld [vmem:[%s15268_s1 + $0x210] ss:$8 sm:$0x30] }
 0x2e7   :  { %5744 = vmatprep.subr.bf16.mxu0 %v14017_v35  ;;  %5780 = vmatpush1.bf16.msra.mxu1 %v13580_v8  ;;  %v14043_v8 = vld [vmem:[%s15267_s5 + $0x120] ss:$8 sps:$4 sm:$0xff]   ;;  %v5551_v40 = vunpack.c.l.b16 %v5455_v23  ;;  %v5911_v23 = vrot.slane %v14059_v62, %v15791_v1 }
 0x2e8   :  { %5781 = vmatprep.subr.bf16.mxu1 %v13586_v3  ;;  %15871 = vst [vmem:[#allocation34_spill] sm:$0xff] %v14043_v8  ;;  %v8417_v3 = vld [vmem:[%s15268_s1 + $0x30] ss:$8 sm:$0xf] }
 0x2e9   :  { %v14070_v19 = vor.u32 %v8418_v5, %v8417_v3  ;;  %v14088_v3 = vor.u32 %v8424_v50, %v8423_v17  ;;  %v8425_v5 = vld [vmem:[%s15268_s1 + $0x1b0] ss:$8 sm:$0xf]  ;;  %v5497_v17 = vpack.c.bf16 %v5392_v53, %v5392_v53  ;;  %v5627_v50 = vrot.slane %v5563_v44, 6  ;;  %v14127_v53 = vld [vmem:[%s15267_s5 + $0x1f4] ss:$8 sps:$4 sm:$0xff]  }
 0x2ea   :  { %5745 = vmatpush1.bf16.msra.mxu0 %v14043_v8  ;;  %v14116_v6 = vor.u32 %v8426_v9, %v8425_v5  ;;  %15877 = vst [vmem:[#allocation31_spill] sm:$0xff] %v14127_v53  ;;  %v5629_v44 = vrot.slane %v5569_v7, 5  ;;  %v6109_v48 = vpack.c.bf16 %v5911_v23, %v5911_v23  ;;  %v15882_v9 = vld [vmem:[#allocation16_spill] sm:$0xff]  ;;  %v15887_v8 = vld [vmem:[#allocation17_spill] sm:$0xff] }
 0x2eb   :  { %5746 = vmatprep.subr.bf16.mxu0 %v14055_v30  ;;  %5782 = vmatpush1.bf16.msra.mxu1 %v13598_v27  ;;  %v5887_v27 = vrot.slane %v14032_v21, %v15791_v1  ;;  %15875 = vst [vmem:[#allocation22_spill] sm:$0xff] %v14088_v3  ;;  %v5863_v29 = vrot.slane %v14070_v19, %v15791_v1 }
 0x2ec   :  { %5783 = vmatprep.subr.bf16.mxu1 %v13604_v12  ;;  %v14083_v12 = vld [vmem:[%s15267_s5 + $0x104] ss:$8 sps:$4 sm:$0xff]   ;;  %v5935_v5 = vrot.slane %v14088_v3, %v15791_v1 }
 0x2ed   :  { %15874 = vst [vmem:[#allocation30_spill] sm:$0xff] %v14083_v12  ;;  %v6103_v38 = vpack.c.bf16 %v5887_v27, %v5887_v27  ;;  %v5631_v27 = vrot.slane %v14086_v36, 4  ;;  %v15493_v36 = vmov 0  }
 0x2ee   :  { %5747 = vmatpush1.bf16.msra.mxu0 %v14077_v18  ;;  %8607 = vset.pattern.permute.xlu0 %v15493_v36  ;;  %v15881_v36 = vld [vmem:[#allocation4_spill] sm:$0xff] }
 0x2ef   :  { %5748 = vmatprep.subr.bf16.mxu0 %v14083_v12  ;;  %5784 = vmatpush1.bf16.msra.mxu1 %v13614_v34  ;;  %v14114_v34 = vrot.slane %v15824_v31, %v15819_v33  ;;  %v5626_v31 = vsel %vm610_vm0, %v5625_v0, %v5551_v40  ;;  %v14138_v12 = vunpack.c.l.b16 %v5497_v17  ;;  %v8429_v0 = vld [vmem:[%s15268_s1 + $0x270] ss:$8 sm:$0xf]  ;;  %v6199_v7 = vunpack.c.l.b16 %v6103_v38  ;;  %v14165_v38 = vld [vmem:[%s15267_s5 + $0x1e4] ss:$8 sps:$4 sm:$0xff]  }
 0x2f0   :  { %5785 = vmatprep.subr.bf16.mxu1 %v13622_v59  ;;  %v8427_v59 = vld [vmem:[%s15268_s1 + $0x210] ss:$8 sm:$0xf]  ;;  %v5628_v23 = vsel %vm613_vm1, %v5627_v50, %v5626_v31  ;;  %v5232_v17 = vrot.slane %v15830_v20, %v15819_v33  ;;  %15880 = vst [vmem:[#allocation33_spill] sm:$0xff] %v14165_v38  ;;  %v14174_v20 = vrot.slane %v15838_v25, %v15819_v33 }
 0x2f1   :  { %v8430_v40 = vld [vmem:[%s15268_s1 + $0x270] ss:$8 sm:$0x30]  ;;  %v6115_v31 = vpack.c.bf16 %v5935_v5, %v5935_v5  ;;  %v5895_v42 = vrot.slane %v14032_v21, %v15881_v36  ;;  %v14191_v25 = vrot.slane %v13469_v24, %v15819_v33  ;;  %v5630_v5 = vsel %vm616_vm2, %v5629_v44, %v5628_v23 }
 0x2f2   :  { %5749 = vmatpush1.bf16.msra.mxu0 %v14109_v52  ;;  %v15878_v52 = vld [vmem:[#allocation39_spill] sm:$0xff]  ;;  %v8432_v50 = vld [vmem:[%s15268_s1 + $0x2d0] ss:$8 sm:$0x30]  ;;  %v5463_v24 = vpack.c.bf16 %v14114_v34, %v14114_v34  ;;  %v5919_v44 = vrot.slane %v14059_v62, %v15881_v36  ;;  %v5871_v34 = vrot.slane %v14070_v19, %v15881_v36 }
 0x2f3   :  { %5750 = vmatprep.subr.bf16.mxu0 %v14127_v53  ;;  %5786 = vmatpush1.bf16.msra.mxu1 %v13638_v37  ;;  %v14140_v53 = vor.u32 %v8428_v43, %v8427_v59  ;;  %v6097_v37 = vpack.c.bf16 %v5863_v29, %v5863_v29  ;;  %v5280_v59 = vrot.slane %v15828_v10, %v15819_v33  ;;  %v8431_v10 = vld [vmem:[%s15268_s1 + $0x2d0] ss:$8 sm:$0xf] }
 0x2f4   :  { %5787 = vmatprep.subr.bf16.mxu1 %v15878_v52  ;;  %v14152_v52 = vld [vmem:[%s15267_s5 + $0x1f0] ss:$8 sps:$4 sm:$0xff]   ;;  %v5959_v29 = vrot.slane %v14116_v6, %v15791_v1  ;;  %v14170_v43 = vrot.slane %v15833_v32, %v15819_v33  ;;  %v14187_v32 = vrot.slane %v13450_v14, %v15819_v33  ;;  %v14202_v14 = vld [vmem:[%s15267_s5 + $0x1e0] ss:$8 sps:$4 sm:$0xff]  }
 0x2f5   :  { %15879 = vst [vmem:[#allocation50_spill] sm:$0xff] %v14152_v52  ;;  %v15883_v18 = vld [vmem:[#allocation40_spill] sm:$0xff]  ;;  %v5983_v4 = vrot.slane %v14140_v53, %v15791_v1  ;;  %v6193_v30 = vunpack.c.l.b16 %v6097_v37  ;;  %15884 = vst [vmem:[#allocation52_spill] sm:$0xff] %v14202_v14  ;;  %v6211_v37 = vunpack.c.l.b16 %v6115_v31  ;;  %v15886_v23 = vld [vmem:[#allocation21_spill] sm:$0xff]  ;;  %v5943_v31 = vrot.slane %v14088_v3, %v15881_v36 }
 0x2f6   :  { %5751 = vmatpush2.bf16.msra.mxu0 %v14152_v52  ;;  %v6205_v52 = vunpack.c.l.b16 %v6109_v48  ;;  %v14207_v48 = vor.u32 %v8432_v50, %v8431_v10  ;;  %v5457_v10 = vpack.c.bf16 %v5232_v17, %v5232_v17 }
 0x2f7   :  { %5752 = vmatprep.subr.bf16.mxu0 %v14165_v38  ;;  %5788 = vmatpush1.bf16.msra.mxu1 %v15882_v9  ;;  %v14193_v38 = vor.u32 %v8430_v40, %v8429_v0  ;;  %v6254_v9 = vrot.slane %v6199_v7, 7  ;;  %v14214_v0 = vld [vmem:[%s15267_s5 + $0x1d4] ss:$8 sps:$4 sm:$0xff]   ;;  %v14219_v40 = vrot.slane %v13487_v57, %v15819_v33  ;;  %v6105_v7 = vpack.c.bf16 %v5895_v42, %v5895_v42  ;;  %v14234_v42 = vld [vmem:[%s15267_s5 + $0x1d0] ss:$8 sps:$4 sm:$0xff]  }
 0x2f8   :  { %5789 = vmatprep.subr.bf16.mxu1 %v15883_v18  ;;  %v6121_v18 = vpack.c.bf16 %v5959_v29, %v5959_v29  ;;  %15885 = vst [vmem:[#allocation46_spill] sm:$0xff] %v14214_v0  ;;  %v5632_v29 = vsel %vm619_vm3, %v5631_v27, %v5630_v5  ;;  %v6127_v35 = vpack.c.bf16 %v5983_v4, %v5983_v4  ;;  %15888 = vst [vmem:[#allocation53_spill] sm:$0xff] %v14234_v42  ;;  %v14242_v4 = vld [vmem:[%s15267_s5 + $0x1c4] ss:$8 sps:$4 sm:$0xff]   ;;  %v15891_v33 = vld [vmem:[#allocation41_spill] sm:$0xff] }
 0x2f9   :  { %v6007_v50 = vrot.slane %v14193_v38, %v15791_v1  ;;  %v6255_v57 = vsel %vm610_vm0, %v6254_v9, %v6193_v30  ;;  %v5559_v27 = vunpack.c.l.b16 %v5463_v24  ;;  %15889 = vst [vmem:[#allocation37_spill] sm:$0xff] %v14242_v4  ;;  %v5475_v30 = vpack.c.bf16 %v14170_v43, %v14170_v43 }
 0x2fa   :  { %5753 = vmatpush2.bf16.msra.mxu0 %v14202_v14  ;;  %v6256_v14 = vrot.slane %v6205_v52, 6  ;;  %v6031_v52 = vrot.slane %v14207_v48, %v15791_v1  ;;  %v6217_v17 = vunpack.c.l.b16 %v6121_v18  ;;  %v6099_v5 = vpack.c.bf16 %v5871_v34, %v5871_v34 }
 0x2fb   :  { %5754 = vmatprep.subr.bf16.mxu0 %v14214_v0  ;;  %5790 = vmatpush1.bf16.msra.mxu1 %v15886_v23  ;;  %v5469_v0 = vpack.c.bf16 %v5280_v59, %v5280_v59  ;;  %v6258_v59 = vrot.slane %v6211_v37, 5  ;;  %v6201_v9 = vunpack.c.l.b16 %v6105_v7  ;;  %v15890_v23 = vld [vmem:[#allocation45_spill] sm:$0xff]  ;;  %v5481_v24 = vpack.c.bf16 %v14174_v20, %v14174_v20  ;;  %v14257_v37 = vld [vmem:[%s15267_s5 + $0x1c0] ss:$8 sps:$4 sm:$0xff]  }
 0x2fc   :  { %5791 = vmatprep.subr.bf16.mxu1 %v15887_v8  ;;  %v6111_v8 = vpack.c.bf16 %v5919_v44, %v5919_v44  ;;  %v6133_v18 = vpack.c.bf16 %v6007_v50, %v6007_v50  ;;  %v6257_v44 = vsel %vm613_vm1, %v6256_v14, %v6255_v57  ;;  %v5967_v1 = vrot.slane %v14116_v6, %v15881_v36  ;;  %v14263_v50 = vld [vmem:[%s15267_s5 + $0x1b4] ss:$8 sps:$4 sm:$0xff]   ;;  %v15894_v57 = vld [vmem:[#allocation23_spill] sm:$0xff] }
 0x2fd   :  { %v6223_v3 = vunpack.c.l.b16 %v6127_v35  ;;  %v6117_v43 = vpack.c.bf16 %v5943_v31, %v5943_v31  ;;  %15892 = vst [vmem:[#allocation48_spill] sm:$0xff] %v14257_v37  ;;  %v5653_v20 = vrot.slane %v5559_v27, 7  ;;  %v6139_v34 = vpack.c.bf16 %v6031_v52, %v6031_v52  ;;  %15893 = vst [vmem:[#allocation39_spill] sm:$0xff] %v14263_v50 }
 0x2fe   :  { %5755 = vmatpush2.bf16.msra.mxu0 %v14234_v42  ;;  %v5565_v42 = vunpack.c.l.b16 %v5469_v0  ;;  %v6260_v7 = vrot.slane %v6217_v17, 4  ;;  %v6207_v14 = vunpack.c.l.b16 %v6111_v8  ;;  %v5991_v35 = vrot.slane %v14140_v53, %v15881_v36 }
 0x2ff   :  { %5756 = vmatprep.subr.bf16.mxu0 %v14242_v4  ;;  %5792 = vmatpush2.bf16.msra.mxu1 %v15890_v23  ;;  %v5553_v4 = vunpack.c.l.b16 %v5457_v10  ;;  %v6195_v0 = vunpack.c.l.b16 %v6099_v5  ;;  %v6282_v10 = vrot.slane %v6201_v9, 7  ;;  %v15895_v31 = vrot.slane %v14097_v11, 3  ;;  %v15896_v23 = vld [vmem:[#allocation35_spill] sm:$0xff]  ;;  %v14279_v5 = vld [vmem:[%s15267_s5 + $0x1b0] ss:$8 sps:$4 sm:$0xff]  }
 0x300   :  { %5793 = vmatprep.subr.bf16.mxu1 %v15891_v33  ;;  %v6259_v33 = vsel %vm616_vm2, %v6258_v59, %v6257_v44  ;;  %v5571_v52 = vunpack.c.l.b16 %v5475_v30  ;;  %v6229_v17 = vunpack.c.l.b16 %v6133_v18  ;;  %v6123_v8 = vpack.c.bf16 %v5967_v1, %v5967_v1 }
 0x301   :  { %v5634_v27 = vsel %vm622_vm4, %v15895_v31, %v5632_v29  ;;  %v5655_v59 = vrot.slane %v5565_v42, 6  ;;  %v6262_v44 = vrot.slane %v6223_v3, 3  ;;  %v5654_v11 = vsel %vm610_vm0, %v5653_v20, %v5553_v4  ;;  %v14289_v3 = vld [vmem:[%s15267_s5 + $0x1a4] ss:$8 sps:$4 sm:$0xff]  }
 0x302   :  { %5757 = vmatpush2.bf16.msra.mxu0 %v14257_v37  ;;  %v6213_v37 = vunpack.c.l.b16 %v6117_v43  ;;  %v6261_v29 = vsel %vm619_vm3, %v6260_v7, %v6259_v33  ;;  %v6015_v1 = vrot.slane %v14193_v38, %v15881_v36  ;;  %v6284_v30 = vrot.slane %v6207_v14, 6  ;;  %v15897_v43 = vld [vmem:[#allocation47_spill] sm:$0xff]  ;;  %v15898_v33 = vld [vmem:[#allocation36_spill] sm:$0xff] }
 0x303   :  { %5758 = vmatprep.subr.bf16.mxu0 %v14263_v50  ;;  %5794 = vmatpush2.bf16.msra.mxu1 %v15894_v57  ;;  %v5487_v50 = vpack.c.bf16 %v14187_v32, %v14187_v32  ;;  %v5577_v32 = vunpack.c.l.b16 %v5481_v24  ;;  %v6235_v42 = vunpack.c.l.b16 %v6139_v34  ;;  %v6129_v9 = vpack.c.bf16 %v5991_v35, %v5991_v35  ;;  %v14304_v35 = vld [vmem:[%s15267_s5 + $0x1a0] ss:$8 sps:$4 sm:$0xff]  }
 0x304   :  { %5795 = vmatprep.subr.bf16.mxu1 %v15896_v23  ;;  %v6283_v18 = vsel %vm610_vm0, %v6282_v10, %v6195_v0  ;;  %v5493_v4 = vpack.c.bf16 %v14191_v25, %v14191_v25  ;;  %v5657_v20 = vrot.slane %v5571_v52, 5  ;;  %v6264_v7 = vrot.slane %v6229_v17, 2  ;;  %v14312_v17 = vld [vmem:[%s15267_s5 + $0x194] ss:$8 sps:$4 sm:$0xff]  }
 0x305   :  { %v6219_v14 = vunpack.c.l.b16 %v6123_v8  ;;  %v5656_v57 = vsel %vm613_vm1, %v5655_v59, %v5654_v11  ;;  %v6263_v31 = vsel %vm622_vm4, %v6262_v44, %v6261_v29  ;;  %v6039_v24 = vrot.slane %v14207_v48, %v15881_v36  ;;  %v15900_v44 = vld [vmem:[#allocation42_spill] sm:$0xff] }
 0x306   :  { %5759 = vmatpush2.bf16.msra.mxu0 %v14279_v5  ;;  %v6286_v34 = vrot.slane %v6213_v37, 5  ;;  %v5637_v25 = vrot.slane %v14138_v12, 1  ;;  %v5583_v0 = vunpack.c.l.b16 %v5487_v50  ;;  %v6135_v10 = vpack.c.bf16 %v6015_v1, %v6015_v1  ;;  %v15901_v1 = vld [vmem:[#allocation49_spill] sm:$0xff] }
 0x307   :  { %5760 = vmatprep.subr.bf16.mxu0 %v14289_v3  ;;  %5796 = vmatpush2.bf16.msra.mxu1 %v15897_v43  ;;  %v6285_v52 = vsel %vm613_vm1, %v6284_v30, %v6283_v18  ;;  %v15899_v36 = vrot.slane %v14099_v49, 2  ;;  %v5659_v8 = vrot.slane %v5577_v32, 4  ;;  %v6266_v23 = vrot.slane %v6235_v42, 1 }
 0x308   :  { %5797 = vmatprep.subr.bf16.mxu1 %v15898_v33  ;;  %v6225_v59 = vunpack.c.l.b16 %v6129_v9  ;;  %v5499_v12 = vpack.c.bf16 %v14219_v40, %v14219_v40  ;;  %v5658_v50 = vsel %vm616_vm2, %v5657_v20, %v5656_v57  ;;  %v6265_v11 = vsel %vm625_vm5, %v6264_v7, %v6263_v31  ;;  %v14335_v9 = vld [vmem:[%s15267_s5 + $0x184] ss:$8 sps:$4 sm:$0xff]  }
 0x309   :  { %v5636_v37 = vsel %vm625_vm5, %v15899_v36, %v5634_v27  ;;  %v6288_v29 = vrot.slane %v6219_v14, 4  ;;  %v5589_v30 = vunpack.c.l.b16 %v5493_v4  ;;  %v6141_v18 = vpack.c.bf16 %v6039_v24, %v6039_v24  ;;  %v14328_v27 = vld [vmem:[%s15267_s5 + $0x190] ss:$8 sps:$4 sm:$0xff]   ;;  %v14346_v24 = vld [vmem:[%s15267_s5 + $0x180] ss:$8 sps:$4 sm:$0xff]  }
 0x30a   :  { %5761 = vmatpush2.bf16.msra.mxu0 %v14304_v35  ;;  %v6287_v49 = vsel %vm616_vm2, %v6286_v34, %v6285_v52  ;;  %v5638_v40 = vsel %vm628_vm6, %v5637_v25, %v5636_v37  ;;  %v5661_v32 = vrot.slane %v5583_v0, 3  ;;  %v6231_v42 = vunpack.c.l.b16 %v6135_v10  ;;  %v15902_v10 = vld [vmem:[#allocation12_spill] sm:$0xff] }
 0x30b   :  { %5762 = vmatprep.subr.bf16.mxu0 %v14312_v17  ;;  %5798 = vmatpush2.bf16.msra.mxu1 %v15900_v44  ;;  %v5660_v43 = vsel %vm619_vm3, %v5659_v8, %v5658_v50  ;;  %v6267_v4 = vsel %vm628_vm6, %v6266_v23, %v6265_v11  ;;  %v6290_v20 = vrot.slane %v6225_v59, 3  ;;  %v5595_v7 = vunpack.c.l.b16 %v5499_v12  ;;  %v15903_v59 = vld [vmem:[#allocation13_spill] sm:$0xff] }
 0x30c   :  { %5799 = vmatprep.subr.bf16.mxu1 %v15901_v1  ;;  %v6289_v14 = vsel %vm619_vm3, %v6288_v29, %v6287_v49  ;;  %v5683_v33 = vpack.c.b16 %v5638_v40, %v5638_v40  ;;  %v5663_v57 = vrot.slane %v5589_v30, 2  ;;  %v6237_v31 = vunpack.c.l.b16 %v6141_v18  ;;  %v9308_v50 = vld [vmem:[%s15267_s5 + $0x70] ss:$8 sps:$4 sm:$0xff]   ;;  %v9310_v30 = vld [vmem:[%s15267_s5 + $0x60] ss:$8 sps:$4 sm:$0xff]  }
 0x30d   :  { %v5662_v34 = vsel %vm622_vm4, %v5661_v32, %v5660_v43  ;;  %v6325_v25 = vpack.c.b16 %v6267_v4, %v6267_v4  ;;  %v6292_v0 = vrot.slane %v6231_v42, 2  ;;  %v4442_v52 = vadd.f32 %v13972_v46, %v15902_v10  ;;  %v9311_v49 = vld [vmem:[%s15267_s5 + $0x54] ss:$8 sps:$4 sm:$0xff]   ;;  %v9313_v42 = vld [vmem:[%s15267_s5 + $0x44] ss:$8 sps:$4 sm:$0xff]  }
 0x30e   :  { %5763 = vmatpush2.bf16.msra.mxu0 %v14328_v27  ;;  %v5665_v36 = vrot.slane %v5595_v7, 1  ;;  %v5664_v8 = vsel %vm625_vm5, %v5663_v57, %v5662_v34  ;;  %v6294_v23 = vrot.slane %v6237_v31, 1  ;;  %v4444_v44 = vadd.f32 %v13981_v41, %v15903_v59  ;;  %v9314_v4 = vld [vmem:[%s15267_s5 + $0x40] ss:$8 sps:$4 sm:$0xff]   ;;  %v9315_v7 = vld [vmem:[%s15267_s5 + $0x34] ss:$8 sps:$4 sm:$0xff]  }
 0x30f   :  { %5764 = vmatprep.subr.bf16.mxu0 %v14335_v9  ;;  %5800 = vmatpush2.bf16.msra.mxu1 %v13818_v28  ;;  %v9307_v28 = vld [vmem:[%s15267_s5 + $0x74] ss:$8 sps:$4 sm:$0xff]   ;;  %v9321_v34 = vld [vmem:[%s15267_s5 + $0x4] ss:$8 sps:$4 sm:$0xff]  }
 0x310   :  { %5801 = vmatprep.subr.bf16.mxu1 %v13828_v51  ;;  %v6291_v51 = vsel %vm622_vm4, %v6290_v20, %v6289_v14  ;;  %v5666_v11 = vsel %vm628_vm6, %v5665_v36, %v5664_v8  ;;  %v14406_v14 = vld [vmem:[%s15271_s0] sm:$0xff]  ;;  %v15904_v57 = vld [vmem:[#allocation5_spill] sm:$0xff] }
 0x311   :  { %v5685_v18 = vpack.c.b16 %v5666_v11, %v5666_v11  ;;  %6464 = vperm.xlu0 %8607, %v14406_v14   ;;  %v5883_v31 = vrot.slane %v14032_v21, %v15904_v57  ;;  %v9322_v36 = vld [vmem:[%s15267_s5] ss:$8 sps:$4 sm:$0xff]   ;;  %v9323_v8 = vld [vmem:[%s15267_s5 + $0xf4] ss:$8 sps:$4 sm:$0xff]  }
 0x312   :  { %5765 = vmatpush2.bf16.msra.mxu0 %v14346_v24 }
 0x313   :  { %6336 = vmatprep.subr.bf16.mxu0 %v9307_v28  ;;  %5802 = vmatpush2.bf16.msra.mxu1 %v13843_v2  ;;  %v6293_v2 = vsel %vm625_vm5, %v6292_v0, %v6291_v51  ;;  %v5927_v0 = vrot.slane %v14059_v62, %v15840_v16  ;;  %v15905_v28 = vld [vmem:[#allocation11_spill] sm:$0xff]  ;;  %v5879_v51 = vrot.slane %v14070_v19, %v15840_v16 }
 0x314   :  { %5803 = vmatprep.subr.bf16.mxu1 %v13851_v22  ;;  %v9309_v22 = vld [vmem:[%s15267_s5 + $0x64] ss:$8 sps:$4 sm:$0xff]   ;;  %v6295_v1 = vsel %vm628_vm6, %v6294_v23, %v6293_v2  ;;  %v5955_v23 = vrot.slane %v14116_v6, %v15904_v57  ;;  %v14457_v2 = vrot.slane %v14140_v53, %v15904_v57 }
 0x315   :  { %v4482_v37 = vpop.f32.mrf.mxu0  ;;  %5767 = vmatmul.mubr.bf16.vlgmr.msra.gmra.mxu0 %v5683_v33  ;;  %v6327_v40 = vpack.c.b16 %v6295_v1, %v6295_v1  ;;  %v9317_v33 = vld [vmem:[%s15267_s5 + $0x24] ss:$8 sps:$4 sm:$0xff]   ;;  %v6113_v11 = vpack.c.bf16 %v5927_v0, %v5927_v0 }
 0x316   :  { %v4483_v12 = vadd.f32 %v4482_v37, %v4442_v52  ;;  %6337 = vmatpush1.bf16.msra.mxu0 %v9308_v50  ;;  %6368 = vmatprep.mubr.bf16.mxu0 %v6325_v25  ;;  %v6102_v25 = vpack.c.bf16 %v5883_v31, %v5883_v31  ;;  %v15907_v50 = vld [vmem:[#allocation34_spill] sm:$0xff] }
 0x317   :  { %v4484_v46 = vpop.f32.mrf.mxu0  ;;  %6338 = vmatprep.subr.bf16.mxu0 %v9309_v22  ;;  %5804 = vmatpush2.bf16.msra.mxu1 %v13867_v26 }
 0x318   :  { %v4485_v41 = vadd.f32 %v4484_v46, %v4444_v44  ;;  %5805 = vmatprep.subr.bf16.mxu1 %v13874_v13  ;;  %v9312_v13 = vld [vmem:[%s15267_s5 + $0x50] ss:$8 sps:$4 sm:$0xff]   ;;  %v6198_v22 = vunpack.c.l.b16 %v6102_v25 }
 0x319   :  { %v4486_v29 = vpop.f32.mrf.mxu0 }
 0x31a   :  { %6339 = vmatpush1.bf16.msra.mxu0 %v9310_v30  ;;  %v6101_v29 = vpack.c.bf16 %v5879_v51, %v5879_v51  ;;  %v9324_v30 = vld [vmem:[%s15267_s5 + $0xf0] ss:$8 sps:$4 sm:$0xff]   ;;  %v9327_v51 = vld [vmem:[%s15267_s5 + $0xd4] ss:$8 sps:$4 sm:$0xff]  }
 0x31b   :  { %6340 = vmatprep.subr.bf16.mxu0 %v9311_v49  ;;  %v4487_v26 = vpop.f32.mrf.mxu0  ;;  %5806 = vmatpush2.bf16.msra.mxu1 %v13885_v45 }
 0x31c   :  { %6377 = vmatprep.subr.bf16.mxu1 %v13892_v58  ;;  %v15909_v26 = vld [vmem:[#allocation6_spill] sm:$0xff] }
 0x31d   :  { %v5915_v31 = vrot.slane %v14059_v62, %v15909_v26  ;;  %v5867_v25 = vrot.slane %v14070_v19, %v15909_v26 }
 0x31e   :  { %6341 = vmatpush1.bf16.msra.mxu0 %v9312_v13  ;;  %v4523_v32 = vpop.f32.mrf.mxu1  ;;  %5808 = vmatmul.mubr.bf16.vlgmr.msra.gmra.mxu1 %v5685_v18  ;;  %v14465_v18 = vrot.slane %v14193_v38, %v15904_v57  ;;  %v5975_v13 = vrot.slane %v14116_v6, %v15840_v16 }
 0x31f   :  { %6342 = vmatprep.subr.bf16.mxu0 %v9313_v42  ;;  %v14386_v43 = vadd.f32 %v4523_v32, %v4483_v12  ;;  %6378 = vmatpush1.bf16.msra.mxu1 %v13915_v47  ;;  %v9325_v32 = vld [vmem:[%s15267_s5 + $0xe4] ss:$8 sps:$4 sm:$0xff]   ;;  %v14476_v42 = vrot.slane %v14207_v48, %v15904_v57 }
 0x320   :  { %6409 = vmatprep.mubr.bf16.mxu1 %v6327_v40  ;;  %v4525_v45 = vpop.f32.mrf.mxu1  ;;  %6379 = vmatprep.subr.bf16.mxu1 %v13922_v63  ;;  %v9316_v63 = vld [vmem:[%s15267_s5 + $0x30] ss:$8 sps:$4 sm:$0xff]   ;;  %v5891_v40 = vrot.slane %v14032_v21, %v15909_v26 }
 0x321   :  { %v14390_v58 = vadd.f32 %v4525_v45, %v4485_v41  ;;  %v15908_v41 = vld [vmem:[#allocation7_spill] sm:$0xff]  ;;  %v6120_v45 = vpack.c.bf16 %v5955_v23, %v5955_v23 }
 0x322   :  { %6343 = vmatpush1.bf16.msra.mxu0 %v9314_v4  ;;  %v4527_v20 = vpop.f32.mrf.mxu1  ;;  %v6104_v0 = vpack.c.bf16 %v5891_v40, %v5891_v40  ;;  %v15912_v23 = vld [vmem:[#allocation43_spill] sm:$0xff] }
 0x323   :  { %6344 = vmatprep.subr.bf16.mxu0 %v9315_v7  ;;  %6380 = vmatpush1.bf16.msra.mxu1 %v13945_v54  ;;  %v9318_v54 = vld [vmem:[%s15267_s5 + $0x20] ss:$8 sps:$4 sm:$0xff]   ;;  %v15910_v7 = vld [vmem:[#allocation29_spill] sm:$0xff] }
 0x324   :  { %v4528_v47 = vpop.f32.mrf.mxu1  ;;  %6381 = vmatprep.subr.bf16.mxu1 %v13951_v15  ;;  %v9319_v15 = vld [vmem:[%s15267_s5 + $0x14] ss:$8 sps:$4 sm:$0xff]  }
 0x325   :  { %v6126_v47 = vpack.c.bf16 %v14457_v2, %v14457_v2 }
 0x326   :  { %6345 = vmatpush1.bf16.msra.mxu0 %v9316_v63 }
 0x327   :  { %6346 = vmatprep.subr.bf16.mxu0 %v9317_v33  ;;  %6382 = vmatpush1.bf16.msra.mxu1 %v13969_v55  ;;  %v5903_v55 = vrot.slane %v14032_v21, %v15840_v16  ;;  %v6240_v33 = vrot.slane %v6198_v22, 7  ;;  %v6216_v22 = vunpack.c.l.b16 %v6120_v45  ;;  %v6047_v45 = vrot.slane %v14207_v48, %v15840_v16 }
 0x328   :  { %6383 = vmatprep.subr.bf16.mxu1 %v13977_v61  ;;  %v9320_v61 = vld [vmem:[%s15267_s5 + $0x10] ss:$8 sps:$4 sm:$0xff]  }
 0x329   :  { %v6107_v52 = vpack.c.bf16 %v5903_v55, %v5903_v55  ;;  %v5999_v55 = vrot.slane %v14140_v53, %v15840_v16 }
 0x32a   :  { %6347 = vmatpush1.bf16.msra.mxu0 %v9318_v54  ;;  %v6209_v54 = vunpack.c.l.b16 %v6113_v11  ;;  %v6110_v11 = vpack.c.bf16 %v5915_v31, %v5915_v31  ;;  %v6246_v31 = vrot.slane %v6216_v22, 4  ;;  %v6011_v22 = vrot.slane %v14193_v38, %v15909_v26 }
 0x32b   :  { %6348 = vmatprep.subr.bf16.mxu0 %v9319_v15  ;;  %6384 = vmatpush1.bf16.msra.mxu1 %v13987_v39  ;;  %v5907_v39 = vrot.slane %v14059_v62, %v15904_v57  ;;  %v6203_v1 = vunpack.c.l.b16 %v6107_v52  ;;  %v15911_v15 = vld [vmem:[#allocation30_spill] sm:$0xff]  ;;  %v6132_v52 = vpack.c.bf16 %v14465_v18, %v14465_v18  ;;  %v6098_v18 = vpack.c.bf16 %v5867_v25, %v5867_v25 }
 0x32c   :  { %6385 = vmatprep.subr.bf16.mxu1 %v13995_v56  ;;  %v5859_v56 = vrot.slane %v14070_v19, %v15904_v57  ;;  %v6312_v2 = vrot.slane %v6209_v54, 6 }
 0x32d   :  { %v6108_v44 = vpack.c.bf16 %v5907_v39, %v5907_v39  ;;  %v9326_v39 = vld [vmem:[%s15267_s5 + $0xe0] ss:$8 sps:$4 sm:$0xff]  }
 0x32e   :  { %6349 = vmatpush1.bf16.msra.mxu0 %v9320_v61  ;;  %v6096_v46 = vpack.c.bf16 %v5859_v56, %v5859_v56  ;;  %v6197_v61 = vunpack.c.l.b16 %v6101_v29 }
 0x32f   :  { %6350 = vmatprep.subr.bf16.mxu0 %v9321_v34  ;;  %6386 = vmatpush1.bf16.msra.mxu1 %v14005_v60  ;;  %v15906_v60 = vld [vmem:[#allocation22_spill] sm:$0xff]  ;;  %v6204_v4 = vunpack.c.l.b16 %v6108_v44  ;;  %v6310_v34 = vrot.slane %v6203_v1, 7 }
 0x330   :  { %6387 = vmatprep.subr.bf16.mxu1 %v15905_v28  ;;  %v5931_v37 = vrot.slane %v15906_v60, %v15904_v57  ;;  %v5951_v12 = vrot.slane %v15906_v60, %v15840_v16  ;;  %v6192_v63 = vunpack.c.l.b16 %v6096_v46  ;;  %v6125_v28 = vpack.c.bf16 %v5975_v13, %v5975_v13  ;;  %v15913_v46 = vld [vmem:[#allocation31_spill] sm:$0xff]  ;;  %v9328_v1 = vld [vmem:[%s15267_s5 + $0xd0] ss:$8 sps:$4 sm:$0xff]  }
 0x331   :  { %v6311_v29 = vsel %vm610_vm0, %v6310_v34, %v6197_v61  ;;  %v9329_v13 = vld [vmem:[%s15267_s5 + $0xc4] ss:$8 sps:$4 sm:$0xff]   ;;  %v6206_v61 = vunpack.c.l.b16 %v6110_v11 }
 0x332   :  { %6351 = vmatpush1.bf16.msra.mxu0 %v9322_v36  ;;  %v6114_v49 = vpack.c.bf16 %v5931_v37, %v5931_v37  ;;  %v6119_v20 = vpack.c.bf16 %v5951_v12, %v5951_v12  ;;  %v6138_v36 = vpack.c.bf16 %v14476_v42, %v14476_v42  ;;  %v6242_v37 = vrot.slane %v6204_v4, 6 }
 0x333   :  { %6352 = vmatprep.subr.bf16.mxu0 %v9323_v8  ;;  %6388 = vmatpush1.bf16.msra.mxu1 %v15907_v50  ;;  %v6241_v44 = vsel %vm610_vm0, %v6240_v33, %v6192_v63  ;;  %v5939_v12 = vrot.slane %v15906_v60, %v15909_v26  ;;  %v6023_v50 = vrot.slane %v14193_v38, %v15840_v16  ;;  %v6221_v40 = vunpack.c.l.b16 %v6125_v28  ;;  %v9330_v16 = vld [vmem:[%s15267_s5 + $0xc0] ss:$8 sps:$4 sm:$0xff]  }
 0x334   :  { %6389 = vmatprep.subr.bf16.mxu1 %v15908_v41  ;;  %v6210_v56 = vunpack.c.l.b16 %v6114_v49  ;;  %v6215_v8 = vunpack.c.l.b16 %v6119_v20  ;;  %v6131_v41 = vpack.c.bf16 %v5999_v55, %v5999_v55  ;;  %v6200_v49 = vunpack.c.l.b16 %v6104_v0  ;;  %v15914_v20 = vld [vmem:[#allocation50_spill] sm:$0xff] }
 0x335   :  { %v5963_v42 = vrot.slane %v14116_v6, %v15909_v26  ;;  %v6116_v63 = vpack.c.bf16 %v5939_v12, %v5939_v12  ;;  %v6137_v33 = vpack.c.bf16 %v6023_v50, %v6023_v50  ;;  %v6313_v54 = vsel %vm613_vm1, %v6312_v2, %v6311_v29  ;;  %v9331_v0 = vld [vmem:[%s15267_s5 + $0xb4] ss:$8 sps:$4 sm:$0xff]  }
 0x336   :  { %6353 = vmatpush2.bf16.msra.mxu0 %v9324_v30  ;;  %v6244_v30 = vrot.slane %v6210_v56, 5  ;;  %v6314_v4 = vrot.slane %v6215_v8, 5  ;;  %v5987_v55 = vrot.slane %v14140_v53, %v15909_v26  ;;  %v6227_v34 = vunpack.c.l.b16 %v6131_v41  ;;  %v15917_v2 = vld [vmem:[#allocation46_spill] sm:$0xff] }
 0x337   :  { %6354 = vmatprep.subr.bf16.mxu0 %v9325_v32  ;;  %6390 = vmatpush1.bf16.msra.mxu1 %v15910_v7  ;;  %v6243_v32 = vsel %vm613_vm1, %v6242_v37, %v6241_v44  ;;  %v6222_v7 = vunpack.c.l.b16 %v6126_v47  ;;  %v6194_v47 = vunpack.c.l.b16 %v6098_v18  ;;  %v6268_v56 = vrot.slane %v6200_v49, 7  ;;  %v9333_v49 = vld [vmem:[%s15267_s5 + $0xa4] ss:$8 sps:$4 sm:$0xff]  }
 0x338   :  { %6391 = vmatprep.subr.bf16.mxu1 %v15911_v15  ;;  %v15915_v15 = vld [vmem:[#allocation33_spill] sm:$0xff]  ;;  %v6316_v25 = vrot.slane %v6221_v40, 4  ;;  %v6228_v28 = vunpack.c.l.b16 %v6132_v52  ;;  %v6143_v37 = vpack.c.bf16 %v6047_v45, %v6047_v45  ;;  %v6315_v8 = vsel %vm616_vm2, %v6314_v4, %v6313_v54 }
 0x339   :  { %v6248_v44 = vrot.slane %v6222_v7, 3  ;;  %v6212_v12 = vunpack.c.l.b16 %v6116_v63  ;;  %v6233_v50 = vunpack.c.l.b16 %v6137_v33  ;;  %v6270_v11 = vrot.slane %v6206_v61, 6  ;;  %v9332_v52 = vld [vmem:[%s15267_s5 + $0xb0] ss:$8 sps:$4 sm:$0xff]  }
 0x33a   :  { %6355 = vmatpush2.bf16.msra.mxu0 %v9326_v39  ;;  %v6245_v39 = vsel %vm616_vm2, %v6244_v30, %v6243_v32  ;;  %v6318_v41 = vrot.slane %v6227_v34, 3  ;;  %v6234_v29 = vunpack.c.l.b16 %v6138_v36  ;;  %v6269_v30 = vsel %vm610_vm0, %v6268_v56, %v6194_v47  ;;  %v15919_v7 = vld [vmem:[#allocation37_spill] sm:$0xff]  ;;  %v15921_v61 = vld [vmem:[#allocation38_spill] sm:$0xff] }
 0x33b   :  { %6356 = vmatprep.subr.bf16.mxu0 %v9327_v51  ;;  %6392 = vmatpush1.bf16.msra.mxu1 %v15912_v23  ;;  %v6122_v51 = vpack.c.bf16 %v5963_v42, %v5963_v42  ;;  %v15916_v23 = vld [vmem:[#allocation52_spill] sm:$0xff]  ;;  %v6317_v18 = vsel %vm619_vm3, %v6316_v25, %v6315_v8  ;;  %v6250_v40 = vrot.slane %v6228_v28, 2  ;;  %v6239_v32 = vunpack.c.l.b16 %v6143_v37  ;;  %v15918_v42 = vld [vmem:[#allocation53_spill] sm:$0xff] }
 0x33c   :  { %6393 = vmatprep.subr.bf16.mxu1 %v15913_v46  ;;  %v6247_v46 = vsel %vm619_vm3, %v6246_v31, %v6245_v39  ;;  %v6035_v36 = vrot.slane %v14207_v48, %v15909_v26  ;;  %v6272_v4 = vrot.slane %v6212_v12, 5  ;;  %v6134_v63 = vpack.c.bf16 %v6011_v22, %v6011_v22  ;;  %v15922_v26 = vld [vmem:[#allocation48_spill] sm:$0xff] }
 0x33d   :  { %v6249_v45 = vsel %vm622_vm4, %v6248_v44, %v6247_v46  ;;  %v6271_v33 = vsel %vm613_vm1, %v6270_v11, %v6269_v30  ;;  %v6319_v54 = vsel %vm622_vm4, %v6318_v41, %v6317_v18  ;;  %v6252_v31 = vrot.slane %v6234_v29, 1  ;;  %v15926_v22 = vld [vmem:[#allocation32_spill] sm:$0xff] }
 0x33e   :  { %6357 = vmatpush2.bf16.msra.mxu0 %v9328_v1  ;;  %v6128_v1 = vpack.c.bf16 %v5987_v55, %v5987_v55  ;;  %v6251_v34 = vsel %vm625_vm5, %v6250_v40, %v6249_v45  ;;  %v6322_v39 = vrot.slane %v6239_v32, 1  ;;  %v6140_v47 = vpack.c.bf16 %v6035_v36, %v6035_v36  ;;  %v9335_v18 = vld [vmem:[%s15267_s5 + $0x264] ss:$8 sps:$4 sm:$0xff]   ;;  %v9336_v40 = vld [vmem:[%s15267_s5 + $0x260] ss:$8 sps:$4 sm:$0xff]  }
 0x33f   :  { %6358 = vmatprep.subr.bf16.mxu0 %v9329_v13  ;;  %6394 = vmatpush2.bf16.msra.mxu1 %v15914_v20  ;;  %v6218_v13 = vunpack.c.l.b16 %v6122_v51  ;;  %v6320_v20 = vrot.slane %v6233_v50, 2  ;;  %v6273_v56 = vsel %vm616_vm2, %v6272_v4, %v6271_v33  ;;  %v6230_v28 = vunpack.c.l.b16 %v6134_v63  ;;  %v15924_v51 = vld [vmem:[#allocation44_spill] sm:$0xff] }
 0x340   :  { %6395 = vmatprep.subr.bf16.mxu1 %v15915_v15  ;;  %v15920_v15 = vld [vmem:[#allocation27_spill] sm:$0xff]  ;;  %v6224_v55 = vunpack.c.l.b16 %v6128_v1  ;;  %v6253_v37 = vsel %vm628_vm6, %v6252_v31, %v6251_v34  ;;  %v6236_v50 = vunpack.c.l.b16 %v6140_v47  ;;  %v15928_v33 = vmov 0   ;;  %v9341_v34 = vld [vmem:[%s15267_s5 + $0x234] ss:$8 sps:$4 sm:$0xff]   ;;  %v9342_v47 = vld [vmem:[%s15267_s5 + $0x230] ss:$8 sps:$4 sm:$0xff]  }
 0x341   :  { %v6321_v25 = vsel %vm625_vm5, %v6320_v20, %v6319_v54  ;;  %v6278_v46 = vrot.slane %v6230_v28, 2  ;;  %v14601_v45 = vld [vmem:[%s15270_s4 + $0x24] ss:$8 sps:$4 sm:$0xff]   ;;  %v14616_v63 = vld [vmem:[%s15270_s4 + $0x20] ss:$8 sps:$4 sm:$0xff]  }
 0x342   :  { %6359 = vmatpush2.bf16.msra.mxu0 %v9330_v16  ;;  %v6274_v16 = vrot.slane %v6218_v13, 4  ;;  %v6276_v8 = vrot.slane %v6224_v55, 3  ;;  %v6323_v12 = vsel %vm628_vm6, %v6322_v39, %v6321_v25  ;;  %v6280_v29 = vrot.slane %v6236_v50, 1  ;;  %v9339_v20 = vld [vmem:[%s15267_s5 + $0x244] ss:$8 sps:$4 sm:$0xff]  }
 0x343   :  { %6360 = vmatprep.subr.bf16.mxu0 %v9331_v0  ;;  %6396 = vmatpush2.bf16.msra.mxu1 %v15916_v23  ;;  %v15923_v0 = vld [vmem:[#allocation39_spill] sm:$0xff]  ;;  %v6329_v41 = vpack.c.b16 %v6323_v12, %v6323_v12  ;;  %v9345_v28 = vld [vmem:[%s15267_s5 + $0x214] ss:$8 sps:$4 sm:$0xff]  }
 0x344   :  { %6397 = vmatprep.subr.bf16.mxu1 %v15917_v2  ;;  %v15925_v23 = vld [vmem:[#allocation51_spill] sm:$0xff]  ;;  %v6275_v44 = vsel %vm619_vm3, %v6274_v16, %v6273_v56  ;;  %v6324_v2 = vpack.c.b16 %v6253_v37, %v6253_v37  ;;  %v14637_v16 = vld [vmem:[%s15270_s4 + $0x10] ss:$8 sps:$4 sm:$0xff]  }
 0x345   :  { %v6277_v11 = vsel %vm622_vm4, %v6276_v8, %v6275_v44  ;;  %v9340_v55 = vld [vmem:[%s15267_s5 + $0x240] ss:$8 sps:$4 sm:$0xff]   ;;  %v9343_v56 = vld [vmem:[%s15267_s5 + $0x224] ss:$8 sps:$4 sm:$0xff]   ;;  %v9346_v8 = vld [vmem:[%s15267_s5 + $0x210] ss:$8 sps:$4 sm:$0xff]  }
 0x346   :  { %6361 = vmatpush2.bf16.msra.mxu0 %v9332_v52  ;;  %v15927_v52 = vld [vmem:[#allocation9_spill] sm:$0xff]  ;;  %v14655_v25 = vld [vmem:[%s15270_s4] ss:$8 sps:$4 sm:$0xff]  }
 0x347   :  { %6362 = vmatprep.subr.bf16.mxu0 %v9333_v49  ;;  %6398 = vmatpush2.bf16.msra.mxu1 %v15918_v42  ;;  %v14595_v42 = vld [vmem:[%s15270_s4 + $0x30] ss:$8 sps:$4 sm:$0xff]   ;;  %v9348_v50 = vld [vmem:[%s15267_s5 + $0x200] ss:$8 sps:$4 sm:$0xff]  }
 0x348   :  { %6399 = vmatprep.subr.bf16.mxu1 %v15919_v7 }
 0x34a   :  { %6363 = vmatpush2.bf16.msra.mxu0 %v15920_v15  ;;  %v14623_v15 = vld [vmem:[%s15270_s4 + $0x14] ss:$8 sps:$4 sm:$0xff]  }
 0x34b   :  { %6364 = vmatprep.subr.bf16.mxu0 %v15921_v61  ;;  %6400 = vmatpush2.bf16.msra.mxu1 %v15922_v26  ;;  %v14643_v26 = vld [vmem:[%s15270_s4 + $0x4] ss:$8 sps:$4 sm:$0xff]  }
 0x34c   :  { %6401 = vmatprep.subr.bf16.mxu1 %v15923_v0  ;;  %v9344_v0 = vld [vmem:[%s15267_s5 + $0x220] ss:$8 sps:$4 sm:$0xff]  }
 0x34e   :  { %6365 = vmatpush2.bf16.msra.mxu0 %v15924_v51  ;;  %v15929_v51 = vld [vmem:[#allocation8_spill] sm:$0xff] }
 0x34f   :  { %6366 = vmatprep.subr.bf16.mxu0 %v15925_v23  ;;  %6402 = vmatpush2.bf16.msra.mxu1 %v14279_v5  ;;  %v6279_v5 = vsel %vm625_vm5, %v6278_v46, %v6277_v11  ;;  %v5899_v37 = vrot.slane %v14032_v21, %v15929_v51  ;;  %v9347_v23 = vld [vmem:[%s15267_s5 + $0x204] ss:$8 sps:$4 sm:$0xff]   ;;  %v5923_v44 = vrot.slane %v14059_v62, %v15929_v51  ;;  %v9349_v62 = vld [vmem:[%s15267_s5 + $0x2f4] ss:$8 sps:$4 sm:$0xff]  }
 0x350   :  { %6403 = vmatprep.subr.bf16.mxu1 %v14289_v3  ;;  %v9334_v3 = vld [vmem:[%s15267_s5 + $0x270] ss:$8 sps:$4 sm:$0xff]   ;;  %v5875_v21 = vrot.slane %v14070_v19, %v15929_v51  ;;  %v5971_v11 = vrot.slane %v14116_v6, %v15929_v51 }
 0x351   :  { %v6106_v12 = vpack.c.bf16 %v5899_v37, %v5899_v37  ;;  %v6112_v19 = vpack.c.bf16 %v5923_v44, %v5923_v44 }
 0x352   :  { %6367 = vmatpush2.bf16.msra.mxu0 %v15926_v22  ;;  %v6100_v46 = vpack.c.bf16 %v5875_v21, %v5875_v21  ;;  %v6124_v6 = vpack.c.bf16 %v5971_v11, %v5971_v11  ;;  %v9361_v21 = vld [vmem:[%s15267_s5 + $0x294] ss:$8 sps:$4 sm:$0xff]  }
 0x353   :  { %6418 = vmatprep.subr.bf16.mxu0 %v15927_v52  ;;  %6404 = vmatpush2.bf16.msra.mxu1 %v14304_v35  ;;  %v6281_v35 = vsel %vm628_vm6, %v6280_v29, %v6279_v5  ;;  %v6202_v22 = vunpack.c.l.b16 %v6106_v12  ;;  %v9351_v52 = vld [vmem:[%s15267_s5 + $0x2e4] ss:$8 sps:$4 sm:$0xff]   ;;  %v6208_v29 = vunpack.c.l.b16 %v6112_v19 }
 0x354   :  { %6405 = vmatprep.subr.bf16.mxu1 %v14312_v17  ;;  %v14582_v17 = vld [vmem:[%s15270_s4 + $0x34] ss:$8 sps:$4 sm:$0xff]   ;;  %v6326_v13 = vpack.c.b16 %v6281_v35, %v6281_v35  ;;  %v6196_v5 = vunpack.c.l.b16 %v6100_v46  ;;  %v9364_v46 = vld [vmem:[%s15267_s5 + $0x280] ss:$8 sps:$4 sm:$0xff]  }
 0x355   :  { %v5084_v1 = vpop.f32.mrf.mxu0  ;;  %6369 = vmatmul.mubr.bf16.vlgmr.msra.gmra.mxu0 %v6324_v2  ;;  %v5947_v2 = vrot.slane %v15906_v60, %v15929_v51  ;;  %v9353_v35 = vld [vmem:[%s15267_s5 + $0x2d4] ss:$8 sps:$4 sm:$0xff]  }
 0x356   :  { %6419 = vmatpush1.bf16.msra.mxu0 %v9334_v3  ;;  %6450 = vmatprep.mubr.bf16.mxu0 %v6329_v41  ;;  %v9350_v41 = vld [vmem:[%s15267_s5 + $0x2f0] ss:$8 sps:$4 sm:$0xff]   ;;  %v6296_v3 = vrot.slane %v6202_v22, 7 }
 0x357   :  { %v5086_v30 = vpop.f32.mrf.mxu0  ;;  %6420 = vmatprep.subr.bf16.mxu0 %v9335_v18  ;;  %6406 = vmatpush2.bf16.msra.mxu1 %v14328_v27  ;;  %v9337_v27 = vld [vmem:[%s15267_s5 + $0x254] ss:$8 sps:$4 sm:$0xff]   ;;  %v6118_v60 = vpack.c.bf16 %v5947_v2, %v5947_v2 }
 0x358   :  { %6407 = vmatprep.subr.bf16.mxu1 %v14335_v9  ;;  %v5085_v9 = vadd.f32 %v5084_v1, %v15902_v10  ;;  %v5087_v36 = vadd.f32 %v5086_v30, %v15903_v59  ;;  %v5995_v1 = vrot.slane %v14140_v53, %v15929_v51  ;;  %v9352_v30 = vld [vmem:[%s15267_s5 + $0x2e0] ss:$8 sps:$4 sm:$0xff]   ;;  %v6019_v53 = vrot.slane %v14193_v38, %v15929_v51  ;;  %v9355_v38 = vld [vmem:[%s15267_s5 + $0x2c4] ss:$8 sps:$4 sm:$0xff]  }
 0x359   :  { %v5088_v49 = vpop.f32.mrf.mxu0  ;;  %v6214_v18 = vunpack.c.l.b16 %v6118_v60 }
 0x35a   :  { %6421 = vmatpush1.bf16.msra.mxu0 %v9336_v40  ;;  %v6298_v49 = vrot.slane %v6208_v29, 6  ;;  %v6130_v40 = vpack.c.bf16 %v5995_v1, %v5995_v1 }
 0x35b   :  { %6422 = vmatprep.subr.bf16.mxu0 %v9337_v27  ;;  %v5089_v32 = vpop.f32.mrf.mxu0  ;;  %6408 = vmatpush2.bf16.msra.mxu1 %v14346_v24  ;;  %v9338_v24 = vld [vmem:[%s15267_s5 + $0x250] ss:$8 sps:$4 sm:$0xff]   ;;  %v6220_v27 = vunpack.c.l.b16 %v6124_v6 }
 0x35c   :  { %6601 = vmatprep.subr.bf16.mxu1 %v14582_v17  ;;  %v9354_v32 = vld [vmem:[%s15267_s5 + $0x2d0] ss:$8 sps:$4 sm:$0xff]  }
 0x35e   :  { %6423 = vmatpush1.bf16.msra.mxu0 %v9338_v24  ;;  %v5125_v4 = vpop.f32.mrf.mxu1  ;;  %6410 = vmatmul.mubr.bf16.vlgmr.msra.gmra.mxu1 %v6326_v13  ;;  %v6297_v13 = vsel %vm610_vm0, %v6296_v3, %v6196_v5  ;;  %v6136_v24 = vpack.c.bf16 %v6019_v53, %v6019_v53 }
 0x35f   :  { %6424 = vmatprep.subr.bf16.mxu0 %v9339_v20  ;;  %v14610_v7 = vadd.f32 %v5125_v4, %v5085_v9  ;;  %6602 = vmatpush1.bf16.msra.mxu1 %v14595_v42  ;;  %v6043_v9 = vrot.slane %v14207_v48, %v15929_v51  ;;  %v6299_v4 = vsel %vm613_vm1, %v6298_v49, %v6297_v13  ;;  %v6226_v20 = vunpack.c.l.b16 %v6130_v40  ;;  %v9357_v48 = vld [vmem:[%s15267_s5 + $0x2b4] ss:$8 sps:$4 sm:$0xff]   ;;  %v9359_v51 = vld [vmem:[%s15267_s5 + $0x2a4] ss:$8 sps:$4 sm:$0xff]  }
 0x360   :  { %6625 = vmatprep.mubr.bf16.mxu1 %v15928_v33  ;;  %v5127_v54 = vpop.f32.mrf.mxu1  ;;  %6603 = vmatprep.subr.bf16.mxu1 %v14601_v45 }
 0x361   :  { %v14625_v31 = vadd.f32 %v5127_v54, %v5087_v36  ;;  %v6300_v36 = vrot.slane %v6214_v18, 5  ;;  %v6302_v54 = vrot.slane %v6220_v27, 4 }
 0x362   :  { %6425 = vmatpush1.bf16.msra.mxu0 %v9340_v55  ;;  %v5129_v61 = vpop.f32.mrf.mxu1  ;;  %v9356_v55 = vld [vmem:[%s15267_s5 + $0x2c0] ss:$8 sps:$4 sm:$0xff]  }
 0x363   :  { %6426 = vmatprep.subr.bf16.mxu0 %v9341_v34  ;;  %6604 = vmatpush1.bf16.msra.mxu1 %v14616_v63  ;;  %v6142_v61 = vpack.c.bf16 %v6043_v9, %v6043_v9  ;;  %v6301_v34 = vsel %vm616_vm2, %v6300_v36, %v6299_v4 }
 0x364   :  { %v5130_v39 = vpop.f32.mrf.mxu1  ;;  %6605 = vmatprep.subr.bf16.mxu1 %v14623_v15 }
 0x365   :  { %v6232_v39 = vunpack.c.l.b16 %v6136_v24 }
 0x366   :  { %6427 = vmatpush1.bf16.msra.mxu0 %v9342_v47  ;;  %v6304_v47 = vrot.slane %v6226_v20, 3 }
 0x367   :  { %6428 = vmatprep.subr.bf16.mxu0 %v9343_v56  ;;  %6606 = vmatpush1.bf16.msra.mxu1 %v14637_v16  ;;  %v6303_v56 = vsel %vm619_vm3, %v6302_v54, %v6301_v34  ;;  %v6306_v37 = vrot.slane %v6232_v39, 2 }
 0x368   :  { %6607 = vmatprep.subr.bf16.mxu1 %v14643_v26 }
 0x36a   :  { %6429 = vmatpush1.bf16.msra.mxu0 %v9344_v0  ;;  %v9358_v0 = vld [vmem:[%s15267_s5 + $0x2b0] ss:$8 sps:$4 sm:$0xff]  }
 0x36b   :  { %6430 = vmatprep.subr.bf16.mxu0 %v9345_v28  ;;  %6608 = vmatpush1.bf16.msra.mxu1 %v14655_v25  ;;  %v6238_v28 = vunpack.c.l.b16 %v6142_v61 }
 0x36c   :  { %6678 = vmatprep.subr.bf16.mxu1 %v14582_v17 }
 0x36d   :  { %v6308_v44 = vrot.slane %v6238_v28, 1 }
 0x36e   :  { %6431 = vmatpush1.bf16.msra.mxu0 %v9346_v8  ;;  %6626 = vmatmul.mubr.bf16.vlgmr.msra.gmra.mxu1 %v15928_v33  ;;  %v6305_v8 = vsel %vm622_vm4, %v6304_v47, %v6303_v56  ;;  %v6459_v47 = vld [vmem:[%s15272_s2] sm:$0x3]  ;;  %s9368_s2 = smov 64  }
 0x36f   :  { %6432 = vmatprep.subr.bf16.mxu0 %v9347_v23  ;;  %6679 = vmatpush1.bf16.msra.mxu1 %v14595_v42  ;;  %v9360_v23 = vld [vmem:[%s15267_s5 + $0x2a0] ss:$8 sps:$4 sm:$0xff]   ;;  %v6307_v12 = vsel %vm625_vm5, %v6306_v37, %v6305_v8  ;;  %v14785_v37 = vrot.slane %v6459_v47, %v15904_v57 }
 0x370   :  { %6702 = vmatprep.mubr.bf16.mxu1 %v15928_v33  ;;  %6680 = vmatprep.subr.bf16.mxu1 %v14601_v45  ;;  %v6309_v2 = vsel %vm628_vm6, %v6308_v44, %v6307_v12 }
 0x371   :  { %v6328_v19 = vpack.c.b16 %v6309_v2, %v6309_v2 }
 0x372   :  { %6433 = vmatpush1.bf16.msra.mxu0 %v9348_v50  ;;  %v9362_v50 = vld [vmem:[%s15267_s5 + $0x290] ss:$8 sps:$4 sm:$0xff]  }
 0x373   :  { %6434 = vmatprep.subr.bf16.mxu0 %v9349_v62  ;;  %6681 = vmatpush1.bf16.msra.mxu1 %v14616_v63  ;;  %v9363_v62 = vld [vmem:[%s15267_s5 + $0x284] ss:$8 sps:$4 sm:$0xff]  }
 0x374   :  { %6682 = vmatprep.subr.bf16.mxu1 %v14623_v15 }
 0x376   :  { %6435 = vmatpush2.bf16.msra.mxu0 %v9350_v41 }
 0x377   :  { %6436 = vmatprep.subr.bf16.mxu0 %v9351_v52  ;;  %6683 = vmatpush1.bf16.msra.mxu1 %v14637_v16 }
 0x378   :  { %6684 = vmatprep.subr.bf16.mxu1 %v14643_v26 }
 0x37a   :  { %6437 = vmatpush2.bf16.msra.mxu0 %v9352_v30 }
 0x37b   :  { %6438 = vmatprep.subr.bf16.mxu0 %v9353_v35  ;;  %6685 = vmatpush1.bf16.msra.mxu1 %v14655_v25 }
 0x37c   :  { %6755 = vmatprep.subr.bf16.mxu1 %v14582_v17 }
 0x37e   :  { %6439 = vmatpush2.bf16.msra.mxu0 %v9354_v32 }
 0x37f   :  { %6440 = vmatprep.subr.bf16.mxu0 %v9355_v38 }
 0x382   :  { %6441 = vmatpush2.bf16.msra.mxu0 %v9356_v55 }
 0x383   :  { %6442 = vmatprep.subr.bf16.mxu0 %v9357_v48 }
 0x386   :  { %6443 = vmatpush2.bf16.msra.mxu0 %v9358_v0  ;;  %v15930_v0 = vlaneseq }
 0x387   :  { %6444 = vmatprep.subr.bf16.mxu0 %v9359_v51 }
 0x388   :  { %v160_v28 = vand.u32 127, %v15930_v0  ;;  %v9369_v0 = vmov 1  }
 0x389   :  { %8608 = vset.pattern.permute.xlu1 %v9369_v0 }
 0x38a   :  { %6445 = vmatpush2.bf16.msra.mxu0 %v9360_v23 }
 0x38b   :  { %6446 = vmatprep.subr.bf16.mxu0 %v9361_v21  ;;  %v161_v21 = vadd.s32 128, %v160_v28 }
 0x38c   :  { %v6465_v23 = vpop.permute.xlu0 %6464 }
 0x38d   :  { %v6478_v12 = vmul.f32 %v14785_v37, %v6465_v23  ;;  %vm165_vm7 = vcmp.lt.s32.totalorder %v161_v21, 192 }
 0x38e   :  { %6447 = vmatpush2.bf16.msra.mxu0 %v9362_v50 }
 0x38f   :  { %6448 = vmatprep.subr.bf16.mxu0 %v9363_v62 }
 0x392   :  { %6449 = vmatpush2.bf16.msra.mxu0 %v9364_v46  ;;  %v9367_v46 = vmov 0.0  }
 0x393   :  { %6909 = vmatprep.subr.bf16.mxu0 %v14582_v17 }
 0x395   :  { %v5166_v22 = vpop.f32.mrf.mxu0  ;;  %6451 = vmatmul.mubr.bf16.vlgmr.msra.gmra.mxu0 %v6328_v19 }
 0x396   :  { %v14758_v11 = vadd.f32 %v5166_v22, %v14610_v7  ;;  %6910 = vmatpush1.bf16.msra.mxu0 %v14595_v42  ;;  %6933 = vmatprep.mubr.bf16.mxu0 %v15928_v33  ;;  %v14803_v22 = vsel %vm165_vm7, 1.0, %v9367_v46 }
 0x397   :  { %v5168_v41 = vpop.f32.mrf.mxu0  ;;  %6911 = vmatprep.subr.bf16.mxu0 %v14601_v45 }
 0x398   :  { %v14764_v60 = vadd.f32 %v5168_v41, %v14625_v31 }
 0x399   :  { %v5170_v52 = vpop.f32.mrf.mxu0 }
 0x39a   :  { %6912 = vmatpush1.bf16.msra.mxu0 %v14616_v63 }
 0x39b   :  { %v5171_v29 = vpop.f32.mrf.mxu0  ;;  %6913 = vmatprep.subr.bf16.mxu0 %v14623_v15 }
 0x39e   :  { %6914 = vmatpush1.bf16.msra.mxu0 %v14637_v16  ;;  %v5727_v7 = vpop.f32.mrf.mxu1 }
 0x39f   :  { %6915 = vmatprep.subr.bf16.mxu0 %v14643_v26  ;;  %v5728_v31 = vadd.f32 %v5727_v7, %v15902_v10  ;;  %v14807_v7 = vadd.f32 1.0, %v14803_v22 }
 0x3a0   :  { %v5729_v1 = vpop.f32.mrf.mxu1 }
 0x3a1   :  { %v5730_v30 = vadd.f32 %v5729_v1, %v15903_v59 }
 0x3a2   :  { %6916 = vmatpush1.bf16.msra.mxu0 %v14655_v25  ;;  %v5731_v5 = vpop.f32.mrf.mxu1 }
 0x3a3   :  { %7063 = vmatprep.subr.bf16.mxu0 %v14582_v17 }
 0x3a4   :  { %v5732_v3 = vpop.f32.mrf.mxu1 }
 0x3d5   :  { %v5768_v6 = vpop.f32.mrf.mxu0 }
 0x3d6   :  { %v5769_v18 = vadd.f32 %v5768_v6, %v5728_v31 }
 0x3d7   :  { %v5770_v35 = vpop.f32.mrf.mxu0 }
 0x3d8   :  { %v5771_v53 = vadd.f32 %v5770_v35, %v5730_v30 }
 0x3d9   :  { %v5772_v49 = vpop.f32.mrf.mxu0 }
 0x3db   :  { %v5773_v40 = vpop.f32.mrf.mxu0 }
 0x3de   :  { %v5809_v13 = vpop.f32.mrf.mxu1 }
 0x3df   :  { %v14774_v27 = vadd.f32 %v5809_v13, %v5769_v18 }
 0x3e0   :  { %v5811_v32 = vpop.f32.mrf.mxu1 }
 0x3e1   :  { %v14776_v9 = vadd.f32 %v5811_v32, %v5771_v53 }
 0x3e2   :  { %v5813_v36 = vpop.f32.mrf.mxu1 }
 0x3e4   :  { %v5814_v38 = vpop.f32.mrf.mxu1 }
 0x415   :  { %v6370_v24 = vpop.f32.mrf.mxu0 }
 0x416   :  { %v6371_v55 = vadd.f32 %v6370_v24, %v15902_v10  ;;  %v6460_v10 = vld [vmem:[%s15273_s3] sm:$0x3] }
 0x417   :  { %v6372_v4 = vpop.f32.mrf.mxu0  ;;  %v14795_v50 = vrot.slane %v6460_v10, %v15904_v57 }
 0x418   :  { %v6373_v61 = vadd.f32 %v6372_v4, %v15903_v59  ;;  %v15931_v59 = vld [vmem:[#allocation3_spill] sm:$0xff] }
 0x419   :  { %v6374_v20 = vpop.f32.mrf.mxu0  ;;  %v14791_v44 = vrot.slane %v6459_v47, %v15931_v59  ;;  %v14799_v62 = vrot.slane %v6460_v10, %v15931_v59  ;;  %v6491_v19 = vadd.f32 %v14795_v50, %v6478_v12 }
 0x41b   :  { %v6375_v54 = vpop.f32.mrf.mxu0  ;;  %v6479_v2 = vmul.f32 %v14791_v44, %v6465_v23 }
 0x41d   :  { %v6492_v41 = vadd.f32 %v14799_v62, %v6479_v2 }
 0x41e   :  { %v6411_v34 = vpop.f32.mrf.mxu1 }
 0x41f   :  { %v6412_v48 = vadd.f32 %v6411_v34, %v6371_v55 }
 0x420   :  { %v6413_v39 = vpop.f32.mrf.mxu1 }
 0x421   :  { %v6414_v56 = vadd.f32 %v6413_v39, %v6373_v61 }
 0x422   :  { %v6415_v51 = vpop.f32.mrf.mxu1 }
 0x424   :  { %v6416_v8 = vpop.f32.mrf.mxu1 }
 0x42e   :  { %v6627_v52 = vpop.f32.mrf.mxu1 }
 0x42f   :  { %v6634_v29 = vadd.f32 %v6627_v52, %v6491_v19 }
 0x430   :  { %v6629_v57 = vpop.f32.mrf.mxu1 }
 0x431   :  { %v6635_v1 = vadd.f32 %v6629_v57, %v6492_v41  ;;  %v8441_v5 = vmul.f32 -1.442695, %v6634_v29 }
 0x432   :  { %v6631_v3 = vpop.f32.mrf.mxu1 }
 0x433   :  { %v6637_v31 = vmul.f32 %v6635_v1, %v14807_v7  ;;  %8791 = vpow2.f32 %v8441_v5 }
 0x434   :  { %v6632_v6 = vpop.f32.mrf.mxu1 }
 0x435   :  { %v8442_v30 = vmul.f32 -1.442695, %v6637_v31 }
 0x437   :  { %8793 = vpow2.f32 %v8442_v30 }
 0x440   :  { %v8792_v18 = vpop.eup %8791 }
 0x441   :  { %v6644_v49 = vadd.f32 1.0, %v8792_v18 }
 0x444   :  { %v8794_v35 = vpop.eup %8793 }
 0x445   :  { %v6645_v53 = vadd.f32 1.0, %v8794_v35 }
 0x447   :  { %8795 = vrcp.f32 %v6645_v53 }
 0x448   :  { %8797 = vrcp.f32 %v6644_v49 }
 0x454   :  { %v8796_v40 = vpop.eup %8795 }
 0x455   :  { %v6452_v13 = vpop.f32.mrf.mxu0  ;;  %v6651_v32 = vmul.f32 %v8796_v40, %v14807_v7  ;;  %v8798_v20 = vpop.eup %8797 }
 0x456   :  { %v14811_v36 = vadd.f32 %v6452_v13, %v6412_v48  ;;  %v6654_v34 = vmul.f32 0.0, %v8798_v20 }
 0x457   :  { %v6454_v38 = vpop.f32.mrf.mxu0  ;;  %v6653_v24 = vsub.f32 %v6651_v32, %v14803_v22 }
 0x458   :  { %v14814_v4 = vadd.f32 %v6454_v38, %v6414_v56 }
 0x459   :  { %v6456_v54 = vpop.f32.mrf.mxu0  ;;  %v6655_v55 = vmul.f32 %v8798_v20, %v6653_v24 }
 0x45b   :  { %v6457_v61 = vpop.f32.mrf.mxu0  ;;  %6657 = vrot.lane.b32.xlu0 %v6655_v55, %s9368_s2 }
 0x4cd   :  { %v6658_v39 = vpop.permute.xlu0 %6657 }
 0x4ce   :  { %v6660_v47 = vadd.f32 %v6658_v39, %v6654_v34 }
 0x4d0   :  { %8799 = vtanh.f32 %v6660_v47 }
 0x4dd   :  { %v8800_v48 = vpop.eup %8799 }
 0x4de   :  { %v6662_v28 = vmul.f32 %v8800_v48, %v6653_v24  ;;  %v9370_v24 = vmov 2  }
 0x4df   :  { %8609 = vset.pattern.permute.xlu0 %v9370_v24 }
 0x4e0   :  { %v6663_v51 = vpack.c.bf16 %v6662_v28, %v6662_v28 }
 0x4e2   :  { %6665 = vrot.lane.b32.xlu1 %v6663_v51, %s9368_s2 }
 0x4e6   :  { %6494 = vperm.xlu1 %8608, %v14406_v14  }
 0x554   :  { %v6666_v56 = vpop.permute.xlu1 %6665 }
 0x555   :  { %8443 = vmatmul.mubr.msk.bf16.vlgmr.msra.gmra.mxu1 %vm6589_vm8, %v6666_v56 }
 0x556   :  { %6756 = vmatpush1.bf16.msra.mxu1 %v14595_v42  ;;  %6779 = vmatprep.mubr.bf16.mxu1 %v15928_v33 }
 0x557   :  { %6757 = vmatprep.subr.bf16.mxu1 %v14601_v45 }
 0x55a   :  { %6758 = vmatpush1.bf16.msra.mxu1 %v14616_v63 }
 0x55b   :  { %6759 = vmatprep.subr.bf16.mxu1 %v14623_v15 }
 0x55e   :  { %6760 = vmatpush1.bf16.msra.mxu1 %v14637_v16 }
 0x55f   :  { %6761 = vmatprep.subr.bf16.mxu1 %v14643_v26 }
 0x561   :  { %v6495_v8 = vpop.permute.xlu1 %6494 }
 0x562   :  { %6762 = vmatpush1.bf16.msra.mxu1 %v14655_v25  ;;  %v6497_v23 = vmul.f32 %v6495_v8, %v14785_v37  ;;  %v6498_v10 = vmul.f32 %v6495_v8, %v14791_v44 }
 0x563   :  { %6832 = vmatprep.subr.bf16.mxu1 %v14582_v17 }
 0x564   :  { %v6499_v59 = vadd.f32 %v6497_v23, %v14795_v50  ;;  %v6500_v21 = vadd.f32 %v6498_v10, %v14799_v62 }
 0x615   :  { %v6704_v12 = vpop.f32.mrf.mxu1 }
 0x616   :  { %v6711_v2 = vadd.f32 %v6704_v12, %v6499_v59 }
 0x617   :  { %v6706_v19 = vpop.f32.mrf.mxu1 }
 0x618   :  { %v6712_v41 = vadd.f32 %v6706_v19, %v6500_v21  ;;  %v8444_v52 = vmul.f32 -1.442695, %v6711_v2 }
 0x619   :  { %v6708_v29 = vpop.f32.mrf.mxu1 }
 0x61a   :  { %v6714_v57 = vmul.f32 %v6712_v41, %v14807_v7  ;;  %8801 = vpow2.f32 %v8444_v52 }
 0x61b   :  { %v6709_v1 = vpop.f32.mrf.mxu1 }
 0x61c   :  { %v8445_v5 = vmul.f32 -1.442695, %v6714_v57 }
 0x61e   :  { %8803 = vpow2.f32 %v8445_v5 }
 0x627   :  { %v8802_v3 = vpop.eup %8801 }
 0x628   :  { %v6721_v30 = vadd.f32 1.0, %v8802_v3 }
 0x62b   :  { %v8804_v31 = vpop.eup %8803 }
 0x62c   :  { %v6722_v6 = vadd.f32 1.0, %v8804_v31 }
 0x62e   :  { %8805 = vrcp.f32 %v6722_v6 }
 0x62f   :  { %8807 = vrcp.f32 %v6721_v30 }
 0x63b   :  { %v8806_v18 = vpop.eup %8805 }
 0x63c   :  { %v6728_v35 = vmul.f32 %v8806_v18, %v14807_v7  ;;  %v8808_v49 = vpop.eup %8807  ;;  %v9371_v18 = vmov 3  }
 0x63d   :  { %v6731_v13 = vmul.f32 %v8808_v49, %v6660_v47 }
 0x63e   :  { %v6730_v53 = vsub.f32 %v6728_v35, %v14803_v22 }
 0x640   :  { %v6732_v40 = vmul.f32 %v8808_v49, %v6730_v53 }
 0x642   :  { %6734 = vrot.lane.b32.xlu0 %v6732_v40, %s9368_s2 }
 0x646   :  { %6502 = vperm.xlu0 %8609, %v14406_v14  }
 0x64a   :  { %8610 = vset.pattern.permute.xlu0 %v9371_v18 }
 0x64b   :  { %6510 = vperm.xlu0 %8610, %v14406_v14  }
 0x6b4   :  { %v6735_v32 = vpop.permute.xlu0 %6734 }
 0x6b5   :  { %v6737_v38 = vadd.f32 %v6735_v32, %v6731_v13 }
 0x6b7   :  { %8809 = vtanh.f32 %v6737_v38 }
 0x6c1   :  { %v6503_v34 = vpop.permute.xlu0 %6502 }
 0x6c2   :  { %v6505_v39 = vmul.f32 %v6503_v34, %v14785_v37  ;;  %v6506_v47 = vmul.f32 %v6503_v34, %v14791_v44 }
 0x6c4   :  { %v8810_v20 = vpop.eup %8809  ;;  %v6507_v0 = vadd.f32 %v6505_v39, %v14795_v50  ;;  %v6508_v48 = vadd.f32 %v6506_v47, %v14799_v62 }
 0x6c5   :  { %v6739_v54 = vmul.f32 %v8810_v20, %v6730_v53 }
 0x6c6   :  { %v6511_v14 = vpop.permute.xlu0 %6510 }
 0x6c7   :  { %v6740_v55 = vpack.c.bf16 %v6739_v54, %v6739_v54  ;;  %v6513_v13 = vmul.f32 %v6511_v14, %v14785_v37  ;;  %v6514_v32 = vmul.f32 %v6511_v14, %v14791_v44 }
 0x6c9   :  { %6742 = vrot.lane.b32.xlu1 %v6740_v55, %s9368_s2  ;;  %v6516_v24 = vadd.f32 %v6514_v32, %v14799_v62 }
 0x73b   :  { %v6743_v61 = vpop.permute.xlu1 %6742 }
 0x73c   :  { %8446 = vmatmul.mubr.msk.bf16.vlgmr.msra.gmra.mxu1 %vm6589_vm8, %v6743_v61 }
 0x73d   :  { %6833 = vmatpush1.bf16.msra.mxu1 %v14595_v42  ;;  %6856 = vmatprep.mubr.bf16.mxu1 %v15928_v33 }
 0x73e   :  { %6834 = vmatprep.subr.bf16.mxu1 %v14601_v45 }
 0x741   :  { %6835 = vmatpush1.bf16.msra.mxu1 %v14616_v63 }
 0x742   :  { %6836 = vmatprep.subr.bf16.mxu1 %v14623_v15 }
 0x745   :  { %6837 = vmatpush1.bf16.msra.mxu1 %v14637_v16 }
 0x746   :  { %6838 = vmatprep.subr.bf16.mxu1 %v14643_v26 }
 0x749   :  { %6839 = vmatpush1.bf16.msra.mxu1 %v14655_v25 }
 0x74a   :  { %6986 = vmatprep.subr.bf16.mxu1 %v14582_v17 }
 0x7fc   :  { %v6781_v28 = vpop.f32.mrf.mxu1 }
 0x7fd   :  { %v6788_v51 = vadd.f32 %v6781_v28, %v6507_v0 }
 0x7fe   :  { %v6783_v56 = vpop.f32.mrf.mxu1 }
 0x7ff   :  { %v6789_v8 = vadd.f32 %v6783_v56, %v6508_v48  ;;  %v8447_v23 = vmul.f32 -1.442695, %v6788_v51 }
 0x800   :  { %v6785_v10 = vpop.f32.mrf.mxu1 }
 0x801   :  { %v6791_v59 = vmul.f32 %v6789_v8, %v14807_v7  ;;  %8811 = vpow2.f32 %v8447_v23 }
 0x802   :  { %v6786_v21 = vpop.f32.mrf.mxu1 }
 0x803   :  { %v8448_v12 = vmul.f32 -1.442695, %v6791_v59 }
 0x805   :  { %8813 = vpow2.f32 %v8448_v12 }
 0x80e   :  { %v8812_v2 = vpop.eup %8811 }
 0x80f   :  { %v6798_v52 = vadd.f32 1.0, %v8812_v2 }
 0x812   :  { %v8814_v19 = vpop.eup %8813 }
 0x813   :  { %v6799_v41 = vadd.f32 1.0, %v8814_v19 }
 0x815   :  { %8815 = vrcp.f32 %v6799_v41  ;;  %v9372_v41 = vmov 4  }
 0x816   :  { %8817 = vrcp.f32 %v6798_v52  ;;  %8611 = vset.pattern.permute.xlu0 %v9372_v41  ;;  %v14880_v52 = vld [vmem:[%s15271_s0] sm:$0xff] }
 0x817   :  { %6518 = vperm.xlu0 %8611, %v14880_v52  }
 0x822   :  { %v8816_v29 = vpop.eup %8815 }
 0x823   :  { %v6805_v57 = vmul.f32 %v8816_v29, %v14807_v7  ;;  %v8818_v5 = vpop.eup %8817 }
 0x824   :  { %v6808_v31 = vmul.f32 %v8818_v5, %v6737_v38  ;;  %v6515_v38 = vadd.f32 %v6513_v13, %v14795_v50 }
 0x825   :  { %v6807_v1 = vsub.f32 %v6805_v57, %v14803_v22 }
 0x827   :  { %v6809_v3 = vmul.f32 %v8818_v5, %v6807_v1 }
 0x829   :  { %6811 = vrot.lane.b32.xlu1 %v6809_v3, %s9368_s2 }
 0x892   :  { %v6519_v3 = vpop.permute.xlu0 %6518 }
 0x89b   :  { %v6812_v6 = vpop.permute.xlu1 %6811 }
 0x89c   :  { %v6814_v30 = vadd.f32 %v6812_v6, %v6808_v31  ;;  %v6521_v31 = vmul.f32 %v6519_v3, %v14785_v37  ;;  %v6522_v6 = vmul.f32 %v6519_v3, %v14791_v44 }
 0x89e   :  { %8819 = vtanh.f32 %v6814_v30  ;;  %v6524_v18 = vadd.f32 %v6522_v6, %v14799_v62 }
 0x8ab   :  { %v8820_v35 = vpop.eup %8819 }
 0x8ac   :  { %v6816_v53 = vmul.f32 %v8820_v35, %v6807_v1 }
 0x8ae   :  { %v6817_v49 = vpack.c.bf16 %v6816_v53, %v6816_v53 }
 0x8b0   :  { %6819 = vrot.lane.b32.xlu1 %v6817_v49, %s9368_s2 }
 0x922   :  { %v6820_v40 = vpop.permute.xlu1 %6819 }
 0x923   :  { %8449 = vmatmul.mubr.msk.bf16.vlgmr.msra.gmra.mxu1 %vm6589_vm8, %v6820_v40 }
 0x924   :  { %6987 = vmatpush1.bf16.msra.mxu1 %v14595_v42  ;;  %7010 = vmatprep.mubr.bf16.mxu1 %v15928_v33 }
 0x925   :  { %6988 = vmatprep.subr.bf16.mxu1 %v14601_v45 }
 0x928   :  { %6989 = vmatpush1.bf16.msra.mxu1 %v14616_v63 }
 0x929   :  { %6990 = vmatprep.subr.bf16.mxu1 %v14623_v15 }
 0x92c   :  { %6991 = vmatpush1.bf16.msra.mxu1 %v14637_v16 }
 0x92d   :  { %6992 = vmatprep.subr.bf16.mxu1 %v14643_v26 }
 0x930   :  { %6993 = vmatpush1.bf16.msra.mxu1 %v14655_v25 }
 0x931   :  { %7140 = vmatprep.subr.bf16.mxu1 %v14582_v17 }
 0x9e3   :  { %v6858_v20 = vpop.f32.mrf.mxu1 }
 0x9e4   :  { %v6865_v54 = vadd.f32 %v6858_v20, %v6515_v38 }
 0x9e5   :  { %v6860_v55 = vpop.f32.mrf.mxu1 }
 0x9e6   :  { %v6866_v61 = vadd.f32 %v6860_v55, %v6516_v24  ;;  %v8450_v34 = vmul.f32 -1.442695, %v6865_v54 }
 0x9e7   :  { %v6862_v39 = vpop.f32.mrf.mxu1 }
 0x9e8   :  { %v6868_v47 = vmul.f32 %v6866_v61, %v14807_v7  ;;  %8821 = vpow2.f32 %v8450_v34 }
 0x9e9   :  { %v6863_v0 = vpop.f32.mrf.mxu1 }
 0x9ea   :  { %v8451_v48 = vmul.f32 -1.442695, %v6868_v47 }
 0x9ec   :  { %8823 = vpow2.f32 %v8451_v48 }
 0x9f5   :  { %v8822_v17 = vpop.eup %8821 }
 0x9f6   :  { %v6875_v56 = vadd.f32 1.0, %v8822_v17 }
 0x9f9   :  { %v8824_v28 = vpop.eup %8823 }
 0x9fa   :  { %v6876_v51 = vadd.f32 1.0, %v8824_v28 }
 0x9fc   :  { %8825 = vrcp.f32 %v6876_v51 }
 0x9fd   :  { %8827 = vrcp.f32 %v6875_v56  ;;  %v9373_v56 = vmov 5  }
 0x9fe   :  { %8612 = vset.pattern.permute.xlu0 %v9373_v56 }
 0x9ff   :  { %6526 = vperm.xlu0 %8612, %v14880_v52  }
 0xa09   :  { %v8826_v8 = vpop.eup %8825 }
 0xa0a   :  { %v6882_v23 = vmul.f32 %v8826_v8, %v14807_v7  ;;  %v8828_v59 = vpop.eup %8827 }
 0xa0b   :  { %v6885_v12 = vmul.f32 %v8828_v59, %v6814_v30  ;;  %v6523_v30 = vadd.f32 %v6521_v31, %v14795_v50 }
 0xa0c   :  { %v6884_v10 = vsub.f32 %v6882_v23, %v14803_v22 }
 0xa0e   :  { %v6886_v21 = vmul.f32 %v8828_v59, %v6884_v10 }
 0xa10   :  { %6888 = vrot.lane.b32.xlu1 %v6886_v21, %s9368_s2 }
 0xa7a   :  { %v6527_v21 = vpop.permute.xlu0 %6526 }
 0xa82   :  { %v6889_v2 = vpop.permute.xlu1 %6888 }
 0xa83   :  { %v6891_v19 = vadd.f32 %v6889_v2, %v6885_v12  ;;  %v6529_v12 = vmul.f32 %v6527_v21, %v14785_v37  ;;  %v6530_v2 = vmul.f32 %v6527_v21, %v14791_v44 }
 0xa85   :  { %8829 = vtanh.f32 %v6891_v19 }
 0xa92   :  { %v8830_v29 = vpop.eup %8829 }
 0xa93   :  { %v6893_v57 = vmul.f32 %v8830_v29, %v6884_v10 }
 0xa95   :  { %v6894_v1 = vpack.c.bf16 %v6893_v57, %v6893_v57 }
 0xa97   :  { %6896 = vrot.lane.b32.xlu1 %v6894_v1, %s9368_s2 }
 0xb09   :  { %v6897_v5 = vpop.permute.xlu1 %6896 }
 0xb0a   :  { %8452 = vmatmul.mubr.msk.bf16.vlgmr.msra.gmra.mxu0 %vm6589_vm8, %v6897_v5 }
 0xb0b   :  { %7064 = vmatpush1.bf16.msra.mxu0 %v14595_v42  ;;  %7087 = vmatprep.mubr.bf16.mxu0 %v15928_v33 }
 0xb0c   :  { %7065 = vmatprep.subr.bf16.mxu0 %v14601_v45 }
 0xb0f   :  { %7066 = vmatpush1.bf16.msra.mxu0 %v14616_v63 }
 0xb10   :  { %7067 = vmatprep.subr.bf16.mxu0 %v14623_v15 }
 0xb13   :  { %7068 = vmatpush1.bf16.msra.mxu0 %v14637_v16 }
 0xb14   :  { %7069 = vmatprep.subr.bf16.mxu0 %v14643_v26 }
 0xb17   :  { %7070 = vmatpush1.bf16.msra.mxu0 %v14655_v25 }
 0xbca   :  { %v6935_v35 = vpop.f32.mrf.mxu0 }
 0xbcb   :  { %v6942_v53 = vadd.f32 %v6935_v35, %v6523_v30 }
 0xbcc   :  { %v6937_v49 = vpop.f32.mrf.mxu0 }
 0xbcd   :  { %v6943_v40 = vadd.f32 %v6937_v49, %v6524_v18  ;;  %v8453_v14 = vmul.f32 -1.442695, %v6942_v53  ;;  %v14923_v49 = vld [vmem:[%s15274_s7 + $0x34] ss:$8 sps:$4 sm:$0xff]  }
 0xbce   :  { %v6939_v13 = vpop.f32.mrf.mxu0  ;;  %7250 = vmatprep.subr.bf16.mxu0 %v14923_v49 }
 0xbcf   :  { %v6945_v32 = vmul.f32 %v6943_v40, %v14807_v7  ;;  %8831 = vpow2.f32 %v8453_v14 }
 0xbd0   :  { %v6940_v38 = vpop.f32.mrf.mxu0 }
 0xbd1   :  { %v8454_v24 = vmul.f32 -1.442695, %v6945_v32 }
 0xbd3   :  { %8833 = vpow2.f32 %v8454_v24 }
 0xbdc   :  { %v8832_v20 = vpop.eup %8831 }
 0xbdd   :  { %v6952_v61 = vadd.f32 1.0, %v8832_v20  ;;  %v9374_v20 = vmov 6  }
 0xbde   :  { %8613 = vset.pattern.permute.xlu0 %v9374_v20 }
 0xbdf   :  { %6534 = vperm.xlu0 %8613, %v14880_v52  }
 0xbe0   :  { %v8834_v54 = vpop.eup %8833 }
 0xbe1   :  { %v6953_v55 = vadd.f32 1.0, %v8834_v54  ;;  %v14935_v54 = vld [vmem:[%s15274_s7 + $0x30] ss:$8 sps:$4 sm:$0xff]  }
 0xbe3   :  { %8835 = vrcp.f32 %v6953_v55  ;;  %v14940_v55 = vld [vmem:[%s15274_s7 + $0x24] ss:$8 sps:$4 sm:$0xff]  }
 0xbe4   :  { %8837 = vrcp.f32 %v6952_v61 }
 0xbf0   :  { %v8836_v34 = vpop.eup %8835 }
 0xbf1   :  { %v6959_v39 = vmul.f32 %v8836_v34, %v14807_v7  ;;  %v8838_v0 = vpop.eup %8837  ;;  %v14947_v34 = vld [vmem:[%s15274_s7 + $0x20] ss:$8 sps:$4 sm:$0xff]  }
 0xbf2   :  { %v6962_v17 = vmul.f32 %v8838_v0, %v6891_v19  ;;  %v6532_v19 = vadd.f32 %v6530_v2, %v14799_v62 }
 0xbf3   :  { %v6961_v47 = vsub.f32 %v6959_v39, %v14803_v22  ;;  %v14954_v39 = vld [vmem:[%s15274_s7 + $0x14] ss:$8 sps:$4 sm:$0xff]  }
 0xbf5   :  { %v6963_v48 = vmul.f32 %v8838_v0, %v6961_v47  ;;  %v14966_v0 = vld [vmem:[%s15274_s7 + $0x4] ss:$8 sps:$4 sm:$0xff]  }
 0xbf7   :  { %6965 = vrot.lane.b32.xlu1 %v6963_v48, %s9368_s2  ;;  %v14972_v48 = vld [vmem:[%s15274_s7] ss:$8 sps:$4 sm:$0xff]  }
 0xc69   :  { %v6966_v28 = vpop.permute.xlu1 %6965 }
 0xc6a   :  { %v6968_v51 = vadd.f32 %v6966_v28, %v6962_v17  ;;  %v6535_v17 = vpop.permute.xlu0 %6534 }
 0xc6b   :  { %v6537_v28 = vmul.f32 %v6535_v17, %v14785_v37 }
 0xc6c   :  { %8839 = vtanh.f32 %v6968_v51 }
 0xc6d   :  { %v6539_v56 = vadd.f32 %v6537_v28, %v14795_v50 }
 0xc79   :  { %v8840_v8 = vpop.eup %8839 }
 0xc7a   :  { %v6970_v23 = vmul.f32 %v8840_v8, %v6961_v47  ;;  %v14960_v47 = vld [vmem:[%s15274_s7 + $0x10] ss:$8 sps:$4 sm:$0xff]  }
 0xc7c   :  { %v6971_v10 = vpack.c.bf16 %v6970_v23, %v6970_v23 }
 0xc7e   :  { %6973 = vrot.lane.b32.xlu1 %v6971_v10, %s9368_s2 }
 0xcf0   :  { %v6974_v59 = vpop.permute.xlu1 %6973 }
 0xcf1   :  { %8455 = vmatmul.mubr.msk.bf16.vlgmr.msra.gmra.mxu1 %vm6589_vm8, %v6974_v59 }
 0xcf2   :  { %7141 = vmatpush1.bf16.msra.mxu1 %v14595_v42  ;;  %7164 = vmatprep.mubr.bf16.mxu1 %v15928_v33  ;;  %v6531_v42 = vadd.f32 %v6529_v12, %v14795_v50 }
 0xcf3   :  { %7142 = vmatprep.subr.bf16.mxu1 %v14601_v45 }
 0xcf6   :  { %7143 = vmatpush1.bf16.msra.mxu1 %v14616_v63 }
 0xcf7   :  { %7144 = vmatprep.subr.bf16.mxu1 %v14623_v15 }
 0xcfa   :  { %7145 = vmatpush1.bf16.msra.mxu1 %v14637_v16 }
 0xcfb   :  { %7146 = vmatprep.subr.bf16.mxu1 %v14643_v26 }
 0xcfe   :  { %7147 = vmatpush1.bf16.msra.mxu1 %v14655_v25 }
 0xcff   :  { %7327 = vmatprep.subr.bf16.mxu1 %v14923_v49 }
 0xdb1   :  { %v7012_v45 = vpop.f32.mrf.mxu1 }
 0xdb2   :  { %v7019_v41 = vadd.f32 %v7012_v45, %v6531_v42 }
 0xdb3   :  { %v7014_v63 = vpop.f32.mrf.mxu1 }
 0xdb4   :  { %v7020_v29 = vadd.f32 %v7014_v63, %v6532_v19  ;;  %v8456_v15 = vmul.f32 -1.442695, %v7019_v41  ;;  %v15932_v63 = vld [vmem:[#allocation28_spill] sm:$0xff] }
 0xdb5   :  { %v7016_v57 = vpop.f32.mrf.mxu1 }
 0xdb6   :  { %v7022_v16 = vmul.f32 %v7020_v29, %v14807_v7  ;;  %8841 = vpow2.f32 %v8456_v15  ;;  %v15933_v57 = vld [vmem:[#allocation10_spill] sm:$0xff] }
 0xdb7   :  { %v7017_v26 = vpop.f32.mrf.mxu1 }
 0xdb8   :  { %v8457_v1 = vmul.f32 -1.442695, %v7022_v16 }
 0xdba   :  { %8843 = vpow2.f32 %v8457_v1 }
 0xdc3   :  { %v8842_v25 = vpop.eup %8841 }
 0xdc4   :  { %v7029_v31 = vadd.f32 1.0, %v8842_v25 }
 0xdc7   :  { %v8844_v5 = vpop.eup %8843 }
 0xdc8   :  { %v7030_v3 = vadd.f32 1.0, %v8844_v5 }
 0xdca   :  { %8845 = vrcp.f32 %v7030_v3 }
 0xdcb   :  { %8847 = vrcp.f32 %v7029_v31 }
 0xdd7   :  { %v8846_v6 = vpop.eup %8845 }
 0xdd8   :  { %v7036_v30 = vmul.f32 %v8846_v6, %v14807_v7  ;;  %v8848_v35 = vpop.eup %8847 }
 0xdd9   :  { %v7039_v40 = vmul.f32 %v8848_v35, %v6968_v51  ;;  %v6538_v51 = vmul.f32 %v6535_v17, %v14791_v44 }
 0xdda   :  { %v7038_v18 = vsub.f32 %v7036_v30, %v14803_v22 }
 0xddb   :  { %v6540_v8 = vadd.f32 %v6538_v51, %v14799_v62 }
 0xddc   :  { %v7040_v53 = vmul.f32 %v8848_v35, %v7038_v18 }
 0xdde   :  { %7042 = vrot.lane.b32.xlu1 %v7040_v53, %s9368_s2 }
 0xe50   :  { %v7043_v14 = vpop.permute.xlu1 %7042 }
 0xe51   :  { %v14927_v13 = vadd.f32 %v7043_v14, %v7039_v40 }
 0xe53   :  { %8849 = vtanh.f32 %v14927_v13 }
 0xe60   :  { %v8850_v32 = vpop.eup %8849 }
 0xe61   :  { %v7047_v38 = vmul.f32 %v8850_v32, %v7038_v18 }
 0xe63   :  { %v7048_v24 = vpack.c.bf16 %v7047_v38, %v7047_v38 }
 0xe65   :  { %7050 = vrot.lane.b32.xlu1 %v7048_v24, %s9368_s2 }
 0xed7   :  { %v7051_v61 = vpop.permute.xlu1 %7050 }
 0xed8   :  { %8458 = vmatmul.mubr.msk.bf16.vlgmr.msra.gmra.mxu0 %vm6589_vm8, %v7051_v61 }
 0xed9   :  { %7251 = vmatpush1.bf16.msra.mxu0 %v14935_v54  ;;  %7274 = vmatprep.mubr.bf16.mxu0 %v15928_v33 }
 0xeda   :  { %7252 = vmatprep.subr.bf16.mxu0 %v14940_v55 }
 0xedd   :  { %7253 = vmatpush1.bf16.msra.mxu0 %v14947_v34 }
 0xede   :  { %7254 = vmatprep.subr.bf16.mxu0 %v14954_v39 }
 0xee1   :  { %7255 = vmatpush1.bf16.msra.mxu0 %v14960_v47 }
 0xee2   :  { %7256 = vmatprep.subr.bf16.mxu0 %v14966_v0 }
 0xee5   :  { %7257 = vmatpush1.bf16.msra.mxu0 %v14972_v48 }
 0xee6   :  { %7404 = vmatprep.subr.bf16.mxu0 %v14923_v49 }
 0xee8   :  { %7275 = vmatmul.mubr.bf16.vlgmr.msra.gmra.mxu0 %v15928_v33 }
 0xee9   :  { %7405 = vmatpush1.bf16.msra.mxu0 %v14935_v54  ;;  %7428 = vmatprep.mubr.bf16.mxu0 %v15928_v33 }
 0xeea   :  { %7406 = vmatprep.subr.bf16.mxu0 %v14940_v55 }
 0xeed   :  { %7407 = vmatpush1.bf16.msra.mxu0 %v14947_v34 }
 0xeee   :  { %7408 = vmatprep.subr.bf16.mxu0 %v14954_v39 }
 0xef1   :  { %7409 = vmatpush1.bf16.msra.mxu0 %v14960_v47 }
 0xef2   :  { %7410 = vmatprep.subr.bf16.mxu0 %v14966_v0 }
 0xef5   :  { %7411 = vmatpush1.bf16.msra.mxu0 %v14972_v48 }
 0xef6   :  { %7558 = vmatprep.subr.bf16.mxu0 %v14923_v49 }
 0xf98   :  { %v7089_v23 = vpop.f32.mrf.mxu0 }
 0xf99   :  { %v7096_v10 = vadd.f32 %v7089_v23, %v6539_v56 }
 0xf9a   :  { %v7091_v59 = vpop.f32.mrf.mxu0 }
 0xf9b   :  { %v7097_v21 = vadd.f32 %v7091_v59, %v6540_v8  ;;  %v8459_v12 = vmul.f32 -1.442695, %v7096_v10 }
 0xf9c   :  { %v7093_v2 = vpop.f32.mrf.mxu0 }
 0xf9d   :  { %v7099_v42 = vmul.f32 %v7097_v21, %v14807_v7  ;;  %8851 = vpow2.f32 %v8459_v12 }
 0xf9e   :  { %v7094_v19 = vpop.f32.mrf.mxu0 }
 0xf9f   :  { %v8460_v45 = vmul.f32 -1.442695, %v7099_v42 }
 0xfa1   :  { %8853 = vpow2.f32 %v8460_v45 }
 0xfa8   :  { %v7276_v41 = vpop.f32.mrf.mxu0 }
 0xfa9   :  { %v7283_v29 = vadd.f32 %v7276_v41, %v15932_v63 }
 0xfaa   :  { %v7278_v15 = vpop.f32.mrf.mxu0  ;;  %v8852_v25 = vpop.eup %8851 }
 0xfab   :  { %v7284_v16 = vadd.f32 %v7278_v15, %v15933_v57  ;;  %v8472_v26 = vmul.f32 -1.442695, %v7283_v29  ;;  %v7106_v18 = vadd.f32 1.0, %v8852_v25 }
 0xfac   :  { %v7280_v1 = vpop.f32.mrf.mxu0 }
 0xfad   :  { %v7286_v5 = vmul.f32 %v7284_v16, %v14807_v7  ;;  %8855 = vpow2.f32 %v8472_v26 }
 0xfae   :  { %v8854_v3 = vpop.eup %8853  ;;  %v7281_v31 = vpop.f32.mrf.mxu0 }
 0xfaf   :  { %v7107_v6 = vadd.f32 1.0, %v8854_v3  ;;  %v8473_v30 = vmul.f32 -1.442695, %v7286_v5  ;;  %v15934_v5 = vld [vmem:[#allocation14_spill] sm:$0xff] }
 0xfb1   :  { %8857 = vrcp.f32 %v7107_v6  ;;  %v15935_v6 = vld [vmem:[#allocation15_spill] sm:$0xff] }
 0xfb2   :  { %8859 = vpow2.f32 %v8473_v30 }
 0xfb3   :  { %8861 = vrcp.f32 %v7106_v18 }
 0xfba   :  { %v8856_v35 = vpop.eup %8855 }
 0xfbb   :  { %v7293_v20 = vadd.f32 1.0, %v8856_v35 }
 0xfbe   :  { %v8858_v53 = vpop.eup %8857 }
 0xfbf   :  { %v8860_v40 = vpop.eup %8859  ;;  %v7113_v14 = vmul.f32 %v8858_v53, %v14807_v7 }
 0xfc0   :  { %v7294_v32 = vadd.f32 1.0, %v8860_v40  ;;  %v8862_v24 = vpop.eup %8861 }
 0xfc1   :  { %v7115_v38 = vsub.f32 %v7113_v14, %v14803_v22  ;;  %v7116_v23 = vmul.f32 %v8862_v24, %v14927_v13 }
 0xfc2   :  { %8863 = vrcp.f32 %v7294_v32 }
 0xfc3   :  { %v7117_v61 = vmul.f32 %v8862_v24, %v7115_v38  ;;  %8865 = vrcp.f32 %v7293_v20 }
 0xfc5   :  { %7119 = vrot.lane.b32.xlu1 %v7117_v61, %s9368_s2 }
 0xfcf   :  { %v8864_v17 = vpop.eup %8863 }
 0xfd0   :  { %v7300_v28 = vmul.f32 %v8864_v17, %v14807_v7  ;;  %v8866_v56 = vpop.eup %8865 }
 0xfd1   :  { %v7303_v12 = vmul.f32 0.0, %v8866_v56 }
 0xfd2   :  { %v7302_v51 = vsub.f32 %v7300_v28, %v14803_v22 }
 0xfd4   :  { %v7304_v8 = vmul.f32 %v8866_v56, %v7302_v51 }
 0xfd6   :  { %7306 = vrot.lane.b32.xlu1 %v7304_v8, %s9368_s2 }
0x1037   :  { %v7120_v10 = vpop.permute.xlu1 %7119 }
0x1038   :  { %v15002_v59 = vadd.f32 %v7120_v10, %v7116_v23 }
0x103a   :  { %8867 = vtanh.f32 %v15002_v59 }
0x1047   :  { %v8868_v21 = vpop.eup %8867 }
0x1048   :  { %v7307_v2 = vpop.permute.xlu1 %7306  ;;  %v7124_v42 = vmul.f32 %v8868_v21, %v7115_v38 }
0x1049   :  { %v7309_v19 = vadd.f32 %v7307_v2, %v7303_v12 }
0x104a   :  { %v7125_v45 = vpack.c.bf16 %v7124_v42, %v7124_v42 }
0x104b   :  { %8869 = vtanh.f32 %v7309_v19 }
0x104c   :  { %7127 = vrot.lane.b32.xlu0 %v7125_v45, %s9368_s2  ;;  %v15936_v45 = vld [vmem:[#allocation18_spill] sm:$0xff] }
0x1058   :  { %v8870_v41 = vpop.eup %8869 }
0x1059   :  { %v7311_v63 = vmul.f32 %v8870_v41, %v7302_v51 }
0x105b   :  { %v7312_v29 = vpack.c.bf16 %v7311_v63, %v7311_v63 }
0x105d   :  { %7314 = vrot.lane.b32.xlu1 %v7312_v29, %s9368_s2  ;;  %v15937_v29 = vld [vmem:[#allocation19_spill] sm:$0xff] }
0x10be   :  { %v7128_v13 = vpop.permute.xlu0 %7127 }
0x10bf   :  { %8461 = vmatmul.mubr.msk.bf16.vlgmr.msra.gmra.mxu1 %vm6589_vm8, %v7128_v13 }
0x10c0   :  { %7328 = vmatpush1.bf16.msra.mxu1 %v14935_v54  ;;  %7351 = vmatprep.mubr.bf16.mxu1 %v15928_v33 }
0x10c1   :  { %7329 = vmatprep.subr.bf16.mxu1 %v14940_v55 }
0x10c4   :  { %7330 = vmatpush1.bf16.msra.mxu1 %v14947_v34 }
0x10c5   :  { %7331 = vmatprep.subr.bf16.mxu1 %v14954_v39 }
0x10c8   :  { %7332 = vmatpush1.bf16.msra.mxu1 %v14960_v47 }
0x10c9   :  { %7333 = vmatprep.subr.bf16.mxu1 %v14966_v0 }
0x10cc   :  { %7334 = vmatpush1.bf16.msra.mxu1 %v14972_v48 }
0x10cd   :  { %7481 = vmatprep.subr.bf16.mxu1 %v14923_v49 }
0x10cf   :  { %v7315_v15 = vpop.permute.xlu1 %7314 }
0x10d0   :  { %8474 = vmatmul.mubr.msk.bf16.vlgmr.msra.gmra.mxu1 %vm6589_vm8, %v7315_v15 }
0x10d1   :  { %7482 = vmatpush1.bf16.msra.mxu1 %v14935_v54  ;;  %7505 = vmatprep.mubr.bf16.mxu1 %v15928_v33 }
0x10d2   :  { %7483 = vmatprep.subr.bf16.mxu1 %v14940_v55 }
0x10d5   :  { %7484 = vmatpush1.bf16.msra.mxu1 %v14947_v34 }
0x10d6   :  { %7485 = vmatprep.subr.bf16.mxu1 %v14954_v39 }
0x10d9   :  { %7486 = vmatpush1.bf16.msra.mxu1 %v14960_v47 }
0x10da   :  { %7487 = vmatprep.subr.bf16.mxu1 %v14966_v0 }
0x10dd   :  { %7488 = vmatpush1.bf16.msra.mxu1 %v14972_v48 }
0x10de   :  { %7635 = vmatprep.subr.bf16.mxu1 %v14923_v49 }
0x117f   :  { %v15027_v57 = vpop.f32.mrf.mxu1 }
0x1181   :  { %v15029_v16 = vpop.f32.mrf.mxu1 }
0x1183   :  { %v7170_v26 = vpop.f32.mrf.mxu1 }
0x1185   :  { %v7171_v1 = vpop.f32.mrf.mxu1 }
0x1190   :  { %v7353_v25 = vpop.f32.mrf.mxu1 }
0x1191   :  { %v7360_v3 = vadd.f32 %v7353_v25, %v15934_v5 }
0x1192   :  { %v7355_v31 = vpop.f32.mrf.mxu1 }
0x1193   :  { %v7361_v30 = vadd.f32 %v7355_v31, %v15935_v6  ;;  %v8475_v18 = vmul.f32 -1.442695, %v7360_v3 }
0x1194   :  { %v7357_v35 = vpop.f32.mrf.mxu1 }
0x1195   :  { %v7363_v53 = vmul.f32 %v7361_v30, %v14807_v7  ;;  %8871 = vpow2.f32 %v8475_v18 }
0x1196   :  { %v7358_v40 = vpop.f32.mrf.mxu1 }
0x1197   :  { %v8476_v14 = vmul.f32 -1.442695, %v7363_v53 }
0x1199   :  { %8873 = vpow2.f32 %v8476_v14 }
0x11a2   :  { %v8872_v32 = vpop.eup %8871 }
0x11a3   :  { %v7370_v20 = vadd.f32 1.0, %v8872_v32 }
0x11a6   :  { %v8874_v38 = vpop.eup %8873 }
0x11a7   :  { %v7371_v24 = vadd.f32 1.0, %v8874_v38 }
0x11a9   :  { %8875 = vrcp.f32 %v7371_v24 }
0x11aa   :  { %8877 = vrcp.f32 %v7370_v20 }
0x11b6   :  { %v8876_v61 = vpop.eup %8875 }
0x11b7   :  { %v7377_v17 = vmul.f32 %v8876_v61, %v14807_v7  ;;  %v8878_v51 = vpop.eup %8877 }
0x11b8   :  { %v7380_v8 = vmul.f32 %v8878_v51, %v7309_v19 }
0x11b9   :  { %v7379_v28 = vsub.f32 %v7377_v17, %v14803_v22 }
0x11bb   :  { %v7381_v56 = vmul.f32 %v8878_v51, %v7379_v28 }
0x11bd   :  { %7383 = vrot.lane.b32.xlu0 %v7381_v56, %s9368_s2  ;;  %v15938_v56 = vld [vmem:[#allocation24_spill] sm:$0xff] }
0x122f   :  { %v7384_v23 = vpop.permute.xlu0 %7383 }
0x1230   :  { %v7386_v10 = vadd.f32 %v7384_v23, %v7380_v8 }
0x1232   :  { %8879 = vtanh.f32 %v7386_v10 }
0x123f   :  { %v8880_v21 = vpop.eup %8879 }
0x1240   :  { %v7388_v12 = vmul.f32 %v8880_v21, %v7379_v28 }
0x1242   :  { %v7389_v2 = vpack.c.bf16 %v7388_v12, %v7388_v12 }
0x1244   :  { %7391 = vrot.lane.b32.xlu1 %v7389_v2, %s9368_s2 }
0x12b6   :  { %v7392_v42 = vpop.permute.xlu1 %7391 }
0x12b7   :  { %8477 = vmatmul.mubr.msk.bf16.vlgmr.msra.gmra.mxu0 %vm6589_vm8, %v7392_v42 }
0x12b8   :  { %7559 = vmatpush1.bf16.msra.mxu0 %v14935_v54  ;;  %7582 = vmatprep.mubr.bf16.mxu0 %v15928_v33 }
0x12b9   :  { %7560 = vmatprep.subr.bf16.mxu0 %v14940_v55 }
0x12bc   :  { %7561 = vmatpush1.bf16.msra.mxu0 %v14947_v34 }
0x12bd   :  { %7562 = vmatprep.subr.bf16.mxu0 %v14954_v39 }
0x12c0   :  { %7563 = vmatpush1.bf16.msra.mxu0 %v14960_v47 }
0x12c1   :  { %7564 = vmatprep.subr.bf16.mxu0 %v14966_v0 }
0x12c4   :  { %7565 = vmatpush1.bf16.msra.mxu0 %v14972_v48 }
0x12c5   :  { %7712 = vmatprep.subr.bf16.mxu0 %v14923_v49 }
0x1377   :  { %v7430_v19 = vpop.f32.mrf.mxu0 }
0x1378   :  { %v7437_v41 = vadd.f32 %v7430_v19, %v15936_v45 }
0x1379   :  { %v7432_v63 = vpop.f32.mrf.mxu0 }
0x137a   :  { %v7438_v13 = vadd.f32 %v7432_v63, %v15937_v29  ;;  %v8478_v15 = vmul.f32 -1.442695, %v7437_v41 }
0x137b   :  { %v7434_v26 = vpop.f32.mrf.mxu0 }
0x137c   :  { %v7440_v1 = vmul.f32 %v7438_v13, %v14807_v7  ;;  %8881 = vpow2.f32 %v8478_v15 }
0x137d   :  { %v7435_v25 = vpop.f32.mrf.mxu0 }
0x137e   :  { %v8479_v5 = vmul.f32 -1.442695, %v7440_v1 }
0x1380   :  { %8883 = vpow2.f32 %v8479_v5 }
0x1389   :  { %v8882_v3 = vpop.eup %8881 }
0x138a   :  { %v7447_v30 = vadd.f32 1.0, %v8882_v3 }
0x138d   :  { %v8884_v31 = vpop.eup %8883 }
0x138e   :  { %v7448_v6 = vadd.f32 1.0, %v8884_v31 }
0x1390   :  { %8885 = vrcp.f32 %v7448_v6 }
0x1391   :  { %8887 = vrcp.f32 %v7447_v30 }
0x139d   :  { %v8886_v18 = vpop.eup %8885 }
0x139e   :  { %v7454_v35 = vmul.f32 %v8886_v18, %v14807_v7  ;;  %v8888_v40 = vpop.eup %8887 }
0x139f   :  { %v7457_v32 = vmul.f32 %v8888_v40, %v7386_v10  ;;  %v15939_v10 = vld [vmem:[#allocation20_spill] sm:$0xff] }
0x13a0   :  { %v7456_v53 = vsub.f32 %v7454_v35, %v14803_v22 }
0x13a2   :  { %v7458_v14 = vmul.f32 %v8888_v40, %v7456_v53 }
0x13a4   :  { %7460 = vrot.lane.b32.xlu0 %v7458_v14, %s9368_s2  ;;  %v15940_v14 = vld [vmem:[#allocation25_spill] sm:$0xff] }
0x1416   :  { %v7461_v38 = vpop.permute.xlu0 %7460 }
0x1417   :  { %v7463_v24 = vadd.f32 %v7461_v38, %v7457_v32 }
0x1419   :  { %8889 = vtanh.f32 %v7463_v24 }
0x1426   :  { %v8890_v20 = vpop.eup %8889 }
0x1427   :  { %v7465_v61 = vmul.f32 %v8890_v20, %v7456_v53 }
0x1429   :  { %v7466_v17 = vpack.c.bf16 %v7465_v61, %v7465_v61 }
0x142b   :  { %7468 = vrot.lane.b32.xlu1 %v7466_v17, %s9368_s2 }
0x149d   :  { %v7469_v28 = vpop.permute.xlu1 %7468 }
0x149e   :  { %8480 = vmatmul.mubr.msk.bf16.vlgmr.msra.gmra.mxu1 %vm6589_vm8, %v7469_v28 }
0x149f   :  { %7636 = vmatpush1.bf16.msra.mxu1 %v14935_v54  ;;  %7659 = vmatprep.mubr.bf16.mxu1 %v15928_v33 }
0x14a0   :  { %7637 = vmatprep.subr.bf16.mxu1 %v14940_v55 }
0x14a3   :  { %7638 = vmatpush1.bf16.msra.mxu1 %v14947_v34 }
0x14a4   :  { %7639 = vmatprep.subr.bf16.mxu1 %v14954_v39 }
0x14a7   :  { %7640 = vmatpush1.bf16.msra.mxu1 %v14960_v47 }
0x14a8   :  { %7641 = vmatprep.subr.bf16.mxu1 %v14966_v0 }
0x14ab   :  { %7642 = vmatpush1.bf16.msra.mxu1 %v14972_v48 }
0x14ac   :  { %7789 = vmatprep.subr.bf16.mxu1 %v14923_v49 }
0x155e   :  { %v7507_v51 = vpop.f32.mrf.mxu1 }
0x155f   :  { %v7514_v8 = vadd.f32 %v7507_v51, %v15938_v56 }
0x1560   :  { %v7509_v23 = vpop.f32.mrf.mxu1 }
0x1561   :  { %v7515_v21 = vadd.f32 %v7509_v23, %v15939_v10  ;;  %v8481_v12 = vmul.f32 -1.442695, %v7514_v8 }
0x1562   :  { %v7511_v2 = vpop.f32.mrf.mxu1 }
0x1563   :  { %v7517_v42 = vmul.f32 %v7515_v21, %v14807_v7  ;;  %8891 = vpow2.f32 %v8481_v12 }
0x1564   :  { %v7512_v19 = vpop.f32.mrf.mxu1 }
0x1565   :  { %v8482_v45 = vmul.f32 -1.442695, %v7517_v42 }
0x1567   :  { %8893 = vpow2.f32 %v8482_v45 }
0x1570   :  { %v8892_v41 = vpop.eup %8891 }
0x1571   :  { %v7524_v13 = vadd.f32 1.0, %v8892_v41 }
0x1574   :  { %v8894_v63 = vpop.eup %8893 }
0x1575   :  { %v7525_v29 = vadd.f32 1.0, %v8894_v63 }
0x1577   :  { %8895 = vrcp.f32 %v7525_v29 }
0x1578   :  { %8897 = vrcp.f32 %v7524_v13 }
0x1584   :  { %v8896_v15 = vpop.eup %8895 }
0x1585   :  { %v7531_v26 = vmul.f32 %v8896_v15, %v14807_v7  ;;  %v8898_v25 = vpop.eup %8897 }
0x1586   :  { %v7534_v3 = vmul.f32 %v8898_v25, %v7463_v24  ;;  %v15941_v24 = vld [vmem:[#allocation26_spill] sm:$0xff] }
0x1587   :  { %v7533_v1 = vsub.f32 %v7531_v26, %v14803_v22 }
0x1589   :  { %v7535_v5 = vmul.f32 %v8898_v25, %v7533_v1 }
0x158b   :  { %7537 = vrot.lane.b32.xlu0 %v7535_v5, %s9368_s2 }
0x15fd   :  { %v7538_v31 = vpop.permute.xlu0 %7537 }
0x15fe   :  { %v7540_v6 = vadd.f32 %v7538_v31, %v7534_v3 }
0x1600   :  { %8899 = vtanh.f32 %v7540_v6 }
0x160d   :  { %v8900_v30 = vpop.eup %8899 }
0x160e   :  { %v7542_v18 = vmul.f32 %v8900_v30, %v7533_v1 }
0x1610   :  { %v7543_v35 = vpack.c.bf16 %v7542_v18, %v7542_v18 }
0x1612   :  { %7545 = vrot.lane.b32.xlu1 %v7543_v35, %s9368_s2 }
0x1684   :  { %v7546_v53 = vpop.permute.xlu1 %7545 }
0x1685   :  { %8483 = vmatmul.mubr.msk.bf16.vlgmr.msra.gmra.mxu0 %vm6589_vm8, %v7546_v53 }
0x1686   :  { %7713 = vmatpush1.bf16.msra.mxu0 %v14935_v54  ;;  %7736 = vmatprep.mubr.bf16.mxu0 %v15928_v33 }
0x1687   :  { %7714 = vmatprep.subr.bf16.mxu0 %v14940_v55 }
0x168a   :  { %7715 = vmatpush1.bf16.msra.mxu0 %v14947_v34 }
0x168b   :  { %7716 = vmatprep.subr.bf16.mxu0 %v14954_v39 }
0x168e   :  { %7717 = vmatpush1.bf16.msra.mxu0 %v14960_v47 }
0x168f   :  { %7718 = vmatprep.subr.bf16.mxu0 %v14966_v0 }
0x1692   :  { %7719 = vmatpush1.bf16.msra.mxu0 %v14972_v48 }
0x1693   :  { %7866 = vmatprep.subr.bf16.mxu0 %v14923_v49 }
0x1745   :  { %v7584_v40 = vpop.f32.mrf.mxu0 }
0x1746   :  { %v7591_v32 = vadd.f32 %v7584_v40, %v15940_v14 }
0x1747   :  { %v7586_v38 = vpop.f32.mrf.mxu0 }
0x1748   :  { %v7592_v20 = vadd.f32 %v7586_v38, %v15941_v24  ;;  %v8484_v61 = vmul.f32 -1.442695, %v7591_v32 }
0x1749   :  { %v7588_v17 = vpop.f32.mrf.mxu0 }
0x174a   :  { %v7594_v28 = vmul.f32 %v7592_v20, %v14807_v7  ;;  %8901 = vpow2.f32 %v8484_v61 }
0x174b   :  { %v7589_v51 = vpop.f32.mrf.mxu0 }
0x174c   :  { %v8485_v56 = vmul.f32 -1.442695, %v7594_v28 }
0x174e   :  { %8903 = vpow2.f32 %v8485_v56 }
0x1757   :  { %v8902_v8 = vpop.eup %8901 }
0x1758   :  { %v7601_v21 = vadd.f32 1.0, %v8902_v8 }
0x175b   :  { %v8904_v23 = vpop.eup %8903 }
0x175c   :  { %v7602_v10 = vadd.f32 1.0, %v8904_v23 }
0x175e   :  { %8905 = vrcp.f32 %v7602_v10 }
0x175f   :  { %8907 = vrcp.f32 %v7601_v21 }
0x176b   :  { %v8906_v49 = vpop.eup %8905 }
0x176c   :  { %v7608_v12 = vmul.f32 %v8906_v49, %v14807_v7  ;;  %v8908_v42 = vpop.eup %8907 }
0x176d   :  { %v7611_v45 = vmul.f32 %v8908_v42, %v7540_v6 }
0x176e   :  { %v7610_v2 = vsub.f32 %v7608_v12, %v14803_v22 }
0x1770   :  { %v7612_v19 = vmul.f32 %v8908_v42, %v7610_v2 }
0x1772   :  { %7614 = vrot.lane.b32.xlu0 %v7612_v19, %s9368_s2 }
0x17e4   :  { %v7615_v41 = vpop.permute.xlu0 %7614 }
0x17e5   :  { %v7617_v63 = vadd.f32 %v7615_v41, %v7611_v45 }
0x17e7   :  { %8909 = vtanh.f32 %v7617_v63 }
0x17f4   :  { %v8910_v29 = vpop.eup %8909 }
0x17f5   :  { %v7619_v13 = vmul.f32 %v8910_v29, %v7610_v2 }
0x17f7   :  { %v7620_v15 = vpack.c.bf16 %v7619_v13, %v7619_v13 }
0x17f9   :  { %7622 = vrot.lane.b32.xlu1 %v7620_v15, %s9368_s2 }
0x186b   :  { %v7623_v26 = vpop.permute.xlu1 %7622 }
0x186c   :  { %8486 = vmatmul.mubr.msk.bf16.vlgmr.msra.gmra.mxu1 %vm6589_vm8, %v7623_v26 }
0x186d   :  { %7790 = vmatpush1.bf16.msra.mxu1 %v14935_v54  ;;  %7813 = vmatprep.mubr.bf16.mxu1 %v15928_v33 }
0x186e   :  { %7791 = vmatprep.subr.bf16.mxu1 %v14940_v55 }
0x1871   :  { %7792 = vmatpush1.bf16.msra.mxu1 %v14947_v34 }
0x1872   :  { %7793 = vmatprep.subr.bf16.mxu1 %v14954_v39 }
0x1875   :  { %7794 = vmatpush1.bf16.msra.mxu1 %v14960_v47 }
0x1876   :  { %7795 = vmatprep.subr.bf16.mxu1 %v14966_v0 }
0x1879   :  { %7796 = vmatpush1.bf16.msra.mxu1 %v14972_v48 }
0x187a   :  { %8537 = vmatprep.subr.bf16.mxu1 %v9367_v46 }
0x192c   :  { %v7661_v1 = vpop.f32.mrf.mxu1 }
0x192d   :  { %v7668_v25 = vadd.f32 %v7661_v1, %v14386_v43 }
0x192e   :  { %v7663_v5 = vpop.f32.mrf.mxu1 }
0x192f   :  { %v7669_v3 = vadd.f32 %v7663_v5, %v14390_v58  ;;  %v8487_v31 = vmul.f32 -1.442695, %v7668_v25  ;;  %v9375_v25 = vmov 7  }
0x1930   :  { %v7665_v6 = vpop.f32.mrf.mxu1  ;;  %8614 = vset.pattern.permute.xlu0 %v9375_v25 }
0x1931   :  { %v7671_v30 = vmul.f32 %v7669_v3, %v14807_v7  ;;  %8911 = vpow2.f32 %v8487_v31 }
0x1932   :  { %v7666_v18 = vpop.f32.mrf.mxu1 }
0x1933   :  { %v8488_v35 = vmul.f32 -1.442695, %v7671_v30 }
0x1935   :  { %8913 = vpow2.f32 %v8488_v35 }
0x193e   :  { %v8912_v53 = vpop.eup %8911 }
0x193f   :  { %v7678_v32 = vadd.f32 1.0, %v8912_v53 }
0x1942   :  { %v8914_v40 = vpop.eup %8913 }
0x1943   :  { %v7679_v14 = vadd.f32 1.0, %v8914_v40 }
0x1945   :  { %8915 = vrcp.f32 %v7679_v14 }
0x1946   :  { %8917 = vrcp.f32 %v7678_v32 }
0x1952   :  { %v8916_v38 = vpop.eup %8915 }
0x1953   :  { %v7685_v43 = vmul.f32 %v8916_v38, %v14807_v7  ;;  %v8918_v58 = vpop.eup %8917 }
0x1954   :  { %v7688_v61 = vmul.f32 %v8918_v58, %v7617_v63 }
0x1955   :  { %v7687_v24 = vsub.f32 %v7685_v43, %v14803_v22 }
0x1957   :  { %v7689_v20 = vmul.f32 %v8918_v58, %v7687_v24 }
0x1959   :  { %7691 = vrot.lane.b32.xlu0 %v7689_v20, %s9368_s2 }
0x19cb   :  { %v7692_v17 = vpop.permute.xlu0 %7691 }
0x19cc   :  { %v7694_v28 = vadd.f32 %v7692_v17, %v7688_v61 }
0x19ce   :  { %8919 = vtanh.f32 %v7694_v28 }
0x19db   :  { %v8920_v51 = vpop.eup %8919 }
0x19dc   :  { %v7696_v56 = vmul.f32 %v8920_v51, %v7687_v24 }
0x19de   :  { %v7697_v8 = vpack.c.bf16 %v7696_v56, %v7696_v56 }
0x19e0   :  { %7699 = vrot.lane.b32.xlu1 %v7697_v8, %s9368_s2 }
0x1a52   :  { %v7700_v23 = vpop.permute.xlu1 %7699 }
0x1a53   :  { %8489 = vmatmul.mubr.msk.bf16.vlgmr.msra.gmra.mxu0 %vm6589_vm8, %v7700_v23 }
0x1a54   :  { %7867 = vmatpush1.bf16.msra.mxu0 %v14935_v54  ;;  %7890 = vmatprep.mubr.bf16.mxu0 %v15928_v33 }
0x1a55   :  { %7868 = vmatprep.subr.bf16.mxu0 %v14940_v55 }
0x1a58   :  { %7869 = vmatpush1.bf16.msra.mxu0 %v14947_v34 }
0x1a59   :  { %7870 = vmatprep.subr.bf16.mxu0 %v14954_v39 }
0x1a5c   :  { %7871 = vmatpush1.bf16.msra.mxu0 %v14960_v47 }
0x1a5d   :  { %7872 = vmatprep.subr.bf16.mxu0 %v14966_v0 }
0x1a60   :  { %7873 = vmatpush1.bf16.msra.mxu0 %v14972_v48 }
0x1a61   :  { %8549 = vmatprep.subr.bf16.mxu0 %v9367_v46 }
0x1b13   :  { %v7738_v10 = vpop.f32.mrf.mxu0 }
0x1b14   :  { %v7745_v21 = vadd.f32 %v7738_v10, %v14758_v11 }
0x1b15   :  { %v7740_v54 = vpop.f32.mrf.mxu0 }
0x1b16   :  { %v7746_v33 = vadd.f32 %v7740_v54, %v14764_v60  ;;  %v8490_v49 = vmul.f32 -1.442695, %v7745_v21 }
0x1b17   :  { %v7742_v55 = vpop.f32.mrf.mxu0 }
0x1b18   :  { %v7748_v34 = vmul.f32 %v7746_v33, %v14807_v7  ;;  %8921 = vpow2.f32 %v8490_v49 }
0x1b19   :  { %v7743_v12 = vpop.f32.mrf.mxu0 }
0x1b1a   :  { %v8491_v39 = vmul.f32 -1.442695, %v7748_v34 }
0x1b1c   :  { %8923 = vpow2.f32 %v8491_v39 }
0x1b25   :  { %v8922_v47 = vpop.eup %8921 }
0x1b26   :  { %v7755_v48 = vadd.f32 1.0, %v8922_v47 }
0x1b29   :  { %v8924_v0 = vpop.eup %8923 }
0x1b2a   :  { %v7756_v2 = vadd.f32 1.0, %v8924_v0 }
0x1b2c   :  { %8925 = vrcp.f32 %v7756_v2 }
0x1b2d   :  { %8927 = vrcp.f32 %v7755_v48  ;;  %v8783_v48 = vld [vmem:[%s15275_s8 + $0x18] sm:$0xff]  }
0x1b39   :  { %v8926_v42 = vpop.eup %8925 }
0x1b3a   :  { %v7762_v11 = vmul.f32 %v8926_v42, %v14807_v7  ;;  %v8928_v60 = vpop.eup %8927  ;;  %v8784_v42 = vld [vmem:[%s15275_s8 + $0x10] sm:$0xff]  }
0x1b3b   :  { %v7765_v41 = vmul.f32 %v8928_v60, %v7694_v28 }
0x1b3c   :  { %v7764_v19 = vsub.f32 %v7762_v11, %v14803_v22  ;;  %v8785_v11 = vld [vmem:[%s15275_s8 + $0x8] sm:$0xff]  }
0x1b3e   :  { %v7766_v45 = vmul.f32 %v8928_v60, %v7764_v19 }
0x1b40   :  { %7768 = vrot.lane.b32.xlu0 %v7766_v45, %s9368_s2 }
0x1bb2   :  { %v7769_v63 = vpop.permute.xlu0 %7768 }
0x1bb3   :  { %v7771_v29 = vadd.f32 %v7769_v63, %v7765_v41 }
0x1bb5   :  { %8929 = vtanh.f32 %v7771_v29 }
0x1bc2   :  { %v8930_v13 = vpop.eup %8929 }
0x1bc3   :  { %v7773_v15 = vmul.f32 %v8930_v13, %v7764_v19 }
0x1bc5   :  { %v7774_v26 = vpack.c.bf16 %v7773_v15, %v7773_v15 }
0x1bc7   :  { %7776 = vrot.lane.b32.xlu1 %v7774_v26, %s9368_s2 }
0x1c39   :  { %v7777_v1 = vpop.permute.xlu1 %7776 }
0x1c3a   :  { %8492 = vmatmul.mubr.msk.bf16.vlgmr.msra.gmra.mxu1 %vm6589_vm8, %v7777_v1 }
0x1c3b   :  { %8545 = vmatprep.mubr.msk.bf16.mxu1 %vm9376_vm9, %v9367_v46 }
0x1cfa   :  { %v7815_v5 = vpop.f32.mrf.mxu1 }
0x1cfb   :  { %v7822_v3 = vadd.f32 %v7815_v5, %v14774_v27 }
0x1cfc   :  { %v7817_v31 = vpop.f32.mrf.mxu1 }
0x1cfd   :  { %v7823_v6 = vadd.f32 %v7817_v31, %v14776_v9  ;;  %v8493_v30 = vmul.f32 -1.442695, %v7822_v3 }
0x1cfe   :  { %v7819_v18 = vpop.f32.mrf.mxu1 }
0x1cff   :  { %v7825_v35 = vmul.f32 %v7823_v6, %v14807_v7  ;;  %8931 = vpow2.f32 %v8493_v30 }
0x1d00   :  { %v7820_v53 = vpop.f32.mrf.mxu1 }
0x1d01   :  { %v8494_v40 = vmul.f32 -1.442695, %v7825_v35 }
0x1d03   :  { %8933 = vpow2.f32 %v8494_v40 }
0x1d0c   :  { %v8932_v14 = vpop.eup %8931 }
0x1d0d   :  { %v7832_v43 = vadd.f32 1.0, %v8932_v14 }
0x1d10   :  { %v8934_v32 = vpop.eup %8933 }
0x1d11   :  { %v7833_v38 = vadd.f32 1.0, %v8934_v32 }
0x1d13   :  { %8935 = vrcp.f32 %v7833_v38  ;;  %v8787_v38 = vld [vmem:[%s15276_s9 + $0x18] sm:$0xff]  }
0x1d14   :  { %8937 = vrcp.f32 %v7832_v43  ;;  %8538 = vmatpush3.bf16.msra.mxu1 %v8787_v38  ;;  %v8790_v43 = vld [vmem:[%s15276_s9] sm:$0xff]  }
0x1d15   :  { %8539 = vmatprep.subr.bf16.mxu1 %v9367_v46 }
0x1d20   :  { %v8936_v24 = vpop.eup %8935 }
0x1d21   :  { %v7839_v27 = vmul.f32 %v8936_v24, %v14807_v7  ;;  %v8938_v9 = vpop.eup %8937 }
0x1d22   :  { %v7842_v61 = vmul.f32 %v8938_v9, %v7771_v29 }
0x1d23   :  { %v7841_v58 = vsub.f32 %v7839_v27, %v14803_v22 }
0x1d25   :  { %v7843_v20 = vmul.f32 %v8938_v9, %v7841_v58 }
0x1d27   :  { %7845 = vrot.lane.b32.xlu0 %v7843_v20, %s9368_s2 }
0x1d2b   :  { %6542 = vperm.xlu0 %8614, %v14880_v52  }
0x1d99   :  { %v7846_v17 = vpop.permute.xlu0 %7845 }
0x1d9a   :  { %v15131_v28 = vadd.f32 %v7846_v17, %v7842_v61 }
0x1d9c   :  { %8939 = vtanh.f32 %v15131_v28 }
0x1da6   :  { %v6543_v51 = vpop.permute.xlu0 %6542 }
0x1da7   :  { %v6545_v56 = vmul.f32 %v6543_v51, %v14785_v37  ;;  %v6546_v8 = vmul.f32 %v6543_v51, %v14791_v44  ;;  %v8110_v51 = vld [vmem:[%s15277_s11 + $0x78] sm:$0xff] }
0x1da9   :  { %v8940_v23 = vpop.eup %8939  ;;  %v6547_v10 = vadd.f32 %v6545_v56, %v14795_v50  ;;  %v6548_v21 = vadd.f32 %v6546_v8, %v14799_v62  ;;  %v8108_v8 = vld [vmem:[%s15277_s11 + $0x68] sm:$0xff] }
0x1daa   :  { %v7850_v54 = vmul.f32 %v8940_v23, %v7841_v58  ;;  %v8107_v23 = vld [vmem:[%s15277_s11 + $0x60] sm:$0xff] }
0x1dab   :  { %v7173_v33 = vadd.f32 %v15027_v57, %v6547_v10  ;;  %v7174_v52 = vadd.f32 %v15029_v16, %v6548_v21  ;;  %v8106_v10 = vld [vmem:[%s15277_s11 + $0x58] sm:$0xff]  ;;  %v8105_v21 = vld [vmem:[%s15277_s11 + $0x50] sm:$0xff] }
0x1dac   :  { %v7851_v49 = vpack.c.bf16 %v7850_v54, %v7850_v54  ;;  %v8104_v54 = vld [vmem:[%s15277_s11 + $0x48] sm:$0xff] }
0x1dad   :  { %v7176_v55 = vmul.f32 %v7174_v52, %v14807_v7  ;;  %v8462_v34 = vmul.f32 -1.442695, %v7173_v33  ;;  %v8103_v33 = vld [vmem:[%s15277_s11 + $0x40] sm:$0xff]  ;;  %v8102_v52 = vld [vmem:[%s15277_s11 + $0x38] sm:$0xff] }
0x1dae   :  { %7853 = vrot.lane.b32.xlu1 %v7851_v49, %s9368_s2  ;;  %v8101_v49 = vld [vmem:[%s15277_s11 + $0x30] sm:$0xff] }
0x1daf   :  { %v8463_v12 = vmul.f32 -1.442695, %v7176_v55  ;;  %8941 = vpow2.f32 %v8462_v34  ;;  %v8100_v55 = vld [vmem:[%s15277_s11 + $0x28] sm:$0xff]  ;;  %v8099_v34 = vld [vmem:[%s15277_s11 + $0x20] sm:$0xff] }
0x1db1   :  { %8943 = vpow2.f32 %v8463_v12 }
0x1dbc   :  { %v8942_v37 = vpop.eup %8941 }
0x1dbd   :  { %v7183_v50 = vadd.f32 1.0, %v8942_v37 }
0x1dbe   :  { %v8944_v44 = vpop.eup %8943 }
0x1dbf   :  { %v7184_v39 = vadd.f32 1.0, %v8944_v44  ;;  %v8098_v44 = vld [vmem:[%s15277_s11 + $0x18] sm:$0xff] }
0x1dc1   :  { %8945 = vrcp.f32 %v7184_v39 }
0x1dc2   :  { %8947 = vrcp.f32 %v7183_v50  ;;  %v8097_v50 = vld [vmem:[%s15277_s11 + $0x10] sm:$0xff] }
0x1dce   :  { %v8946_v62 = vpop.eup %8945 }
0x1dcf   :  { %v7190_v57 = vmul.f32 %v8946_v62, %v14807_v7  ;;  %v8948_v47 = vpop.eup %8947 }
0x1dd0   :  { %v7193_v5 = vmul.f32 %v8948_v47, %v15002_v59 }
0x1dd1   :  { %v7192_v16 = vsub.f32 %v7190_v57, %v14803_v22  ;;  %v8096_v57 = vld [vmem:[%s15277_s11 + $0x8] sm:$0xff] }
0x1dd3   :  { %v7194_v0 = vmul.f32 %v8948_v47, %v7192_v16  ;;  %v18_v47 = vstv %s15278_s12 }
0x1dd4   :  { %19 = vst [vmem:[#allocation2] sm:$0x1] %v18_v47 }
0x1dd5   :  { %7196 = vrot.lane.b32.xlu1 %v7194_v0, %s9368_s2 }
0x1e20   :  { %v7854_v2 = vpop.permute.xlu1 %7853 }
0x1e21   :  { %8495 = vmatmul.mubr.msk.bf16.vlgmr.msra.gmra.mxu0 %vm6589_vm8, %v7854_v2  ;;  %v8508_v2 = vld [vmem:[%s15279_s10] ss:$0 sm:$0xff] }
0x1e22   :  { %8550 = vmatpush3.bf16.msra.mxu0 %v8783_v48  ;;  %8557 = vmatprep.mubr.msk.bf16.mxu0 %vm9376_vm9, %v9367_v46 }
0x1e23   :  { %8551 = vmatprep.subr.bf16.mxu0 %v9367_v46 }
0x1e26   :  { %8552 = vmatpush3.bf16.msra.mxu0 %v8784_v42 }
0x1e27   :  { %8553 = vmatprep.subr.bf16.mxu0 %v9367_v46 }
0x1e2a   :  { %8554 = vmatpush3.bf16.msra.mxu0 %v8785_v11 }
0x1e2b   :  { %8555 = vmatprep.subr.bf16.mxu0 %v9367_v46 }
0x1e47   :  { %v7197_v1 = vpop.permute.xlu1 %7196 }
0x1e48   :  { %v7199_v31 = vadd.f32 %v7197_v1, %v7193_v5 }
0x1ee1   :  { %v7892_v19 = vpop.f32.mrf.mxu0 }
0x1ee2   :  { %v7899_v60 = vadd.f32 %v7892_v19, %v14811_v36  ;;  %v8786_v36 = vld [vmem:[%s15275_s8] sm:$0xff]  }
0x1ee3   :  { %v7894_v45 = vpop.f32.mrf.mxu0  ;;  %8556 = vmatpush3.bf16.msra.mxu0 %v8786_v36 }
0x1ee4   :  { %v7900_v41 = vadd.f32 %v7894_v45, %v14814_v4  ;;  %v8496_v63 = vmul.f32 -1.442695, %v7899_v60  ;;  %v8509_v45 = vld [vmem:[#allocation2] ss:$0 sm:$0xff] }
0x1ee5   :  { %v7896_v29 = vpop.f32.mrf.mxu0 }
0x1ee6   :  { %v7902_v13 = vmul.f32 %v7900_v41, %v14807_v7  ;;  %8949 = vpow2.f32 %v8496_v63 }
0x1ee7   :  { %v7897_v15 = vpop.f32.mrf.mxu0 }
0x1ee8   :  { %v8497_v26 = vmul.f32 -1.442695, %v7902_v13 }
0x1eea   :  { %8951 = vpow2.f32 %v8497_v26 }
0x1ef3   :  { %v8950_v25 = vpop.eup %8949 }
0x1ef4   :  { %v7909_v30 = vadd.f32 1.0, %v8950_v25 }
0x1ef7   :  { %v8952_v3 = vpop.eup %8951 }
0x1ef8   :  { %v7910_v6 = vadd.f32 1.0, %v8952_v3 }
0x1efa   :  { %8953 = vrcp.f32 %v7910_v6 }
0x1efb   :  { %8955 = vtanh.f32 %v7199_v31 }
0x1efc   :  { %8957 = vrcp.f32 %v7909_v30 }
0x1f07   :  { %v8954_v4 = vpop.eup %8953 }
0x1f08   :  { %v7916_v59 = vmul.f32 %v8954_v4, %v14807_v7  ;;  %v8956_v18 = vpop.eup %8955  ;;  %v8788_v7 = vld [vmem:[%s15276_s9 + $0x10] sm:$0xff]  }
0x1f09   :  { %v8958_v53 = vpop.eup %8957  ;;  %v7201_v14 = vmul.f32 %v8956_v18, %v7192_v16  ;;  %8540 = vmatpush3.bf16.msra.mxu1 %v8788_v7  ;;  %v8095_v16 = vld [vmem:[%s15277_s11] sm:$0xff] }
0x1f0a   :  { %v7918_v35 = vsub.f32 %v7916_v59, %v14803_v22  ;;  %v8789_v22 = vld [vmem:[%s15276_s9 + $0x8] sm:$0xff]   ;;  %8541 = vmatprep.subr.bf16.mxu1 %v9367_v46  ;;  %v7919_v24 = vmul.f32 %v8958_v53, %v15131_v28  ;;  %v8109_v28 = vld [vmem:[%s15277_s11 + $0x70] sm:$0xff] }
0x1f0b   :  { %v7928_v32 = vpack.c.bf16 %v7201_v14, %v7201_v14 }
0x1f0c   :  { %v7920_v40 = vmul.f32 %v8958_v53, %v7918_v35 }
0x1f0d   :  { %8542 = vmatpush3.bf16.msra.mxu1 %v8789_v22 }
0x1f0e   :  { %7922 = vrot.lane.b32.xlu1 %v7920_v40, %s9368_s2  ;;  %8543 = vmatprep.subr.bf16.mxu1 %v9367_v46 }
0x1f11   :  { %8544 = vmatpush3.bf16.msra.mxu1 %v8790_v43 }
0x1f12   :  { %8017 = vrot.lane.b32.xlu1 %v7928_v32, %s9368_s2  ;;  %8561 = vmatprep.subr.mxu1 %v9367_v46 }
0x1f80   :  { %v7923_v27 = vpop.permute.xlu1 %7922 }
0x1f81   :  { %v7925_v58 = vadd.f32 %v7923_v27, %v7919_v24 }
0x1f83   :  { %8959 = vtanh.f32 %v7925_v58 }
0x1f84   :  { %v8018_v9 = vpop.permute.xlu1 %8017 }
0x1f85   :  { %8558 = vmatmul.mubr.msk.bf16.vlgmr.msra.gmra.mxu0 %vm6589_vm8, %v8018_v9 }
0x1f90   :  { %v8960_v20 = vpop.eup %8959 }
0x1f91   :  { %v7927_v61 = vmul.f32 %v8960_v20, %v7918_v35 }
0x1f93   :  { %v7937_v17 = vpack.c.bf16 %v7927_v61, %v7927_v61 }
0x1f95   :  { %7947 = vrot.lane.b32.xlu0 %v7937_v17, %s9368_s2 }
0x2007   :  { %v7948_v56 = vpop.permute.xlu0 %7947 }
0x2008   :  { %8546 = vmatmul.mubr.msk.bf16.vlgmr.msra.gmra.mxu1 %vm6589_vm8, %v7948_v56 }
0x2009   :  { %8562 = vmatpush3.msra.mxu1 %v8110_v51  ;;  %8593 = vmatprep.mubr.msk.f32.mxu1 %vm9376_vm9, %v9367_v46 }
0x200a   :  { %8563 = vmatprep.subr.mxu1 %v9367_v46 }
0x200b   :  { %8564 = vmatpush3.msra.mxu1 %v8109_v28 }
0x200c   :  { %8565 = vmatprep.subr.mxu1 %v9367_v46 }
0x200d   :  { %8566 = vmatpush3.msra.mxu1 %v8108_v8 }
0x200e   :  { %8567 = vmatprep.subr.mxu1 %v9367_v46 }
0x200f   :  { %8568 = vmatpush3.msra.mxu1 %v8107_v23 }
0x2010   :  { %8569 = vmatprep.subr.mxu1 %v9367_v46 }
0x2011   :  { %8570 = vmatpush3.msra.mxu1 %v8106_v10 }
0x2012   :  { %8571 = vmatprep.subr.mxu1 %v9367_v46 }
0x2013   :  { %8572 = vmatpush3.msra.mxu1 %v8105_v21 }
0x2014   :  { %8573 = vmatprep.subr.mxu1 %v9367_v46 }
0x2015   :  { %8574 = vmatpush3.msra.mxu1 %v8104_v54 }
0x2016   :  { %8575 = vmatprep.subr.mxu1 %v9367_v46 }
0x2017   :  { %8576 = vmatpush3.msra.mxu1 %v8103_v33 }
0x2018   :  { %8577 = vmatprep.subr.mxu1 %v9367_v46 }
0x2019   :  { %8578 = vmatpush3.msra.mxu1 %v8102_v52 }
0x201a   :  { %8579 = vmatprep.subr.mxu1 %v9367_v46 }
0x201b   :  { %8580 = vmatpush3.msra.mxu1 %v8101_v49 }
0x201c   :  { %8581 = vmatprep.subr.mxu1 %v9367_v46 }
0x201d   :  { %8582 = vmatpush3.msra.mxu1 %v8100_v55 }
0x201e   :  { %8583 = vmatprep.subr.mxu1 %v9367_v46 }
0x201f   :  { %8584 = vmatpush3.msra.mxu1 %v8099_v34 }
0x2020   :  { %8585 = vmatprep.subr.mxu1 %v9367_v46 }
0x2021   :  { %8586 = vmatpush3.msra.mxu1 %v8098_v44 }
0x2022   :  { %8587 = vmatprep.subr.mxu1 %v9367_v46 }
0x2023   :  { %8588 = vmatpush3.msra.mxu1 %v8097_v50 }
0x2024   :  { %8589 = vmatprep.subr.mxu1 %v9367_v46 }
0x2025   :  { %8590 = vmatpush3.msra.mxu1 %v8096_v57 }
0x2026   :  { %8591 = vmatprep.subr.mxu1 %v9367_v46 }
0x2027   :  { %8592 = vmatpush3.msra.mxu1 %v8095_v16 }
0x2045   :  { %v8080_v12 = vpop.f32.mrf.mxu0 }
0x2047   :  { %v8559_v37 = vpop.f32.mrf.mxu0 }
0x2049   :  { %v8083_v39 = vpop.f32.mrf.mxu0 }
0x204b   :  { %v8560_v62 = vpop.f32.mrf.mxu0 }
0x20c8   :  { %v8010_v0 = vpop.f32.mrf.mxu1 }
0x20c9   :  { %v8081_v48 = vadd.f32 %v8080_v12, %v8010_v0 }
0x20ca   :  { %v8547_v42 = vpop.f32.mrf.mxu1 }
0x20cb   :  { %v8093_v11 = vadd.f32 %v8508_v2, %v8081_v48 }
0x20cc   :  { %v8013_v19 = vpop.f32.mrf.mxu1 }
0x20cd   :  { %v8094_v46 = vmax.f32 %v8093_v11, 0.0 }
0x20ce   :  { %v8548_v60 = vpop.f32.mrf.mxu1 }
0x20cf   :  { %8594 = vmatmul.mubr.f32.vlgmr.msra.gmra.mxu1 %v8094_v46 }
0x218f   :  { %v8184_v41 = vpop.f32.mrf.mxu1 }
0x2190   :  { %v8185_v63 = vadd.f32 %v8509_v45, %v8184_v41 }
0x2191   :  { %v8595_v29 = vpop.f32.mrf.mxu1 }
0x2192   :  { %8189 = vst.msk [vmem:[%s15280_s13] sm:$0xff] %vm8188_vm10, %v8185_v63 }

</bundles_post_ra>
